<compile_context>
chip_gen: v7x
topology: tpu7x:2x2x1
jax: 0.10.0
libtpu: 0.0.40
codegen_flags: <defaults>
</compile_context>

<pallas_src>
import numpy as np

import jax
import jax.numpy as jnp
from jax.experimental import pallas as pl
from jax.experimental.pallas import tpu as pltpu

TB = 8        # batch tile; keep a multiple of 8 (it is the sublane dim of the input block)
NEG = -1e30   # bias for padded logit lanes -> vanish under log-softmax


# ---------------------------------------------------------------------------
# Fused forward kernel (one grid step = TB images)
# ---------------------------------------------------------------------------
def _net_kernel(xp_ref, w1e_ref, b1e_ref, w2e_ref, b2e_ref,
                wf1_ref, bf1_ref, wf2_ref, bf2_ref, out_ref):
    tb = xp_ref.shape[1]
    # xp[i, n, m*28 + w] = image[n, 4*i + m, w]   (rows packed by residue mod 4)
    x = xp_ref[...]                                   # (7, tb, 112) f32

    w1e = w1e_ref[...]                                # (140, 240) bf16
    b1e = b1e_ref[...]                                # (1, 240)   f32

    def conv1_rows(r, s):
        # rows are (q, n) with conv1 output row oh1 = 4q + 2r + s, q in 0..5
        pieces = []
        for kh in range(5):
            t = 2 * r + s + kh                        # 0..7
            i0, m = t // 4, t % 4
            pieces.append(x[i0:i0 + 6, :, m * 28:(m + 1) * 28])      # (6, tb, 28)
        p = jnp.concatenate(pieces, axis=-1)          # (6, tb, 140); col = kh*28 + wi
        p = p.reshape(6 * tb, 140).astype(jnp.bfloat16)
        acc = jnp.dot(p, w1e, preferred_element_type=jnp.float32)
        return acc + b1e                              # (6*tb, 240); col = ow*10 + oc

    # conv1 + bias + 2x2 maxpool + relu, kept split by parity r of the pooled row
    h1 = []                                           # h1[r]: (6, tb, 120); [q, n, h1x*10+ic], h1y = 2q + r
    for r in range(2):
        m1 = jnp.maximum(conv1_rows(r, 0), conv1_rows(r, 1))         # pool over oh pairs
        m1 = m1.reshape(6, tb, 240)
        cols = []
        for w in range(12):                                          # pool over ow pairs + relu
            a = m1[:, :, 20 * w:20 * w + 10]
            b = m1[:, :, 20 * w + 10:20 * w + 20]
            cols.append(jnp.maximum(jnp.maximum(a, b), 0.0))
        h1.append(jnp.concatenate(cols, axis=-1))                    # (6, tb, 120)

    # conv2 as a single matmul: every (h1y, h1x, ic) in lanes of the patch row.
    # Dropout2d = identity (eval mode).
    p2 = jnp.concatenate([h1[y % 2][y // 2] for y in range(12)], axis=-1)    # (tb, 1440)
    c2 = jnp.dot(p2.astype(jnp.bfloat16), w2e_ref[...],
                 preferred_element_type=jnp.float32) + b2e_ref[...]          # (tb, 1280)

    # 2x2 maxpool + relu + flatten; lane col = (oh2*8 + ow2)*20 + oc
    def c2_block(oh, ow):
        c0 = (oh * 8 + ow) * 20
        return c2[:, c0:c0 + 20]

    feats = []
    for hy in range(4):
        for hx in range(4):
            m = jnp.maximum(jnp.maximum(c2_block(2 * hy, 2 * hx), c2_block(2 * hy, 2 * hx + 1)),
                            jnp.maximum(c2_block(2 * hy + 1, 2 * hx), c2_block(2 * hy + 1, 2 * hx + 1)))
            feats.append(jnp.maximum(m, 0.0))                        # (tb, 20)
    flat = jnp.concatenate(feats, axis=-1)            # (tb, 320); col = hy*80 + hx*20 + oc

    # fc1 (+relu) and fc2, both padded to lane-dense N=128
    f1 = jnp.dot(flat.astype(jnp.bfloat16), wf1_ref[...],
                 preferred_element_type=jnp.float32) + bf1_ref[...]
    f1 = jnp.maximum(f1, 0.0)                         # (tb, 128); cols >= 50 are exactly 0
    # F.dropout = identity (eval mode)
    logits = jnp.dot(f1.astype(jnp.bfloat16), wf2_ref[...],
                     preferred_element_type=jnp.float32) + bf2_ref[...]      # cols >= 10 ~ -1e30

    # fused, numerically-stable log-softmax (padded lanes vanish: exp(-1e30 - m) == 0)
    m = jnp.max(logits, axis=-1, keepdims=True)
    s = logits - m
    lse = jnp.log(jnp.sum(jnp.exp(s), axis=-1, keepdims=True))
    out_ref[...] = s - lse


# ---------------------------------------------------------------------------
# Host-side parameter preparation: fold im2col / flatten order into the weights
# ---------------------------------------------------------------------------
def init_params(key):
    ks = jax.random.split(key, 8)

    def nrm(k, shape, scale=0.05):
        return (scale * jax.random.normal(k, shape)).astype(jnp.float32)

    # PyTorch layouts: conv (OC, IC, KH, KW); linear (out, in).
    return dict(
        conv1_w=nrm(ks[0], (10, 1, 5, 5)), conv1_b=nrm(ks[1], (10,)),
        conv2_w=nrm(ks[2], (20, 10, 5, 5)), conv2_b=nrm(ks[3], (20,)),
        fc1_w=nrm(ks[4], (50, 320)), fc1_b=nrm(ks[5], (50,)),
        fc2_w=nrm(ks[6], (10, 50)), fc2_b=nrm(ks[7], (10,)),
    )


def prepare_params(params):
    w1 = np.asarray(params["conv1_w"], np.float32)
    b1 = np.asarray(params["conv1_b"], np.float32)
    w2 = np.asarray(params["conv2_w"], np.float32)
    b2 = np.asarray(params["conv2_b"], np.float32)
    wf1 = np.asarray(params["fc1_w"], np.float32)
    bf1 = np.asarray(params["fc1_b"], np.float32)
    wf2 = np.asarray(params["fc2_w"], np.float32)
    bf2 = np.asarray(params["fc2_b"], np.float32)

    # conv1: rows = kh*28 + wi, cols = ow*10 + oc
    W1 = np.zeros((5, 28, 24, 10), np.float32)
    for kh in range(5):
        for kw in range(5):
            for ow in range(24):
                W1[kh, ow + kw, ow, :] = w1[:, 0, kh, kw]
    W1e = W1.reshape(140, 240)
    b1e = np.tile(b1, 24).reshape(1, 240)

    # conv2: rows = (h1y*12 + h1x)*10 + ic, cols = (oh2*8 + ow2)*20 + oc
    W2 = np.zeros((12, 12, 10, 8, 8, 20), np.float32)
    for oh in range(8):
        for ow in range(8):
            for kh in range(5):
                for kw in range(5):
                    W2[oh + kh, ow + kw, :, oh, ow, :] = w2[:, :, kh, kw].T
    W2e = W2.reshape(1440, 1280)
    b2e = np.tile(b2, 64).reshape(1, 1280)

    # fc1: permute input features from torch (c,h,w) flatten order to our (h,w,c)
    # lane order, pad out-dim 50 -> 128 (zeros).
    Wf1 = np.zeros((4, 4, 20, 128), np.float32)
    Wf1[:, :, :, :50] = np.transpose(wf1.reshape(50, 20, 4, 4), (2, 3, 1, 0))
    Wf1 = Wf1.reshape(320, 128)
    Bf1 = np.zeros((1, 128), np.float32)
    Bf1[0, :50] = bf1

    # fc2 padded to 128x128; unused logit lanes get a large negative bias
    Wf2 = np.zeros((128, 128), np.float32)
    Wf2[:50, :10] = wf2.T
    Bf2 = np.full((1, 128), NEG, np.float32)
    Bf2[0, :10] = bf2

    bf16 = jnp.bfloat16
    return dict(
        w1e=jnp.asarray(W1e, bf16), b1e=jnp.asarray(b1e),
        w2e=jnp.asarray(W2e, bf16), b2e=jnp.asarray(b2e),
        wf1=jnp.asarray(Wf1, bf16), bf1=jnp.asarray(Bf1),
        wf2=jnp.asarray(Wf2, bf16), bf2=jnp.asarray(Bf2),
    )


# ---------------------------------------------------------------------------
# Forward wrapper
# ---------------------------------------------------------------------------
@jax.jit
def net_forward(x_nchw, prep):
    n = x_nchw.shape[0]
    n_pad = -(-n // TB) * TB

    # Pack image rows by residue mod 4 along lanes: xp[n, i, m*28 + w] = x[n, 4i+m, w]
    x3 = x_nchw.reshape(n, 28, 28).astype(jnp.float32)
    xp = x3.reshape(n, 7, 112)
    xp = jnp.pad(xp, ((0, n_pad - n), (0, 0), (0, 0)))
    xp = jnp.transpose(xp, (1, 0, 2))                 # (7, n_pad, 112)

    out = pl.pallas_call(
        _net_kernel,
        out_shape=jax.ShapeDtypeStruct((n_pad, 128), jnp.float32),
        grid_spec=pltpu.PrefetchScalarGridSpec(
            num_scalar_prefetch=0,
            grid=(n_pad // TB,),
            in_specs=[
                pl.BlockSpec((7, TB, 112), lambda b: (0, b, 0)),     # packed input
                pl.BlockSpec((140, 240), lambda b: (0, 0)),          # conv1 weight (expanded)
                pl.BlockSpec((1, 240), lambda b: (0, 0)),
                pl.BlockSpec((1440, 1280), lambda b: (0, 0)),        # conv2 weight (expanded)
                pl.BlockSpec((1, 1280), lambda b: (0, 0)),
                pl.BlockSpec((320, 128), lambda b: (0, 0)),          # fc1
                pl.BlockSpec((1, 128), lambda b: (0, 0)),
                pl.BlockSpec((128, 128), lambda b: (0, 0)),          # fc2
                pl.BlockSpec((1, 128), lambda b: (0, 0)),
            ],
            out_specs=pl.BlockSpec((TB, 128), lambda b: (b, 0)),
        ),
        compiler_params=pltpu.CompilerParams(
            dimension_semantics=("parallel",),
            vmem_limit_bytes=32 * 1024 * 1024,
        ),
    )(xp, prep["w1e"], prep["b1e"], prep["w2e"], prep["b2e"],
      prep["wf1"], prep["bf1"], prep["wf2"], prep["bf2"])

    return out[:n, :10]


if __name__ == "__main__":
    key = jax.random.PRNGKey(0)
    k_x, k_p = jax.random.split(key)

    # The 320-feature flatten implies MNIST-style 28x28 single-channel input.
    x = jax.random.normal(k_x, (2, 1, 28, 28), dtype=jnp.float32)
    params = init_params(k_p)
    prep = prepare_params(params)

    out = jax.block_until_ready(net_forward(x, prep))

    assert out.shape == (2, 10), out.shape
    # rows of a log-softmax should exp-sum to ~1
    assert jnp.allclose(jnp.exp(out).sum(axis=-1), 1.0, atol=1e-3)
    print("KERNEL_OK")
</pallas_src>

<mosaic_0001>
module attributes {stable_mosaic.version = 11 : i64} {
  func.func @_net_kernel(%arg0: i32, %arg1: memref<7x8x112xf32, #tpu.memory_space<vmem>>, %arg2: memref<140x240xbf16, #tpu.memory_space<vmem>>, %arg3: memref<1x240xf32, #tpu.memory_space<vmem>>, %arg4: memref<1440x1280xbf16, #tpu.memory_space<vmem>>, %arg5: memref<1x1280xf32, #tpu.memory_space<vmem>>, %arg6: memref<320x128xbf16, #tpu.memory_space<vmem>>, %arg7: memref<1x128xf32, #tpu.memory_space<vmem>>, %arg8: memref<128x128xbf16, #tpu.memory_space<vmem>>, %arg9: memref<1x128xf32, #tpu.memory_space<vmem>>, %arg10: memref<8x128xf32, #tpu.memory_space<vmem>>) attributes {dimension_semantics = [#tpu.dimension_semantics<parallel>], iteration_bounds = array<i64: 1>, scalar_prefetch = 0 : i64, scratch_operands = 0 : i64, tpu.core_type = #tpu.core_type<tc>, window_params = [{transform_indices = @transform_0, window_bounds = array<i64: 7, 8, 112>}, {pipeline_mode = #tpu.pipeline_mode<synchronous>, transform_indices = @transform_1, window_bounds = array<i64: 140, 240>}, {pipeline_mode = #tpu.pipeline_mode<synchronous>, transform_indices = @transform_2, window_bounds = array<i64: 1, 240>}, {pipeline_mode = #tpu.pipeline_mode<synchronous>, transform_indices = @transform_3, window_bounds = array<i64: 1440, 1280>}, {pipeline_mode = #tpu.pipeline_mode<synchronous>, transform_indices = @transform_4, window_bounds = array<i64: 1, 1280>}, {pipeline_mode = #tpu.pipeline_mode<synchronous>, transform_indices = @transform_5, window_bounds = array<i64: 320, 128>}, {pipeline_mode = #tpu.pipeline_mode<synchronous>, transform_indices = @transform_6, window_bounds = array<i64: 1, 128>}, {pipeline_mode = #tpu.pipeline_mode<synchronous>, transform_indices = @transform_7, window_bounds = array<i64: 128, 128>}, {pipeline_mode = #tpu.pipeline_mode<synchronous>, transform_indices = @transform_8, window_bounds = array<i64: 1, 128>}, {transform_indices = @transform_9, window_bounds = array<i64: 8, 128>}]} {
    %c0 = arith.constant 0 : index
    %c0_0 = arith.constant 0 : index
    %c0_1 = arith.constant 0 : index
    %0 = vector.load %arg1[%c0, %c0_0, %c0_1] : memref<7x8x112xf32, #tpu.memory_space<vmem>>, vector<7x8x112xf32>
    %c0_2 = arith.constant 0 : index
    %c0_3 = arith.constant 0 : index
    %1 = vector.load %arg2[%c0_2, %c0_3] : memref<140x240xbf16, #tpu.memory_space<vmem>>, vector<140x240xbf16>
    %c0_4 = arith.constant 0 : index
    %c0_5 = arith.constant 0 : index
    %2 = vector.load %arg3[%c0_4, %c0_5] : memref<1x240xf32, #tpu.memory_space<vmem>>, vector<1x240xf32>
    %3 = vector.extract_strided_slice %0 {offsets = [0, 0, 0], sizes = [6, 8, 28], strides = [1, 1, 1]} : vector<7x8x112xf32> to vector<6x8x28xf32>
    %4 = vector.extract_strided_slice %0 {offsets = [0, 0, 28], sizes = [6, 8, 28], strides = [1, 1, 1]} : vector<7x8x112xf32> to vector<6x8x28xf32>
    %5 = vector.extract_strided_slice %0 {offsets = [0, 0, 56], sizes = [6, 8, 28], strides = [1, 1, 1]} : vector<7x8x112xf32> to vector<6x8x28xf32>
    %6 = vector.extract_strided_slice %0 {offsets = [0, 0, 84], sizes = [6, 8, 28], strides = [1, 1, 1]} : vector<7x8x112xf32> to vector<6x8x28xf32>
    %7 = vector.extract_strided_slice %0 {offsets = [1, 0, 0], sizes = [6, 8, 28], strides = [1, 1, 1]} : vector<7x8x112xf32> to vector<6x8x28xf32>
    %8 = tpu.concatenate %3, %4, %5, %6, %7 in 2 : vector<6x8x28xf32>, vector<6x8x28xf32>, vector<6x8x28xf32>, vector<6x8x28xf32>, vector<6x8x28xf32> -> vector<6x8x140xf32>
    %9 = vector.shape_cast %8 : vector<6x8x140xf32> to vector<48x140xf32>
    %10 = arith.truncf %9 : vector<48x140xf32> to vector<48x140xbf16>
    %cst = arith.constant dense<0.000000e+00> : vector<48x240xf32>
    %11 = tpu.matmul %10, %1, %cst {dimension_numbers = #tpu.dot_dimension_numbers<[1], [0], [0], [1], [0, 0, 1, 1], [], []>} : vector<48x140xbf16>, vector<140x240xbf16>, vector<48x240xf32> -> vector<48x240xf32>
    %12 = vector.broadcast %2 : vector<1x240xf32> to vector<48x240xf32>
    %13 = arith.addf %11, %12 : vector<48x240xf32>
    %14 = vector.extract_strided_slice %0 {offsets = [0, 0, 28], sizes = [6, 8, 28], strides = [1, 1, 1]} : vector<7x8x112xf32> to vector<6x8x28xf32>
    %15 = vector.extract_strided_slice %0 {offsets = [0, 0, 56], sizes = [6, 8, 28], strides = [1, 1, 1]} : vector<7x8x112xf32> to vector<6x8x28xf32>
    %16 = vector.extract_strided_slice %0 {offsets = [0, 0, 84], sizes = [6, 8, 28], strides = [1, 1, 1]} : vector<7x8x112xf32> to vector<6x8x28xf32>
    %17 = vector.extract_strided_slice %0 {offsets = [1, 0, 0], sizes = [6, 8, 28], strides = [1, 1, 1]} : vector<7x8x112xf32> to vector<6x8x28xf32>
    %18 = vector.extract_strided_slice %0 {offsets = [1, 0, 28], sizes = [6, 8, 28], strides = [1, 1, 1]} : vector<7x8x112xf32> to vector<6x8x28xf32>
    %19 = tpu.concatenate %14, %15, %16, %17, %18 in 2 : vector<6x8x28xf32>, vector<6x8x28xf32>, vector<6x8x28xf32>, vector<6x8x28xf32>, vector<6x8x28xf32> -> vector<6x8x140xf32>
    %20 = vector.shape_cast %19 : vector<6x8x140xf32> to vector<48x140xf32>
    %21 = arith.truncf %20 : vector<48x140xf32> to vector<48x140xbf16>
    %cst_6 = arith.constant dense<0.000000e+00> : vector<48x240xf32>
    %22 = tpu.matmul %21, %1, %cst_6 {dimension_numbers = #tpu.dot_dimension_numbers<[1], [0], [0], [1], [0, 0, 1, 1], [], []>} : vector<48x140xbf16>, vector<140x240xbf16>, vector<48x240xf32> -> vector<48x240xf32>
    %23 = vector.broadcast %2 : vector<1x240xf32> to vector<48x240xf32>
    %24 = arith.addf %22, %23 : vector<48x240xf32>
    %25 = arith.maximumf %13, %24 : vector<48x240xf32>
    %26 = vector.shape_cast %25 : vector<48x240xf32> to vector<6x8x240xf32>
    %27 = vector.extract_strided_slice %26 {offsets = [0, 0, 0], sizes = [6, 8, 10], strides = [1, 1, 1]} : vector<6x8x240xf32> to vector<6x8x10xf32>
    %28 = vector.extract_strided_slice %26 {offsets = [0, 0, 10], sizes = [6, 8, 10], strides = [1, 1, 1]} : vector<6x8x240xf32> to vector<6x8x10xf32>
    %29 = arith.maximumf %27, %28 : vector<6x8x10xf32>
    %cst_7 = arith.constant 0.000000e+00 : f32
    %30 = vector.broadcast %cst_7 : f32 to vector<6x8x10xf32>
    %31 = arith.maximumf %29, %30 : vector<6x8x10xf32>
    %32 = vector.extract_strided_slice %26 {offsets = [0, 0, 20], sizes = [6, 8, 10], strides = [1, 1, 1]} : vector<6x8x240xf32> to vector<6x8x10xf32>
    %33 = vector.extract_strided_slice %26 {offsets = [0, 0, 30], sizes = [6, 8, 10], strides = [1, 1, 1]} : vector<6x8x240xf32> to vector<6x8x10xf32>
    %34 = arith.maximumf %32, %33 : vector<6x8x10xf32>
    %cst_8 = arith.constant 0.000000e+00 : f32
    %35 = vector.broadcast %cst_8 : f32 to vector<6x8x10xf32>
    %36 = arith.maximumf %34, %35 : vector<6x8x10xf32>
    %37 = vector.extract_strided_slice %26 {offsets = [0, 0, 40], sizes = [6, 8, 10], strides = [1, 1, 1]} : vector<6x8x240xf32> to vector<6x8x10xf32>
    %38 = vector.extract_strided_slice %26 {offsets = [0, 0, 50], sizes = [6, 8, 10], strides = [1, 1, 1]} : vector<6x8x240xf32> to vector<6x8x10xf32>
    %39 = arith.maximumf %37, %38 : vector<6x8x10xf32>
    %cst_9 = arith.constant 0.000000e+00 : f32
    %40 = vector.broadcast %cst_9 : f32 to vector<6x8x10xf32>
    %41 = arith.maximumf %39, %40 : vector<6x8x10xf32>
    %42 = vector.extract_strided_slice %26 {offsets = [0, 0, 60], sizes = [6, 8, 10], strides = [1, 1, 1]} : vector<6x8x240xf32> to vector<6x8x10xf32>
    %43 = vector.extract_strided_slice %26 {offsets = [0, 0, 70], sizes = [6, 8, 10], strides = [1, 1, 1]} : vector<6x8x240xf32> to vector<6x8x10xf32>
    %44 = arith.maximumf %42, %43 : vector<6x8x10xf32>
    %cst_10 = arith.constant 0.000000e+00 : f32
    %45 = vector.broadcast %cst_10 : f32 to vector<6x8x10xf32>
    %46 = arith.maximumf %44, %45 : vector<6x8x10xf32>
    %47 = vector.extract_strided_slice %26 {offsets = [0, 0, 80], sizes = [6, 8, 10], strides = [1, 1, 1]} : vector<6x8x240xf32> to vector<6x8x10xf32>
    %48 = vector.extract_strided_slice %26 {offsets = [0, 0, 90], sizes = [6, 8, 10], strides = [1, 1, 1]} : vector<6x8x240xf32> to vector<6x8x10xf32>
    %49 = arith.maximumf %47, %48 : vector<6x8x10xf32>
    %cst_11 = arith.constant 0.000000e+00 : f32
    %50 = vector.broadcast %cst_11 : f32 to vector<6x8x10xf32>
    %51 = arith.maximumf %49, %50 : vector<6x8x10xf32>
    %52 = vector.extract_strided_slice %26 {offsets = [0, 0, 100], sizes = [6, 8, 10], strides = [1, 1, 1]} : vector<6x8x240xf32> to vector<6x8x10xf32>
    %53 = vector.extract_strided_slice %26 {offsets = [0, 0, 110], sizes = [6, 8, 10], strides = [1, 1, 1]} : vector<6x8x240xf32> to vector<6x8x10xf32>
    %54 = arith.maximumf %52, %53 : vector<6x8x10xf32>
    %cst_12 = arith.constant 0.000000e+00 : f32
    %55 = vector.broadcast %cst_12 : f32 to vector<6x8x10xf32>
    %56 = arith.maximumf %54, %55 : vector<6x8x10xf32>
    %57 = vector.extract_strided_slice %26 {offsets = [0, 0, 120], sizes = [6, 8, 10], strides = [1, 1, 1]} : vector<6x8x240xf32> to vector<6x8x10xf32>
    %58 = vector.extract_strided_slice %26 {offsets = [0, 0, 130], sizes = [6, 8, 10], strides = [1, 1, 1]} : vector<6x8x240xf32> to vector<6x8x10xf32>
    %59 = arith.maximumf %57, %58 : vector<6x8x10xf32>
    %cst_13 = arith.constant 0.000000e+00 : f32
    %60 = vector.broadcast %cst_13 : f32 to vector<6x8x10xf32>
    %61 = arith.maximumf %59, %60 : vector<6x8x10xf32>
    %62 = vector.extract_strided_slice %26 {offsets = [0, 0, 140], sizes = [6, 8, 10], strides = [1, 1, 1]} : vector<6x8x240xf32> to vector<6x8x10xf32>
    %63 = vector.extract_strided_slice %26 {offsets = [0, 0, 150], sizes = [6, 8, 10], strides = [1, 1, 1]} : vector<6x8x240xf32> to vector<6x8x10xf32>
    %64 = arith.maximumf %62, %63 : vector<6x8x10xf32>
    %cst_14 = arith.constant 0.000000e+00 : f32
    %65 = vector.broadcast %cst_14 : f32 to vector<6x8x10xf32>
    %66 = arith.maximumf %64, %65 : vector<6x8x10xf32>
    %67 = vector.extract_strided_slice %26 {offsets = [0, 0, 160], sizes = [6, 8, 10], strides = [1, 1, 1]} : vector<6x8x240xf32> to vector<6x8x10xf32>
    %68 = vector.extract_strided_slice %26 {offsets = [0, 0, 170], sizes = [6, 8, 10], strides = [1, 1, 1]} : vector<6x8x240xf32> to vector<6x8x10xf32>
    %69 = arith.maximumf %67, %68 : vector<6x8x10xf32>
    %cst_15 = arith.constant 0.000000e+00 : f32
    %70 = vector.broadcast %cst_15 : f32 to vector<6x8x10xf32>
    %71 = arith.maximumf %69, %70 : vector<6x8x10xf32>
    %72 = vector.extract_strided_slice %26 {offsets = [0, 0, 180], sizes = [6, 8, 10], strides = [1, 1, 1]} : vector<6x8x240xf32> to vector<6x8x10xf32>
    %73 = vector.extract_strided_slice %26 {offsets = [0, 0, 190], sizes = [6, 8, 10], strides = [1, 1, 1]} : vector<6x8x240xf32> to vector<6x8x10xf32>
    %74 = arith.maximumf %72, %73 : vector<6x8x10xf32>
    %cst_16 = arith.constant 0.000000e+00 : f32
    %75 = vector.broadcast %cst_16 : f32 to vector<6x8x10xf32>
    %76 = arith.maximumf %74, %75 : vector<6x8x10xf32>
    %77 = vector.extract_strided_slice %26 {offsets = [0, 0, 200], sizes = [6, 8, 10], strides = [1, 1, 1]} : vector<6x8x240xf32> to vector<6x8x10xf32>
    %78 = vector.extract_strided_slice %26 {offsets = [0, 0, 210], sizes = [6, 8, 10], strides = [1, 1, 1]} : vector<6x8x240xf32> to vector<6x8x10xf32>
    %79 = arith.maximumf %77, %78 : vector<6x8x10xf32>
    %cst_17 = arith.constant 0.000000e+00 : f32
    %80 = vector.broadcast %cst_17 : f32 to vector<6x8x10xf32>
    %81 = arith.maximumf %79, %80 : vector<6x8x10xf32>
    %82 = vector.extract_strided_slice %26 {offsets = [0, 0, 220], sizes = [6, 8, 10], strides = [1, 1, 1]} : vector<6x8x240xf32> to vector<6x8x10xf32>
    %83 = vector.extract_strided_slice %26 {offsets = [0, 0, 230], sizes = [6, 8, 10], strides = [1, 1, 1]} : vector<6x8x240xf32> to vector<6x8x10xf32>
    %84 = arith.maximumf %82, %83 : vector<6x8x10xf32>
    %cst_18 = arith.constant 0.000000e+00 : f32
    %85 = vector.broadcast %cst_18 : f32 to vector<6x8x10xf32>
    %86 = arith.maximumf %84, %85 : vector<6x8x10xf32>
    %87 = tpu.concatenate %31, %36, %41, %46, %51, %56, %61, %66, %71, %76, %81, %86 in 2 : vector<6x8x10xf32>, vector<6x8x10xf32>, vector<6x8x10xf32>, vector<6x8x10xf32>, vector<6x8x10xf32>, vector<6x8x10xf32>, vector<6x8x10xf32>, vector<6x8x10xf32>, vector<6x8x10xf32>, vector<6x8x10xf32>, vector<6x8x10xf32>, vector<6x8x10xf32> -> vector<6x8x120xf32>
    %88 = vector.extract_strided_slice %0 {offsets = [0, 0, 56], sizes = [6, 8, 28], strides = [1, 1, 1]} : vector<7x8x112xf32> to vector<6x8x28xf32>
    %89 = vector.extract_strided_slice %0 {offsets = [0, 0, 84], sizes = [6, 8, 28], strides = [1, 1, 1]} : vector<7x8x112xf32> to vector<6x8x28xf32>
    %90 = vector.extract_strided_slice %0 {offsets = [1, 0, 0], sizes = [6, 8, 28], strides = [1, 1, 1]} : vector<7x8x112xf32> to vector<6x8x28xf32>
    %91 = vector.extract_strided_slice %0 {offsets = [1, 0, 28], sizes = [6, 8, 28], strides = [1, 1, 1]} : vector<7x8x112xf32> to vector<6x8x28xf32>
    %92 = vector.extract_strided_slice %0 {offsets = [1, 0, 56], sizes = [6, 8, 28], strides = [1, 1, 1]} : vector<7x8x112xf32> to vector<6x8x28xf32>
    %93 = tpu.concatenate %88, %89, %90, %91, %92 in 2 : vector<6x8x28xf32>, vector<6x8x28xf32>, vector<6x8x28xf32>, vector<6x8x28xf32>, vector<6x8x28xf32> -> vector<6x8x140xf32>
    %94 = vector.shape_cast %93 : vector<6x8x140xf32> to vector<48x140xf32>
    %95 = arith.truncf %94 : vector<48x140xf32> to vector<48x140xbf16>
    %cst_19 = arith.constant dense<0.000000e+00> : vector<48x240xf32>
    %96 = tpu.matmul %95, %1, %cst_19 {dimension_numbers = #tpu.dot_dimension_numbers<[1], [0], [0], [1], [0, 0, 1, 1], [], []>} : vector<48x140xbf16>, vector<140x240xbf16>, vector<48x240xf32> -> vector<48x240xf32>
    %97 = vector.broadcast %2 : vector<1x240xf32> to vector<48x240xf32>
    %98 = arith.addf %96, %97 : vector<48x240xf32>
    %99 = vector.extract_strided_slice %0 {offsets = [0, 0, 84], sizes = [6, 8, 28], strides = [1, 1, 1]} : vector<7x8x112xf32> to vector<6x8x28xf32>
    %100 = vector.extract_strided_slice %0 {offsets = [1, 0, 0], sizes = [6, 8, 28], strides = [1, 1, 1]} : vector<7x8x112xf32> to vector<6x8x28xf32>
    %101 = vector.extract_strided_slice %0 {offsets = [1, 0, 28], sizes = [6, 8, 28], strides = [1, 1, 1]} : vector<7x8x112xf32> to vector<6x8x28xf32>
    %102 = vector.extract_strided_slice %0 {offsets = [1, 0, 56], sizes = [6, 8, 28], strides = [1, 1, 1]} : vector<7x8x112xf32> to vector<6x8x28xf32>
    %103 = vector.extract_strided_slice %0 {offsets = [1, 0, 84], sizes = [6, 8, 28], strides = [1, 1, 1]} : vector<7x8x112xf32> to vector<6x8x28xf32>
    %104 = tpu.concatenate %99, %100, %101, %102, %103 in 2 : vector<6x8x28xf32>, vector<6x8x28xf32>, vector<6x8x28xf32>, vector<6x8x28xf32>, vector<6x8x28xf32> -> vector<6x8x140xf32>
    %105 = vector.shape_cast %104 : vector<6x8x140xf32> to vector<48x140xf32>
    %106 = arith.truncf %105 : vector<48x140xf32> to vector<48x140xbf16>
    %cst_20 = arith.constant dense<0.000000e+00> : vector<48x240xf32>
    %107 = tpu.matmul %106, %1, %cst_20 {dimension_numbers = #tpu.dot_dimension_numbers<[1], [0], [0], [1], [0, 0, 1, 1], [], []>} : vector<48x140xbf16>, vector<140x240xbf16>, vector<48x240xf32> -> vector<48x240xf32>
    %108 = vector.broadcast %2 : vector<1x240xf32> to vector<48x240xf32>
    %109 = arith.addf %107, %108 : vector<48x240xf32>
    %110 = arith.maximumf %98, %109 : vector<48x240xf32>
    %111 = vector.shape_cast %110 : vector<48x240xf32> to vector<6x8x240xf32>
    %112 = vector.extract_strided_slice %111 {offsets = [0, 0, 0], sizes = [6, 8, 10], strides = [1, 1, 1]} : vector<6x8x240xf32> to vector<6x8x10xf32>
    %113 = vector.extract_strided_slice %111 {offsets = [0, 0, 10], sizes = [6, 8, 10], strides = [1, 1, 1]} : vector<6x8x240xf32> to vector<6x8x10xf32>
    %114 = arith.maximumf %112, %113 : vector<6x8x10xf32>
    %cst_21 = arith.constant 0.000000e+00 : f32
    %115 = vector.broadcast %cst_21 : f32 to vector<6x8x10xf32>
    %116 = arith.maximumf %114, %115 : vector<6x8x10xf32>
    %117 = vector.extract_strided_slice %111 {offsets = [0, 0, 20], sizes = [6, 8, 10], strides = [1, 1, 1]} : vector<6x8x240xf32> to vector<6x8x10xf32>
    %118 = vector.extract_strided_slice %111 {offsets = [0, 0, 30], sizes = [6, 8, 10], strides = [1, 1, 1]} : vector<6x8x240xf32> to vector<6x8x10xf32>
    %119 = arith.maximumf %117, %118 : vector<6x8x10xf32>
    %cst_22 = arith.constant 0.000000e+00 : f32
    %120 = vector.broadcast %cst_22 : f32 to vector<6x8x10xf32>
    %121 = arith.maximumf %119, %120 : vector<6x8x10xf32>
    %122 = vector.extract_strided_slice %111 {offsets = [0, 0, 40], sizes = [6, 8, 10], strides = [1, 1, 1]} : vector<6x8x240xf32> to vector<6x8x10xf32>
    %123 = vector.extract_strided_slice %111 {offsets = [0, 0, 50], sizes = [6, 8, 10], strides = [1, 1, 1]} : vector<6x8x240xf32> to vector<6x8x10xf32>
    %124 = arith.maximumf %122, %123 : vector<6x8x10xf32>
    %cst_23 = arith.constant 0.000000e+00 : f32
    %125 = vector.broadcast %cst_23 : f32 to vector<6x8x10xf32>
    %126 = arith.maximumf %124, %125 : vector<6x8x10xf32>
    %127 = vector.extract_strided_slice %111 {offsets = [0, 0, 60], sizes = [6, 8, 10], strides = [1, 1, 1]} : vector<6x8x240xf32> to vector<6x8x10xf32>
    %128 = vector.extract_strided_slice %111 {offsets = [0, 0, 70], sizes = [6, 8, 10], strides = [1, 1, 1]} : vector<6x8x240xf32> to vector<6x8x10xf32>
    %129 = arith.maximumf %127, %128 : vector<6x8x10xf32>
    %cst_24 = arith.constant 0.000000e+00 : f32
    %130 = vector.broadcast %cst_24 : f32 to vector<6x8x10xf32>
    %131 = arith.maximumf %129, %130 : vector<6x8x10xf32>
    %132 = vector.extract_strided_slice %111 {offsets = [0, 0, 80], sizes = [6, 8, 10], strides = [1, 1, 1]} : vector<6x8x240xf32> to vector<6x8x10xf32>
    %133 = vector.extract_strided_slice %111 {offsets = [0, 0, 90], sizes = [6, 8, 10], strides = [1, 1, 1]} : vector<6x8x240xf32> to vector<6x8x10xf32>
    %134 = arith.maximumf %132, %133 : vector<6x8x10xf32>
    %cst_25 = arith.constant 0.000000e+00 : f32
    %135 = vector.broadcast %cst_25 : f32 to vector<6x8x10xf32>
    %136 = arith.maximumf %134, %135 : vector<6x8x10xf32>
    %137 = vector.extract_strided_slice %111 {offsets = [0, 0, 100], sizes = [6, 8, 10], strides = [1, 1, 1]} : vector<6x8x240xf32> to vector<6x8x10xf32>
    %138 = vector.extract_strided_slice %111 {offsets = [0, 0, 110], sizes = [6, 8, 10], strides = [1, 1, 1]} : vector<6x8x240xf32> to vector<6x8x10xf32>
    %139 = arith.maximumf %137, %138 : vector<6x8x10xf32>
    %cst_26 = arith.constant 0.000000e+00 : f32
    %140 = vector.broadcast %cst_26 : f32 to vector<6x8x10xf32>
    %141 = arith.maximumf %139, %140 : vector<6x8x10xf32>
    %142 = vector.extract_strided_slice %111 {offsets = [0, 0, 120], sizes = [6, 8, 10], strides = [1, 1, 1]} : vector<6x8x240xf32> to vector<6x8x10xf32>
    %143 = vector.extract_strided_slice %111 {offsets = [0, 0, 130], sizes = [6, 8, 10], strides = [1, 1, 1]} : vector<6x8x240xf32> to vector<6x8x10xf32>
    %144 = arith.maximumf %142, %143 : vector<6x8x10xf32>
    %cst_27 = arith.constant 0.000000e+00 : f32
    %145 = vector.broadcast %cst_27 : f32 to vector<6x8x10xf32>
    %146 = arith.maximumf %144, %145 : vector<6x8x10xf32>
    %147 = vector.extract_strided_slice %111 {offsets = [0, 0, 140], sizes = [6, 8, 10], strides = [1, 1, 1]} : vector<6x8x240xf32> to vector<6x8x10xf32>
    %148 = vector.extract_strided_slice %111 {offsets = [0, 0, 150], sizes = [6, 8, 10], strides = [1, 1, 1]} : vector<6x8x240xf32> to vector<6x8x10xf32>
    %149 = arith.maximumf %147, %148 : vector<6x8x10xf32>
    %cst_28 = arith.constant 0.000000e+00 : f32
    %150 = vector.broadcast %cst_28 : f32 to vector<6x8x10xf32>
    %151 = arith.maximumf %149, %150 : vector<6x8x10xf32>
    %152 = vector.extract_strided_slice %111 {offsets = [0, 0, 160], sizes = [6, 8, 10], strides = [1, 1, 1]} : vector<6x8x240xf32> to vector<6x8x10xf32>
    %153 = vector.extract_strided_slice %111 {offsets = [0, 0, 170], sizes = [6, 8, 10], strides = [1, 1, 1]} : vector<6x8x240xf32> to vector<6x8x10xf32>
    %154 = arith.maximumf %152, %153 : vector<6x8x10xf32>
    %cst_29 = arith.constant 0.000000e+00 : f32
    %155 = vector.broadcast %cst_29 : f32 to vector<6x8x10xf32>
    %156 = arith.maximumf %154, %155 : vector<6x8x10xf32>
    %157 = vector.extract_strided_slice %111 {offsets = [0, 0, 180], sizes = [6, 8, 10], strides = [1, 1, 1]} : vector<6x8x240xf32> to vector<6x8x10xf32>
    %158 = vector.extract_strided_slice %111 {offsets = [0, 0, 190], sizes = [6, 8, 10], strides = [1, 1, 1]} : vector<6x8x240xf32> to vector<6x8x10xf32>
    %159 = arith.maximumf %157, %158 : vector<6x8x10xf32>
    %cst_30 = arith.constant 0.000000e+00 : f32
    %160 = vector.broadcast %cst_30 : f32 to vector<6x8x10xf32>
    %161 = arith.maximumf %159, %160 : vector<6x8x10xf32>
    %162 = vector.extract_strided_slice %111 {offsets = [0, 0, 200], sizes = [6, 8, 10], strides = [1, 1, 1]} : vector<6x8x240xf32> to vector<6x8x10xf32>
    %163 = vector.extract_strided_slice %111 {offsets = [0, 0, 210], sizes = [6, 8, 10], strides = [1, 1, 1]} : vector<6x8x240xf32> to vector<6x8x10xf32>
    %164 = arith.maximumf %162, %163 : vector<6x8x10xf32>
    %cst_31 = arith.constant 0.000000e+00 : f32
    %165 = vector.broadcast %cst_31 : f32 to vector<6x8x10xf32>
    %166 = arith.maximumf %164, %165 : vector<6x8x10xf32>
    %167 = vector.extract_strided_slice %111 {offsets = [0, 0, 220], sizes = [6, 8, 10], strides = [1, 1, 1]} : vector<6x8x240xf32> to vector<6x8x10xf32>
    %168 = vector.extract_strided_slice %111 {offsets = [0, 0, 230], sizes = [6, 8, 10], strides = [1, 1, 1]} : vector<6x8x240xf32> to vector<6x8x10xf32>
    %169 = arith.maximumf %167, %168 : vector<6x8x10xf32>
    %cst_32 = arith.constant 0.000000e+00 : f32
    %170 = vector.broadcast %cst_32 : f32 to vector<6x8x10xf32>
    %171 = arith.maximumf %169, %170 : vector<6x8x10xf32>
    %172 = tpu.concatenate %116, %121, %126, %131, %136, %141, %146, %151, %156, %161, %166, %171 in 2 : vector<6x8x10xf32>, vector<6x8x10xf32>, vector<6x8x10xf32>, vector<6x8x10xf32>, vector<6x8x10xf32>, vector<6x8x10xf32>, vector<6x8x10xf32>, vector<6x8x10xf32>, vector<6x8x10xf32>, vector<6x8x10xf32>, vector<6x8x10xf32>, vector<6x8x10xf32> -> vector<6x8x120xf32>
    %173 = vector.extract_strided_slice %87 {offsets = [0, 0, 0], sizes = [1, 8, 120], strides = [1, 1, 1]} : vector<6x8x120xf32> to vector<1x8x120xf32>
    %174 = vector.shape_cast %173 : vector<1x8x120xf32> to vector<8x120xf32>
    %175 = vector.extract_strided_slice %172 {offsets = [0, 0, 0], sizes = [1, 8, 120], strides = [1, 1, 1]} : vector<6x8x120xf32> to vector<1x8x120xf32>
    %176 = vector.shape_cast %175 : vector<1x8x120xf32> to vector<8x120xf32>
    %177 = vector.extract_strided_slice %87 {offsets = [1, 0, 0], sizes = [1, 8, 120], strides = [1, 1, 1]} : vector<6x8x120xf32> to vector<1x8x120xf32>
    %178 = vector.shape_cast %177 : vector<1x8x120xf32> to vector<8x120xf32>
    %179 = vector.extract_strided_slice %172 {offsets = [1, 0, 0], sizes = [1, 8, 120], strides = [1, 1, 1]} : vector<6x8x120xf32> to vector<1x8x120xf32>
    %180 = vector.shape_cast %179 : vector<1x8x120xf32> to vector<8x120xf32>
    %181 = vector.extract_strided_slice %87 {offsets = [2, 0, 0], sizes = [1, 8, 120], strides = [1, 1, 1]} : vector<6x8x120xf32> to vector<1x8x120xf32>
    %182 = vector.shape_cast %181 : vector<1x8x120xf32> to vector<8x120xf32>
    %183 = vector.extract_strided_slice %172 {offsets = [2, 0, 0], sizes = [1, 8, 120], strides = [1, 1, 1]} : vector<6x8x120xf32> to vector<1x8x120xf32>
    %184 = vector.shape_cast %183 : vector<1x8x120xf32> to vector<8x120xf32>
    %185 = vector.extract_strided_slice %87 {offsets = [3, 0, 0], sizes = [1, 8, 120], strides = [1, 1, 1]} : vector<6x8x120xf32> to vector<1x8x120xf32>
    %186 = vector.shape_cast %185 : vector<1x8x120xf32> to vector<8x120xf32>
    %187 = vector.extract_strided_slice %172 {offsets = [3, 0, 0], sizes = [1, 8, 120], strides = [1, 1, 1]} : vector<6x8x120xf32> to vector<1x8x120xf32>
    %188 = vector.shape_cast %187 : vector<1x8x120xf32> to vector<8x120xf32>
    %189 = vector.extract_strided_slice %87 {offsets = [4, 0, 0], sizes = [1, 8, 120], strides = [1, 1, 1]} : vector<6x8x120xf32> to vector<1x8x120xf32>
    %190 = vector.shape_cast %189 : vector<1x8x120xf32> to vector<8x120xf32>
    %191 = vector.extract_strided_slice %172 {offsets = [4, 0, 0], sizes = [1, 8, 120], strides = [1, 1, 1]} : vector<6x8x120xf32> to vector<1x8x120xf32>
    %192 = vector.shape_cast %191 : vector<1x8x120xf32> to vector<8x120xf32>
    %193 = vector.extract_strided_slice %87 {offsets = [5, 0, 0], sizes = [1, 8, 120], strides = [1, 1, 1]} : vector<6x8x120xf32> to vector<1x8x120xf32>
    %194 = vector.shape_cast %193 : vector<1x8x120xf32> to vector<8x120xf32>
    %195 = vector.extract_strided_slice %172 {offsets = [5, 0, 0], sizes = [1, 8, 120], strides = [1, 1, 1]} : vector<6x8x120xf32> to vector<1x8x120xf32>
    %196 = vector.shape_cast %195 : vector<1x8x120xf32> to vector<8x120xf32>
    %197 = tpu.concatenate %174, %176, %178, %180, %182, %184, %186, %188, %190, %192, %194, %196 in 1 : vector<8x120xf32>, vector<8x120xf32>, vector<8x120xf32>, vector<8x120xf32>, vector<8x120xf32>, vector<8x120xf32>, vector<8x120xf32>, vector<8x120xf32>, vector<8x120xf32>, vector<8x120xf32>, vector<8x120xf32>, vector<8x120xf32> -> vector<8x1440xf32>
    %198 = arith.truncf %197 : vector<8x1440xf32> to vector<8x1440xbf16>
    %c0_33 = arith.constant 0 : index
    %c0_34 = arith.constant 0 : index
    %199 = vector.load %arg4[%c0_33, %c0_34] : memref<1440x1280xbf16, #tpu.memory_space<vmem>>, vector<1440x1280xbf16>
    %cst_35 = arith.constant dense<0.000000e+00> : vector<8x1280xf32>
    %200 = tpu.matmul %198, %199, %cst_35 {dimension_numbers = #tpu.dot_dimension_numbers<[1], [0], [0], [1], [0, 0, 1, 1], [], []>} : vector<8x1440xbf16>, vector<1440x1280xbf16>, vector<8x1280xf32> -> vector<8x1280xf32>
    %c0_36 = arith.constant 0 : index
    %c0_37 = arith.constant 0 : index
    %201 = vector.load %arg5[%c0_36, %c0_37] : memref<1x1280xf32, #tpu.memory_space<vmem>>, vector<1x1280xf32>
    %202 = vector.broadcast %201 : vector<1x1280xf32> to vector<8x1280xf32>
    %203 = arith.addf %200, %202 : vector<8x1280xf32>
    %204 = vector.extract_strided_slice %203 {offsets = [0, 0], sizes = [8, 20], strides = [1, 1]} : vector<8x1280xf32> to vector<8x20xf32>
    %205 = vector.extract_strided_slice %203 {offsets = [0, 20], sizes = [8, 20], strides = [1, 1]} : vector<8x1280xf32> to vector<8x20xf32>
    %206 = arith.maximumf %204, %205 : vector<8x20xf32>
    %207 = vector.extract_strided_slice %203 {offsets = [0, 160], sizes = [8, 20], strides = [1, 1]} : vector<8x1280xf32> to vector<8x20xf32>
    %208 = vector.extract_strided_slice %203 {offsets = [0, 180], sizes = [8, 20], strides = [1, 1]} : vector<8x1280xf32> to vector<8x20xf32>
    %209 = arith.maximumf %207, %208 : vector<8x20xf32>
    %210 = arith.maximumf %206, %209 : vector<8x20xf32>
    %cst_38 = arith.constant 0.000000e+00 : f32
    %211 = vector.broadcast %cst_38 : f32 to vector<8x20xf32>
    %212 = arith.maximumf %210, %211 : vector<8x20xf32>
    %213 = vector.extract_strided_slice %203 {offsets = [0, 40], sizes = [8, 20], strides = [1, 1]} : vector<8x1280xf32> to vector<8x20xf32>
    %214 = vector.extract_strided_slice %203 {offsets = [0, 60], sizes = [8, 20], strides = [1, 1]} : vector<8x1280xf32> to vector<8x20xf32>
    %215 = arith.maximumf %213, %214 : vector<8x20xf32>
    %216 = vector.extract_strided_slice %203 {offsets = [0, 200], sizes = [8, 20], strides = [1, 1]} : vector<8x1280xf32> to vector<8x20xf32>
    %217 = vector.extract_strided_slice %203 {offsets = [0, 220], sizes = [8, 20], strides = [1, 1]} : vector<8x1280xf32> to vector<8x20xf32>
    %218 = arith.maximumf %216, %217 : vector<8x20xf32>
    %219 = arith.maximumf %215, %218 : vector<8x20xf32>
    %cst_39 = arith.constant 0.000000e+00 : f32
    %220 = vector.broadcast %cst_39 : f32 to vector<8x20xf32>
    %221 = arith.maximumf %219, %220 : vector<8x20xf32>
    %222 = vector.extract_strided_slice %203 {offsets = [0, 80], sizes = [8, 20], strides = [1, 1]} : vector<8x1280xf32> to vector<8x20xf32>
    %223 = vector.extract_strided_slice %203 {offsets = [0, 100], sizes = [8, 20], strides = [1, 1]} : vector<8x1280xf32> to vector<8x20xf32>
    %224 = arith.maximumf %222, %223 : vector<8x20xf32>
    %225 = vector.extract_strided_slice %203 {offsets = [0, 240], sizes = [8, 20], strides = [1, 1]} : vector<8x1280xf32> to vector<8x20xf32>
    %226 = vector.extract_strided_slice %203 {offsets = [0, 260], sizes = [8, 20], strides = [1, 1]} : vector<8x1280xf32> to vector<8x20xf32>
    %227 = arith.maximumf %225, %226 : vector<8x20xf32>
    %228 = arith.maximumf %224, %227 : vector<8x20xf32>
    %cst_40 = arith.constant 0.000000e+00 : f32
    %229 = vector.broadcast %cst_40 : f32 to vector<8x20xf32>
    %230 = arith.maximumf %228, %229 : vector<8x20xf32>
    %231 = vector.extract_strided_slice %203 {offsets = [0, 120], sizes = [8, 20], strides = [1, 1]} : vector<8x1280xf32> to vector<8x20xf32>
    %232 = vector.extract_strided_slice %203 {offsets = [0, 140], sizes = [8, 20], strides = [1, 1]} : vector<8x1280xf32> to vector<8x20xf32>
    %233 = arith.maximumf %231, %232 : vector<8x20xf32>
    %234 = vector.extract_strided_slice %203 {offsets = [0, 280], sizes = [8, 20], strides = [1, 1]} : vector<8x1280xf32> to vector<8x20xf32>
    %235 = vector.extract_strided_slice %203 {offsets = [0, 300], sizes = [8, 20], strides = [1, 1]} : vector<8x1280xf32> to vector<8x20xf32>
    %236 = arith.maximumf %234, %235 : vector<8x20xf32>
    %237 = arith.maximumf %233, %236 : vector<8x20xf32>
    %cst_41 = arith.constant 0.000000e+00 : f32
    %238 = vector.broadcast %cst_41 : f32 to vector<8x20xf32>
    %239 = arith.maximumf %237, %238 : vector<8x20xf32>
    %240 = vector.extract_strided_slice %203 {offsets = [0, 320], sizes = [8, 20], strides = [1, 1]} : vector<8x1280xf32> to vector<8x20xf32>
    %241 = vector.extract_strided_slice %203 {offsets = [0, 340], sizes = [8, 20], strides = [1, 1]} : vector<8x1280xf32> to vector<8x20xf32>
    %242 = arith.maximumf %240, %241 : vector<8x20xf32>
    %243 = vector.extract_strided_slice %203 {offsets = [0, 480], sizes = [8, 20], strides = [1, 1]} : vector<8x1280xf32> to vector<8x20xf32>
    %244 = vector.extract_strided_slice %203 {offsets = [0, 500], sizes = [8, 20], strides = [1, 1]} : vector<8x1280xf32> to vector<8x20xf32>
    %245 = arith.maximumf %243, %244 : vector<8x20xf32>
    %246 = arith.maximumf %242, %245 : vector<8x20xf32>
    %cst_42 = arith.constant 0.000000e+00 : f32
    %247 = vector.broadcast %cst_42 : f32 to vector<8x20xf32>
    %248 = arith.maximumf %246, %247 : vector<8x20xf32>
    %249 = vector.extract_strided_slice %203 {offsets = [0, 360], sizes = [8, 20], strides = [1, 1]} : vector<8x1280xf32> to vector<8x20xf32>
    %250 = vector.extract_strided_slice %203 {offsets = [0, 380], sizes = [8, 20], strides = [1, 1]} : vector<8x1280xf32> to vector<8x20xf32>
    %251 = arith.maximumf %249, %250 : vector<8x20xf32>
    %252 = vector.extract_strided_slice %203 {offsets = [0, 520], sizes = [8, 20], strides = [1, 1]} : vector<8x1280xf32> to vector<8x20xf32>
    %253 = vector.extract_strided_slice %203 {offsets = [0, 540], sizes = [8, 20], strides = [1, 1]} : vector<8x1280xf32> to vector<8x20xf32>
    %254 = arith.maximumf %252, %253 : vector<8x20xf32>
    %255 = arith.maximumf %251, %254 : vector<8x20xf32>
    %cst_43 = arith.constant 0.000000e+00 : f32
    %256 = vector.broadcast %cst_43 : f32 to vector<8x20xf32>
    %257 = arith.maximumf %255, %256 : vector<8x20xf32>
    %258 = vector.extract_strided_slice %203 {offsets = [0, 400], sizes = [8, 20], strides = [1, 1]} : vector<8x1280xf32> to vector<8x20xf32>
    %259 = vector.extract_strided_slice %203 {offsets = [0, 420], sizes = [8, 20], strides = [1, 1]} : vector<8x1280xf32> to vector<8x20xf32>
    %260 = arith.maximumf %258, %259 : vector<8x20xf32>
    %261 = vector.extract_strided_slice %203 {offsets = [0, 560], sizes = [8, 20], strides = [1, 1]} : vector<8x1280xf32> to vector<8x20xf32>
    %262 = vector.extract_strided_slice %203 {offsets = [0, 580], sizes = [8, 20], strides = [1, 1]} : vector<8x1280xf32> to vector<8x20xf32>
    %263 = arith.maximumf %261, %262 : vector<8x20xf32>
    %264 = arith.maximumf %260, %263 : vector<8x20xf32>
    %cst_44 = arith.constant 0.000000e+00 : f32
    %265 = vector.broadcast %cst_44 : f32 to vector<8x20xf32>
    %266 = arith.maximumf %264, %265 : vector<8x20xf32>
    %267 = vector.extract_strided_slice %203 {offsets = [0, 440], sizes = [8, 20], strides = [1, 1]} : vector<8x1280xf32> to vector<8x20xf32>
    %268 = vector.extract_strided_slice %203 {offsets = [0, 460], sizes = [8, 20], strides = [1, 1]} : vector<8x1280xf32> to vector<8x20xf32>
    %269 = arith.maximumf %267, %268 : vector<8x20xf32>
    %270 = vector.extract_strided_slice %203 {offsets = [0, 600], sizes = [8, 20], strides = [1, 1]} : vector<8x1280xf32> to vector<8x20xf32>
    %271 = vector.extract_strided_slice %203 {offsets = [0, 620], sizes = [8, 20], strides = [1, 1]} : vector<8x1280xf32> to vector<8x20xf32>
    %272 = arith.maximumf %270, %271 : vector<8x20xf32>
    %273 = arith.maximumf %269, %272 : vector<8x20xf32>
    %cst_45 = arith.constant 0.000000e+00 : f32
    %274 = vector.broadcast %cst_45 : f32 to vector<8x20xf32>
    %275 = arith.maximumf %273, %274 : vector<8x20xf32>
    %276 = vector.extract_strided_slice %203 {offsets = [0, 640], sizes = [8, 20], strides = [1, 1]} : vector<8x1280xf32> to vector<8x20xf32>
    %277 = vector.extract_strided_slice %203 {offsets = [0, 660], sizes = [8, 20], strides = [1, 1]} : vector<8x1280xf32> to vector<8x20xf32>
    %278 = arith.maximumf %276, %277 : vector<8x20xf32>
    %279 = vector.extract_strided_slice %203 {offsets = [0, 800], sizes = [8, 20], strides = [1, 1]} : vector<8x1280xf32> to vector<8x20xf32>
    %280 = vector.extract_strided_slice %203 {offsets = [0, 820], sizes = [8, 20], strides = [1, 1]} : vector<8x1280xf32> to vector<8x20xf32>
    %281 = arith.maximumf %279, %280 : vector<8x20xf32>
    %282 = arith.maximumf %278, %281 : vector<8x20xf32>
    %cst_46 = arith.constant 0.000000e+00 : f32
    %283 = vector.broadcast %cst_46 : f32 to vector<8x20xf32>
    %284 = arith.maximumf %282, %283 : vector<8x20xf32>
    %285 = vector.extract_strided_slice %203 {offsets = [0, 680], sizes = [8, 20], strides = [1, 1]} : vector<8x1280xf32> to vector<8x20xf32>
    %286 = vector.extract_strided_slice %203 {offsets = [0, 700], sizes = [8, 20], strides = [1, 1]} : vector<8x1280xf32> to vector<8x20xf32>
    %287 = arith.maximumf %285, %286 : vector<8x20xf32>
    %288 = vector.extract_strided_slice %203 {offsets = [0, 840], sizes = [8, 20], strides = [1, 1]} : vector<8x1280xf32> to vector<8x20xf32>
    %289 = vector.extract_strided_slice %203 {offsets = [0, 860], sizes = [8, 20], strides = [1, 1]} : vector<8x1280xf32> to vector<8x20xf32>
    %290 = arith.maximumf %288, %289 : vector<8x20xf32>
    %291 = arith.maximumf %287, %290 : vector<8x20xf32>
    %cst_47 = arith.constant 0.000000e+00 : f32
    %292 = vector.broadcast %cst_47 : f32 to vector<8x20xf32>
    %293 = arith.maximumf %291, %292 : vector<8x20xf32>
    %294 = vector.extract_strided_slice %203 {offsets = [0, 720], sizes = [8, 20], strides = [1, 1]} : vector<8x1280xf32> to vector<8x20xf32>
    %295 = vector.extract_strided_slice %203 {offsets = [0, 740], sizes = [8, 20], strides = [1, 1]} : vector<8x1280xf32> to vector<8x20xf32>
    %296 = arith.maximumf %294, %295 : vector<8x20xf32>
    %297 = vector.extract_strided_slice %203 {offsets = [0, 880], sizes = [8, 20], strides = [1, 1]} : vector<8x1280xf32> to vector<8x20xf32>
    %298 = vector.extract_strided_slice %203 {offsets = [0, 900], sizes = [8, 20], strides = [1, 1]} : vector<8x1280xf32> to vector<8x20xf32>
    %299 = arith.maximumf %297, %298 : vector<8x20xf32>
    %300 = arith.maximumf %296, %299 : vector<8x20xf32>
    %cst_48 = arith.constant 0.000000e+00 : f32
    %301 = vector.broadcast %cst_48 : f32 to vector<8x20xf32>
    %302 = arith.maximumf %300, %301 : vector<8x20xf32>
    %303 = vector.extract_strided_slice %203 {offsets = [0, 760], sizes = [8, 20], strides = [1, 1]} : vector<8x1280xf32> to vector<8x20xf32>
    %304 = vector.extract_strided_slice %203 {offsets = [0, 780], sizes = [8, 20], strides = [1, 1]} : vector<8x1280xf32> to vector<8x20xf32>
    %305 = arith.maximumf %303, %304 : vector<8x20xf32>
    %306 = vector.extract_strided_slice %203 {offsets = [0, 920], sizes = [8, 20], strides = [1, 1]} : vector<8x1280xf32> to vector<8x20xf32>
    %307 = vector.extract_strided_slice %203 {offsets = [0, 940], sizes = [8, 20], strides = [1, 1]} : vector<8x1280xf32> to vector<8x20xf32>
    %308 = arith.maximumf %306, %307 : vector<8x20xf32>
    %309 = arith.maximumf %305, %308 : vector<8x20xf32>
    %cst_49 = arith.constant 0.000000e+00 : f32
    %310 = vector.broadcast %cst_49 : f32 to vector<8x20xf32>
    %311 = arith.maximumf %309, %310 : vector<8x20xf32>
    %312 = vector.extract_strided_slice %203 {offsets = [0, 960], sizes = [8, 20], strides = [1, 1]} : vector<8x1280xf32> to vector<8x20xf32>
    %313 = vector.extract_strided_slice %203 {offsets = [0, 980], sizes = [8, 20], strides = [1, 1]} : vector<8x1280xf32> to vector<8x20xf32>
    %314 = arith.maximumf %312, %313 : vector<8x20xf32>
    %315 = vector.extract_strided_slice %203 {offsets = [0, 1120], sizes = [8, 20], strides = [1, 1]} : vector<8x1280xf32> to vector<8x20xf32>
    %316 = vector.extract_strided_slice %203 {offsets = [0, 1140], sizes = [8, 20], strides = [1, 1]} : vector<8x1280xf32> to vector<8x20xf32>
    %317 = arith.maximumf %315, %316 : vector<8x20xf32>
    %318 = arith.maximumf %314, %317 : vector<8x20xf32>
    %cst_50 = arith.constant 0.000000e+00 : f32
    %319 = vector.broadcast %cst_50 : f32 to vector<8x20xf32>
    %320 = arith.maximumf %318, %319 : vector<8x20xf32>
    %321 = vector.extract_strided_slice %203 {offsets = [0, 1000], sizes = [8, 20], strides = [1, 1]} : vector<8x1280xf32> to vector<8x20xf32>
    %322 = vector.extract_strided_slice %203 {offsets = [0, 1020], sizes = [8, 20], strides = [1, 1]} : vector<8x1280xf32> to vector<8x20xf32>
    %323 = arith.maximumf %321, %322 : vector<8x20xf32>
    %324 = vector.extract_strided_slice %203 {offsets = [0, 1160], sizes = [8, 20], strides = [1, 1]} : vector<8x1280xf32> to vector<8x20xf32>
    %325 = vector.extract_strided_slice %203 {offsets = [0, 1180], sizes = [8, 20], strides = [1, 1]} : vector<8x1280xf32> to vector<8x20xf32>
    %326 = arith.maximumf %324, %325 : vector<8x20xf32>
    %327 = arith.maximumf %323, %326 : vector<8x20xf32>
    %cst_51 = arith.constant 0.000000e+00 : f32
    %328 = vector.broadcast %cst_51 : f32 to vector<8x20xf32>
    %329 = arith.maximumf %327, %328 : vector<8x20xf32>
    %330 = vector.extract_strided_slice %203 {offsets = [0, 1040], sizes = [8, 20], strides = [1, 1]} : vector<8x1280xf32> to vector<8x20xf32>
    %331 = vector.extract_strided_slice %203 {offsets = [0, 1060], sizes = [8, 20], strides = [1, 1]} : vector<8x1280xf32> to vector<8x20xf32>
    %332 = arith.maximumf %330, %331 : vector<8x20xf32>
    %333 = vector.extract_strided_slice %203 {offsets = [0, 1200], sizes = [8, 20], strides = [1, 1]} : vector<8x1280xf32> to vector<8x20xf32>
    %334 = vector.extract_strided_slice %203 {offsets = [0, 1220], sizes = [8, 20], strides = [1, 1]} : vector<8x1280xf32> to vector<8x20xf32>
    %335 = arith.maximumf %333, %334 : vector<8x20xf32>
    %336 = arith.maximumf %332, %335 : vector<8x20xf32>
    %cst_52 = arith.constant 0.000000e+00 : f32
    %337 = vector.broadcast %cst_52 : f32 to vector<8x20xf32>
    %338 = arith.maximumf %336, %337 : vector<8x20xf32>
    %339 = vector.extract_strided_slice %203 {offsets = [0, 1080], sizes = [8, 20], strides = [1, 1]} : vector<8x1280xf32> to vector<8x20xf32>
    %340 = vector.extract_strided_slice %203 {offsets = [0, 1100], sizes = [8, 20], strides = [1, 1]} : vector<8x1280xf32> to vector<8x20xf32>
    %341 = arith.maximumf %339, %340 : vector<8x20xf32>
    %342 = vector.extract_strided_slice %203 {offsets = [0, 1240], sizes = [8, 20], strides = [1, 1]} : vector<8x1280xf32> to vector<8x20xf32>
    %343 = vector.extract_strided_slice %203 {offsets = [0, 1260], sizes = [8, 20], strides = [1, 1]} : vector<8x1280xf32> to vector<8x20xf32>
    %344 = arith.maximumf %342, %343 : vector<8x20xf32>
    %345 = arith.maximumf %341, %344 : vector<8x20xf32>
    %cst_53 = arith.constant 0.000000e+00 : f32
    %346 = vector.broadcast %cst_53 : f32 to vector<8x20xf32>
    %347 = arith.maximumf %345, %346 : vector<8x20xf32>
    %348 = tpu.concatenate %212, %221, %230, %239, %248, %257, %266, %275, %284, %293, %302, %311, %320, %329, %338, %347 in 1 : vector<8x20xf32>, vector<8x20xf32>, vector<8x20xf32>, vector<8x20xf32>, vector<8x20xf32>, vector<8x20xf32>, vector<8x20xf32>, vector<8x20xf32>, vector<8x20xf32>, vector<8x20xf32>, vector<8x20xf32>, vector<8x20xf32>, vector<8x20xf32>, vector<8x20xf32>, vector<8x20xf32>, vector<8x20xf32> -> vector<8x320xf32>
    %349 = arith.truncf %348 : vector<8x320xf32> to vector<8x320xbf16>
    %c0_54 = arith.constant 0 : index
    %c0_55 = arith.constant 0 : index
    %350 = vector.load %arg6[%c0_54, %c0_55] : memref<320x128xbf16, #tpu.memory_space<vmem>>, vector<320x128xbf16>
    %cst_56 = arith.constant dense<0.000000e+00> : vector<8x128xf32>
    %351 = tpu.matmul %349, %350, %cst_56 {dimension_numbers = #tpu.dot_dimension_numbers<[1], [0], [0], [1], [0, 0, 1, 1], [], []>} : vector<8x320xbf16>, vector<320x128xbf16>, vector<8x128xf32> -> vector<8x128xf32>
    %c0_57 = arith.constant 0 : index
    %c0_58 = arith.constant 0 : index
    %352 = vector.load %arg7[%c0_57, %c0_58] : memref<1x128xf32, #tpu.memory_space<vmem>>, vector<1x128xf32>
    %353 = vector.broadcast %352 : vector<1x128xf32> to vector<8x128xf32>
    %354 = arith.addf %351, %353 : vector<8x128xf32>
    %cst_59 = arith.constant 0.000000e+00 : f32
    %355 = vector.broadcast %cst_59 : f32 to vector<8x128xf32>
    %356 = arith.maximumf %354, %355 : vector<8x128xf32>
    %357 = arith.truncf %356 : vector<8x128xf32> to vector<8x128xbf16>
    %c0_60 = arith.constant 0 : index
    %c0_61 = arith.constant 0 : index
    %358 = vector.load %arg8[%c0_60, %c0_61] : memref<128x128xbf16, #tpu.memory_space<vmem>>, vector<128x128xbf16>
    %cst_62 = arith.constant dense<0.000000e+00> : vector<8x128xf32>
    %359 = tpu.matmul %357, %358, %cst_62 {dimension_numbers = #tpu.dot_dimension_numbers<[1], [0], [0], [1], [0, 0, 1, 1], [], []>} : vector<8x128xbf16>, vector<128x128xbf16>, vector<8x128xf32> -> vector<8x128xf32>
    %c0_63 = arith.constant 0 : index
    %c0_64 = arith.constant 0 : index
    %360 = vector.load %arg9[%c0_63, %c0_64] : memref<1x128xf32, #tpu.memory_space<vmem>>, vector<1x128xf32>
    %361 = vector.broadcast %360 : vector<1x128xf32> to vector<8x128xf32>
    %362 = arith.addf %359, %361 : vector<8x128xf32>
    %cst_65 = arith.constant dense<0xFF800000> : vector<8xf32>
    %363 = vector.multi_reduction <maximumf>, %362, %cst_65 [1] : vector<8x128xf32> to vector<8xf32>
    %364 = vector.shape_cast %363 : vector<8xf32> to vector<8x1xf32>
    %365 = vector.broadcast %364 : vector<8x1xf32> to vector<8x128xf32>
    %366 = arith.subf %362, %365 : vector<8x128xf32>
    %367 = math.exp %366 : vector<8x128xf32>
    %cst_66 = arith.constant dense<0.000000e+00> : vector<8xf32>
    %368 = vector.multi_reduction <add>, %367, %cst_66 [1] : vector<8x128xf32> to vector<8xf32>
    %369 = vector.shape_cast %368 : vector<8xf32> to vector<8x1xf32>
    %370 = math.log %369 : vector<8x1xf32>
    %371 = vector.broadcast %370 : vector<8x1xf32> to vector<8x128xf32>
    %372 = arith.subf %366, %371 : vector<8x128xf32>
    %c0_67 = arith.constant 0 : index
    %c0_68 = arith.constant 0 : index
    %373 = vector.load %arg10[%c0_67, %c0_68] : memref<8x128xf32, #tpu.memory_space<vmem>>, vector<8x128xf32>
    tpu.vector_store %arg10[%c0_67, %c0_68], %372 {strides = array<i32>} : memref<8x128xf32, #tpu.memory_space<vmem>>, vector<8x128xf32>,
    return
  }
  func.func @transform_0(%arg0: i32) -> (i32, i32, i32) {
    %c0_i32 = arith.constant 0 : i32
    %c0_i32_0 = arith.constant 0 : i32
    %c0_i32_1 = arith.constant 0 : i32
    return %c0_i32, %arg0, %c0_i32_0 : i32, i32, i32
  }
  func.func @transform_1(%arg0: i32) -> (i32, i32) {
    %c0_i32 = arith.constant 0 : i32
    %c0_i32_0 = arith.constant 0 : i32
    %c0_i32_1 = arith.constant 0 : i32
    return %c0_i32, %c0_i32_0 : i32, i32
  }
  func.func @transform_2(%arg0: i32) -> (i32, i32) {
    %c0_i32 = arith.constant 0 : i32
    %c0_i32_0 = arith.constant 0 : i32
    %c0_i32_1 = arith.constant 0 : i32
    return %c0_i32, %c0_i32_0 : i32, i32
  }
  func.func @transform_3(%arg0: i32) -> (i32, i32) {
    %c0_i32 = arith.constant 0 : i32
    %c0_i32_0 = arith.constant 0 : i32
    %c0_i32_1 = arith.constant 0 : i32
    return %c0_i32, %c0_i32_0 : i32, i32
  }
  func.func @transform_4(%arg0: i32) -> (i32, i32) {
    %c0_i32 = arith.constant 0 : i32
    %c0_i32_0 = arith.constant 0 : i32
    %c0_i32_1 = arith.constant 0 : i32
    return %c0_i32, %c0_i32_0 : i32, i32
  }
  func.func @transform_5(%arg0: i32) -> (i32, i32) {
    %c0_i32 = arith.constant 0 : i32
    %c0_i32_0 = arith.constant 0 : i32
    %c0_i32_1 = arith.constant 0 : i32
    return %c0_i32, %c0_i32_0 : i32, i32
  }
  func.func @transform_6(%arg0: i32) -> (i32, i32) {
    %c0_i32 = arith.constant 0 : i32
    %c0_i32_0 = arith.constant 0 : i32
    %c0_i32_1 = arith.constant 0 : i32
    return %c0_i32, %c0_i32_0 : i32, i32
  }
  func.func @transform_7(%arg0: i32) -> (i32, i32) {
    %c0_i32 = arith.constant 0 : i32
    %c0_i32_0 = arith.constant 0 : i32
    %c0_i32_1 = arith.constant 0 : i32
    return %c0_i32, %c0_i32_0 : i32, i32
  }
  func.func @transform_8(%arg0: i32) -> (i32, i32) {
    %c0_i32 = arith.constant 0 : i32
    %c0_i32_0 = arith.constant 0 : i32
    %c0_i32_1 = arith.constant 0 : i32
    return %c0_i32, %c0_i32_0 : i32, i32
  }
  func.func @transform_9(%arg0: i32) -> (i32, i32) {
    %c0_i32 = arith.constant 0 : i32
    %c0_i32_0 = arith.constant 0 : i32
    return %arg0, %c0_i32 : i32, i32
  }
}

</mosaic_0001>

<bundles_post_ra>
// kernel: net_forward.1
= control target key start
LH: loop header
LB: loop body
LE: loop exit
PB: predicated region body
PF: predicated region fallthrough
CT: control target
= control target key end

     0   :  { %14 = vsyncpa [#allocation3], 0  ;;  %s13768_s0 = inlined_call_operand.vmem [shape: f32[7,8,112], index: 0, kind: input, shape index: {}]   ;;  %s13769_s1 = inlined_call_operand.hbm [shape: bf16[140,240], index: 1, kind: input, shape index: {}]   ;;  %s13770_s2 = inlined_call_operand.hbm [shape: f32[1,240], index: 2, kind: input, shape index: {}]   ;;  %s13771_s3 = inlined_call_operand.hbm [shape: bf16[1440,1280], index: 3, kind: input, shape index: {}]   ;;  %s13772_s4 = inlined_call_operand.hbm [shape: f32[1,1280], index: 4, kind: input, shape index: {}]   ;;  %s13773_s5 = inlined_call_operand.hbm [shape: bf16[320,128], index: 5, kind: input, shape index: {}]   ;;  %s13774_s6 = inlined_call_operand.hbm [shape: f32[1,128], index: 6, kind: input, shape index: {}]   ;;  %s13775_s7 = inlined_call_operand.hbm [shape: bf16[128,128], index: 7, kind: input, shape index: {}]   ;;  %s13776_s8 = inlined_call_operand.hbm [shape: f32[1,128], index: 8, kind: input, shape index: {}]   ;;  %s13777_s9 = inlined_call_operand.vmem [shape: f32[8,128], index: 9, kind: output, shape index: {}]  }
   0x1   :  { %15 = vsyncpa [#allocation5], 0 }
   0x2   :  { %16 = vsyncpa [#allocation8], 0 }
   0x3   :  { %17 = vsyncpa [#allocation11], 0 }
   0x4   :  { %18 = vsyncpa [#allocation14], 0  ;;  %s12321_s30 = smov [#allocation4]   ;;  %s12322_s11 = smov [#allocation7]  }
   0x5   :  { %s39_s10 = sshll.u32 %s12321_s30, 4  ;;  %s61_s12 = sshll.u32 %s12322_s11, 4  ;;  %s40_s10 = int_to_ptr.vmem [resolvable:$true] %s39_s10  ;;  %s62_s12 = int_to_ptr.vmem [resolvable:$true] %s61_s12 }
   0x6   :  { %s12135_s15 = scalar_lea.hbm %s13770_s2, 32 }
   0x7   :  { %p12136_p0 = scmp.ne.s32.totalorder %s13770_s2, %s12135_s15  ;;  %p12139_p1 = scmp.lt.u32.totalorder %s12135_s15, %s13770_s2 }
   0x9   :  { %p12141_p2 = pnand %p12139_p1, %p12136_p0 }
   0xb   :  { %12144 = shalt.err (!%p12141_p2)
}
   0xc   :  { %s12145_s20 = scalar_lea.vmem %s40_s10, 32  ;;  %p12150_p4 = scmp.lt.s32.totalorder %s40_s10, %s40_s10 }
   0xd   :  { %p12146_p3 = scmp.ne.s32.totalorder %s40_s10, %s12145_s20  ;;  %p12151_p5 = scmp.lt.s32.totalorder %s12145_s20, %s12145_s20 }
   0xf   :  { %p12152_p6 = por %p12151_p5, %p12150_p4 }
  0x11   :  { %p12153_p7 = pnand %p12152_p6, %p12146_p3 }
  0x13   :  { %12156 = shalt.err (!%p12153_p7)
}
  0x14   :  { %42 = dma.hbm_to_vmem [thread:$0]  %s13770_s2, 32, %s40_s10, [#allocation5]  }
  0x15   :  { %s12157_s25 = scalar_lea.hbm %s13772_s4, 160 }
  0x16   :  { %p12158_p8 = scmp.ne.s32.totalorder %s13772_s4, %s12157_s25  ;;  %p12161_p9 = scmp.lt.u32.totalorder %s12157_s25, %s13772_s4 }
  0x18   :  { %p12163_p10 = pnand %p12161_p9, %p12158_p8 }
  0x1a   :  { %12166 = shalt.err (!%p12163_p10)
}
  0x1b   :  { %s12167_s30 = scalar_lea.vmem %s62_s12, 160  ;;  %p12172_p12 = scmp.lt.s32.totalorder %s62_s12, %s62_s12 }
  0x1c   :  { %p12168_p11 = scmp.ne.s32.totalorder %s62_s12, %s12167_s30  ;;  %p12173_p13 = scmp.lt.s32.totalorder %s12167_s30, %s12167_s30 }
  0x1e   :  { %p12174_p0 = por %p12173_p13, %p12172_p12 }
  0x20   :  { %p12175_p1 = pnand %p12174_p0, %p12168_p11 }
  0x22   :  { %12178 = shalt.err (!%p12175_p1)
}
  0x23   :  { %64 = dma.hbm_to_vmem [thread:$0]  %s13772_s4, 160, %s62_s12, [#allocation8]  }
  0x24   :  { %s12323_s11 = smov [#allocation10]   ;;  %s12324_s14 = smov [#allocation2]  }
  0x25   :  { %s83_s13 = sshll.u32 %s12323_s11, 4  ;;  %s26_s15 = sshll.u32 %s12324_s14, 4  ;;  %s84_s13 = int_to_ptr.vmem [resolvable:$true] %s83_s13  ;;  %s12437_s15 = int_to_ptr.vmem [resolvable:$true] %s26_s15 }
  0x26   :  { %s12179_s18 = scalar_lea.hbm %s13774_s6, 16 }
  0x27   :  { %p12180_p2 = scmp.ne.s32.totalorder %s13774_s6, %s12179_s18  ;;  %p12183_p3 = scmp.lt.u32.totalorder %s12179_s18, %s13774_s6 }
  0x29   :  { %p12185_p4 = pnand %p12183_p3, %p12180_p2 }
  0x2b   :  { %12188 = shalt.err (!%p12185_p4)
}
  0x2c   :  { %s12189_s4 = scalar_lea.vmem %s84_s13, 16  ;;  %s12193_s12 = scalar_lea.vmem %s84_s13, 32 }
  0x2d   :  { %p12190_p5 = scmp.ne.s32.totalorder %s84_s13, %s12189_s4  ;;  %p12194_p6 = scmp.lt.s32.totalorder %s84_s13, %s84_s13 }
  0x2e   :  { %p12195_p7 = scmp.lt.s32.totalorder %s12193_s12, %s12189_s4 }
  0x30   :  { %p12196_p8 = por %p12195_p7, %p12194_p6 }
  0x32   :  { %p12197_p9 = pnand %p12196_p8, %p12190_p5 }
  0x34   :  { %12200 = shalt.err (!%p12197_p9)
}
  0x35   :  { %86 = dma.hbm_to_vmem [thread:$0]  %s13774_s6, 16, %s84_s13, [#allocation11]  }
  0x36   :  { %s12201_s27 = scalar_lea.hbm %s13769_s1, 2304 }
  0x37   :  { %p12202_p10 = scmp.ne.s32.totalorder %s13769_s1, %s12201_s27  ;;  %p12205_p11 = scmp.lt.u32.totalorder %s12201_s27, %s13769_s1 }
  0x39   :  { %p12207_p12 = pnand %p12205_p11, %p12202_p10 }
  0x3b   :  { %12210 = shalt.err (!%p12207_p12)
}
  0x3c   :  { %s12211_s10 = scalar_lea.vmem %s12437_s15, 2304  ;;  %p12216_p0 = scmp.lt.s32.totalorder %s12437_s15, %s12437_s15 }
  0x3d   :  { %p12212_p13 = scmp.ne.s32.totalorder %s12437_s15, %s12211_s10  ;;  %p12217_p1 = scmp.lt.s32.totalorder %s12211_s10, %s12211_s10 }
  0x3f   :  { %p12218_p2 = por %p12217_p1, %p12216_p0 }
  0x41   :  { %p12219_p3 = pnand %p12218_p2, %p12212_p13 }
  0x43   :  { %12222 = shalt.err (!%p12219_p3)
}
  0x44   :  { %s12325_s6 = smov 128   ;;  %s12326_s11 = smov 8  }
  0x45   :  { %32 = dma.hbm_to_vmem [thread:$0]  %s13769_s1, 2304, %s12437_s15, [#allocation3], %s12325_s6, %s12325_s6, %s12326_s11  }
  0x46   :  { %s12327_s16 = smov [#allocation6]   ;;  %s12223_s20 = scalar_lea.hbm %s13771_s3, 115200 }
  0x47   :  { %s48_s17 = sshll.u32 %s12327_s16, 4  ;;  %p12224_p4 = scmp.ne.s32.totalorder %s13771_s3, %s12223_s20  ;;  %s49_s17 = int_to_ptr.vmem [resolvable:$true] %s48_s17 }
  0x48   :  { %p12227_p5 = scmp.lt.u32.totalorder %s12223_s20, %s13771_s3 }
  0x4a   :  { %p12229_p6 = pnand %p12227_p5, %p12224_p4 }
  0x4c   :  { %12232 = shalt.err (!%p12229_p6)
}
  0x4d   :  { %s12233_s23 = scalar_lea.vmem %s49_s17, 115200  ;;  %p12238_p8 = scmp.lt.s32.totalorder %s49_s17, %s49_s17 }
  0x4e   :  { %p12234_p7 = scmp.ne.s32.totalorder %s49_s17, %s12233_s23  ;;  %p12239_p9 = scmp.lt.s32.totalorder %s12233_s23, %s12233_s23 }
  0x50   :  { %p12240_p10 = por %p12239_p9, %p12238_p8 }
  0x52   :  { %p12241_p11 = pnand %p12240_p10, %p12234_p7 }
  0x54   :  { %12244 = shalt.err (!%p12241_p11)
}
  0x55   :  { %s12328_s1 = smov 640   ;;  %s12329_s15 = smov 40  }
  0x56   :  { %54 = dma.hbm_to_vmem [thread:$0]  %s13771_s3, 115200, %s49_s17, [#allocation5], %s12328_s1, %s12328_s1, %s12329_s15  }
  0x57   :  { %s12330_s26 = smov [#allocation9]   ;;  %s12245_s30 = scalar_lea.hbm %s13773_s5, 2560 }
  0x58   :  { %s70_s27 = sshll.u32 %s12330_s26, 4  ;;  %p12246_p12 = scmp.ne.s32.totalorder %s13773_s5, %s12245_s30  ;;  %s71_s27 = int_to_ptr.vmem [resolvable:$true] %s70_s27 }
  0x59   :  { %p12249_p13 = scmp.lt.u32.totalorder %s12245_s30, %s13773_s5 }
  0x5b   :  { %p12251_p0 = pnand %p12249_p13, %p12246_p12 }
  0x5d   :  { %12254 = shalt.err (!%p12251_p0)
}
  0x5e   :  { %s12255_s14 = scalar_lea.vmem %s71_s27, 2560  ;;  %p12260_p2 = scmp.lt.s32.totalorder %s71_s27, %s71_s27 }
  0x5f   :  { %p12256_p1 = scmp.ne.s32.totalorder %s71_s27, %s12255_s14  ;;  %p12261_p3 = scmp.lt.s32.totalorder %s12255_s14, %s12255_s14 }
  0x61   :  { %p12262_p4 = por %p12261_p3, %p12260_p2 }
  0x63   :  { %p12263_p5 = pnand %p12262_p4, %p12256_p1 }
  0x65   :  { %12266 = shalt.err (!%p12263_p5)
}
  0x66   :  { %s12331_s3 = smov 64   ;;  %s12332_s16 = smov 4  }
  0x67   :  { %76 = dma.hbm_to_vmem [thread:$0]  %s13773_s5, 2560, %s71_s27, [#allocation8], %s12331_s3, %s12331_s3, %s12332_s16  }
  0x68   :  { %s12333_s19 = smov [#allocation12]   ;;  %s12334_s21 = smov [#allocation13]  }
  0x69   :  { %s92_s20 = sshll.u32 %s12333_s19, 4  ;;  %s105_s22 = sshll.u32 %s12334_s21, 4  ;;  %s93_s20 = int_to_ptr.vmem [resolvable:$true] %s92_s20  ;;  %s106_s22 = int_to_ptr.vmem [resolvable:$true] %s105_s22 }
  0x6a   :  { %s12267_s23 = scalar_lea.hbm %s13775_s7, 1024 }
  0x6b   :  { %p12268_p6 = scmp.ne.s32.totalorder %s13775_s7, %s12267_s23  ;;  %p12271_p7 = scmp.lt.u32.totalorder %s12267_s23, %s13775_s7 }
  0x6d   :  { %p12273_p8 = pnand %p12271_p7, %p12268_p6 }
  0x6f   :  { %12276 = shalt.err (!%p12273_p8)
}
  0x70   :  { %s12277_s5 = scalar_lea.vmem %s93_s20, 1024  ;;  %p12282_p10 = scmp.lt.s32.totalorder %s93_s20, %s93_s20 }
  0x71   :  { %p12278_p9 = scmp.ne.s32.totalorder %s93_s20, %s12277_s5  ;;  %p12283_p11 = scmp.lt.s32.totalorder %s12277_s5, %s12277_s5 }
  0x73   :  { %p12284_p12 = por %p12283_p11, %p12282_p10 }
  0x75   :  { %p12285_p13 = pnand %p12284_p12, %p12278_p9 }
  0x77   :  { %12288 = shalt.err (!%p12285_p13)
}
  0x78   :  { %98 = dma.hbm_to_vmem [thread:$0]  %s13775_s7, 1024, %s93_s20, [#allocation11], %s12331_s3, %s12331_s3, %s12332_s16  }
  0x79   :  { %s12289_s2 = scalar_lea.hbm %s13776_s8, 16 }
  0x7a   :  { %p12290_p0 = scmp.ne.s32.totalorder %s13776_s8, %s12289_s2  ;;  %p12293_p1 = scmp.lt.u32.totalorder %s12289_s2, %s13776_s8 }
  0x7c   :  { %p12295_p2 = pnand %p12293_p1, %p12290_p0 }
  0x7e   :  { %12298 = shalt.err (!%p12295_p2)
}
  0x7f   :  { %s12299_s17 = scalar_lea.vmem %s106_s22, 16  ;;  %s12303_s18 = scalar_lea.vmem %s106_s22, 32 }
  0x80   :  { %p12300_p3 = scmp.ne.s32.totalorder %s106_s22, %s12299_s17  ;;  %p12304_p4 = scmp.lt.s32.totalorder %s106_s22, %s106_s22 }
  0x81   :  { %p12305_p5 = scmp.lt.s32.totalorder %s12303_s18, %s12299_s17 }
  0x83   :  { %p12306_p6 = por %p12305_p5, %p12304_p4 }
  0x85   :  { %p12307_p7 = pnand %p12306_p6, %p12300_p3 }
  0x87   :  { %12310 = shalt.err (!%p12307_p7)
}
  0x88   :  { %108 = dma.hbm_to_vmem [thread:$0]  %s13776_s8, 16, %s106_s22, [#allocation14]  }
  0x89   :  { %12311 = dma.done.wait [#allocation3], 2304  }
  0x8a   :  { %12312 = vsyncadd [#allocation3], 4294964992 }
  0x8b   :  { %12313 = dma.done.wait [#allocation5], 115232  }
  0x8c   :  { %12314 = vsyncadd [#allocation5], 4294852064 }
  0x8d   :  { %12315 = dma.done.wait [#allocation8], 2720  }
  0x8e   :  { %12316 = vsyncadd [#allocation8], 4294964576 }
  0x8f   :  { %12317 = dma.done.wait [#allocation11], 1040  }
  0x90   :  { %12318 = vsyncadd [#allocation11], 4294966256 }
  0x91   :  { %12319 = dma.done.wait [#allocation14], 16  }
  0x92   :  { %12320 = vsyncadd [#allocation14], 4294967280  ;;  %v12525_v0 = vld [vmem:[%s13768_s0] sm:$0xff]  ;;  %v12530_v1 = vld [vmem:[%s13768_s0 + $0x8] sm:$0xff]  ;;  %s12335_s1 = smov 100   ;;  %s12336_s24 = smov 112  }
  0x93   :  { %v12535_v2 = vld [vmem:[%s13768_s0 + $0x10] sm:$0xff]  ;;  %v10144_v3 = vpack.i.bf16 %v12530_v1, %v12525_v0  ;;  %v12546_v5 = vld [vmem:[%s13768_s0 + $0x18] sm:$0xff]  ;;  %v12555_v7 = vld [vmem:[#allocation2 + $0x4] ss:$8 sps:$4 sm:$0xff]   ;;  %s12337_s5 = smov 84   ;;  %s12338_s2 = smov 44  }
  0x94   :  { %v12541_v4 = vpack.i.bf16 %v12535_v2, %v12530_v1  ;;  %v12553_v6 = vpack.i.bf16 %v12546_v5, %v12535_v2  ;;  %v12557_v8 = vld [vmem:[#allocation2] ss:$8 sps:$4 sm:$0xff]   ;;  %v12562_v10 = vld [vmem:[#allocation2 + $0x14] ss:$8 sps:$4 sm:$0xff]   ;;  %313 = vmatprep.subr.bf16.mxu0 %v12555_v7  ;;  %449 = vmatprep.subr.bf16.mxu1 %v12555_v7  ;;  %v12567_v11 = vld [vmem:[#allocation2 + $0x10] ss:$8 sps:$4 sm:$0xff]  }
  0x95   :  { %10145 = vrot.lane.b32.xlu0 %v10144_v3, %s12335_s1  ;;  %v138_v9 = vld [vmem:[%s13768_s0 + $0x20] sm:$0xff]  ;;  %314 = vmatpush1.bf16.msra.mxu0 %v12557_v8  ;;  %v139_v13 = vld [vmem:[%s13768_s0 + $0x28] sm:$0xff]  ;;  %v140_v14 = vld [vmem:[%s13768_s0 + $0x30] sm:$0xff]  ;;  %s12339_s10 = smov 28   ;;  %s12340_s6 = smov 72   ;;  %vm306_vm0 = vcmask 1045504  }
  0x96   :  { %10155 = vrot.lane.b32.xlu1 %v12541_v4, %s12336_s24  ;;  %v12574_v12 = vpack.i.bf16 %v138_v9, %v12546_v5  ;;  %450 = vmatpush1.bf16.msra.mxu1 %v12557_v8  ;;  %v12584_v15 = vld [vmem:[#allocation2 + $0x24] ss:$8 sps:$4 sm:$0xff]   ;;  %v12588_v16 = vld [vmem:[#allocation2 + $0x20] ss:$8 sps:$4 sm:$0xff]   ;;  %v10174_v17 = vpack.i.bf16 %v139_v13, %v138_v9  ;;  %v12594_v18 = vpack.i.bf16 %v140_v14, %v139_v13  ;;  %v12598_v19 = vld [vmem:[#allocation2 + $0x34] ss:$8 sps:$4 sm:$0xff]  }
  0x97   :  { %315 = vmatprep.subr.bf16.mxu0 %v12562_v10  ;;  %451 = vmatprep.subr.bf16.mxu1 %v12562_v10  ;;  %v12601_v20 = vld [vmem:[#allocation2 + $0x30] ss:$8 sps:$4 sm:$0xff]   ;;  %v10721_v21 = vld [vmem:[#allocation2 + $0x44] ss:$8 sps:$4 sm:$0xff]   ;;  %v10723_v22 = vld [vmem:[#allocation2 + $0x40] ss:$8 sps:$4 sm:$0xff]  }
  0x98   :  { %v10724_v23 = vld [vmem:[#allocation2 + $0x54] ss:$8 sps:$4 sm:$0xff]   ;;  %v10726_v24 = vld [vmem:[#allocation2 + $0x50] ss:$8 sps:$4 sm:$0xff]   ;;  %v10727_v25 = vld [vmem:[#allocation2 + $0x64] ss:$8 sps:$4 sm:$0xff]  }
  0x99   :  { %10150 = vrot.lane.b32.xlu0 %v12541_v4, %s12337_s5  ;;  %316 = vmatpush1.bf16.msra.mxu0 %v12567_v11  ;;  %v10729_v26 = vld [vmem:[#allocation2 + $0x60] ss:$8 sps:$4 sm:$0xff]   ;;  %v10730_v27 = vld [vmem:[#allocation2 + $0x74] ss:$8 sps:$4 sm:$0xff]   ;;  %s12341_s13 = smov 56   ;;  %vm184_vm1 = vcmask 916480  }
  0x9a   :  { %10160 = vrot.lane.b32.xlu1 %v12553_v6, %s12335_s1  ;;  %452 = vmatpush1.bf16.msra.mxu1 %v12567_v11  ;;  %v10732_v28 = vld [vmem:[#allocation2 + $0x70] ss:$8 sps:$4 sm:$0xff]   ;;  %v10735_v29 = vld [vmem:[#allocation2 + $0x80] ss:$8 sps:$4 sm:$0x3f]   ;;  %vm13778_vm2 = vcmask 97280  }
  0x9b   :  { %317 = vmatprep.subr.bf16.mxu0 %v12584_v15  ;;  %453 = vmatprep.subr.bf16.mxu1 %v12584_v15  ;;  %v10733_v30 = vld [vmem:[#allocation2 + $0x84] ss:$8 sps:$4 sm:$0x3f]   ;;  %v12630_v31 = vsel %vm306_vm0, %v10735_v29, 0  ;;  %vm421_vm3 = vcmask 687104   ;;  %vm413_vm4 = vcmask 228352  }
  0x9c   :  { %v12118_v14 = vld [vmem:[#allocation2 + $0x10] ss:$8 sps:$4 sm:$0xff]   ;;  %vm414_vm5 = vcmask 457728   ;;  %s12343_s16 = smov 68   ;;  %s12344_s19 = smov 98   ;;  %vm843_vm6 = vcmask 80896  }
  0x9d   :  { %10165 = vrot.lane.b32.xlu0 %v12574_v12, %s12337_s5  ;;  %318 = vmatpush1.bf16.msra.mxu0 %v12588_v16  ;;  %s12345_s20 = smov 108   ;;  %s12346_s21 = smov 88   ;;  %vm850_vm7 = vcmask 162816   ;;  %vm740_vm8 = vcmask 556032   ;;  %vm857_vm9 = vcmask 244736   ;;  %vm864_vm10 = vcmask 326656  }
  0x9e   :  { %10170 = vrot.lane.b32.xlu1 %v12574_v12, %s12336_s24  ;;  %454 = vmatpush1.bf16.msra.mxu1 %v12588_v16  ;;  %s12347_s4 = smov 78   ;;  %s12348_s8 = smov 58   ;;  %vm871_vm11 = vcmask 408576   ;;  %vm878_vm12 = vcmask 490496   ;;  %vm885_vm13 = vcmask 572416   ;;  %vm892_vm14 = vcmask 654336  }
  0x9f   :  { %319 = vmatprep.subr.bf16.mxu0 %v12598_v19  ;;  %455 = vmatprep.subr.bf16.mxu1 %v12598_v19  ;;  %s12349_s22 = smov 48   ;;  %s12350_s12 = smov 38   ;;  %vm906_vm15 = vcmask 818176  }
  0xa0   :  { %s12351_s23 = smov 18   ;;  %s12352_s25 = smov 80  }
  0xa1   :  { %10175 = vrot.lane.b32.xlu0 %v10174_v17, %s12335_s1  ;;  %320 = vmatpush1.bf16.msra.mxu0 %v12601_v20  ;;  %s12353_s26 = smov 96   ;;  %s12359_s27 = smov 32  }
  0xa2   :  { %10180 = vrot.lane.b32.xlu1 %v12594_v18, %s12337_s5  ;;  %456 = vmatpush1.bf16.msra.mxu1 %v12601_v20  ;;  %s12360_s28 = smov 124  }
  0xa3   :  { %321 = vmatprep.subr.bf16.mxu0 %v10721_v21  ;;  %457 = vmatprep.subr.bf16.mxu1 %v10721_v21 }
  0xa5   :  { %10185 = vrot.lane.b32.xlu0 %v12594_v18, %s12336_s24  ;;  %322 = vmatpush1.bf16.msra.mxu0 %v10723_v22 }
  0xa6   :  { %10190 = vrot.lane.b32.xlu1 %v10144_v3, %s12338_s2  ;;  %458 = vmatpush1.bf16.msra.mxu1 %v10723_v22 }
  0xa7   :  { %323 = vmatprep.subr.bf16.mxu0 %v10724_v23  ;;  %459 = vmatprep.subr.bf16.mxu1 %v10724_v23 }
  0xa9   :  { %10195 = vrot.lane.b32.xlu0 %v12541_v4, %s12339_s10  ;;  %324 = vmatpush1.bf16.msra.mxu0 %v10726_v24 }
  0xaa   :  { %10200 = vrot.lane.b32.xlu1 %v10144_v3, %s12340_s6  ;;  %460 = vmatpush1.bf16.msra.mxu1 %v10726_v24 }
  0xab   :  { %325 = vmatprep.subr.bf16.mxu0 %v10727_v25  ;;  %461 = vmatprep.subr.bf16.mxu1 %v10727_v25  ;;  %v12121_v25 = vld [vmem:[%s13768_s0 + $0x28] sm:$0xff] }
  0xad   :  { %10205 = vrot.lane.b32.xlu0 %v12541_v4, %s12341_s13  ;;  %326 = vmatpush1.bf16.msra.mxu0 %v10729_v26 }
  0xae   :  { %10210 = vrot.lane.b32.xlu1 %v12553_v6, %s12338_s2  ;;  %462 = vmatpush1.bf16.msra.mxu1 %v10729_v26 }
  0xaf   :  { %327 = vmatprep.subr.bf16.mxu0 %v10730_v27  ;;  %463 = vmatprep.subr.bf16.mxu1 %v10730_v27  ;;  %v12122_v27 = vld [vmem:[#allocation2 + $0x44] ss:$8 sps:$4 sm:$0xff]  }
  0xb1   :  { %10215 = vrot.lane.b32.xlu0 %v12574_v12, %s12339_s10  ;;  %328 = vmatpush1.bf16.msra.mxu0 %v10732_v28 }
  0xb2   :  { %10220 = vrot.lane.b32.xlu1 %v12553_v6, %s12340_s6  ;;  %464 = vmatpush1.bf16.msra.mxu1 %v10732_v28 }
  0xb3   :  { %8974 = vmatprep.subr.msk.bf16.mxu0 %vm306_vm0, %v10733_v30  ;;  %8978 = vmatprep.subr.msk.bf16.mxu1 %vm306_vm0, %v10733_v30 }
  0xb5   :  { %10225 = vrot.lane.b32.xlu0 %v12574_v12, %s12341_s13  ;;  %330 = vmatpush1.bf16.msra.mxu0 %v12630_v31 }
  0xb6   :  { %10230 = vrot.lane.b32.xlu1 %v10174_v17, %s12338_s2  ;;  %466 = vmatpush1.bf16.msra.mxu1 %v12630_v31 }
  0xb7   :  { %989 = vmatprep.subr.bf16.mxu0 %v12555_v7  ;;  %1127 = vmatprep.subr.bf16.mxu1 %v12555_v7 }
  0xb9   :  { %10235 = vrot.lane.b32.xlu0 %v12594_v18, %s12339_s10 }
  0xba   :  { %10240 = vrot.lane.b32.xlu1 %v10174_v17, %s12340_s6  ;;  %v12119_v17 = vld [vmem:[#allocation2 + $0x24] ss:$8 sps:$4 sm:$0xff]  }
  0xbd   :  { %10245 = vrot.lane.b32.xlu0 %v12594_v18, %s12341_s13 }
 0x107   :  { %v10146_v32 = vpop.permute.xlu0 %10145 }
 0x108   :  { %v10156_v33 = vpop.permute.xlu1 %10155  ;;  %v10148_v42 = vunpack.i.h.bf16 %v10146_v32  ;;  %v10147_v43 = vunpack.i.l.bf16 %v10146_v32 }
 0x109   :  { %v10158_v34 = vunpack.i.h.bf16 %v10156_v33  ;;  %v10157_v35 = vunpack.i.l.bf16 %v10156_v33 }
 0x10b   :  { %v192_v36 = vpack.c.bf16 %v10158_v34, %v10157_v35  ;;  %v185_v37 = vsel %vm184_vm1, %v12525_v0, %v10157_v35  ;;  %v186_v38 = vsel %vm184_vm1, %v12530_v1, %v10158_v34  ;;  %v10151_v39 = vpop.permute.xlu0 %10150  ;;  %v12124_v34 = vld [vmem:[#allocation2 + $0x34] ss:$8 sps:$4 sm:$0xff]   ;;  %v12125_v35 = vld [vmem:[#allocation2 + $0x40] ss:$8 sps:$4 sm:$0xff]  }
 0x10c   :  { %v10161_v40 = vpop.permute.xlu1 %10160  ;;  %v191_v41 = vpack.c.bf16 %v186_v38, %v185_v37  ;;  %v10153_v44 = vunpack.i.h.bf16 %v10151_v39  ;;  %v10152_v45 = vunpack.i.l.bf16 %v10151_v39  ;;  %v12126_v37 = vld [vmem:[#allocation2 + $0x54] ss:$8 sps:$4 sm:$0xff]  }
 0x10d   :  { %8975 = vmatprep.mubr.msk.bf16.mxu0 %vm13778_vm2, %v192_v36  ;;  %v10163_v49 = vunpack.i.h.bf16 %v10161_v40  ;;  %v10162_v50 = vunpack.i.l.bf16 %v10161_v40 }
 0x10e   :  { %346 = vmatmul.mubr.bf16.vlgmr.msra.gmra.mrb[0].mxu0 %v191_v41  ;;  %v435_v46 = vpack.c.bf16 %v10153_v44, %v10152_v45  ;;  %v422_v47 = vsel %vm421_vm3, %v10147_v43, %v10152_v45  ;;  %v423_v48 = vsel %vm421_vm3, %v10148_v42, %v10153_v44 }
 0x10f   :  { %990 = vmatpush1.bf16.msra.mxu0 %v12557_v8  ;;  %v10166_v51 = vpop.permute.xlu0 %10165  ;;  %v428_v53 = vsel %vm184_vm1, %v422_v47, %v10152_v45  ;;  %v429_v54 = vsel %vm184_vm1, %v423_v48, %v10153_v44  ;;  %v12127_v44 = vld [vmem:[#allocation2 + $0x30] ss:$8 sps:$4 sm:$0xff]  }
 0x110   :  { %v10171_v52 = vpop.permute.xlu1 %10170  ;;  %991 = vmatprep.subr.bf16.mxu0 %v12562_v10  ;;  %v10168_v55 = vunpack.i.h.bf16 %v10166_v51  ;;  %v10167_v56 = vunpack.i.l.bf16 %v10166_v51  ;;  %8979 = vmatprep.mubr.msk.bf16.mxu1 %vm13778_vm2, %v435_v46  ;;  %v434_v59 = vpack.c.bf16 %v429_v54, %v428_v53  ;;  %v12129_v53 = vld [vmem:[#allocation2 + $0x64] ss:$8 sps:$4 sm:$0xff]  }
 0x111   :  { %v10173_v57 = vunpack.i.h.bf16 %v10171_v52  ;;  %v10172_v58 = vunpack.i.l.bf16 %v10171_v52 }
 0x112   :  { %v437_v63 = vpack.c.bf16 %v10168_v55, %v10167_v56  ;;  %482 = vmatmul.mubr.bf16.vlgmr.msra.gmra.mrb[0].mxu1 %v434_v59  ;;  %v424_v1 = vsel %vm421_vm3, %v10162_v50, %v10167_v56  ;;  %v425_v3 = vsel %vm421_vm3, %v10163_v49, %v10168_v55  ;;  %v12128_v50 = vld [vmem:[#allocation2 + $0x50] ss:$8 sps:$4 sm:$0xff]   ;;  %v12130_v59 = vld [vmem:[#allocation2 + $0x60] ss:$8 sps:$4 sm:$0xff]  }
 0x113   :  { %v194_v60 = vpack.c.bf16 %v10173_v57, %v10172_v58  ;;  %992 = vmatpush1.bf16.msra.mxu0 %v12567_v11  ;;  %v187_v61 = vsel %vm184_vm1, %v12535_v2, %v10172_v58  ;;  %v188_v62 = vsel %vm184_vm1, %v12546_v5, %v10173_v57  ;;  %v10176_v4 = vpop.permute.xlu0 %10175  ;;  %1128 = vmatpush1.bf16.msra.mxu1 %v12557_v8 }
 0x114   :  { %v193_v0 = vpack.c.bf16 %v188_v62, %v187_v61  ;;  %993 = vmatprep.subr.bf16.mxu0 %v12584_v15  ;;  %v10181_v6 = vpop.permute.xlu1 %10180  ;;  %1129 = vmatprep.subr.bf16.mxu1 %v12562_v10  ;;  %v10178_v2 = vunpack.i.h.bf16 %v10176_v4  ;;  %v10177_v5 = vunpack.i.l.bf16 %v10176_v4  ;;  %v430_v11 = vsel %vm184_vm1, %v424_v1, %v10167_v56 }
 0x115   :  { %8976 = vmatprep.mubr.msk.bf16.mxu0 %vm13778_vm2, %v194_v60  ;;  %v10183_v7 = vunpack.i.h.bf16 %v10181_v6  ;;  %v10182_v9 = vunpack.i.l.bf16 %v10181_v6  ;;  %8980 = vmatprep.mubr.msk.bf16.mxu1 %vm13778_vm2, %v437_v63  ;;  %v431_v12 = vsel %vm184_vm1, %v425_v3, %v10168_v55 }
 0x116   :  { %356 = vmatmul.mubr.bf16.gmra.mrb[4].mxu0 %v193_v0  ;;  %v436_v18 = vpack.c.bf16 %v431_v12, %v430_v11  ;;  %v12131_v0 = vld [vmem:[#allocation2 + $0x74] ss:$8 sps:$4 sm:$0xff]   ;;  %v12132_v11 = vld [vmem:[#allocation2 + $0x70] ss:$8 sps:$4 sm:$0xff]  }
 0x117   :  { %994 = vmatpush1.bf16.msra.mxu0 %v12588_v16  ;;  %v10186_v8 = vpop.permute.xlu0 %10185  ;;  %1130 = vmatpush1.bf16.msra.mxu1 %v12118_v14  ;;  %v439_v21 = vpack.c.bf16 %v10183_v7, %v10182_v9  ;;  %v426_v22 = vsel %vm421_vm3, %v10177_v5, %v10182_v9  ;;  %v427_v23 = vsel %vm421_vm3, %v10178_v2, %v10183_v7 }
 0x118   :  { %995 = vmatprep.subr.bf16.mxu0 %v12598_v19  ;;  %v12671_v13 = vpop.permute.xlu1 %10190  ;;  %v10188_v10 = vunpack.i.h.bf16 %v10186_v8  ;;  %v10187_v15 = vunpack.i.l.bf16 %v10186_v8  ;;  %1131 = vmatprep.subr.bf16.mxu1 %v12119_v17  ;;  %v12120_v19 = vld [vmem:[%s13768_s0 + $0x20] sm:$0xff]  ;;  %v432_v32 = vsel %vm184_vm1, %v426_v22, %v10182_v9  ;;  %v433_v33 = vsel %vm184_vm1, %v427_v23, %v10183_v7  ;;  %s12342_s0 = smov 118  }
 0x119   :  { %v10193_v36 = vunpack.i.h.bf16 %v12671_v13  ;;  %v10192_v38 = vunpack.i.l.bf16 %v12671_v13  ;;  %v438_v42 = vpack.c.bf16 %v433_v33, %v432_v32 }
 0x11a   :  { %v196_v16 = vpack.c.bf16 %v10188_v10, %v10187_v15  ;;  %v189_v24 = vsel %vm184_vm1, %v12120_v19, %v10187_v15  ;;  %v190_v26 = vsel %vm184_vm1, %v12121_v25, %v10188_v10  ;;  %492 = vmatmul.mubr.bf16.gmra.mrb[4].mxu1 %v436_v18  ;;  %v12133_v10 = vld [vmem:[#allocation2 + $0x84] ss:$8 sps:$4 sm:$0x3f]  }
 0x11b   :  { %996 = vmatpush1.bf16.msra.mxu0 %v12601_v20  ;;  %v10196_v28 = vpop.permute.xlu0 %10195  ;;  %v195_v30 = vpack.c.bf16 %v190_v26, %v189_v24  ;;  %v12123_v20 = vld [vmem:[#allocation2 + $0x20] ss:$8 sps:$4 sm:$0xff]   ;;  %8981 = vmatprep.mubr.msk.bf16.mxu1 %vm13778_vm2, %v439_v21 }
 0x11c   :  { %997 = vmatprep.subr.bf16.mxu0 %v12122_v27  ;;  %v10201_v29 = vpop.permute.xlu1 %10200  ;;  %1132 = vmatpush1.bf16.msra.mxu1 %v12123_v20  ;;  %v12690_v39 = vunpack.i.h.bf16 %v10196_v28  ;;  %v12692_v40 = vunpack.i.l.bf16 %v10196_v28 }
 0x11d   :  { %8977 = vmatprep.mubr.msk.bf16.mxu0 %vm13778_vm2, %v196_v16  ;;  %1133 = vmatprep.subr.bf16.mxu1 %v12124_v34  ;;  %v10203_v45 = vunpack.i.h.bf16 %v10201_v29  ;;  %v10202_v46 = vunpack.i.l.bf16 %v10201_v29 }
 0x11e   :  { %366 = vmatmul.mubr.bf16.gmra.mrb[8].mxu0 %v195_v30  ;;  %v1113_v49 = vpack.c.bf16 %v12690_v39, %v12692_v40  ;;  %v1089_v52 = vsel %vm413_vm4, %v10193_v36, %v12690_v39  ;;  %v1088_v56 = vsel %vm413_vm4, %v10192_v38, %v12692_v40 }
 0x11f   :  { %998 = vmatpush1.bf16.msra.mxu0 %v12125_v35  ;;  %v10206_v41 = vpop.permute.xlu0 %10205  ;;  %v1095_v60 = vsel %vm414_vm5, %v1089_v52, %v12690_v39  ;;  %v1094_v61 = vsel %vm414_vm5, %v1088_v56, %v12692_v40 }
 0x120   :  { %999 = vmatprep.subr.bf16.mxu0 %v12126_v37  ;;  %v12694_v43 = vpop.permute.xlu1 %10210  ;;  %1134 = vmatpush1.bf16.msra.mxu1 %v12127_v44  ;;  %v10208_v47 = vunpack.i.h.bf16 %v10206_v41  ;;  %v10207_v48 = vunpack.i.l.bf16 %v10206_v41  ;;  %v1100_v15 = vsel %vm421_vm3, %v1094_v61, %v12692_v40  ;;  %v1101_v17 = vsel %vm421_vm3, %v1095_v60, %v12690_v39 }
 0x121   :  { %1135 = vmatprep.subr.bf16.mxu1 %v12122_v27  ;;  %v10213_v12 = vunpack.i.h.bf16 %v12694_v43  ;;  %v10212_v8 = vunpack.i.l.bf16 %v12694_v43  ;;  %v1106_v19 = vsel %vm184_vm1, %v1100_v15, %v12692_v40  ;;  %v1107_v24 = vsel %vm184_vm1, %v1101_v17, %v12690_v39 }
 0x122   :  { %v975_v51 = vpack.c.bf16 %v10208_v47, %v10207_v48  ;;  %502 = vmatmul.mubr.bf16.gmra.mrb[8].mxu1 %v438_v42  ;;  %v957_v57 = vsel %vm414_vm5, %v10203_v45, %v10208_v47  ;;  %v956_v58 = vsel %vm414_vm5, %v10202_v46, %v10207_v48 }
 0x123   :  { %1000 = vmatpush1.bf16.msra.mxu0 %v12128_v50  ;;  %v10216_v54 = vpop.permute.xlu0 %10215  ;;  %8987 = vmatprep.mubr.msk.bf16.mxu1 %vm13778_vm2, %v1113_v49  ;;  %v963_v62 = vsel %vm421_vm3, %v957_v57, %v10208_v47  ;;  %v962_v63 = vsel %vm421_vm3, %v956_v58, %v10207_v48 }
 0x124   :  { %1001 = vmatprep.subr.bf16.mxu0 %v12129_v53  ;;  %v10221_v55 = vpop.permute.xlu1 %10220  ;;  %1136 = vmatpush1.bf16.msra.mxu1 %v12125_v35  ;;  %v969_v7 = vsel %vm184_vm1, %v963_v62, %v10208_v47  ;;  %v968_v9 = vsel %vm184_vm1, %v962_v63, %v10207_v48  ;;  %v10218_v13 = vunpack.i.h.bf16 %v10216_v54  ;;  %v10217_v14 = vunpack.i.l.bf16 %v10216_v54 }
 0x125   :  { %8983 = vmatprep.mubr.msk.bf16.mxu0 %vm13778_vm2, %v975_v51  ;;  %1137 = vmatprep.subr.bf16.mxu1 %v12126_v37  ;;  %v10223_v4 = vunpack.i.h.bf16 %v10221_v55  ;;  %v10222_v6 = vunpack.i.l.bf16 %v10221_v55  ;;  %v974_v23 = vpack.c.bf16 %v969_v7, %v968_v9  ;;  %v1112_v35 = vpack.c.bf16 %v1107_v24, %v1106_v19  ;;  %v159_v9 = vld [vmem:[#allocation4] sm:$0x3] }
 0x126   :  { %v1090_v29 = vsel %vm413_vm4, %v10212_v8, %v10217_v14  ;;  %v1091_v30 = vsel %vm413_vm4, %v10213_v12, %v10218_v13  ;;  %v1115_v44 = vpack.c.bf16 %v10218_v13, %v10217_v14 }
 0x127   :  { %1002 = vmatpush1.bf16.msra.mxu0 %v12130_v59  ;;  %v10226_v1 = vpop.permute.xlu0 %10225  ;;  %v1096_v38 = vsel %vm414_vm5, %v1090_v29, %v10217_v14  ;;  %v1097_v39 = vsel %vm414_vm5, %v1091_v30, %v10218_v13 }
 0x128   :  { %1003 = vmatprep.subr.bf16.mxu0 %v12131_v0  ;;  %v12712_v3 = vpop.permute.xlu1 %10230  ;;  %1138 = vmatpush1.bf16.msra.mxu1 %v12128_v50  ;;  %v10228_v2 = vunpack.i.h.bf16 %v10226_v1  ;;  %v10227_v5 = vunpack.i.l.bf16 %v10226_v1  ;;  %v1102_v48 = vsel %vm421_vm3, %v1096_v38, %v10217_v14  ;;  %v1103_v49 = vsel %vm421_vm3, %v1097_v39, %v10218_v13 }
 0x129   :  { %1139 = vmatprep.subr.bf16.mxu1 %v12129_v53  ;;  %v10233_v40 = vunpack.i.h.bf16 %v12712_v3  ;;  %v10232_v41 = vunpack.i.l.bf16 %v12712_v3  ;;  %v1108_v54 = vsel %vm184_vm1, %v1102_v48, %v10217_v14  ;;  %v1109_v55 = vsel %vm184_vm1, %v1103_v49, %v10218_v13 }
 0x12a   :  { %v958_v21 = vsel %vm414_vm5, %v10222_v6, %v10227_v5  ;;  %v959_v22 = vsel %vm414_vm5, %v10223_v4, %v10228_v2  ;;  %v977_v25 = vpack.c.bf16 %v10228_v2, %v10227_v5  ;;  %v1114_v60 = vpack.c.bf16 %v1109_v55, %v1108_v54 }
 0x12b   :  { %1004 = vmatpush1.bf16.msra.mxu0 %v12132_v11  ;;  %v10236_v18 = vpop.permute.xlu0 %10235  ;;  %v964_v27 = vsel %vm421_vm3, %v958_v21, %v10227_v5  ;;  %v965_v28 = vsel %vm421_vm3, %v959_v22, %v10228_v2  ;;  %v198_v6 = vlaneseq }
 0x12c   :  { %8982 = vmatprep.subr.msk.bf16.mxu0 %vm306_vm0, %v12133_v10  ;;  %1140 = vmatpush1.bf16.msra.mxu1 %v12130_v59  ;;  %v10241_v16 = vpop.permute.xlu1 %10240  ;;  %v970_v36 = vsel %vm184_vm1, %v964_v27, %v10227_v5  ;;  %v971_v37 = vsel %vm184_vm1, %v965_v28, %v10228_v2  ;;  %v10238_v42 = vunpack.i.h.bf16 %v10236_v18  ;;  %v10237_v43 = vunpack.i.l.bf16 %v10236_v18 }
 0x12d   :  { %1141 = vmatprep.subr.bf16.mxu1 %v12131_v0  ;;  %v10243_v20 = vunpack.i.h.bf16 %v10241_v16  ;;  %v10242_v32 = vunpack.i.l.bf16 %v10241_v16  ;;  %v976_v47 = vpack.c.bf16 %v971_v37, %v970_v36  ;;  %v12764_v2 = vshrl.u32 %v198_v6, 7 }
 0x12e   :  { %v1092_v53 = vsel %vm413_vm4, %v10232_v41, %v10237_v43  ;;  %v1117_v61 = vpack.c.bf16 %v10238_v42, %v10237_v43 }
 0x12f   :  { %1006 = vmatpush1.bf16.msra.mxu0 %v12630_v31  ;;  %v10246_v26 = vpop.permute.xlu0 %10245  ;;  %v1098_v58 = vsel %vm414_vm5, %v1092_v53, %v10237_v43  ;;  %v12767_v5 = vsub.s32 0, %v12764_v2  ;;  %v12770_v7 = vsub.s32 1, %v12764_v2 }
 0x130   :  { %1142 = vmatpush1.bf16.msra.mxu1 %v12132_v11  ;;  %v10248_v33 = vunpack.i.h.bf16 %v10246_v26  ;;  %v10247_v34 = vunpack.i.l.bf16 %v10246_v26  ;;  %v1104_v63 = vsel %vm421_vm3, %v1098_v58, %v10237_v43 }
 0x131   :  { %8986 = vmatprep.subr.msk.bf16.mxu1 %vm306_vm0, %v12133_v10  ;;  %v1110_v1 = vsel %vm184_vm1, %v1104_v63, %v10237_v43  ;;  %v12773_v11 = vrot.slane %v159_v9, %v12767_v5  ;;  %v12777_v14 = vrot.slane %v159_v9, %v12770_v7  ;;  %vm899_vm0 = vcmask 736256  }
 0x132   :  { %1022 = vmatmul.mubr.bf16.vlgmr.msra.gmra.mrb[12].mxu0 %v974_v23  ;;  %v960_v45 = vsel %vm414_vm5, %v10242_v32, %v10247_v34  ;;  %v961_v46 = vsel %vm414_vm5, %v10243_v20, %v10248_v33  ;;  %v979_v50 = vpack.c.bf16 %v10248_v33, %v10247_v34 }
 0x133   :  { %8984 = vmatprep.mubr.msk.bf16.mxu0 %vm13778_vm2, %v977_v25  ;;  %v966_v51 = vsel %vm421_vm3, %v960_v45, %v10247_v34  ;;  %v967_v52 = vsel %vm421_vm3, %v961_v46, %v10248_v33 }
 0x134   :  { %1144 = vmatpush1.bf16.msra.mxu1 %v12630_v31  ;;  %v1093_v31 = vsel %vm413_vm4, %v10233_v40, %v10238_v42  ;;  %v972_v56 = vsel %vm184_vm1, %v966_v51, %v10247_v34  ;;  %v973_v57 = vsel %vm184_vm1, %v967_v52, %v10248_v33  ;;  %vm1637_vm4 = vcmask 719872  }
 0x135   :  { %v1099_v59 = vsel %vm414_vm5, %v1093_v31, %v10238_v42  ;;  %v978_v62 = vpack.c.bf16 %v973_v57, %v972_v56 }
 0x136   :  { %v1105_v0 = vsel %vm421_vm3, %v1099_v59, %v10238_v42  ;;  %vm913_vm3 = vcmask 900096  }
 0x137   :  { %1160 = vmatmul.mubr.bf16.vlgmr.msra.gmra.mrb[12].mxu1 %v1112_v35  ;;  %v1111_v3 = vsel %vm184_vm1, %v1105_v0, %v10238_v42 }
 0x138   :  { %8988 = vmatprep.mubr.msk.bf16.mxu1 %vm13778_vm2, %v1115_v44  ;;  %v1116_v4 = vpack.c.bf16 %v1111_v3, %v1110_v1 }
 0x13a   :  { %1032 = vmatmul.mubr.bf16.gmra.mrb[16].mxu0 %v976_v47 }
 0x13b   :  { %8985 = vmatprep.mubr.msk.bf16.mxu0 %vm13778_vm2, %v979_v50 }
 0x13f   :  { %1170 = vmatmul.mubr.bf16.gmra.mrb[16].mxu1 %v1114_v60 }
 0x140   :  { %8989 = vmatprep.mubr.msk.bf16.mxu1 %vm13778_vm2, %v1117_v61  ;;  %vm13779_vm2 = vcmask 523264  }
 0x142   :  { %1042 = vmatmul.mubr.bf16.gmra.mrb[20].mxu0 %v978_v62 }
 0x147   :  { %1180 = vmatmul.mubr.bf16.gmra.mrb[20].mxu1 %v1116_v4 }
 0x1e1   :  { %v347_v12 = vpop.f32.mrb[0].mxu0 }
 0x1e2   :  { %v348_v8 = vadd.f32 %v347_v12, %v12773_v11  ;;  %v349_v13 = vpop.f32.mrb[1].mxu0 }
 0x1e3   :  { %v351_v10 = vpop.f32.mrb[2].mxu0  ;;  %v350_v17 = vadd.f32 %v349_v13, %v12777_v14 }
 0x1e4   :  { %v353_v15 = vpop.f32.mrb[3].mxu0  ;;  %v352_v24 = vadd.f32 %v351_v10, %v12773_v11 }
 0x1e5   :  { %v483_v18 = vpop.f32.mrb[0].mxu1  ;;  %v354_v29 = vadd.f32 %v353_v15, %v12777_v14 }
 0x1e6   :  { %v484_v21 = vadd.f32 %v483_v18, %v12773_v11  ;;  %v485_v22 = vpop.f32.mrb[1].mxu1 }
 0x1e7   :  { %v486_v23 = vadd.f32 %v485_v22, %v12777_v14  ;;  %v487_v16 = vpop.f32.mrb[2].mxu1 }
 0x1e8   :  { %v12783_v25 = vmax.f32 %v348_v8, %v484_v21  ;;  %v488_v26 = vadd.f32 %v487_v16, %v12773_v11  ;;  %v489_v27 = vpop.f32.mrb[3].mxu1 }
 0x1e9   :  { %v357_v19 = vpop.f32.mrb[4].mxu0  ;;  %v12787_v30 = vmax.f32 %v350_v17, %v486_v23  ;;  %v490_v20 = vadd.f32 %v489_v27, %v12777_v14 }
 0x1ea   :  { %v359_v28 = vpop.f32.mrb[5].mxu0  ;;  %v12790_v33 = vmax.f32 %v352_v24, %v488_v26  ;;  %v358_v36 = vadd.f32 %v357_v19, %v12773_v11 }
 0x1eb   :  { %v361_v32 = vpop.f32.mrb[6].mxu0  ;;  %v12792_v35 = vmax.f32 %v354_v29, %v490_v20  ;;  %v360_v37 = vadd.f32 %v359_v28, %v12777_v14 }
 0x1ec   :  { %v363_v34 = vpop.f32.mrb[7].mxu0  ;;  %v362_v43 = vadd.f32 %v361_v32, %v12773_v11 }
 0x1ed   :  { %v493_v38 = vpop.f32.mrb[4].mxu1  ;;  %v364_v47 = vadd.f32 %v363_v34, %v12777_v14 }
 0x1ee   :  { %v494_v39 = vadd.f32 %v493_v38, %v12773_v11  ;;  %v495_v40 = vpop.f32.mrb[5].mxu1 }
 0x1ef   :  { %v496_v41 = vadd.f32 %v495_v40, %v12777_v14  ;;  %v497_v42 = vpop.f32.mrb[6].mxu1 }
 0x1f0   :  { %v12799_v44 = vmax.f32 %v358_v36, %v494_v39  ;;  %v498_v45 = vadd.f32 %v497_v42, %v12773_v11  ;;  %v499_v46 = vpop.f32.mrb[7].mxu1 }
 0x1f1   :  { %v12803_v48 = vmax.f32 %v360_v37, %v496_v41  ;;  %v500_v49 = vadd.f32 %v499_v46, %v12777_v14  ;;  %v367_v50 = vpop.f32.mrb[8].mxu0 }
 0x1f2   :  { %v12806_v51 = vmax.f32 %v362_v43, %v498_v45  ;;  %v368_v52 = vadd.f32 %v367_v50, %v12773_v11  ;;  %v369_v53 = vpop.f32.mrb[9].mxu0 }
 0x1f3   :  { %v12809_v31 = vmax.f32 %v364_v47, %v500_v49  ;;  %v371_v54 = vpop.f32.mrb[10].mxu0  ;;  %v370_v59 = vadd.f32 %v369_v53, %v12777_v14 }
 0x1f4   :  { %v372_v55 = vadd.f32 %v371_v54, %v12773_v11  ;;  %v373_v56 = vpop.f32.mrb[11].mxu0 }
 0x1f5   :  { %v10249_v57 = vpack.i.bf16 %v12809_v31, %v12799_v44  ;;  %v503_v58 = vpop.f32.mrb[8].mxu1  ;;  %v374_v0 = vadd.f32 %v373_v56, %v12777_v14 }
 0x1f6   :  { %v504_v60 = vadd.f32 %v503_v58, %v12773_v11  ;;  %v505_v61 = vpop.f32.mrb[9].mxu1 }
 0x1f7   :  { %10250 = vrot.lane.b32.xlu0 %v10249_v57, %s12342_s0  ;;  %v506_v62 = vadd.f32 %v505_v61, %v12777_v14  ;;  %v507_v63 = vpop.f32.mrb[10].mxu1 }
 0x1f8   :  { %v12819_v1 = vmax.f32 %v368_v52, %v504_v60  ;;  %v508_v3 = vadd.f32 %v507_v63, %v12773_v11  ;;  %v509_v4 = vpop.f32.mrb[11].mxu1 }
 0x1f9   :  { %v12822_v6 = vmax.f32 %v370_v59, %v506_v62  ;;  %v510_v9 = vadd.f32 %v509_v4, %v12777_v14 }
 0x1fa   :  { %v12825_v12 = vmax.f32 %v372_v55, %v508_v3 }
 0x1fb   :  { %v12827_v8 = vmax.f32 %v374_v0, %v510_v9 }
 0x205   :  { %v1023_v13 = vpop.f32.mrb[12].mxu0 }
 0x206   :  { %v1024_v10 = vadd.f32 %v1023_v13, %v12773_v11  ;;  %v1025_v15 = vpop.f32.mrb[13].mxu0 }
 0x207   :  { %v1027_v17 = vpop.f32.mrb[14].mxu0  ;;  %v1026_v23 = vadd.f32 %v1025_v15, %v12777_v14 }
 0x208   :  { %v1028_v18 = vadd.f32 %v1027_v17, %v12773_v11  ;;  %v1029_v21 = vpop.f32.mrb[15].mxu0 }
 0x209   :  { %v1030_v27 = vadd.f32 %v1029_v21, %v12777_v14 }
 0x20a   :  { %v1161_v22 = vpop.f32.mrb[12].mxu1 }
 0x20b   :  { %v1162_v16 = vadd.f32 %v1161_v22, %v12773_v11  ;;  %v1163_v19 = vpop.f32.mrb[13].mxu1 }
 0x20c   :  { %v1164_v24 = vadd.f32 %v1163_v19, %v12777_v14  ;;  %v1165_v26 = vpop.f32.mrb[14].mxu1 }
 0x20d   :  { %v1033_v28 = vpop.f32.mrb[16].mxu0  ;;  %v12835_v29 = vmax.f32 %v1024_v10, %v1162_v16  ;;  %v1166_v20 = vadd.f32 %v1165_v26, %v12773_v11  ;;  %v1167_v32 = vpop.f32.mrb[15].mxu1 }
 0x20e   :  { %v1035_v34 = vpop.f32.mrb[17].mxu0  ;;  %v12838_v36 = vmax.f32 %v1026_v23, %v1164_v24  ;;  %v1168_v37 = vadd.f32 %v1167_v32, %v12777_v14  ;;  %v1034_v42 = vadd.f32 %v1033_v28, %v12773_v11 }
 0x20f   :  { %v1037_v38 = vpop.f32.mrb[18].mxu0  ;;  %v12841_v39 = vmax.f32 %v1028_v18, %v1166_v20  ;;  %v1036_v45 = vadd.f32 %v1035_v34, %v12777_v14 }
 0x210   :  { %v1039_v40 = vpop.f32.mrb[19].mxu0  ;;  %v12843_v41 = vmax.f32 %v1030_v27, %v1168_v37  ;;  %v1038_v49 = vadd.f32 %v1037_v38, %v12773_v11 }
 0x211   :  { %v1040_v53 = vadd.f32 %v1039_v40, %v12777_v14 }
 0x212   :  { %v1171_v43 = vpop.f32.mrb[16].mxu1 }
 0x213   :  { %v1172_v46 = vadd.f32 %v1171_v43, %v12773_v11  ;;  %v1173_v47 = vpop.f32.mrb[17].mxu1 }
 0x214   :  { %v1174_v50 = vadd.f32 %v1173_v47, %v12777_v14  ;;  %v1175_v52 = vpop.f32.mrb[18].mxu1 }
 0x215   :  { %v1043_v54 = vpop.f32.mrb[20].mxu0  ;;  %v12851_v55 = vmax.f32 %v1034_v42, %v1172_v46  ;;  %v1176_v56 = vadd.f32 %v1175_v52, %v12773_v11  ;;  %v1177_v57 = vpop.f32.mrb[19].mxu1 }
 0x216   :  { %v1044_v58 = vadd.f32 %v1043_v54, %v12773_v11  ;;  %v1045_v59 = vpop.f32.mrb[21].mxu0  ;;  %v12855_v60 = vmax.f32 %v1036_v45, %v1174_v50  ;;  %v1178_v61 = vadd.f32 %v1177_v57, %v12777_v14 }
 0x217   :  { %v1047_v62 = vpop.f32.mrb[22].mxu0  ;;  %v12858_v63 = vmax.f32 %v1038_v49, %v1176_v56  ;;  %v10254_v0 = vpack.i.bf16 %v12851_v55, %v12806_v51  ;;  %v1046_v13 = vadd.f32 %v1045_v59, %v12777_v14 }
 0x218   :  { %v1048_v3 = vadd.f32 %v1047_v62, %v12773_v11  ;;  %v12863_v4 = vmax.f32 %v1040_v53, %v1178_v61  ;;  %v10259_v17 = vpack.i.bf16 %v12803_v48, %v12855_v60  ;;  %v1049_v50 = vpop.f32.mrb[23].mxu0 }
 0x219   :  { %10255 = vrot.lane.b32.xlu1 %v10254_v0, %s12342_s0  ;;  %v10264_v23 = vpack.i.bf16 %v12822_v6, %v12858_v63  ;;  %v1050_v57 = vadd.f32 %v1049_v50, %v12777_v14 }
 0x21a   :  { %v1181_v9 = vpop.f32.mrb[20].mxu1  ;;  %v10269_v26 = vpack.i.bf16 %v12790_v33, %v12863_v4 }
 0x21b   :  { %v1182_v10 = vadd.f32 %v1181_v9, %v12773_v11  ;;  %v1183_v15 = vpop.f32.mrb[21].mxu1 }
 0x21c   :  { %v1184_v18 = vadd.f32 %v1183_v15, %v12777_v14  ;;  %v1185_v21 = vpop.f32.mrb[22].mxu1 }
 0x21d   :  { %v12871_v22 = vmax.f32 %v1044_v58, %v1182_v10  ;;  %10260 = vrot.lane.b32.xlu1 %v10259_v17, %s12342_s0  ;;  %v1186_v16 = vadd.f32 %v1185_v21, %v12773_v11  ;;  %v1187_v52 = vpop.f32.mrb[23].mxu1 }
 0x21e   :  { %v12877_v19 = vmax.f32 %v1046_v13, %v1184_v18  ;;  %v1188_v58 = vadd.f32 %v1187_v52, %v12777_v14 }
 0x21f   :  { %v12879_v24 = vmax.f32 %v1048_v3, %v1186_v16 }
 0x220   :  { %v12899_v59 = vmax.f32 %v1050_v57, %v1188_v58 }
 0x221   :  { %10265 = vrot.lane.b32.xlu1 %v10264_v23, %s12342_s0 }
 0x225   :  { %10270 = vrot.lane.b32.xlu1 %v10269_v26, %s12342_s0 }
 0x269   :  { %v10251_v27 = vpop.permute.xlu0 %10250 }
 0x26a   :  { %v10253_v28 = vunpack.i.h.bf16 %v10251_v27  ;;  %v10252_v20 = vunpack.i.l.bf16 %v10251_v27 }
 0x26c   :  { %v590_v32 = vmax.f32 %v12806_v51, %v10253_v28  ;;  %v591_v34 = vmax.f32 %v12809_v31, %v10253_v28  ;;  %v550_v11 = vmax.f32 %v12799_v44, %v10252_v20 }
 0x26e   :  { %v603_v37 = vmax.f32 %v591_v34, 0.0  ;;  %v12888_v38 = vmax.f32 %v550_v11, 0.0  ;;  %v602_v40 = vmax.f32 %v590_v32, 0.0 }
 0x270   :  { %v10284_v42 = vpack.i.bf16 %v603_v37, %v602_v40  ;;  %v10274_v43 = vpack.i.bf16 %v12819_v1, %v12888_v38  ;;  %v10389_v40 = vpack.i.bf16 %v12792_v35, %v12835_v29 }
 0x272   :  { %10285 = vrot.lane.b32.xlu0 %v10284_v42, %s12343_s16  ;;  %10275 = vrot.lane.b32.xlu1 %v10274_v43, %s12342_s0 }
 0x28b   :  { %v10256_v45 = vpop.permute.xlu1 %10255 }
 0x28c   :  { %v10257_v0 = vunpack.i.l.bf16 %v10256_v45 }
 0x28e   :  { %v12912_v13 = vmax.f32 %v12806_v51, %v10257_v0  ;;  %v10738_v0 = vld [vmem:[#allocation6 + $0xa04] ss:$40 sps:$4 sm:$0xff]  }
 0x28f   :  { %v10261_v46 = vpop.permute.xlu1 %10260  ;;  %7200 = vmatprep.subr.bf16.mxu0 %v10738_v0 }
 0x290   :  { %v10263_v47 = vunpack.i.h.bf16 %v10261_v46  ;;  %v10262_v17 = vunpack.i.l.bf16 %v10261_v46  ;;  %v557_v18 = vmax.f32 %v12912_v13, 0.0 }
 0x292   :  { %v589_v31 = vmax.f32 %v12803_v48, %v10263_v47  ;;  %v588_v49 = vmax.f32 %v12799_v44, %v10263_v47  ;;  %v10258_v48 = vunpack.i.h.bf16 %v10256_v45  ;;  %v1266_v51 = vmax.f32 %v12851_v55, %v10262_v17 }
 0x293   :  { %v12901_v61 = vpop.permute.xlu1 %10265  ;;  %v1267_v16 = vmax.f32 %v12855_v60, %v10262_v17  ;;  %v10399_v45 = vpack.i.bf16 %v12827_v8, %v12871_v22  ;;  %v10747_v17 = vld [vmem:[#allocation6 + $0xaf4] ss:$40 sps:$4 sm:$0xff]  }
 0x294   :  { %v601_v53 = vmax.f32 %v589_v31, 0.0  ;;  %v600_v54 = vmax.f32 %v588_v49, 0.0  ;;  %v12909_v9 = vmax.f32 %v12851_v55, %v10258_v48  ;;  %v10268_v21 = vunpack.i.h.bf16 %v12901_v61  ;;  %v10736_v48 = vld [vmem:[#allocation6 + $0xa00] ss:$40 sps:$4 sm:$0xff]  }
 0x295   :  { %v1279_v28 = vmax.f32 %v1267_v16, 0.0  ;;  %v1278_v32 = vmax.f32 %v1266_v51, 0.0  ;;  %v10267_v34 = vunpack.i.l.bf16 %v12901_v61  ;;  %7201 = vmatpush1.bf16.msra.mxu0 %v10736_v48  ;;  %v10748_v51 = vld [vmem:[#allocation6 + $0xb40] ss:$40 sps:$4 sm:$0xff]   ;;  %v10753_v16 = vld [vmem:[#allocation6 + $0xb94] ss:$40 sps:$4 sm:$0xff]  }
 0x296   :  { %v10279_v56 = vpack.i.bf16 %v601_v53, %v600_v54  ;;  %v1234_v15 = vmax.f32 %v12909_v9, 0.0  ;;  %v593_v26 = vmax.f32 %v12822_v6, %v10268_v21  ;;  %v592_v31 = vmax.f32 %v12819_v1, %v10268_v21  ;;  %v10745_v21 = vld [vmem:[#allocation6 + $0xaf0] ss:$40 sps:$4 sm:$0xff]  }
 0x297   :  { %v12903_v62 = vpop.permute.xlu1 %10270  ;;  %v10349_v6 = vpack.i.bf16 %v1279_v28, %v1278_v32  ;;  %v10364_v60 = vpack.i.bf16 %v1279_v28, %v603_v37  ;;  %v1229_v11 = vmax.f32 %v12858_v63, %v10267_v34  ;;  %v10754_v32 = vld [vmem:[#allocation6 + $0xbe0] ss:$40 sps:$4 sm:$0xff]   ;;  %v10757_v34 = vld [vmem:[#allocation6 + $0xc30] ss:$40 sps:$4 sm:$0xff]  }
 0x298   :  { %10280 = vrot.lane.b32.xlu1 %v10279_v56, %s12343_s16  ;;  %v10339_v27 = vpack.i.bf16 %v1234_v15, %v557_v18  ;;  %v605_v20 = vmax.f32 %v593_v26, 0.0  ;;  %v10273_v37 = vunpack.i.h.bf16 %v12903_v62  ;;  %v604_v52 = vmax.f32 %v592_v31, 0.0  ;;  %v10751_v26 = vld [vmem:[#allocation6 + $0xb90] ss:$40 sps:$4 sm:$0xff]   ;;  %v10765_v31 = vld [vmem:[#allocation6 + $0xcd4] ss:$40 sps:$4 sm:$0xff]  }
 0x299   :  { %v12952_v42 = vmax.f32 %v1229_v11, 0.0  ;;  %v10272_v54 = vunpack.i.l.bf16 %v12903_v62 }
 0x29a   :  { %v10309_v55 = vpack.i.bf16 %v605_v20, %v601_v53  ;;  %v549_v43 = vmax.f32 %v12790_v33, %v10273_v37  ;;  %v10404_v53 = vpack.i.bf16 %v605_v20, %v604_v52  ;;  %v10756_v20 = vld [vmem:[#allocation6 + $0xbe4] ss:$40 sps:$4 sm:$0xff]  }
 0x29b   :  { %v10414_v47 = vpack.i.bf16 %v12825_v12, %v12952_v42  ;;  %v1268_v56 = vmax.f32 %v12858_v63, %v10272_v54  ;;  %v12980_v57 = vmax.f32 %v12863_v4, %v10272_v54  ;;  %v10739_v63 = vld [vmem:[#allocation6 + $0xa50] ss:$40 sps:$4 sm:$0xff]   ;;  %v10744_v4 = vld [vmem:[#allocation6 + $0xaa4] ss:$40 sps:$4 sm:$0xff]   ;;  %v10766_v54 = vld [vmem:[#allocation6 + $0xd20] ss:$40 sps:$4 sm:$0xff]  }
 0x29c   :  { %v12959_v46 = vmax.f32 %v549_v43, 0.0  ;;  %v10760_v43 = vld [vmem:[#allocation6 + $0xc80] ss:$40 sps:$4 sm:$0xff]  }
 0x29d   :  { %v1281_v58 = vmax.f32 %v12980_v57, 0.0  ;;  %v1280_v61 = vmax.f32 %v1268_v56, 0.0 }
 0x29e   :  { %v10429_v49 = vpack.i.bf16 %v12959_v46, %v12952_v42 }
 0x29f   :  { %v10434_v62 = vpack.i.bf16 %v1281_v58, %v1280_v61  ;;  %v10771_v61 = vld [vmem:[#allocation6 + $0xd74] ss:$40 sps:$4 sm:$0xff]  }
 0x2e4   :  { %v12905_v44 = vpop.permute.xlu1 %10275 }
 0x2e5   :  { %v10278_v3 = vunpack.i.h.bf16 %v12905_v44 }
 0x2e7   :  { %v552_v14 = vmax.f32 %v12819_v1, %v10278_v3  ;;  %v10409_v1 = vpack.i.bf16 %v12783_v25, %v12877_v19  ;;  %v10741_v3 = vld [vmem:[#allocation6 + $0xa54] ss:$40 sps:$4 sm:$0xff]  }
 0x2e8   :  { %7202 = vmatprep.subr.bf16.mxu0 %v10741_v3  ;;  %v10774_v3 = vld [vmem:[#allocation6 + $0xdc4] ss:$40 sps:$4 sm:$0xff]  }
 0x2e9   :  { %v12915_v10 = vmax.f32 %v552_v14, 0.0  ;;  %7203 = vmatpush1.bf16.msra.mxu0 %v10739_v63  ;;  %v10742_v14 = vld [vmem:[#allocation6 + $0xaa0] ss:$40 sps:$4 sm:$0xff]   ;;  %v10277_v63 = vunpack.i.l.bf16 %v12905_v44 }
 0x2ea   :  { %7204 = vmatprep.subr.bf16.mxu0 %v10744_v4  ;;  %v10772_v4 = vld [vmem:[#allocation6 + $0xdc0] ss:$40 sps:$4 sm:$0xff]  }
 0x2eb   :  { %v10294_v23 = vpack.i.bf16 %v12915_v10, %v12888_v38  ;;  %v10394_v50 = vpack.i.bf16 %v12915_v10, %v12838_v36 }
 0x2ed   :  { %10295 = vrot.lane.b32.xlu0 %v10294_v23, %s12344_s19  ;;  %10290 = vrot.lane.b32.xlu1 %v10294_v23, %s12345_s20 }
 0x2ee   :  { %7205 = vmatpush1.bf16.msra.mxu0 %v10742_v14 }
 0x2ef   :  { %7206 = vmatprep.subr.bf16.mxu0 %v10747_v17 }
 0x2f1   :  { %10300 = vrot.lane.b32.xlu0 %v10294_v23, %s12346_s21  ;;  %10340 = vrot.lane.b32.xlu1 %v10339_v27, %s12346_s21 }
 0x2f2   :  { %7207 = vmatpush1.bf16.msra.mxu0 %v10745_v21 }
 0x2f5   :  { %10305 = vrot.lane.b32.xlu0 %v10294_v23, %s12347_s4  ;;  %10345 = vrot.lane.b32.xlu1 %v10339_v27, %s12347_s4  ;;  %v10750_v23 = vld [vmem:[#allocation6 + $0xb44] ss:$40 sps:$4 sm:$0xff]  }
 0x2f6   :  { %7208 = vmatprep.subr.bf16.mxu0 %v10750_v23 }
 0x2f7   :  { %7209 = vmatpush1.bf16.msra.mxu0 %v10748_v51 }
 0x2f8   :  { %7210 = vmatprep.subr.bf16.mxu0 %v10753_v16  ;;  %v846_v16 = vsel %vm843_vm6, %v12888_v38, %v10277_v63 }
 0x2f9   :  { %10310 = vrot.lane.b32.xlu0 %v10309_v55, %s12348_s8  ;;  %10350 = vrot.lane.b32.xlu1 %v10349_v6, %s12343_s16 }
 0x2fb   :  { %7211 = vmatpush1.bf16.msra.mxu0 %v10751_v26 }
 0x2fc   :  { %7212 = vmatprep.subr.bf16.mxu0 %v10756_v20 }
 0x2fd   :  { %10315 = vrot.lane.b32.xlu0 %v10309_v55, %s12349_s22  ;;  %10365 = vrot.lane.b32.xlu1 %v10364_v60, %s12349_s22 }
 0x2ff   :  { %7213 = vmatpush1.bf16.msra.mxu0 %v10754_v32 }
 0x301   :  { %10320 = vrot.lane.b32.xlu0 %v10309_v55, %s12350_s12  ;;  %10370 = vrot.lane.b32.xlu1 %v10364_v60, %s12350_s12 }
 0x305   :  { %10325 = vrot.lane.b32.xlu0 %v10339_v27, %s12342_s0  ;;  %10375 = vrot.lane.b32.xlu1 %v10364_v60, %s12339_s10 }
 0x309   :  { %10330 = vrot.lane.b32.xlu0 %v10339_v27, %s12345_s20  ;;  %10380 = vrot.lane.b32.xlu1 %v10364_v60, %s12351_s23 }
 0x30a   :  { %v12990_v28 = vpop.permute.xlu1 %10280 }
 0x30d   :  { %10335 = vrot.lane.b32.xlu0 %v10339_v27, %s12344_s19  ;;  %10390 = vrot.lane.b32.xlu1 %v10389_v40, %s12342_s0  ;;  %v12988_v27 = vpop.permute.xlu0 %10285  ;;  %v10762_v40 = vld [vmem:[#allocation6 + $0xc84] ss:$40 sps:$4 sm:$0xff]  }
 0x30e   :  { %v10288_v23 = vunpack.i.h.bf16 %v12988_v27  ;;  %v10287_v51 = vunpack.i.l.bf16 %v12988_v27 }
 0x310   :  { %v744_v27 = vsel %vm740_vm8, %v10287_v51, %v10288_v23 }
 0x311   :  { %10355 = vrot.lane.b32.xlu0 %v10364_v60, %s12348_s8  ;;  %10400 = vrot.lane.b32.xlu1 %v10399_v45, %s12342_s0  ;;  %v10759_v60 = vld [vmem:[#allocation6 + $0xc34] ss:$40 sps:$4 sm:$0xff]  }
 0x312   :  { %7214 = vmatprep.subr.bf16.mxu0 %v10759_v60 }
 0x313   :  { %7215 = vmatpush1.bf16.msra.mxu0 %v10757_v34  ;;  %v10775_v34 = vld [vmem:[#allocation6 + $0xe10] ss:$40 sps:$4 sm:$0xff]  }
 0x314   :  { %7216 = vmatprep.subr.bf16.mxu0 %v10762_v40  ;;  %v10777_v40 = vld [vmem:[#allocation6 + $0xe14] ss:$40 sps:$4 sm:$0xff]  }
 0x315   :  { %10360 = vrot.lane.b32.xlu0 %v10309_v55, %s12339_s10  ;;  %10415 = vrot.lane.b32.xlu1 %v10414_v47, %s12342_s0 }
 0x317   :  { %7217 = vmatpush1.bf16.msra.mxu0 %v10760_v43 }
 0x318   :  { %7218 = vmatprep.subr.bf16.mxu0 %v10765_v31 }
 0x319   :  { %10385 = vrot.lane.b32.xlu0 %v10309_v55, %s12351_s23  ;;  %10430 = vrot.lane.b32.xlu1 %v10429_v49, %s12347_s4 }
 0x31d   :  { %10395 = vrot.lane.b32.xlu0 %v10394_v50, %s12342_s0 }
 0x321   :  { %10405 = vrot.lane.b32.xlu0 %v10404_v53, %s12343_s16  ;;  %v10768_v53 = vld [vmem:[#allocation6 + $0xd24] ss:$40 sps:$4 sm:$0xff]  }
 0x325   :  { %10410 = vrot.lane.b32.xlu0 %v10409_v1, %s12342_s0 }
 0x329   :  { %10420 = vrot.lane.b32.xlu0 %v10429_v49, %s12345_s20 }
 0x32d   :  { %10425 = vrot.lane.b32.xlu0 %v10429_v49, %s12344_s19  ;;  %v10763_v49 = vld [vmem:[#allocation6 + $0xcd0] ss:$40 sps:$4 sm:$0xff]  }
 0x32e   :  { %7219 = vmatpush1.bf16.msra.mxu0 %v10763_v49  ;;  %v10283_v49 = vunpack.i.h.bf16 %v12990_v28 }
 0x32f   :  { %7220 = vmatprep.subr.bf16.mxu0 %v10768_v53  ;;  %v10282_v53 = vunpack.i.l.bf16 %v12990_v28 }
 0x331   :  { %10435 = vrot.lane.b32.xlu0 %v10434_v62, %s12343_s16  ;;  %v10769_v62 = vld [vmem:[#allocation6 + $0xd70] ss:$40 sps:$4 sm:$0xff]  }
 0x332   :  { %7221 = vmatpush1.bf16.msra.mxu0 %v10766_v54 }
 0x333   :  { %7222 = vmatprep.subr.bf16.mxu0 %v10771_v61 }
 0x336   :  { %7223 = vmatpush1.bf16.msra.mxu0 %v10769_v62 }
 0x337   :  { %7224 = vmatprep.subr.bf16.mxu0 %v10774_v3 }
 0x33a   :  { %7225 = vmatpush1.bf16.msra.mxu0 %v10772_v4 }
 0x33b   :  { %7226 = vmatprep.subr.bf16.mxu0 %v10777_v40 }
 0x33e   :  { %7227 = vmatpush1.bf16.msra.mxu0 %v10775_v34 }
 0x35f   :  { %v12992_v55 = vpop.permute.xlu0 %10295  ;;  %v12994_v6 = vpop.permute.xlu1 %10290 }
 0x360   :  { %v10292_v14 = vunpack.i.l.bf16 %v12994_v6  ;;  %v10297_v44 = vunpack.i.l.bf16 %v12992_v55 }
 0x362   :  { %v853_v26 = vsel %vm850_vm7, %v846_v16, %v10292_v14 }
 0x363   :  { %v12996_v11 = vpop.permute.xlu0 %10300  ;;  %v12998_v37 = vpop.permute.xlu1 %10340  ;;  %v860_v61 = vsel %vm857_vm9, %v853_v26, %v10297_v44  ;;  %v10778_v26 = vld [vmem:[#allocation6 + $0xe60] ss:$40 sps:$4 sm:$0xff]  }
 0x364   :  { %v10302_v54 = vunpack.i.l.bf16 %v12996_v11  ;;  %v10343_v62 = vunpack.i.h.bf16 %v12998_v37  ;;  %v10342_v3 = vunpack.i.l.bf16 %v12998_v37 }
 0x366   :  { %v867_v13 = vsel %vm864_vm10, %v860_v61, %v10302_v54 }
 0x367   :  { %v13000_v45 = vpop.permute.xlu0 %10305  ;;  %v13002_v47 = vpop.permute.xlu1 %10345 }
 0x368   :  { %v10307_v63 = vunpack.i.l.bf16 %v13000_v45  ;;  %v10347_v40 = vunpack.i.l.bf16 %v13002_v47 }
 0x36a   :  { %v874_v54 = vsel %vm871_vm11, %v867_v13, %v10307_v63 }
 0x36b   :  { %v13004_v50 = vpop.permute.xlu0 %10310  ;;  %v13006_v52 = vpop.permute.xlu1 %10350 }
 0x36c   :  { %v10353_v37 = vunpack.i.h.bf16 %v13006_v52  ;;  %v10352_v44 = vunpack.i.l.bf16 %v13006_v52  ;;  %v10348_v52 = vunpack.i.h.bf16 %v13002_v47 }
 0x36f   :  { %v13008_v1 = vpop.permute.xlu0 %10315  ;;  %v13010_v56 = vpop.permute.xlu1 %10365 }
 0x373   :  { %v13012_v48 = vpop.permute.xlu0 %10320  ;;  %v13014_v0 = vpop.permute.xlu1 %10370 }
 0x374   :  { %v10373_v13 = vunpack.i.h.bf16 %v13014_v0 }
 0x377   :  { %v10326_v17 = vpop.permute.xlu0 %10325  ;;  %v13018_v21 = vpop.permute.xlu1 %10375 }
 0x378   :  { %v10328_v20 = vunpack.i.h.bf16 %v10326_v17  ;;  %v10327_v43 = vunpack.i.l.bf16 %v10326_v17 }
 0x37a   :  { %v1522_v4 = vsel %vm843_vm6, %v1234_v15, %v10328_v20  ;;  %v847_v28 = vsel %vm843_vm6, %v557_v18, %v10327_v43  ;;  %v10780_v20 = vld [vmem:[#allocation6 + $0xe64] ss:$40 sps:$4 sm:$0xff]  }
 0x37b   :  { %v10331_v32 = vpop.permute.xlu0 %10330  ;;  %v13026_v60 = vpop.permute.xlu1 %10380  ;;  %7228 = vmatprep.subr.bf16.mxu0 %v10780_v20  ;;  %v10367_v20 = vunpack.i.l.bf16 %v13010_v56 }
 0x37c   :  { %v10333_v31 = vunpack.i.h.bf16 %v10331_v32  ;;  %v10332_v38 = vunpack.i.l.bf16 %v10331_v32  ;;  %7229 = vmatpush1.bf16.msra.mxu0 %v10778_v26 }
 0x37e   :  { %v854_v9 = vsel %vm850_vm7, %v847_v28, %v10332_v38  ;;  %v1528_v15 = vsel %vm850_vm7, %v1522_v4, %v10333_v31  ;;  %v1420_v28 = vsel %vm740_vm8, %v10352_v44, %v10353_v37 }
 0x37f   :  { %v10336_v14 = vpop.permute.xlu0 %10335  ;;  %v13039_v17 = vpop.permute.xlu1 %10390 }
 0x380   :  { %v10338_v23 = vunpack.i.h.bf16 %v10336_v14  ;;  %v10337_v51 = vunpack.i.l.bf16 %v10336_v14  ;;  %v10393_v16 = vunpack.i.h.bf16 %v13039_v17 }
 0x382   :  { %v861_v18 = vsel %vm857_vm9, %v854_v9, %v10337_v51  ;;  %v1534_v32 = vsel %vm857_vm9, %v1528_v15, %v10338_v23  ;;  %v13055_v34 = vmax.f32 %v12792_v35, %v10393_v16  ;;  %v10312_v35 = vunpack.i.l.bf16 %v13004_v50 }
 0x383   :  { %v868_v43 = vsel %vm864_vm10, %v861_v18, %v10342_v3  ;;  %v1540_v31 = vsel %vm864_vm10, %v1534_v32, %v10343_v62  ;;  %v10356_v38 = vpop.permute.xlu0 %10355  ;;  %v10368_v3 = vunpack.i.h.bf16 %v13010_v56  ;;  %v743_v9 = vsel %vm740_vm8, %v10282_v53, %v10283_v49  ;;  %v13084_v18 = vpop.permute.xlu1 %10400  ;;  %v10783_v56 = vld [vmem:[#allocation6 + $0xeb4] ss:$40 sps:$4 sm:$0xff]  }
 0x384   :  { %v599_v61 = vmax.f32 %v13055_v34, 0.0  ;;  %v10358_v4 = vunpack.i.h.bf16 %v10356_v38  ;;  %v10357_v14 = vunpack.i.l.bf16 %v10356_v38  ;;  %v875_v23 = vsel %vm871_vm11, %v868_v43, %v10347_v40  ;;  %7230 = vmatprep.subr.bf16.mxu0 %v10783_v56 }
 0x385   :  { %v1546_v47 = vsel %vm871_vm11, %v1540_v31, %v10348_v52  ;;  %v882_v62 = vsel %vm878_vm12, %v875_v23, %v744_v27  ;;  %v10317_v15 = vunpack.i.l.bf16 %v13008_v1  ;;  %v10322_v27 = vunpack.i.l.bf16 %v13012_v48  ;;  %v10781_v52 = vld [vmem:[#allocation6 + $0xeb0] ss:$40 sps:$4 sm:$0xff]  }
 0x386   :  { %v1552_v51 = vsel %vm878_vm12, %v1546_v47, %v1420_v28  ;;  %v10439_v63 = vpack.i.bf16 %v599_v61, %v1281_v58  ;;  %v889_v37 = vsel %vm885_vm13, %v882_v62, %v10357_v14  ;;  %v881_v58 = vsel %vm878_vm12, %v874_v54, %v743_v9  ;;  %7231 = vmatpush1.bf16.msra.mxu0 %v10781_v52 }
 0x387   :  { %v1558_v44 = vsel %vm885_vm13, %v1552_v51, %v10358_v4  ;;  %v13078_v26 = vpop.permute.xlu0 %10360  ;;  %v10372_v49 = vunpack.i.l.bf16 %v13014_v0  ;;  %v10378_v53 = vunpack.i.h.bf16 %v13018_v21  ;;  %v888_v40 = vsel %vm885_vm13, %v881_v58, %v10312_v35  ;;  %v13106_v62 = vpop.permute.xlu1 %10415 }
 0x388   :  { %v1564_v57 = vsel %vm892_vm14, %v1558_v44, %v10368_v3  ;;  %10440 = vrot.lane.b32.xlu1 %v10439_v63, %s12348_s8  ;;  %v10362_v32 = vunpack.i.l.bf16 %v13078_v26  ;;  %v896_v43 = vsel %vm892_vm14, %v889_v37, %v10367_v20  ;;  %v895_v38 = vsel %vm892_vm14, %v888_v40, %v10317_v15 }
 0x389   :  { %v1570_v31 = vsel %vm899_vm0, %v1564_v57, %v10373_v13  ;;  %v10377_v4 = vunpack.i.l.bf16 %v13018_v21  ;;  %v903_v0 = vsel %vm899_vm0, %v896_v43, %v10372_v49  ;;  %v10383_v28 = vunpack.i.h.bf16 %v13026_v60 }
 0x38a   :  { %v1576_v14 = vsel %vm906_vm15, %v1570_v31, %v10378_v53  ;;  %v10382_v35 = vunpack.i.l.bf16 %v13026_v60  ;;  %v902_v47 = vsel %vm899_vm0, %v895_v38, %v10322_v27  ;;  %v10392_v60 = vunpack.i.l.bf16 %v13039_v17 }
 0x38b   :  { %v13096_v54 = vpop.permute.xlu0 %10385  ;;  %v910_v3 = vsel %vm906_vm15, %v903_v0, %v10377_v4  ;;  %v909_v21 = vsel %vm906_vm15, %v902_v47, %v10362_v32  ;;  %v1582_v15 = vsel %vm913_vm3, %v1576_v14, %v10383_v28  ;;  %v10418_v37 = vunpack.i.h.bf16 %v13106_v62 }
 0x38c   :  { %v10387_v23 = vunpack.i.l.bf16 %v13096_v54  ;;  %v917_v51 = vsel %vm913_vm3, %v910_v3, %v10382_v35  ;;  %v10444_v44 = vpack.i.bf16 %v1582_v15, %v12952_v42  ;;  %v1226_v20 = vmax.f32 %v12835_v29, %v10392_v60 }
 0x38d   :  { %1607 = vrot.lane.b32.xlu1 %v917_v51, %s12352_s25  ;;  %v553_v27 = vmax.f32 %v12825_v12, %v10418_v37  ;;  %v586_v57 = vmax.f32 %v12790_v33, %v10393_v16  ;;  %v10474_v58 = vpack.i.bf16 %v12841_v39, %v12787_v30  ;;  %v10403_v16 = vunpack.i.h.bf16 %v13084_v18 }
 0x38e   :  { %v916_v9 = vsel %vm913_vm3, %v909_v21, %v10387_v23  ;;  %v13126_v49 = vmax.f32 %v1226_v20, 0.0  ;;  %v10293_v34 = vunpack.i.h.bf16 %v12994_v6  ;;  %v10298_v47 = vunpack.i.h.bf16 %v12992_v55 }
 0x38f   :  { %1599 = vrot.lane.b32.xlu0 %v916_v9, %s12353_s26  ;;  %v10396_v13 = vpop.permute.xlu0 %10395  ;;  %v13128_v53 = vmax.f32 %v553_v27, 0.0  ;;  %v598_v52 = vmax.f32 %v586_v57, 0.0  ;;  %v10509_v21 = vpack.i.bf16 %v12843_v41, %v12879_v24  ;;  %v10303_v6 = vunpack.i.h.bf16 %v12996_v11 }
 0x390   :  { %v10397_v32 = vunpack.i.l.bf16 %v10396_v13  ;;  %v10469_v33 = vpack.i.bf16 %v13126_v49, %v12959_v46  ;;  %v10398_v38 = vunpack.i.h.bf16 %v10396_v13  ;;  %v10308_v60 = vunpack.i.h.bf16 %v13000_v45 }
 0x391   :  { %10445 = vrot.lane.b32.xlu1 %v10444_v44, %s12346_s21  ;;  %v10484_v17 = vpack.i.bf16 %v13128_v53, %v13126_v49  ;;  %v594_v11 = vmax.f32 %v12825_v12, %v10403_v16  ;;  %v10529_v13 = vpack.i.bf16 %v13128_v53, %v12899_v59 }
 0x392   :  { %v1262_v56 = vmax.f32 %v12835_v29, %v10397_v32  ;;  %v1263_v40 = vmax.f32 %v12838_v36, %v10397_v32  ;;  %v10494_v29 = vpack.i.bf16 %v599_v61, %v598_v52  ;;  %v595_v36 = vmax.f32 %v12827_v8, %v10403_v16 }
 0x393   :  { %10455 = vrot.lane.b32.xlu0 %v10439_v63, %s12350_s12  ;;  %v848_v28 = vsel %vm843_vm6, %v12915_v10, %v10398_v38  ;;  %v10402_v8 = vunpack.i.l.bf16 %v13084_v18  ;;  %v606_v12 = vmax.f32 %v594_v11, 0.0  ;;  %v10807_v38 = vld [vmem:[#allocation6 + $0x4] ss:$40 sps:$4 sm:$0xff]  }
 0x394   :  { %v1274_v43 = vmax.f32 %v1262_v56, 0.0  ;;  %v1275_v31 = vmax.f32 %v1263_v40, 0.0  ;;  %v607_v14 = vmax.f32 %v595_v36, 0.0  ;;  %v855_v23 = vsel %vm850_vm7, %v848_v28, %v10293_v34  ;;  %v10805_v36 = vld [vmem:[#allocation6] ss:$40 sps:$4 sm:$0xff]   ;;  %7118 = vmatprep.subr.bf16.mxu1 %v10807_v38 }
 0x395   :  { %10450 = vrot.lane.b32.xlu1 %v10439_v63, %s12349_s22  ;;  %v862_v10 = vsel %vm857_vm9, %v855_v23, %v10298_v47  ;;  %v1230_v51 = vmax.f32 %v12871_v22, %v10402_v8  ;;  %v10318_v40 = vunpack.i.h.bf16 %v13008_v1  ;;  %7119 = vmatpush1.bf16.msra.mxu1 %v10805_v36  ;;  %v10817_v28 = vld [vmem:[#allocation6 + $0xa0] ss:$40 sps:$4 sm:$0xff]   ;;  %v10823_v34 = vld [vmem:[#allocation6 + $0xf0] ss:$40 sps:$4 sm:$0xff]   ;;  %v10837_v8 = vld [vmem:[#allocation6 + $0x194] ss:$40 sps:$4 sm:$0xff]  }
 0x396   :  { %v10504_v4 = vpack.i.bf16 %v1275_v31, %v1274_v43  ;;  %v10514_v35 = vpack.i.bf16 %v607_v14, %v1275_v31  ;;  %v869_v15 = vsel %vm864_vm10, %v862_v10, %v10303_v6  ;;  %v10835_v23 = vld [vmem:[#allocation6 + $0x190] ss:$40 sps:$4 sm:$0xff]   ;;  %v10843_v47 = vld [vmem:[#allocation6 + $0x1e4] ss:$40 sps:$4 sm:$0xff]   ;;  %v13209_v10 = vpop.permute.xlu1 %10430 }
 0x397   :  { %10465 = vrot.lane.b32.xlu0 %v10439_v63, %s12351_s23  ;;  %v13168_v37 = vmax.f32 %v1230_v51, 0.0  ;;  %v876_v20 = vsel %vm871_vm11, %v869_v15, %v10308_v60 }
 0x399   :  { %10460 = vrot.lane.b32.xlu1 %v10439_v63, %s12339_s10  ;;  %v10406_v63 = vpop.permute.xlu0 %10405  ;;  %v10559_v1 = vpack.i.bf16 %v13168_v37, %v13128_v53 }
 0x39a   :  { %v10408_v18 = vunpack.i.h.bf16 %v10406_v63  ;;  %v10407_v9 = vunpack.i.l.bf16 %v10406_v63 }
 0x39b   :  { %10475 = vrot.lane.b32.xlu0 %v10474_v58, %s12342_s0  ;;  %v10313_v58 = vunpack.i.h.bf16 %v13004_v50  ;;  %v10323_v50 = vunpack.i.h.bf16 %v13012_v48  ;;  %v10388_v48 = vunpack.i.h.bf16 %v13096_v54  ;;  %v10825_v54 = vld [vmem:[#allocation6 + $0xf4] ss:$40 sps:$4 sm:$0xff]  }
 0x39c   :  { %v745_v44 = vsel %vm740_vm8, %v10407_v9, %v10408_v18  ;;  %v10417_v9 = vunpack.i.l.bf16 %v13106_v62  ;;  %v10432_v62 = vunpack.i.l.bf16 %v13209_v10 }
 0x39d   :  { %10470 = vrot.lane.b32.xlu1 %v10469_v33, %s12342_s0  ;;  %v10411_v0 = vpop.permute.xlu0 %10410  ;;  %v883_v45 = vsel %vm878_vm12, %v876_v20, %v745_v44 }
 0x39e   :  { %v10413_v61 = vunpack.i.h.bf16 %v10411_v0  ;;  %v10412_v27 = vunpack.i.l.bf16 %v10411_v0  ;;  %v890_v56 = vsel %vm885_vm13, %v883_v45, %v10313_v58  ;;  %v10811_v0 = vld [vmem:[#allocation6 + $0x50] ss:$40 sps:$4 sm:$0xff]   ;;  %v1523_v20 = vsel %vm843_vm6, %v12952_v42, %v10417_v9 }
 0x39f   :  { %10485 = vrot.lane.b32.xlu0 %v10484_v17, %s12344_s19  ;;  %v897_v63 = vsel %vm892_vm14, %v890_v56, %v10318_v40 }
 0x3a0   :  { %v548_v3 = vmax.f32 %v12783_v25, %v10413_v61  ;;  %v1270_v32 = vmax.f32 %v12871_v22, %v10412_v27  ;;  %v1271_v52 = vmax.f32 %v12877_v19, %v10412_v27  ;;  %v904_v22 = vsel %vm899_vm0, %v897_v63, %v10323_v50  ;;  %v10831_v61 = vld [vmem:[#allocation6 + $0x144] ss:$40 sps:$4 sm:$0xff]  }
 0x3a1   :  { %10480 = vrot.lane.b32.xlu1 %v10484_v17, %s12345_s20  ;;  %v10363_v19 = vunpack.i.h.bf16 %v13078_v26  ;;  %v10786_v26 = vld [vmem:[#allocation6 + $0xf04] ss:$40 sps:$4 sm:$0xff]  }
 0x3a2   :  { %v13165_v55 = vmax.f32 %v548_v3, 0.0  ;;  %v13189_v16 = vmax.f32 %v1271_v52, 0.0  ;;  %7241 = vmatprep.subr.bf16.mxu0 %v10786_v26  ;;  %v10841_v3 = vld [vmem:[#allocation6 + $0x1e0] ss:$40 sps:$4 sm:$0xff]  }
 0x3a3   :  { %10495 = vrot.lane.b32.xlu0 %v10494_v29, %s12343_s16  ;;  %v911_v31 = vsel %vm906_vm15, %v904_v22, %v10363_v19  ;;  %v10784_v19 = vld [vmem:[#allocation6 + $0xf00] ss:$40 sps:$4 sm:$0xff]  }
 0x3a4   :  { %v10544_v57 = vpack.i.bf16 %v13165_v55, %v13168_v37  ;;  %v918_v29 = vsel %vm913_vm3, %v911_v31, %v10388_v48  ;;  %v10847_v48 = vld [vmem:[#allocation6 + $0x230] ss:$40 sps:$4 sm:$0xff]  }
 0x3a5   :  { %10490 = vrot.lane.b32.xlu1 %v10469_v33, %s12346_s21  ;;  %v10564_v33 = vpack.i.bf16 %v607_v14, %v606_v12  ;;  %v10819_v14 = vld [vmem:[#allocation6 + $0xa4] ss:$40 sps:$4 sm:$0xff]  }
 0x3a7   :  { %10505 = vrot.lane.b32.xlu0 %v10504_v4, %s12343_s16  ;;  %v10813_v4 = vld [vmem:[#allocation6 + $0x54] ss:$40 sps:$4 sm:$0xff]  }
 0x3a8   :  { %7120 = vmatprep.subr.bf16.mxu1 %v10813_v4  ;;  %v10787_v4 = vld [vmem:[#allocation6 + $0xf50] ss:$40 sps:$4 sm:$0xff]  }
 0x3a9   :  { %10500 = vrot.lane.b32.xlu1 %v10484_v17, %s12347_s4  ;;  %v1282_v17 = vmax.f32 %v1270_v32, 0.0  ;;  %7121 = vmatpush1.bf16.msra.mxu1 %v10811_v0 }
 0x3aa   :  { %7122 = vmatprep.subr.bf16.mxu1 %v10819_v14 }
 0x3ab   :  { %10515 = vrot.lane.b32.xlu0 %v10514_v35, %s12348_s8  ;;  %v10574_v43 = vpack.i.bf16 %v13189_v16, %v1282_v17 }
 0x3ad   :  { %10510 = vrot.lane.b32.xlu1 %v10509_v21, %s12342_s0  ;;  %7123 = vmatpush1.bf16.msra.mxu1 %v10817_v28  ;;  %v13207_v21 = vpop.permute.xlu0 %10420  ;;  %v10792_v28 = vld [vmem:[#allocation6 + $0xfa4] ss:$40 sps:$4 sm:$0xff]  }
 0x3ae   :  { %7124 = vmatprep.subr.bf16.mxu1 %v10825_v54  ;;  %v10422_v11 = vunpack.i.l.bf16 %v13207_v21  ;;  %v10855_v54 = vld [vmem:[#allocation6 + $0x284] ss:$40 sps:$4 sm:$0xff]  }
 0x3af   :  { %10525 = vrot.lane.b32.xlu0 %v10514_v35, %s12350_s12 }
 0x3b1   :  { %10520 = vrot.lane.b32.xlu1 %v10514_v35, %s12349_s22  ;;  %7125 = vmatpush1.bf16.msra.mxu1 %v10823_v34  ;;  %v13211_v6 = vpop.permute.xlu0 %10425 }
 0x3b2   :  { %7126 = vmatprep.subr.bf16.mxu1 %v10831_v61  ;;  %v10427_v44 = vunpack.i.l.bf16 %v13211_v6  ;;  %v10853_v61 = vld [vmem:[#allocation6 + $0x280] ss:$40 sps:$4 sm:$0xff]  }
 0x3b3   :  { %10535 = vrot.lane.b32.xlu0 %v10514_v35, %s12339_s10 }
 0x3b5   :  { %10530 = vrot.lane.b32.xlu1 %v10529_v13, %s12342_s0  ;;  %v10436_v18 = vpop.permute.xlu0 %10435 }
 0x3b6   :  { %v10438_v32 = vunpack.i.h.bf16 %v10436_v18  ;;  %v10437_v52 = vunpack.i.l.bf16 %v10436_v18 }
 0x3b7   :  { %10545 = vrot.lane.b32.xlu0 %v10544_v57, %s12342_s0 }
 0x3b9   :  { %10540 = vrot.lane.b32.xlu1 %v10514_v35, %s12351_s23  ;;  %v10829_v35 = vld [vmem:[#allocation6 + $0x140] ss:$40 sps:$4 sm:$0xff]  }
 0x3ba   :  { %7127 = vmatpush1.bf16.msra.mxu1 %v10829_v35 }
 0x3bb   :  { %10555 = vrot.lane.b32.xlu0 %v10544_v57, %s12344_s19  ;;  %7128 = vmatprep.subr.bf16.mxu1 %v10837_v8 }
 0x3bd   :  { %10550 = vrot.lane.b32.xlu1 %v10544_v57, %s12345_s20 }
 0x3be   :  { %7129 = vmatpush1.bf16.msra.mxu1 %v10835_v23 }
 0x3bf   :  { %10565 = vrot.lane.b32.xlu0 %v10564_v33, %s12343_s16  ;;  %7130 = vmatprep.subr.bf16.mxu1 %v10843_v47 }
 0x3c1   :  { %10560 = vrot.lane.b32.xlu1 %v10559_v1, %s12346_s21  ;;  %v10789_v1 = vld [vmem:[#allocation6 + $0xf54] ss:$40 sps:$4 sm:$0xff]  }
 0x3c2   :  { %7131 = vmatpush1.bf16.msra.mxu1 %v10841_v3  ;;  %v10790_v3 = vld [vmem:[#allocation6 + $0xfa0] ss:$40 sps:$4 sm:$0xff]  }
 0x3c3   :  { %10575 = vrot.lane.b32.xlu0 %v10574_v43, %s12343_s16  ;;  %v1421_v43 = vsel %vm740_vm8, %v10437_v52, %v10438_v32  ;;  %v10793_v52 = vld [vmem:[#allocation6 + $0xff0] ss:$40 sps:$4 sm:$0xff]  }
 0x3c5   :  { %10570 = vrot.lane.b32.xlu1 %v10544_v57, %s12347_s4  ;;  %v1529_v57 = vsel %vm850_vm7, %v1523_v20, %v10422_v11  ;;  %v10795_v20 = vld [vmem:[#allocation6 + $0xff4] ss:$40 sps:$4 sm:$0xff]  }
 0x3c6   :  { %v1535_v12 = vsel %vm857_vm9, %v1529_v57, %v10427_v44 }
 0x3c7   :  { %1615 = vrot.lane.b32.xlu0 %v918_v29, %s12331_s3  ;;  %v10849_v29 = vld [vmem:[#allocation6 + $0x234] ss:$40 sps:$4 sm:$0xff]   ;;  %s12354_s3 = smov 120  }
 0x3c8   :  { %7132 = vmatprep.subr.bf16.mxu1 %v10849_v29 }
 0x3c9   :  { %7133 = vmatpush1.bf16.msra.mxu1 %v10847_v48 }
 0x3ca   :  { %7134 = vmatprep.subr.bf16.mxu1 %v10855_v54 }
 0x3cd   :  { %7135 = vmatpush1.bf16.msra.mxu1 %v10853_v61  ;;  %v10867_v61 = vld [vmem:[#allocation6 + $0x374] ss:$40 sps:$4 sm:$0xff]  }
 0x3fa   :  { %v13213_v51 = vpop.permute.xlu1 %10440 }
 0x3fb   :  { %v10442_v26 = vunpack.i.l.bf16 %v13213_v51 }
 0x3ff   :  { %v13216_v15 = vpop.permute.xlu1 %1607 }
 0x401   :  { %v13218_v60 = vpop.permute.xlu0 %1599 }
 0x403   :  { %v10446_v27 = vpop.permute.xlu1 %10445 }
 0x404   :  { %v10448_v45 = vunpack.i.h.bf16 %v10446_v27  ;;  %v10447_v58 = vunpack.i.l.bf16 %v10446_v27 }
 0x405   :  { %v13224_v13 = vpop.permute.xlu0 %10455 }
 0x406   :  { %v1639_v56 = vsel %vm892_vm14, %v10448_v45, %v13216_v15  ;;  %v1541_v40 = vsel %vm864_vm10, %v1535_v12, %v10447_v58  ;;  %v1638_v42 = vsel %vm1637_vm4, %v13218_v60, %v10448_v45  ;;  %v10457_v44 = vunpack.i.l.bf16 %v13224_v13  ;;  %v10859_v45 = vld [vmem:[#allocation6 + $0x2d0] ss:$40 sps:$4 sm:$0xff]   ;;  %v10861_v58 = vld [vmem:[#allocation6 + $0x2d4] ss:$40 sps:$4 sm:$0xff]  }
 0x407   :  { %v13233_v33 = vpack.c.bf16 %v1639_v56, %v1639_v56  ;;  %v1547_v17 = vsel %vm871_vm11, %v1541_v40, %v10432_v62  ;;  %v13236_v63 = vpack.c.bf16 %v1638_v42, %v1638_v42  ;;  %v13238_v50 = vpop.permute.xlu1 %10450  ;;  %v10864_v56 = vld [vmem:[#allocation6 + $0x324] ss:$40 sps:$4 sm:$0xff]   ;;  %7136 = vmatprep.subr.bf16.mxu1 %v10861_v58  ;;  %vm1640_vm4 = vcmask 588800  }
 0x408   :  { %v1553_v31 = vsel %vm878_vm12, %v1547_v17, %v1421_v43  ;;  %v10452_v0 = vunpack.i.l.bf16 %v13238_v50  ;;  %v10798_v17 = vld [vmem:[#allocation6 + $0x1044] ss:$40 sps:$4 sm:$0xff]   ;;  %7137 = vmatpush1.bf16.msra.mxu1 %v10859_v45  ;;  %v10862_v43 = vld [vmem:[#allocation6 + $0x320] ss:$40 sps:$4 sm:$0xff]  }
 0x409   :  { %v13240_v22 = vpop.permute.xlu0 %10465  ;;  %7232 = vmatprep.mubr.bf16.mxu0 %v13233_v33  ;;  %v1559_v34 = vsel %vm885_vm13, %v1553_v31, %v10442_v26  ;;  %v10423_v31 = vunpack.i.h.bf16 %v13207_v21  ;;  %7138 = vmatprep.subr.bf16.mxu1 %v10864_v56  ;;  %v10428_v21 = vunpack.i.h.bf16 %v13211_v6  ;;  %v10870_v45 = vld [vmem:[#allocation6 + $0x3c4] ss:$40 sps:$4 sm:$0xff]   ;;  %v10802_v56 = vld [vmem:[#allocation6 + $0x10e0] ss:$40 sps:$4 sm:$0xff]  }
 0x40a   :  { %7233 = vmatmul.mubr.bf16.vlgmr.msra.gmra.mrb[24].mxu0 %v13236_v63  ;;  %v1565_v18 = vsel %vm892_vm14, %v1559_v34, %v10452_v0  ;;  %v10467_v42 = vunpack.i.l.bf16 %v13240_v22  ;;  %v10801_v0 = vld [vmem:[#allocation6 + $0x1094] ss:$40 sps:$4 sm:$0xff]   ;;  %v10865_v34 = vld [vmem:[#allocation6 + $0x370] ss:$40 sps:$4 sm:$0xff]  }
 0x40b   :  { %v13247_v36 = vpop.permute.xlu1 %10460  ;;  %7242 = vmatpush1.bf16.msra.mxu0 %v10784_v19  ;;  %v1571_v32 = vsel %vm899_vm0, %v1565_v18, %v10457_v44  ;;  %v10799_v18 = vld [vmem:[#allocation6 + $0x1090] ss:$40 sps:$4 sm:$0xff]  }
 0x40c   :  { %7243 = vmatprep.subr.bf16.mxu0 %v10789_v1  ;;  %v10462_v9 = vunpack.i.l.bf16 %v13247_v36  ;;  %7139 = vmatpush1.bf16.msra.mxu1 %v10862_v43 }
 0x40d   :  { %v13249_v38 = vpop.permute.xlu0 %10475  ;;  %7140 = vmatprep.subr.bf16.mxu1 %v10867_v61 }
 0x40e   :  { %v10477_v14 = vunpack.i.l.bf16 %v13249_v38  ;;  %v10478_v35 = vunpack.i.h.bf16 %v13249_v38  ;;  %v1577_v40 = vsel %vm906_vm15, %v1571_v32, %v10462_v9  ;;  %v10796_v38 = vld [vmem:[#allocation6 + $0x1040] ss:$40 sps:$4 sm:$0xff]  }
 0x40f   :  { %v13256_v23 = vpop.permute.xlu1 %10470  ;;  %7244 = vmatpush1.bf16.msra.mxu0 %v10787_v4  ;;  %v1583_v26 = vsel %vm913_vm3, %v1577_v40, %v10467_v42 }
 0x410   :  { %v585_v8 = vmax.f32 %v12787_v30, %v10477_v14  ;;  %7245 = vmatprep.subr.bf16.mxu0 %v10792_v28  ;;  %v1227_v30 = vmax.f32 %v12841_v39, %v10478_v35  ;;  %v10472_v27 = vunpack.i.l.bf16 %v13256_v23  ;;  %v584_v28 = vmax.f32 %v12783_v25, %v10477_v14  ;;  %v10804_v25 = vld [vmem:[#allocation6 + $0x10e4] ss:$40 sps:$4 sm:$0xff]   ;;  %7141 = vmatpush1.bf16.msra.mxu1 %v10865_v34 }
 0x411   :  { %v13258_v47 = vpop.permute.xlu0 %10485  ;;  %v10473_v35 = vunpack.i.h.bf16 %v13256_v23  ;;  %v10433_v23 = vunpack.i.h.bf16 %v13209_v10  ;;  %7142 = vmatprep.subr.bf16.mxu1 %v10870_v45  ;;  %v10814_v45 = vld [vmem:[#allocation6 + $0x1180] ss:$40 sps:$4 sm:$0xff]  }
 0x412   :  { %v13262_v11 = vmax.f32 %v585_v8, 0.0  ;;  %v13278_v19 = vmax.f32 %v1227_v30, 0.0  ;;  %v845_v1 = vsel %vm843_vm6, %v12959_v46, %v10472_v27  ;;  %v596_v44 = vmax.f32 %v584_v28, 0.0  ;;  %v10868_v27 = vld [vmem:[#allocation6 + $0x3c0] ss:$40 sps:$4 sm:$0xff]  }
 0x413   :  { %v13269_v62 = vpop.permute.xlu1 %10480  ;;  %7246 = vmatpush1.bf16.msra.mxu0 %v10790_v3  ;;  %v852_v4 = vsel %vm850_vm7, %v845_v1, %v10423_v31  ;;  %v10487_v58 = vunpack.i.l.bf16 %v13258_v47  ;;  %v10873_v28 = vld [vmem:[#allocation6 + $0x414] ss:$40 sps:$4 sm:$0xff]  }
 0x414   :  { %v10579_v57 = vpack.i.bf16 %v13262_v11, %v13189_v16  ;;  %7247 = vmatprep.subr.bf16.mxu0 %v10795_v20  ;;  %v10599_v54 = vpack.i.bf16 %v13278_v19, %v13165_v55  ;;  %v10482_v9 = vunpack.i.l.bf16 %v13269_v62  ;;  %v859_v6 = vsel %vm857_vm9, %v852_v4, %v10428_v21  ;;  %7143 = vmatpush1.bf16.msra.mxu1 %v10868_v27  ;;  %v10871_v21 = vld [vmem:[#allocation6 + $0x410] ss:$40 sps:$4 sm:$0xff]  }
 0x415   :  { %v13271_v12 = vpop.permute.xlu0 %10495  ;;  %7144 = vmatprep.subr.bf16.mxu1 %v10873_v28 }
 0x416   :  { %10580 = vrot.lane.b32.xlu1 %v10579_v57, %s12348_s8  ;;  %10585 = vrot.lane.b32.xlu0 %v10579_v57, %s12349_s22  ;;  %v10498_v20 = vunpack.i.h.bf16 %v13271_v12  ;;  %v10497_v30 = vunpack.i.l.bf16 %v13271_v12 }
 0x417   :  { %v13283_v48 = vpop.permute.xlu1 %10490  ;;  %7248 = vmatpush1.bf16.msra.mxu0 %v10793_v52 }
 0x418   :  { %v10492_v46 = vunpack.i.l.bf16 %v13283_v48  ;;  %7249 = vmatprep.subr.bf16.mxu0 %v10798_v17  ;;  %v10493_v40 = vunpack.i.h.bf16 %v13283_v48  ;;  %v10810_v17 = vld [vmem:[#allocation6 + $0x1134] ss:$40 sps:$4 sm:$0xff]   ;;  %7145 = vmatpush1.bf16.msra.mxu1 %v10871_v21  ;;  %v10828_v21 = vld [vmem:[#allocation6 + $0x1224] ss:$40 sps:$4 sm:$0xff]  }
 0x419   :  { %v13285_v29 = vpop.permute.xlu0 %10505 }
 0x41a   :  { %1611 = vrot.lane.b32.xlu1 %v1583_v26, %s12340_s6  ;;  %10595 = vrot.lane.b32.xlu0 %v10579_v57, %s12339_s10  ;;  %v866_v14 = vsel %vm864_vm10, %v859_v6, %v10492_v46  ;;  %v10507_v1 = vunpack.i.l.bf16 %v13285_v29  ;;  %v742_v26 = vsel %vm740_vm8, %v10497_v30, %v10498_v20  ;;  %v10453_v20 = vunpack.i.h.bf16 %v13238_v50 }
 0x41b   :  { %v13297_v8 = vpop.permute.xlu1 %10500  ;;  %7250 = vmatpush1.bf16.msra.mxu0 %v10796_v38  ;;  %v873_v42 = vsel %vm871_vm11, %v866_v14, %v10433_v23  ;;  %v10604_v38 = vpack.i.bf16 %v13262_v11, %v596_v44  ;;  %v10876_v14 = vld [vmem:[#allocation6 + $0x464] ss:$40 sps:$4 sm:$0xff]   ;;  %v10874_v44 = vld [vmem:[#allocation6 + $0x460] ss:$40 sps:$4 sm:$0xff]  }
 0x41c   :  { %7251 = vmatprep.subr.bf16.mxu0 %v10801_v0  ;;  %v10502_v43 = vunpack.i.l.bf16 %v13297_v8  ;;  %v880_v4 = vsel %vm878_vm12, %v873_v42, %v742_v26  ;;  %7146 = vmatprep.subr.bf16.mxu1 %v10876_v14 }
 0x41d   :  { %v13299_v3 = vpop.permute.xlu0 %10515  ;;  %7147 = vmatpush1.bf16.msra.mxu1 %v10874_v44 }
 0x41e   :  { %10590 = vrot.lane.b32.xlu1 %v10579_v57, %s12350_s12  ;;  %10600 = vrot.lane.b32.xlu0 %v10599_v54, %s12346_s21  ;;  %v1520_v57 = vsel %vm843_vm6, %v13126_v49, %v10473_v35  ;;  %v10508_v49 = vunpack.i.h.bf16 %v13285_v29  ;;  %v10808_v29 = vld [vmem:[#allocation6 + $0x1130] ss:$40 sps:$4 sm:$0xff]   ;;  %v10443_v54 = vunpack.i.h.bf16 %v13213_v51  ;;  %v10517_v30 = vunpack.i.l.bf16 %v13299_v3 }
 0x41f   :  { %v10511_v32 = vpop.permute.xlu1 %10510  ;;  %7252 = vmatpush1.bf16.msra.mxu0 %v10799_v18  ;;  %v1526_v10 = vsel %vm850_vm7, %v1520_v57, %v10482_v9 }
 0x420   :  { %v10512_v12 = vunpack.i.l.bf16 %v10511_v32  ;;  %7253 = vmatprep.subr.bf16.mxu0 %v10804_v25  ;;  %v10513_v31 = vunpack.i.h.bf16 %v10511_v32  ;;  %v1418_v35 = vsel %vm740_vm8, %v10507_v1, %v10508_v49  ;;  %v10816_v25 = vld [vmem:[#allocation6 + $0x1184] ss:$40 sps:$4 sm:$0xff]   ;;  %v887_v23 = vsel %vm885_vm13, %v880_v4, %v10443_v54 }
 0x421   :  { %v13312_v52 = vpop.permute.xlu0 %10525  ;;  %v10458_v32 = vunpack.i.h.bf16 %v13224_v13  ;;  %v10468_v13 = vunpack.i.h.bf16 %v13240_v22  ;;  %v10488_v4 = vunpack.i.h.bf16 %v13258_v47 }
 0x422   :  { %1510 = vrot.lane.b32.xlu1 %v13189_v16, %s12351_s23  ;;  %v1231_v48 = vmax.f32 %v12879_v24, %v10512_v12  ;;  %v1532_v16 = vsel %vm857_vm9, %v1526_v10, %v10487_v58  ;;  %v1264_v9 = vmax.f32 %v12841_v39, %v10513_v31  ;;  %v1265_v6 = vmax.f32 %v12843_v41, %v10513_v31  ;;  %v10879_v58 = vld [vmem:[#allocation6 + $0x4b4] ss:$40 sps:$4 sm:$0xff]  }
 0x423   :  { %v13327_v46 = vpop.permute.xlu1 %10520  ;;  %7254 = vmatpush1.bf16.msra.mxu0 %v10802_v56  ;;  %v1538_v34 = vsel %vm864_vm10, %v1532_v16, %v10493_v40  ;;  %v894_v10 = vsel %vm892_vm14, %v887_v23, %v10453_v20  ;;  %v10822_v40 = vld [vmem:[#allocation6 + $0x11d4] ss:$40 sps:$4 sm:$0xff]   ;;  %7148 = vmatprep.subr.bf16.mxu1 %v10879_v58  ;;  %v10527_v16 = vunpack.i.l.bf16 %v13312_v52 }
 0x424   :  { %v13333_v61 = vmax.f32 %v1231_v48, 0.0  ;;  %7255 = vmatprep.subr.bf16.mxu0 %v10810_v17  ;;  %v1544_v18 = vsel %vm871_vm11, %v1538_v34, %v10502_v43  ;;  %v10522_v41 = vunpack.i.l.bf16 %v13327_v46  ;;  %v1276_v56 = vmax.f32 %v1264_v9, 0.0  ;;  %v10877_v17 = vld [vmem:[#allocation6 + $0x4b0] ss:$40 sps:$4 sm:$0xff]  }
 0x425   :  { %v13329_v0 = vpop.permute.xlu0 %10535  ;;  %v1550_v39 = vsel %vm878_vm12, %v1544_v18, %v1418_v35  ;;  %v13350_v50 = vmax.f32 %v1265_v6, 0.0  ;;  %v10820_v43 = vld [vmem:[#allocation6 + $0x11d0] ss:$40 sps:$4 sm:$0xff]   ;;  %v901_v48 = vsel %vm899_vm0, %v894_v10, %v10458_v32  ;;  %7149 = vmatpush1.bf16.msra.mxu1 %v10877_v17 }
 0x426   :  { %10605 = vrot.lane.b32.xlu1 %v10604_v38, %s12343_s16  ;;  %v10609_v51 = vpack.i.bf16 %v13333_v61, %v13278_v19  ;;  %v1556_v49 = vsel %vm885_vm13, %v1550_v39, %v10517_v30  ;;  %v10463_v38 = vunpack.i.h.bf16 %v13247_v36  ;;  %v10537_v28 = vunpack.i.l.bf16 %v13329_v0  ;;  %v10834_v30 = vld [vmem:[#allocation6 + $0x1274] ss:$40 sps:$4 sm:$0xff]  }
 0x427   :  { %v10531_v27 = vpop.permute.xlu1 %10530  ;;  %7256 = vmatpush1.bf16.msra.mxu0 %v10808_v29  ;;  %v1562_v31 = vsel %vm892_vm14, %v1556_v49, %v10522_v41  ;;  %v10629_v22 = vpack.i.bf16 %v13350_v50, %v1276_v56  ;;  %v10483_v36 = vunpack.i.h.bf16 %v13269_v62 }
 0x428   :  { %10610 = vrot.lane.b32.xlu0 %v10609_v51, %s12342_s0  ;;  %7257 = vmatprep.subr.bf16.mxu0 %v10816_v25  ;;  %v10533_v42 = vunpack.i.h.bf16 %v10531_v27  ;;  %v10532_v12 = vunpack.i.l.bf16 %v10531_v27  ;;  %v1568_v9 = vsel %vm899_vm0, %v1562_v31, %v10527_v16  ;;  %v908_v6 = vsel %vm906_vm15, %v901_v48, %v10463_v38  ;;  %v10826_v25 = vld [vmem:[#allocation6 + $0x1220] ss:$40 sps:$4 sm:$0xff]  }
 0x429   :  { %v10546_v57 = vpop.permute.xlu0 %10545  ;;  %v10838_v48 = vld [vmem:[#allocation6 + $0x12c0] ss:$40 sps:$4 sm:$0xff]  }
 0x42a   :  { %10615 = vrot.lane.b32.xlu1 %v10609_v51, %s12345_s20  ;;  %v10548_v26 = vunpack.i.h.bf16 %v10546_v57  ;;  %v10547_v29 = vunpack.i.l.bf16 %v10546_v57  ;;  %v849_v54 = vsel %vm843_vm6, %v13128_v53, %v10533_v42  ;;  %v1273_v34 = vmax.f32 %v12899_v59, %v10532_v12  ;;  %v10840_v42 = vld [vmem:[#allocation6 + $0x12c4] ss:$40 sps:$4 sm:$0xff]  }
 0x42b   :  { %v13354_v1 = vpop.permute.xlu1 %10540  ;;  %7258 = vmatpush1.bf16.msra.mxu0 %v10814_v45  ;;  %v1272_v14 = vmax.f32 %v12879_v24, %v10532_v12  ;;  %v856_v62 = vsel %vm850_vm7, %v849_v54, %v10483_v36  ;;  %v1574_v45 = vsel %vm906_vm15, %v1568_v9, %v10537_v28  ;;  %v915_v57 = vsel %vm913_vm3, %v908_v6, %v10468_v13  ;;  %v10852_v28 = vld [vmem:[#allocation6 + $0x1364] ss:$40 sps:$4 sm:$0xff]   ;;  %v10858_v36 = vld [vmem:[#allocation6 + $0x13b4] ss:$40 sps:$4 sm:$0xff]  }
 0x42c   :  { %10620 = vrot.lane.b32.xlu0 %v10609_v51, %s12344_s19  ;;  %7259 = vmatprep.subr.bf16.mxu0 %v10822_v40  ;;  %v10542_v47 = vunpack.i.l.bf16 %v13354_v1  ;;  %v844_v53 = vsel %vm843_vm6, %v13165_v55, %v10548_v26  ;;  %v1524_v23 = vsel %vm843_vm6, %v13168_v37, %v10547_v29  ;;  %v13382_v24 = vmax.f32 %v1273_v34, 0.0  ;;  %v10832_v37 = vld [vmem:[#allocation6 + $0x1270] ss:$40 sps:$4 sm:$0xff]   ;;  %v10850_v34 = vld [vmem:[#allocation6 + $0x1360] ss:$40 sps:$4 sm:$0xff]  }
 0x42d   :  { %v10556_v35 = vpop.permute.xlu0 %10555  ;;  %v863_v40 = vsel %vm857_vm9, %v856_v62, %v10488_v4  ;;  %v1284_v12 = vmax.f32 %v1272_v14, 0.0  ;;  %v10503_v13 = vunpack.i.h.bf16 %v13297_v8  ;;  %v10846_v4 = vld [vmem:[#allocation6 + $0x1314] ss:$40 sps:$4 sm:$0xff]   ;;  %v10909_v9 = vld [vmem:[#allocation6 + $0x504] ss:$40 sps:$4 sm:$0xff]  }
 0x42e   :  { %10625 = vrot.lane.b32.xlu1 %v10609_v51, %s12347_s4  ;;  %v10558_v44 = vunpack.i.h.bf16 %v10556_v35  ;;  %v10557_v20 = vunpack.i.l.bf16 %v10556_v35  ;;  %v1580_v41 = vsel %vm913_vm3, %v1574_v45, %v10542_v47  ;;  %v10523_v35 = vunpack.i.h.bf16 %v13327_v46  ;;  %v10882_v46 = vld [vmem:[#allocation6 + $0x1404] ss:$40 sps:$4 sm:$0xff]   ;;  %7159 = vmatprep.subr.bf16.mxu1 %v10909_v9 }
 0x42f   :  { %v10551_v18 = vpop.permute.xlu1 %10550  ;;  %7260 = vmatpush1.bf16.msra.mxu0 %v10820_v43  ;;  %v10634_v43 = vpack.i.bf16 %v13382_v24, %v13350_v50  ;;  %v10639_v16 = vpack.i.bf16 %v13382_v24, %v1284_v12 }
 0x430   :  { %v10553_v51 = vunpack.i.h.bf16 %v10551_v18  ;;  %v10552_v59 = vunpack.i.l.bf16 %v10551_v18  ;;  %10630 = vrot.lane.b32.xlu0 %v10629_v22, %s12343_s16  ;;  %7261 = vmatprep.subr.bf16.mxu0 %v10828_v21  ;;  %v10844_v21 = vld [vmem:[#allocation6 + $0x1310] ss:$40 sps:$4 sm:$0xff]   ;;  %v10518_v22 = vunpack.i.h.bf16 %v13299_v3  ;;  %v10528_v18 = vunpack.i.h.bf16 %v13312_v52 }
 0x431   :  { %v10566_v32 = vpop.permute.xlu0 %10565  ;;  %v10856_v3 = vld [vmem:[#allocation6 + $0x13b0] ss:$40 sps:$4 sm:$0xff]  }
 0x432   :  { %825 = vrot.lane.b32.xlu1 %v13262_v11, %s12351_s23  ;;  %v851_v55 = vsel %vm850_vm7, %v844_v53, %v10553_v51  ;;  %v1530_v27 = vsel %vm850_vm7, %v1524_v23, %v10552_v59  ;;  %v10568_v31 = vunpack.i.h.bf16 %v10566_v32  ;;  %v10567_v26 = vunpack.i.l.bf16 %v10566_v32  ;;  %v10880_v32 = vld [vmem:[#allocation6 + $0x1400] ss:$40 sps:$4 sm:$0xff]  }
 0x433   :  { %v10561_v39 = vpop.permute.xlu1 %10560  ;;  %v1536_v11 = vsel %vm857_vm9, %v1530_v27, %v10557_v20  ;;  %7262 = vmatpush1.bf16.msra.mxu0 %v10826_v25  ;;  %v13391_v58 = vsel %vm857_vm9, %v851_v55, %v10558_v44  ;;  %v10538_v25 = vunpack.i.h.bf16 %v13329_v0 }
 0x434   :  { %v10563_v56 = vunpack.i.h.bf16 %v10561_v39  ;;  %v10562_v10 = vunpack.i.l.bf16 %v10561_v39  ;;  %1587 = vrot.lane.b32.xlu0 %v1580_v41, %s12354_s3  ;;  %7263 = vmatprep.subr.bf16.mxu0 %v10834_v30  ;;  %v746_v29 = vsel %vm740_vm8, %v10567_v26, %v10568_v31 }
 0x435   :  { %v10576_v53 = vpop.permute.xlu0 %10575 }
 0x436   :  { %1591 = vrot.lane.b32.xlu1 %v915_v57, %s12336_s24  ;;  %v870_v17 = vsel %vm864_vm10, %v863_v40, %v10562_v10  ;;  %v1542_v49 = vsel %vm864_vm10, %v1536_v11, %v10563_v56  ;;  %v10578_v62 = vunpack.i.h.bf16 %v10576_v53  ;;  %v10577_v0 = vunpack.i.l.bf16 %v10576_v53  ;;  %v10885_v10 = vld [vmem:[#allocation6 + $0x1454] ss:$40 sps:$4 sm:$0xff]   ;;  %s12355_s24 = smov 104  }
 0x437   :  { %7264 = vmatpush1.bf16.msra.mxu0 %v10832_v37  ;;  %v877_v38 = vsel %vm871_vm11, %v870_v17, %v10503_v13  ;;  %v10571_v51 = vpop.permute.xlu1 %10570  ;;  %v10888_v13 = vld [vmem:[#allocation6 + $0x14a4] ss:$40 sps:$4 sm:$0xff]  }
 0x438   :  { %1356 = vrot.lane.b32.xlu0 %v13333_v61, %s12346_s21  ;;  %7265 = vmatprep.subr.bf16.mxu0 %v10840_v42  ;;  %v884_v8 = vsel %vm878_vm12, %v877_v38, %v746_v29  ;;  %v10572_v23 = vunpack.i.l.bf16 %v10571_v51  ;;  %v1422_v30 = vsel %vm740_vm8, %v10577_v0, %v10578_v62 }
 0x439   :  { %v891_v54 = vsel %vm885_vm13, %v884_v8, %v10518_v22  ;;  %v13430_v59 = vpop.permute.xlu0 %1615  ;;  %v10573_v8 = vunpack.i.h.bf16 %v10571_v51 }
 0x43a   :  { %10635 = vrot.lane.b32.xlu1 %v10634_v43, %s12348_s8  ;;  %v898_v47 = vsel %vm892_vm14, %v891_v54, %v10523_v35  ;;  %v10889_v54 = vld [vmem:[#allocation6 + $0x14f0] ss:$40 sps:$4 sm:$0xff]  }
 0x43b   :  { %7266 = vmatpush1.bf16.msra.mxu0 %v10838_v48  ;;  %v905_v6 = vsel %vm899_vm0, %v898_v47, %v10528_v18 }
 0x43c   :  { %10640 = vrot.lane.b32.xlu0 %v10639_v16, %s12343_s16  ;;  %7267 = vmatprep.subr.bf16.mxu0 %v10846_v4  ;;  %v912_v52 = vsel %vm906_vm15, %v905_v6, %v10538_v25  ;;  %v10886_v4 = vld [vmem:[#allocation6 + $0x14a0] ss:$40 sps:$4 sm:$0xff]   ;;  %v10891_v16 = vld [vmem:[#allocation6 + $0x14f4] ss:$40 sps:$4 sm:$0xff]  }
 0x43d   :  { %v10892_v6 = vld [vmem:[#allocation6 + $0x1540] ss:$40 sps:$4 sm:$0xff]  }
 0x43e   :  { %10645 = vrot.lane.b32.xlu1 %v10634_v43, %s12349_s22 }
 0x43f   :  { %7268 = vmatpush1.bf16.msra.mxu0 %v10844_v21 }
 0x440   :  { %10650 = vrot.lane.b32.xlu0 %v10634_v43, %s12350_s12  ;;  %7269 = vmatprep.subr.bf16.mxu0 %v10852_v28 }
 0x442   :  { %1486 = vrot.lane.b32.xlu1 %v13350_v50, %s12339_s10 }
 0x443   :  { %7270 = vmatpush1.bf16.msra.mxu0 %v10850_v34 }
 0x444   :  { %1504 = vrot.lane.b32.xlu0 %v13350_v50, %s12351_s23  ;;  %7271 = vmatprep.subr.bf16.mxu0 %v10858_v36  ;;  %v10543_v50 = vunpack.i.h.bf16 %v13354_v1  ;;  %v10894_v36 = vld [vmem:[#allocation6 + $0x1544] ss:$40 sps:$4 sm:$0xff]  }
 0x446   :  { %1494 = vrot.lane.b32.xlu1 %v13382_v24, %s12339_s10  ;;  %v919_v14 = vsel %vm913_vm3, %v912_v52, %v10543_v50  ;;  %v10897_v52 = vld [vmem:[#allocation6 + $0x1594] ss:$40 sps:$4 sm:$0xff]  }
 0x447   :  { %7272 = vmatpush1.bf16.msra.mxu0 %v10856_v3 }
 0x448   :  { %1512 = vrot.lane.b32.xlu0 %v13382_v24, %s12351_s23  ;;  %7282 = vmatprep.subr.bf16.mxu0 %v10882_v46  ;;  %v1548_v24 = vsel %vm871_vm11, %v1542_v49, %v10572_v23  ;;  %v10883_v49 = vld [vmem:[#allocation6 + $0x1450] ss:$40 sps:$4 sm:$0xff]  }
 0x449   :  { %v1554_v11 = vsel %vm878_vm12, %v1548_v24, %v1422_v30  ;;  %v10895_v23 = vld [vmem:[#allocation6 + $0x1590] ss:$40 sps:$4 sm:$0xff]  }
 0x44c   :  { %1623 = vrot.lane.b32.xlu0 %v919_v14, %s12349_s22 }
 0x488   :  { %v10581_v44 = vpop.permute.xlu1 %10580  ;;  %v10586_v20 = vpop.permute.xlu0 %10585 }
 0x489   :  { %v10582_v1 = vunpack.i.l.bf16 %v10581_v44  ;;  %v10587_v41 = vunpack.i.l.bf16 %v10586_v20  ;;  %v10583_v47 = vunpack.i.h.bf16 %v10581_v44  ;;  %v10588_v9 = vunpack.i.h.bf16 %v10586_v20  ;;  %v10900_v20 = vld [vmem:[#allocation6 + $0x15e4] ss:$40 sps:$4 sm:$0xff]  }
 0x48b   :  { %v1560_v56 = vsel %vm885_vm13, %v1554_v11, %v10582_v1 }
 0x48c   :  { %v1612_v55 = vpop.permute.xlu1 %1611  ;;  %v13434_v27 = vpop.permute.xlu0 %10595 }
 0x48d   :  { %v1641_v45 = vsel %vm1640_vm4, %v13216_v15, %v1612_v55  ;;  %v1643_v39 = vsel %vm13779_vm2, %v1612_v55, %v13430_v59  ;;  %v1566_v15 = vsel %vm892_vm14, %v1560_v56, %v10587_v41  ;;  %v10597_v17 = vunpack.i.l.bf16 %v13434_v27 }
 0x48e   :  { %v13441_v57 = vpack.c.bf16 %v1641_v45, %v1641_v45  ;;  %v13443_v37 = vpack.c.bf16 %v1643_v39, %v1643_v39  ;;  %v10598_v44 = vunpack.i.h.bf16 %v13434_v27  ;;  %vm1630_vm2 = vcmask 982016   ;;  %v10903_v27 = vld [vmem:[#allocation6 + $0x1634] ss:$40 sps:$4 sm:$0xff]  }
 0x490   :  { %v10591_v40 = vpop.permute.xlu1 %10590  ;;  %7273 = vmatprep.mubr.bf16.mxu0 %v13443_v37  ;;  %v13447_v12 = vpop.permute.xlu0 %10600 }
 0x491   :  { %v10592_v42 = vunpack.i.l.bf16 %v10591_v40  ;;  %7274 = vmatmul.mubr.bf16.vlgmr.msra.gmra.mrb[24].mxu0 %v13441_v57  ;;  %v10602_v31 = vunpack.i.l.bf16 %v13447_v12  ;;  %v10593_v50 = vunpack.i.h.bf16 %v10591_v40 }
 0x492   :  { %7283 = vmatpush1.bf16.msra.mxu0 %v10880_v32  ;;  %v10898_v32 = vld [vmem:[#allocation6 + $0x15e0] ss:$40 sps:$4 sm:$0xff]  }
 0x493   :  { %v1572_v43 = vsel %vm899_vm0, %v1566_v15, %v10592_v42  ;;  %7284 = vmatprep.subr.bf16.mxu0 %v10885_v10  ;;  %v865_v29 = vsel %vm864_vm10, %v13391_v58, %v10602_v31  ;;  %v10901_v31 = vld [vmem:[#allocation6 + $0x1630] ss:$40 sps:$4 sm:$0xff]  }
 0x494   :  { %v1511_v26 = vpop.permute.xlu1 %1510  ;;  %v1578_v48 = vsel %vm906_vm15, %v1572_v43, %v10597_v17  ;;  %v872_v34 = vsel %vm871_vm11, %v865_v29, %v10573_v8  ;;  %v10603_v17 = vunpack.i.h.bf16 %v13447_v12  ;;  %v10906_v29 = vld [vmem:[#allocation6 + $0x1684] ss:$40 sps:$4 sm:$0xff]  }
 0x495   :  { %v1584_v38 = vsel %vm913_vm3, %v1578_v48, %v1511_v26  ;;  %v10907_v26 = vld [vmem:[#allocation6 + $0x500] ss:$40 sps:$4 sm:$0xff]  }
 0x496   :  { %1619 = vrot.lane.b32.xlu1 %v1584_v38, %s12341_s13  ;;  %7285 = vmatpush1.bf16.msra.mxu0 %v10883_v49 }
 0x497   :  { %7286 = vmatprep.subr.bf16.mxu0 %v10888_v13 }
 0x498   :  { %v10606_v21 = vpop.permute.xlu1 %10605 }
 0x499   :  { %v10608_v22 = vunpack.i.h.bf16 %v10606_v21  ;;  %v10607_v28 = vunpack.i.l.bf16 %v10606_v21  ;;  %v10915_v21 = vld [vmem:[#allocation6 + $0x554] ss:$40 sps:$4 sm:$0xff]  }
 0x49a   :  { %7287 = vmatpush1.bf16.msra.mxu0 %v10886_v4  ;;  %v10611_v3 = vpop.permute.xlu0 %10610 }
 0x49b   :  { %v741_v35 = vsel %vm740_vm8, %v10607_v28, %v10608_v22  ;;  %7288 = vmatprep.subr.bf16.mxu0 %v10891_v16  ;;  %v10612_v51 = vunpack.i.l.bf16 %v10611_v3  ;;  %v10613_v39 = vunpack.i.h.bf16 %v10611_v3  ;;  %v10904_v28 = vld [vmem:[#allocation6 + $0x1680] ss:$40 sps:$4 sm:$0xff]   ;;  %v10921_v3 = vld [vmem:[#allocation6 + $0x5a4] ss:$40 sps:$4 sm:$0xff]  }
 0x49c   :  { %v879_v18 = vsel %vm878_vm12, %v872_v34, %v741_v35  ;;  %v10616_v46 = vpop.permute.xlu1 %10615 }
 0x49d   :  { %v886_v58 = vsel %vm885_vm13, %v879_v18, %v10583_v47  ;;  %v10617_v62 = vunpack.i.l.bf16 %v10616_v46  ;;  %v1521_v1 = vsel %vm843_vm6, %v13278_v19, %v10612_v51  ;;  %v10618_v56 = vunpack.i.h.bf16 %v10616_v46  ;;  %v10912_v18 = vld [vmem:[#allocation6 + $0x16d4] ss:$40 sps:$4 sm:$0xff]  }
 0x49e   :  { %7289 = vmatpush1.bf16.msra.mxu0 %v10889_v54  ;;  %v893_v25 = vsel %vm892_vm14, %v886_v58, %v10588_v9  ;;  %v10621_v14 = vpop.permute.xlu0 %10620  ;;  %v1525_v49 = vsel %vm843_vm6, %v13333_v61, %v10613_v39  ;;  %v10913_v54 = vld [vmem:[#allocation6 + $0x550] ss:$40 sps:$4 sm:$0xff]   ;;  %vm1645_vm6 = vcmask 392192  }
 0x49f   :  { %7290 = vmatprep.subr.bf16.mxu0 %v10894_v36  ;;  %v900_v0 = vsel %vm899_vm0, %v893_v25, %v10593_v50  ;;  %v10622_v55 = vunpack.i.l.bf16 %v10621_v14  ;;  %v1527_v11 = vsel %vm850_vm7, %v1521_v1, %v10617_v62  ;;  %v10623_v43 = vunpack.i.h.bf16 %v10621_v14  ;;  %v10910_v62 = vld [vmem:[#allocation6 + $0x16d0] ss:$40 sps:$4 sm:$0xff]  }
 0x4a0   :  { %v13464_v53 = vpop.permute.xlu1 %10625  ;;  %v907_v45 = vsel %vm906_vm15, %v900_v0, %v10598_v44  ;;  %v1531_v61 = vsel %vm850_vm7, %v1525_v49, %v10618_v56  ;;  %v10919_v0 = vld [vmem:[#allocation6 + $0x5a0] ss:$40 sps:$4 sm:$0xff]  }
 0x4a1   :  { %v1533_v42 = vsel %vm857_vm9, %v1527_v11, %v10622_v55  ;;  %v10627_v48 = vunpack.i.l.bf16 %v13464_v53  ;;  %v1537_v36 = vsel %vm857_vm9, %v1531_v61, %v10623_v43  ;;  %v10916_v56 = vld [vmem:[#allocation6 + $0x1720] ss:$40 sps:$4 sm:$0xff]   ;;  %v10933_v43 = vld [vmem:[#allocation6 + $0x644] ss:$40 sps:$4 sm:$0xff]   ;;  %vm1635_vm9 = vcmask 785408  }
 0x4a2   :  { %7291 = vmatpush1.bf16.msra.mxu0 %v10892_v6  ;;  %v10631_v30 = vpop.permute.xlu0 %10630  ;;  %v1539_v12 = vsel %vm864_vm10, %v1533_v42, %v10603_v17  ;;  %v10628_v6 = vunpack.i.h.bf16 %v13464_v53  ;;  %v10927_v53 = vld [vmem:[#allocation6 + $0x5f4] ss:$40 sps:$4 sm:$0xff]   ;;  %v10928_v61 = vld [vmem:[#allocation6 + $0x17c0] ss:$40 sps:$4 sm:$0xff]  }
 0x4a3   :  { %7292 = vmatprep.subr.bf16.mxu0 %v10897_v52  ;;  %v10633_v38 = vunpack.i.h.bf16 %v10631_v30  ;;  %v10632_v4 = vunpack.i.l.bf16 %v10631_v30  ;;  %v1545_v34 = vsel %vm871_vm11, %v1539_v12, %v10627_v48  ;;  %v10924_v42 = vld [vmem:[#allocation6 + $0x1774] ss:$40 sps:$4 sm:$0xff]  }
 0x4a4   :  { %v826_v24 = vpop.permute.xlu1 %825  ;;  %v10939_v12 = vld [vmem:[#allocation6 + $0x694] ss:$40 sps:$4 sm:$0xff]  }
 0x4a5   :  { %v914_v41 = vsel %vm913_vm3, %v907_v45, %v826_v24  ;;  %v1419_v35 = vsel %vm740_vm8, %v10632_v4, %v10633_v38  ;;  %v10918_v24 = vld [vmem:[#allocation6 + $0x1724] ss:$40 sps:$4 sm:$0xff]   ;;  %v10922_v38 = vld [vmem:[#allocation6 + $0x1770] ss:$40 sps:$4 sm:$0xff]  }
 0x4a6   :  { %7293 = vmatpush1.bf16.msra.mxu0 %v10895_v23  ;;  %v1588_v10 = vpop.permute.xlu0 %1587  ;;  %v1551_v14 = vsel %vm878_vm12, %v1545_v34, %v1419_v35  ;;  %v10930_v4 = vld [vmem:[#allocation6 + $0x17c4] ss:$40 sps:$4 sm:$0xff]   ;;  %v10934_v34 = vld [vmem:[#allocation6 + $0x1810] ss:$40 sps:$4 sm:$0xff]  }
 0x4a7   :  { %7294 = vmatprep.subr.bf16.mxu0 %v10900_v20  ;;  %v1631_v19 = vsel %vm1630_vm2, %v914_v41, %v1588_v10  ;;  %v10942_v35 = vld [vmem:[#allocation6 + $0x1864] ss:$40 sps:$4 sm:$0xff]  }
 0x4a8   :  { %v13473_v40 = vpop.permute.xlu1 %1591  ;;  %v13485_v16 = vpack.c.bf16 %v1631_v19, %v1631_v19  ;;  %v10925_v19 = vld [vmem:[#allocation6 + $0x5f0] ss:$40 sps:$4 sm:$0xff]  }
 0x4a9   :  { %v1632_v15 = vsel %vm184_vm1, %v1588_v10, %v13473_v40 }
 0x4aa   :  { %v13482_v13 = vpack.c.bf16 %v1632_v15, %v1632_v15  ;;  %7295 = vmatpush1.bf16.msra.mxu0 %v10898_v32  ;;  %v1357_v8 = vpop.permute.xlu0 %1356 }
 0x4ab   :  { %7296 = vmatprep.subr.bf16.mxu0 %v10903_v27  ;;  %v1543_v46 = vsel %vm864_vm10, %v1537_v36, %v1357_v8  ;;  %v10943_v36 = vld [vmem:[#allocation6 + $0x6e0] ss:$40 sps:$4 sm:$0xff]  }
 0x4ac   :  { %v10636_v22 = vpop.permute.xlu1 %10635  ;;  %7150 = vmatprep.mubr.bf16.mxu1 %v13482_v13  ;;  %v1549_v23 = vsel %vm871_vm11, %v1543_v46, %v10628_v6  ;;  %v10949_v46 = vld [vmem:[#allocation6 + $0x730] ss:$40 sps:$4 sm:$0xff]   ;;  %v10954_v6 = vld [vmem:[#allocation6 + $0x1904] ss:$40 sps:$4 sm:$0xff]   ;;  %vm7114_vm11 = vcmask 261120  }
 0x4ad   :  { %7151 = vmatmul.mubr.bf16.vlgmr.msra.gmra.mrb[24].mxu1 %v13485_v16  ;;  %v10637_v47 = vunpack.i.l.bf16 %v10636_v22  ;;  %v10638_v44 = vunpack.i.h.bf16 %v10636_v22  ;;  %v10936_v22 = vld [vmem:[#allocation6 + $0x1814] ss:$40 sps:$4 sm:$0xff]  }
 0x4ae   :  { %7297 = vmatpush1.bf16.msra.mxu0 %v10901_v31  ;;  %7160 = vmatpush1.bf16.msra.mxu1 %v10907_v26  ;;  %v10641_v9 = vpop.permute.xlu0 %10640 }
 0x4af   :  { %7298 = vmatprep.subr.bf16.mxu0 %v10906_v29  ;;  %7161 = vmatprep.subr.bf16.mxu1 %v10915_v21  ;;  %v10643_v25 = vunpack.i.h.bf16 %v10641_v9  ;;  %v10642_v52 = vunpack.i.l.bf16 %v10641_v9  ;;  %v1557_v20 = vsel %vm885_vm13, %v1551_v14, %v10637_v47  ;;  %v10931_v29 = vld [vmem:[#allocation6 + $0x640] ss:$40 sps:$4 sm:$0xff]   ;;  %v10951_v47 = vld [vmem:[#allocation6 + $0x734] ss:$40 sps:$4 sm:$0xff]   ;;  %v10957_v9 = vld [vmem:[#allocation6 + $0x784] ss:$40 sps:$4 sm:$0xff]  }
 0x4b0   :  { %v10646_v58 = vpop.permute.xlu1 %10645  ;;  %v10969_v14 = vld [vmem:[#allocation6 + $0x824] ss:$40 sps:$4 sm:$0xff]  }
 0x4b1   :  { %v10647_v50 = vunpack.i.l.bf16 %v10646_v58  ;;  %v10648_v51 = vunpack.i.h.bf16 %v10646_v58  ;;  %v1423_v30 = vsel %vm740_vm8, %v10642_v52, %v10643_v25  ;;  %v10946_v58 = vld [vmem:[#allocation6 + $0x18b0] ss:$40 sps:$4 sm:$0xff]   ;;  %v10955_v25 = vld [vmem:[#allocation6 + $0x780] ss:$40 sps:$4 sm:$0xff]   ;;  %v10963_v52 = vld [vmem:[#allocation6 + $0x7d4] ss:$40 sps:$4 sm:$0xff]  }
 0x4b2   :  { %7299 = vmatpush1.bf16.msra.mxu0 %v10904_v28  ;;  %7162 = vmatpush1.bf16.msra.mxu1 %v10913_v54  ;;  %v1555_v1 = vsel %vm878_vm12, %v1549_v23, %v1423_v30  ;;  %v10651_v55 = vpop.permute.xlu0 %10650  ;;  %v10937_v28 = vld [vmem:[#allocation6 + $0x690] ss:$40 sps:$4 sm:$0xff]   ;;  %v10945_v54 = vld [vmem:[#allocation6 + $0x6e4] ss:$40 sps:$4 sm:$0xff]  }
 0x4b3   :  { %7300 = vmatprep.subr.bf16.mxu0 %v10912_v18  ;;  %7163 = vmatprep.subr.bf16.mxu1 %v10921_v3  ;;  %v1563_v39 = vsel %vm892_vm14, %v1557_v20, %v10647_v50  ;;  %v10653_v11 = vunpack.i.h.bf16 %v10651_v55  ;;  %v10652_v41 = vunpack.i.l.bf16 %v10651_v55  ;;  %v1561_v32 = vsel %vm885_vm13, %v1555_v1, %v10638_v44  ;;  %v10940_v18 = vld [vmem:[#allocation6 + $0x1860] ss:$40 sps:$4 sm:$0xff]   ;;  %v10948_v3 = vld [vmem:[#allocation6 + $0x18b4] ss:$40 sps:$4 sm:$0xff]   ;;  %v10961_v50 = vld [vmem:[#allocation6 + $0x7d0] ss:$40 sps:$4 sm:$0xff]  }
 0x4b4   :  { %v1487_v45 = vpop.permute.xlu1 %1486  ;;  %v1567_v27 = vsel %vm892_vm14, %v1561_v32, %v10648_v51  ;;  %v10967_v51 = vld [vmem:[#allocation6 + $0x820] ss:$40 sps:$4 sm:$0xff]   ;;  %v10981_v23 = vld [vmem:[#allocation6 + $0x8c4] ss:$40 sps:$4 sm:$0xff]   ;;  %v10987_v20 = vld [vmem:[#allocation6 + $0x914] ss:$40 sps:$4 sm:$0xff]  }
 0x4b5   :  { %v1569_v10 = vsel %vm899_vm0, %v1563_v39, %v10652_v41  ;;  %v1573_v26 = vsel %vm899_vm0, %v1567_v27, %v10653_v11  ;;  %v10979_v44 = vld [vmem:[#allocation6 + $0x8c0] ss:$40 sps:$4 sm:$0xff]   ;;  %v10985_v30 = vld [vmem:[#allocation6 + $0x910] ss:$40 sps:$4 sm:$0xff]   ;;  %v10999_v1 = vld [vmem:[#allocation6 + $0x9b4] ss:$40 sps:$4 sm:$0xff]  }
 0x4b6   :  { %7301 = vmatpush1.bf16.msra.mxu0 %v10910_v62  ;;  %7164 = vmatpush1.bf16.msra.mxu1 %v10919_v0  ;;  %v1575_v15 = vsel %vm906_vm15, %v1569_v10, %v1487_v45  ;;  %v1505_v17 = vpop.permute.xlu0 %1504  ;;  %v10975_v62 = vld [vmem:[#allocation6 + $0x874] ss:$40 sps:$4 sm:$0xff]   ;;  %v10973_v0 = vld [vmem:[#allocation6 + $0x870] ss:$40 sps:$4 sm:$0xff]   ;;  %v10952_v10 = vld [vmem:[#allocation6 + $0x1900] ss:$40 sps:$4 sm:$0xff]  }
 0x4b7   :  { %7302 = vmatprep.subr.bf16.mxu0 %v10918_v24  ;;  %7165 = vmatprep.subr.bf16.mxu1 %v10927_v53  ;;  %v1581_v31 = vsel %vm913_vm3, %v1575_v15, %v1505_v17  ;;  %v10993_v24 = vld [vmem:[#allocation6 + $0x964] ss:$40 sps:$4 sm:$0xff]   ;;  %v10991_v53 = vld [vmem:[#allocation6 + $0x960] ss:$40 sps:$4 sm:$0xff]   ;;  %v10997_v55 = vld [vmem:[#allocation6 + $0x9b0] ss:$40 sps:$4 sm:$0xff]  }
 0x4b8   :  { %v1495_v49 = vpop.permute.xlu1 %1494  ;;  %1595 = vrot.lane.b32.xlu1 %v1581_v31, %s12355_s24  ;;  %v11005_v45 = vld [vmem:[#allocation6 + $0xc] ss:$40 sps:$4 sm:$0xff]   ;;  %v10964_v17 = vld [vmem:[#allocation6 + $0x19a0] ss:$40 sps:$4 sm:$0xff]   ;;  %vm8392_vm13 = vcmask 883712   ;;  %vm13780_vm0 = vcmask 97280  }
 0x4b9   :  { %v1579_v48 = vsel %vm906_vm15, %v1573_v26, %v1495_v49  ;;  %v10966_v15 = vld [vmem:[#allocation6 + $0x19a4] ss:$40 sps:$4 sm:$0xff]   ;;  %v10972_v49 = vld [vmem:[#allocation6 + $0x19f4] ss:$40 sps:$4 sm:$0xff]   ;;  %v10976_v31 = vld [vmem:[#allocation6 + $0x1a40] ss:$40 sps:$4 sm:$0xff]  }
 0x4ba   :  { %7303 = vmatpush1.bf16.msra.mxu0 %v10916_v56  ;;  %7166 = vmatpush1.bf16.msra.mxu1 %v10925_v19  ;;  %v1513_v21 = vpop.permute.xlu0 %1512  ;;  %v10958_v19 = vld [vmem:[#allocation6 + $0x1950] ss:$40 sps:$4 sm:$0xff]   ;;  %v10984_v26 = vld [vmem:[#allocation6 + $0x1a94] ss:$40 sps:$4 sm:$0xff]  }
 0x4bb   :  { %7304 = vmatprep.subr.bf16.mxu0 %v10924_v42  ;;  %7167 = vmatprep.subr.bf16.mxu1 %v10933_v43  ;;  %v1585_v8 = vsel %vm913_vm3, %v1579_v48, %v1513_v21  ;;  %v10960_v42 = vld [vmem:[#allocation6 + $0x1954] ss:$40 sps:$4 sm:$0xff]   ;;  %v10978_v43 = vld [vmem:[#allocation6 + $0x1a44] ss:$40 sps:$4 sm:$0xff]   ;;  %v10982_v48 = vld [vmem:[#allocation6 + $0x1a90] ss:$40 sps:$4 sm:$0xff]  }
 0x4bc   :  { %1627 = vrot.lane.b32.xlu0 %v1585_v8, %s12329_s15  ;;  %v10994_v21 = vld [vmem:[#allocation6 + $0x1b30] ss:$40 sps:$4 sm:$0xff]   ;;  %v11000_v8 = vld [vmem:[#allocation6 + $0x1b80] ss:$40 sps:$4 sm:$0xff]   ;;  %s12356_s15 = smov 12   ;;  %vm8558_vm3 = vcmask 424960  }
 0x4be   :  { %7305 = vmatpush1.bf16.msra.mxu0 %v10922_v38  ;;  %7168 = vmatpush1.bf16.msra.mxu1 %v10931_v29  ;;  %v1624_v39 = vpop.permute.xlu0 %1623  ;;  %v10990_v38 = vld [vmem:[#allocation6 + $0x1ae4] ss:$40 sps:$4 sm:$0xff]   ;;  %v10996_v29 = vld [vmem:[#allocation6 + $0x1b34] ss:$40 sps:$4 sm:$0xff]  }
 0x4bf   :  { %7306 = vmatprep.subr.bf16.mxu0 %v10930_v4  ;;  %7169 = vmatprep.subr.bf16.mxu1 %v10939_v12  ;;  %v10988_v4 = vld [vmem:[#allocation6 + $0x1ae0] ss:$40 sps:$4 sm:$0xff]   ;;  %v11002_v12 = vld [vmem:[#allocation6 + $0x1b84] ss:$40 sps:$4 sm:$0xff]  }
 0x4c2   :  { %7307 = vmatpush1.bf16.msra.mxu0 %v10928_v61  ;;  %7170 = vmatpush1.bf16.msra.mxu1 %v10937_v28  ;;  %v11008_v61 = vld [vmem:[#allocation6 + $0x1bd4] ss:$40 sps:$4 sm:$0xff]  }
 0x4c3   :  { %7308 = vmatprep.subr.bf16.mxu0 %v10936_v22  ;;  %7171 = vmatprep.subr.bf16.mxu1 %v10945_v54 }
 0x4c6   :  { %7309 = vmatpush1.bf16.msra.mxu0 %v10934_v34  ;;  %7172 = vmatpush1.bf16.msra.mxu1 %v10943_v36  ;;  %v11003_v36 = vld [vmem:[#allocation6 + $0x8] ss:$40 sps:$4 sm:$0xff]  }
 0x4c7   :  { %7310 = vmatprep.subr.bf16.mxu0 %v10942_v35  ;;  %7173 = vmatprep.subr.bf16.mxu1 %v10951_v47  ;;  %v11006_v47 = vld [vmem:[#allocation6 + $0x1bd0] ss:$40 sps:$4 sm:$0xff]  }
 0x4ca   :  { %7311 = vmatpush1.bf16.msra.mxu0 %v10940_v18  ;;  %7174 = vmatpush1.bf16.msra.mxu1 %v10949_v46  ;;  %v11014_v46 = vld [vmem:[#allocation6 + $0x14] ss:$40 sps:$4 sm:$0xff]  }
 0x4cb   :  { %7312 = vmatprep.subr.bf16.mxu0 %v10948_v3  ;;  %7175 = vmatprep.subr.bf16.mxu1 %v10957_v9  ;;  %v11011_v3 = vld [vmem:[#allocation6 + $0x5c] ss:$40 sps:$4 sm:$0xff]  }
 0x4ce   :  { %7313 = vmatpush1.bf16.msra.mxu0 %v10946_v58  ;;  %7176 = vmatpush1.bf16.msra.mxu1 %v10955_v25  ;;  %v11012_v58 = vld [vmem:[#allocation6 + $0x10] ss:$40 sps:$4 sm:$0xff]  }
 0x4cf   :  { %7323 = vmatprep.subr.bf16.mxu0 %v10954_v6  ;;  %7177 = vmatprep.subr.bf16.mxu1 %v10963_v52  ;;  %v11017_v6 = vld [vmem:[#allocation6 + $0xac] ss:$40 sps:$4 sm:$0xff]  }
 0x4d0   :  { %v11020_v52 = vld [vmem:[#allocation6 + $0x64] ss:$40 sps:$4 sm:$0xff]  }
 0x4d2   :  { %7178 = vmatpush1.bf16.msra.mxu1 %v10961_v50  ;;  %v11015_v50 = vld [vmem:[#allocation6 + $0xa8] ss:$40 sps:$4 sm:$0xff]  }
 0x4d3   :  { %7179 = vmatprep.subr.bf16.mxu1 %v10969_v14  ;;  %v11018_v14 = vld [vmem:[#allocation6 + $0x60] ss:$40 sps:$4 sm:$0xff]  }
 0x4d6   :  { %7180 = vmatpush1.bf16.msra.mxu1 %v10967_v51  ;;  %v11023_v51 = vld [vmem:[#allocation6 + $0xfc] ss:$40 sps:$4 sm:$0xff]  }
 0x4d7   :  { %7181 = vmatprep.subr.bf16.mxu1 %v10975_v62  ;;  %v11026_v62 = vld [vmem:[#allocation6 + $0xb4] ss:$40 sps:$4 sm:$0xff]  }
 0x4da   :  { %7182 = vmatpush1.bf16.msra.mxu1 %v10973_v0  ;;  %v11021_v0 = vld [vmem:[#allocation6 + $0xf8] ss:$40 sps:$4 sm:$0xff]  }
 0x4db   :  { %7183 = vmatprep.subr.bf16.mxu1 %v10981_v23  ;;  %v11024_v23 = vld [vmem:[#allocation6 + $0xb0] ss:$40 sps:$4 sm:$0xff]  }
 0x4de   :  { %7184 = vmatpush1.bf16.msra.mxu1 %v10979_v44  ;;  %v11029_v44 = vld [vmem:[#allocation6 + $0x14c] ss:$40 sps:$4 sm:$0xff]  }
 0x4df   :  { %7185 = vmatprep.subr.bf16.mxu1 %v10987_v20  ;;  %v11032_v20 = vld [vmem:[#allocation6 + $0x104] ss:$40 sps:$4 sm:$0xff]  }
 0x4e2   :  { %7186 = vmatpush1.bf16.msra.mxu1 %v10985_v30  ;;  %v11027_v30 = vld [vmem:[#allocation6 + $0x148] ss:$40 sps:$4 sm:$0xff]  }
 0x4e3   :  { %7187 = vmatprep.subr.bf16.mxu1 %v10993_v24  ;;  %v11030_v24 = vld [vmem:[#allocation6 + $0x100] ss:$40 sps:$4 sm:$0xff]  }
 0x4e6   :  { %7188 = vmatpush1.bf16.msra.mxu1 %v10991_v53  ;;  %v11035_v53 = vld [vmem:[#allocation6 + $0x19c] ss:$40 sps:$4 sm:$0xff]  }
 0x4e7   :  { %7189 = vmatprep.subr.bf16.mxu1 %v10999_v1  ;;  %v11038_v1 = vld [vmem:[#allocation6 + $0x154] ss:$40 sps:$4 sm:$0xff]  }
 0x4ea   :  { %7190 = vmatpush1.bf16.msra.mxu1 %v10997_v55  ;;  %v11033_v55 = vld [vmem:[#allocation6 + $0x198] ss:$40 sps:$4 sm:$0xff]  }
 0x4eb   :  { %7364 = vmatprep.subr.bf16.mxu1 %v11005_v45  ;;  %v11036_v45 = vld [vmem:[#allocation6 + $0x150] ss:$40 sps:$4 sm:$0xff]  }
 0x508   :  { %v1620_v11 = vpop.permute.xlu1 %1619 }
 0x509   :  { %v1644_v41 = vsel %vm414_vm5, %v13430_v59, %v1620_v11  ;;  %v1646_v32 = vsel %vm1645_vm6, %v1620_v11, %v1624_v39  ;;  %v10970_v59 = vld [vmem:[#allocation6 + $0x19f0] ss:$40 sps:$4 sm:$0xff]   ;;  %vm1633_vm5 = vcmask 850944   ;;  %v11044_v11 = vld [vmem:[#allocation6 + $0x1a4] ss:$40 sps:$4 sm:$0xff]  }
 0x50a   :  { %v13514_v27 = vpack.c.bf16 %v1644_v41, %v1644_v41  ;;  %v13516_v56 = vpack.c.bf16 %v1646_v32, %v1646_v32  ;;  %v11039_v41 = vld [vmem:[#allocation6 + $0x1e8] ss:$40 sps:$4 sm:$0xff]  }
 0x50b   :  { %v11042_v32 = vld [vmem:[#allocation6 + $0x1a0] ss:$40 sps:$4 sm:$0xff]  }
 0x50c   :  { %7314 = vmatprep.mubr.bf16.mxu0 %v13516_v56 }
 0x50d   :  { %7315 = vmatmul.mubr.bf16.vlgmr.msra.gmra.mrb[24].mxu0 %v13514_v27 }
 0x50e   :  { %7324 = vmatpush1.bf16.msra.mxu0 %v10952_v10  ;;  %v11047_v10 = vld [vmem:[#allocation6 + $0x23c] ss:$40 sps:$4 sm:$0xff]  }
 0x50f   :  { %7325 = vmatprep.subr.bf16.mxu0 %v10960_v42  ;;  %v11050_v42 = vld [vmem:[#allocation6 + $0x1f4] ss:$40 sps:$4 sm:$0xff]  }
 0x512   :  { %7326 = vmatpush1.bf16.msra.mxu0 %v10958_v19  ;;  %v11045_v19 = vld [vmem:[#allocation6 + $0x238] ss:$40 sps:$4 sm:$0xff]  }
 0x513   :  { %7327 = vmatprep.subr.bf16.mxu0 %v10966_v15  ;;  %v11048_v15 = vld [vmem:[#allocation6 + $0x1f0] ss:$40 sps:$4 sm:$0xff]  }
 0x516   :  { %7328 = vmatpush1.bf16.msra.mxu0 %v10964_v17  ;;  %v11053_v17 = vld [vmem:[#allocation6 + $0x28c] ss:$40 sps:$4 sm:$0xff]  }
 0x517   :  { %7329 = vmatprep.subr.bf16.mxu0 %v10972_v49  ;;  %v11056_v49 = vld [vmem:[#allocation6 + $0x244] ss:$40 sps:$4 sm:$0xff]  }
 0x51a   :  { %7330 = vmatpush1.bf16.msra.mxu0 %v10970_v59  ;;  %v11051_v59 = vld [vmem:[#allocation6 + $0x288] ss:$40 sps:$4 sm:$0xff]  }
 0x51b   :  { %7331 = vmatprep.subr.bf16.mxu0 %v10978_v43  ;;  %v11054_v43 = vld [vmem:[#allocation6 + $0x240] ss:$40 sps:$4 sm:$0xff]  }
 0x51e   :  { %7332 = vmatpush1.bf16.msra.mxu0 %v10976_v31  ;;  %v11059_v31 = vld [vmem:[#allocation6 + $0x2dc] ss:$40 sps:$4 sm:$0xff]  }
 0x51f   :  { %7333 = vmatprep.subr.bf16.mxu0 %v10984_v26  ;;  %v11062_v26 = vld [vmem:[#allocation6 + $0x294] ss:$40 sps:$4 sm:$0xff]  }
 0x522   :  { %7334 = vmatpush1.bf16.msra.mxu0 %v10982_v48  ;;  %v11057_v48 = vld [vmem:[#allocation6 + $0x2d8] ss:$40 sps:$4 sm:$0xff]  }
 0x523   :  { %7335 = vmatprep.subr.bf16.mxu0 %v10990_v38  ;;  %v11060_v38 = vld [vmem:[#allocation6 + $0x290] ss:$40 sps:$4 sm:$0xff]  }
 0x526   :  { %7336 = vmatpush1.bf16.msra.mxu0 %v10988_v4  ;;  %v11065_v4 = vld [vmem:[#allocation6 + $0x32c] ss:$40 sps:$4 sm:$0xff]  }
 0x527   :  { %7337 = vmatprep.subr.bf16.mxu0 %v10996_v29  ;;  %v11068_v29 = vld [vmem:[#allocation6 + $0x2e4] ss:$40 sps:$4 sm:$0xff]  }
 0x52a   :  { %7338 = vmatpush1.bf16.msra.mxu0 %v10994_v21  ;;  %v1596_v22 = vpop.permute.xlu1 %1595  ;;  %v11063_v21 = vld [vmem:[#allocation6 + $0x328] ss:$40 sps:$4 sm:$0xff]  }
 0x52b   :  { %7339 = vmatprep.subr.bf16.mxu0 %v11002_v12  ;;  %v1634_v28 = vsel %vm1633_vm5, %v13473_v40, %v1596_v22  ;;  %v1636_v54 = vsel %vm1635_vm9, %v1596_v22, %v13218_v60  ;;  %v11009_v60 = vld [vmem:[#allocation6 + $0x58] ss:$40 sps:$4 sm:$0xff]  }
 0x52c   :  { %v13523_v34 = vpack.c.bf16 %v1634_v28, %v1634_v28  ;;  %v13525_v35 = vpack.c.bf16 %v1636_v54, %v1636_v54  ;;  %v11066_v12 = vld [vmem:[#allocation6 + $0x2e0] ss:$40 sps:$4 sm:$0xff]   ;;  %v11072_v28 = vld [vmem:[#allocation6 + $0x330] ss:$40 sps:$4 sm:$0xff]   ;;  %v11077_v54 = vld [vmem:[#allocation6 + $0x3cc] ss:$40 sps:$4 sm:$0xff]  }
 0x52d   :  { %v11069_v22 = vld [vmem:[#allocation6 + $0x378] ss:$40 sps:$4 sm:$0xff]  }
 0x52e   :  { %7340 = vmatpush1.bf16.msra.mxu0 %v11000_v8  ;;  %v1628_v18 = vpop.permute.xlu0 %1627  ;;  %7191 = vmatprep.mubr.bf16.mxu1 %v13525_v35  ;;  %v11071_v8 = vld [vmem:[#allocation6 + $0x37c] ss:$40 sps:$4 sm:$0xff]  }
 0x52f   :  { %7341 = vmatprep.subr.bf16.mxu0 %v11008_v61  ;;  %v1647_v9 = vsel %vm864_vm10, %v1624_v39, %v1628_v18  ;;  %v13529_v40 = vpack.c.bf16 %v1628_v18, %v1628_v18  ;;  %7192 = vmatmul.mubr.bf16.vlgmr.msra.gmra.mrb[24].mxu1 %v13523_v34  ;;  %v11041_v39 = vld [vmem:[#allocation6 + $0x1ec] ss:$40 sps:$4 sm:$0xff]   ;;  %v11078_v18 = vld [vmem:[#allocation6 + $0x380] ss:$40 sps:$4 sm:$0xff]  }
 0x530   :  { %7365 = vmatpush1.bf16.msra.mxu1 %v11003_v36  ;;  %7396 = vmatprep.mubr.bf16.mxu1 %v13482_v13  ;;  %v13535_v25 = vpack.c.bf16 %v1647_v9, %v1647_v9  ;;  %v11074_v61 = vld [vmem:[#allocation6 + $0x334] ss:$40 sps:$4 sm:$0xff]   ;;  %v11080_v36 = vld [vmem:[#allocation6 + $0x384] ss:$40 sps:$4 sm:$0xff]   ;;  %v11081_v9 = vld [vmem:[#allocation6 + $0x418] ss:$40 sps:$4 sm:$0xff]  }
 0x531   :  { %9890 = vmatprep.mubr.msk.bf16.mxu0 %vm7114_vm11, %v13529_v40  ;;  %7366 = vmatprep.subr.bf16.mxu1 %v11011_v3  ;;  %v11083_v3 = vld [vmem:[#allocation6 + $0x41c] ss:$40 sps:$4 sm:$0xff]  }
 0x532   :  { %7342 = vmatpush1.bf16.msra.mxu0 %v11006_v47  ;;  %v11075_v47 = vld [vmem:[#allocation6 + $0x3c8] ss:$40 sps:$4 sm:$0xff]  }
 0x533   :  { %7610 = vmatprep.subr.bf16.mxu0 %v11014_v46  ;;  %v11086_v46 = vld [vmem:[#allocation6 + $0x3d4] ss:$40 sps:$4 sm:$0xff]  }
 0x534   :  { %7367 = vmatpush1.bf16.msra.mxu1 %v11009_v60  ;;  %v11084_v60 = vld [vmem:[#allocation6 + $0x3d0] ss:$40 sps:$4 sm:$0xff]  }
 0x535   :  { %7356 = vmatmul.mubr.bf16.vlgmr.msra.gmra.mrb[24].mxu0 %v13535_v25  ;;  %7368 = vmatprep.subr.bf16.mxu1 %v11017_v6  ;;  %v11092_v6 = vld [vmem:[#allocation6 + $0x424] ss:$40 sps:$4 sm:$0xff]  }
 0x536   :  { %7611 = vmatpush1.bf16.msra.mxu0 %v11012_v58  ;;  %7642 = vmatprep.mubr.bf16.mxu0 %v13482_v13  ;;  %v11089_v58 = vld [vmem:[#allocation6 + $0x46c] ss:$40 sps:$4 sm:$0xff]  }
 0x537   :  { %7612 = vmatprep.subr.bf16.mxu0 %v11020_v52  ;;  %v11087_v52 = vld [vmem:[#allocation6 + $0x468] ss:$40 sps:$4 sm:$0xff]  }
 0x538   :  { %7369 = vmatpush1.bf16.msra.mxu1 %v11015_v50  ;;  %v11090_v50 = vld [vmem:[#allocation6 + $0x420] ss:$40 sps:$4 sm:$0xff]  }
 0x539   :  { %7370 = vmatprep.subr.bf16.mxu1 %v11023_v51  ;;  %v11098_v51 = vld [vmem:[#allocation6 + $0x474] ss:$40 sps:$4 sm:$0xff]  }
 0x53a   :  { %7613 = vmatpush1.bf16.msra.mxu0 %v11018_v14  ;;  %v11095_v14 = vld [vmem:[#allocation6 + $0x4bc] ss:$40 sps:$4 sm:$0xff]  }
 0x53b   :  { %7614 = vmatprep.subr.bf16.mxu0 %v11026_v62  ;;  %v11093_v62 = vld [vmem:[#allocation6 + $0x4b8] ss:$40 sps:$4 sm:$0xff]  }
 0x53c   :  { %7371 = vmatpush1.bf16.msra.mxu1 %v11021_v0  ;;  %v11096_v0 = vld [vmem:[#allocation6 + $0x470] ss:$40 sps:$4 sm:$0xff]  }
 0x53d   :  { %7372 = vmatprep.subr.bf16.mxu1 %v11029_v44  ;;  %v11104_v44 = vld [vmem:[#allocation6 + $0x4c4] ss:$40 sps:$4 sm:$0xff]  }
 0x53e   :  { %7615 = vmatpush1.bf16.msra.mxu0 %v11024_v23  ;;  %v11101_v23 = vld [vmem:[#allocation6 + $0x50c] ss:$40 sps:$4 sm:$0xff]  }
 0x53f   :  { %7616 = vmatprep.subr.bf16.mxu0 %v11032_v20  ;;  %v11099_v20 = vld [vmem:[#allocation6 + $0x508] ss:$40 sps:$4 sm:$0xff]  }
 0x540   :  { %7373 = vmatpush1.bf16.msra.mxu1 %v11027_v30  ;;  %v11102_v30 = vld [vmem:[#allocation6 + $0x4c0] ss:$40 sps:$4 sm:$0xff]  }
 0x541   :  { %7374 = vmatprep.subr.bf16.mxu1 %v11035_v53  ;;  %v11110_v53 = vld [vmem:[#allocation6 + $0x514] ss:$40 sps:$4 sm:$0xff]  }
 0x542   :  { %7617 = vmatpush1.bf16.msra.mxu0 %v11030_v24  ;;  %v11107_v24 = vld [vmem:[#allocation6 + $0x55c] ss:$40 sps:$4 sm:$0xff]  }
 0x543   :  { %7618 = vmatprep.subr.bf16.mxu0 %v11038_v1  ;;  %v11105_v1 = vld [vmem:[#allocation6 + $0x558] ss:$40 sps:$4 sm:$0xff]  }
 0x544   :  { %7375 = vmatpush1.bf16.msra.mxu1 %v11033_v55  ;;  %v11108_v55 = vld [vmem:[#allocation6 + $0x510] ss:$40 sps:$4 sm:$0xff]  }
 0x545   :  { %7376 = vmatprep.subr.bf16.mxu1 %v11041_v39  ;;  %v11116_v39 = vld [vmem:[#allocation6 + $0x564] ss:$40 sps:$4 sm:$0xff]  }
 0x546   :  { %7619 = vmatpush1.bf16.msra.mxu0 %v11036_v45  ;;  %v11113_v45 = vld [vmem:[#allocation6 + $0x5ac] ss:$40 sps:$4 sm:$0xff]  }
 0x547   :  { %7620 = vmatprep.subr.bf16.mxu0 %v11044_v11  ;;  %v11111_v11 = vld [vmem:[#allocation6 + $0x5a8] ss:$40 sps:$4 sm:$0xff]  }
 0x548   :  { %7377 = vmatpush1.bf16.msra.mxu1 %v11039_v41  ;;  %v11114_v41 = vld [vmem:[#allocation6 + $0x560] ss:$40 sps:$4 sm:$0xff]  }
 0x549   :  { %7378 = vmatprep.subr.bf16.mxu1 %v11047_v10  ;;  %v11122_v10 = vld [vmem:[#allocation6 + $0x5b4] ss:$40 sps:$4 sm:$0xff]  }
 0x54a   :  { %7621 = vmatpush1.bf16.msra.mxu0 %v11042_v32  ;;  %v11119_v32 = vld [vmem:[#allocation6 + $0x5fc] ss:$40 sps:$4 sm:$0xff]  }
 0x54b   :  { %7622 = vmatprep.subr.bf16.mxu0 %v11050_v42  ;;  %v11117_v42 = vld [vmem:[#allocation6 + $0x5f8] ss:$40 sps:$4 sm:$0xff]  }
 0x54c   :  { %7379 = vmatpush1.bf16.msra.mxu1 %v11045_v19  ;;  %v11120_v19 = vld [vmem:[#allocation6 + $0x5b0] ss:$40 sps:$4 sm:$0xff]  }
 0x54d   :  { %7380 = vmatprep.subr.bf16.mxu1 %v11053_v17  ;;  %v11128_v17 = vld [vmem:[#allocation6 + $0x604] ss:$40 sps:$4 sm:$0xff]  }
 0x54e   :  { %7623 = vmatpush1.bf16.msra.mxu0 %v11048_v15  ;;  %v11125_v15 = vld [vmem:[#allocation6 + $0x64c] ss:$40 sps:$4 sm:$0xff]  }
 0x54f   :  { %7624 = vmatprep.subr.bf16.mxu0 %v11056_v49  ;;  %v11123_v49 = vld [vmem:[#allocation6 + $0x648] ss:$40 sps:$4 sm:$0xff]  }
 0x550   :  { %7381 = vmatpush1.bf16.msra.mxu1 %v11051_v59  ;;  %v11126_v59 = vld [vmem:[#allocation6 + $0x600] ss:$40 sps:$4 sm:$0xff]  }
 0x551   :  { %7382 = vmatprep.subr.bf16.mxu1 %v11059_v31  ;;  %v11134_v31 = vld [vmem:[#allocation6 + $0x654] ss:$40 sps:$4 sm:$0xff]  }
 0x552   :  { %7625 = vmatpush1.bf16.msra.mxu0 %v11054_v43  ;;  %v11131_v43 = vld [vmem:[#allocation6 + $0x69c] ss:$40 sps:$4 sm:$0xff]  }
 0x553   :  { %7626 = vmatprep.subr.bf16.mxu0 %v11062_v26  ;;  %v11129_v26 = vld [vmem:[#allocation6 + $0x698] ss:$40 sps:$4 sm:$0xff]  }
 0x554   :  { %7383 = vmatpush1.bf16.msra.mxu1 %v11057_v48  ;;  %v11132_v48 = vld [vmem:[#allocation6 + $0x650] ss:$40 sps:$4 sm:$0xff]  }
 0x555   :  { %7384 = vmatprep.subr.bf16.mxu1 %v11065_v4  ;;  %v11140_v4 = vld [vmem:[#allocation6 + $0x6a4] ss:$40 sps:$4 sm:$0xff]  }
 0x556   :  { %7627 = vmatpush1.bf16.msra.mxu0 %v11060_v38  ;;  %v11137_v38 = vld [vmem:[#allocation6 + $0x6ec] ss:$40 sps:$4 sm:$0xff]  }
 0x557   :  { %7628 = vmatprep.subr.bf16.mxu0 %v11068_v29  ;;  %v11135_v29 = vld [vmem:[#allocation6 + $0x6e8] ss:$40 sps:$4 sm:$0xff]  }
 0x558   :  { %7385 = vmatpush1.bf16.msra.mxu1 %v11063_v21  ;;  %v11138_v21 = vld [vmem:[#allocation6 + $0x6a0] ss:$40 sps:$4 sm:$0xff]  }
 0x559   :  { %7386 = vmatprep.subr.bf16.mxu1 %v11071_v8  ;;  %v11146_v8 = vld [vmem:[#allocation6 + $0x6f4] ss:$40 sps:$4 sm:$0xff]  }
 0x55a   :  { %7629 = vmatpush1.bf16.msra.mxu0 %v11066_v12  ;;  %v11143_v12 = vld [vmem:[#allocation6 + $0x73c] ss:$40 sps:$4 sm:$0xff]  }
 0x55b   :  { %7630 = vmatprep.subr.bf16.mxu0 %v11074_v61  ;;  %v11141_v61 = vld [vmem:[#allocation6 + $0x738] ss:$40 sps:$4 sm:$0xff]  }
 0x55c   :  { %7387 = vmatpush1.bf16.msra.mxu1 %v11069_v22  ;;  %v11144_v22 = vld [vmem:[#allocation6 + $0x6f0] ss:$40 sps:$4 sm:$0xff]  }
 0x55d   :  { %7388 = vmatprep.subr.bf16.mxu1 %v11077_v54  ;;  %v11152_v54 = vld [vmem:[#allocation6 + $0x744] ss:$40 sps:$4 sm:$0xff]  }
 0x55e   :  { %7631 = vmatpush1.bf16.msra.mxu0 %v11072_v28  ;;  %v11149_v28 = vld [vmem:[#allocation6 + $0x78c] ss:$40 sps:$4 sm:$0xff]  }
 0x55f   :  { %7632 = vmatprep.subr.bf16.mxu0 %v11080_v36  ;;  %v11147_v36 = vld [vmem:[#allocation6 + $0x788] ss:$40 sps:$4 sm:$0xff]  }
 0x560   :  { %7389 = vmatpush1.bf16.msra.mxu1 %v11075_v47  ;;  %v11150_v47 = vld [vmem:[#allocation6 + $0x740] ss:$40 sps:$4 sm:$0xff]  }
 0x561   :  { %7390 = vmatprep.subr.bf16.mxu1 %v11083_v3  ;;  %v11158_v3 = vld [vmem:[#allocation6 + $0x794] ss:$40 sps:$4 sm:$0xff]  }
 0x562   :  { %7633 = vmatpush1.bf16.msra.mxu0 %v11078_v18  ;;  %v11155_v18 = vld [vmem:[#allocation6 + $0x7dc] ss:$40 sps:$4 sm:$0xff]  }
 0x563   :  { %7634 = vmatprep.subr.bf16.mxu0 %v11086_v46  ;;  %v11153_v46 = vld [vmem:[#allocation6 + $0x7d8] ss:$40 sps:$4 sm:$0xff]  }
 0x564   :  { %7391 = vmatpush1.bf16.msra.mxu1 %v11081_v9  ;;  %v11156_v9 = vld [vmem:[#allocation6 + $0x790] ss:$40 sps:$4 sm:$0xff]  }
 0x565   :  { %7392 = vmatprep.subr.bf16.mxu1 %v11089_v58  ;;  %v11164_v58 = vld [vmem:[#allocation6 + $0x7e4] ss:$40 sps:$4 sm:$0xff]  }
 0x566   :  { %7635 = vmatpush1.bf16.msra.mxu0 %v11084_v60  ;;  %v11161_v60 = vld [vmem:[#allocation6 + $0x82c] ss:$40 sps:$4 sm:$0xff]  }
 0x567   :  { %7636 = vmatprep.subr.bf16.mxu0 %v11092_v6  ;;  %v11159_v6 = vld [vmem:[#allocation6 + $0x828] ss:$40 sps:$4 sm:$0xff]  }
 0x568   :  { %7393 = vmatpush1.bf16.msra.mxu1 %v11087_v52  ;;  %v11162_v52 = vld [vmem:[#allocation6 + $0x7e0] ss:$40 sps:$4 sm:$0xff]  }
 0x569   :  { %7394 = vmatprep.subr.bf16.mxu1 %v11095_v14  ;;  %v11170_v14 = vld [vmem:[#allocation6 + $0x834] ss:$40 sps:$4 sm:$0xff]  }
 0x56a   :  { %7637 = vmatpush1.bf16.msra.mxu0 %v11090_v50  ;;  %v11167_v50 = vld [vmem:[#allocation6 + $0x87c] ss:$40 sps:$4 sm:$0xff]  }
 0x56b   :  { %7638 = vmatprep.subr.bf16.mxu0 %v11098_v51  ;;  %v11165_v51 = vld [vmem:[#allocation6 + $0x878] ss:$40 sps:$4 sm:$0xff]  }
 0x56c   :  { %7395 = vmatpush1.bf16.msra.mxu1 %v11093_v62  ;;  %v11168_v62 = vld [vmem:[#allocation6 + $0x830] ss:$40 sps:$4 sm:$0xff]  }
 0x56d   :  { %7405 = vmatprep.subr.bf16.mxu1 %v11101_v23  ;;  %v11176_v23 = vld [vmem:[#allocation6 + $0x884] ss:$40 sps:$4 sm:$0xff]  }
 0x56e   :  { %7639 = vmatpush1.bf16.msra.mxu0 %v11096_v0  ;;  %v11173_v0 = vld [vmem:[#allocation6 + $0x8cc] ss:$40 sps:$4 sm:$0xff]  }
 0x56f   :  { %7640 = vmatprep.subr.bf16.mxu0 %v11104_v44  ;;  %7397 = vmatmul.mubr.bf16.vlgmr.msra.gmra.mrb[28].mxu1 %v13485_v16  ;;  %v11171_v44 = vld [vmem:[#allocation6 + $0x8c8] ss:$40 sps:$4 sm:$0xff]  }
 0x570   :  { %7406 = vmatpush1.bf16.msra.mxu1 %v11099_v20  ;;  %7437 = vmatprep.mubr.bf16.mxu1 %v13525_v35  ;;  %v11174_v20 = vld [vmem:[#allocation6 + $0x880] ss:$40 sps:$4 sm:$0xff]  }
 0x571   :  { %7407 = vmatprep.subr.bf16.mxu1 %v11107_v24  ;;  %v11182_v24 = vld [vmem:[#allocation6 + $0x8d4] ss:$40 sps:$4 sm:$0xff]  }
 0x572   :  { %7641 = vmatpush1.bf16.msra.mxu0 %v11102_v30  ;;  %v11179_v30 = vld [vmem:[#allocation6 + $0x91c] ss:$40 sps:$4 sm:$0xff]  }
 0x573   :  { %7651 = vmatprep.subr.bf16.mxu0 %v11110_v53  ;;  %v11177_v53 = vld [vmem:[#allocation6 + $0x918] ss:$40 sps:$4 sm:$0xff]  }
 0x574   :  { %7408 = vmatpush1.bf16.msra.mxu1 %v11105_v1  ;;  %v11180_v1 = vld [vmem:[#allocation6 + $0x8d0] ss:$40 sps:$4 sm:$0xff]  }
 0x575   :  { %7643 = vmatmul.mubr.bf16.vlgmr.msra.gmra.mrb[28].mxu0 %v13485_v16  ;;  %7409 = vmatprep.subr.bf16.mxu1 %v11113_v45  ;;  %v11188_v45 = vld [vmem:[#allocation6 + $0x924] ss:$40 sps:$4 sm:$0xff]  }
 0x576   :  { %7652 = vmatpush1.bf16.msra.mxu0 %v11108_v55  ;;  %7683 = vmatprep.mubr.bf16.mxu0 %v13525_v35  ;;  %v11185_v55 = vld [vmem:[#allocation6 + $0x96c] ss:$40 sps:$4 sm:$0xff]  }
 0x577   :  { %7653 = vmatprep.subr.bf16.mxu0 %v11116_v39  ;;  %v11183_v39 = vld [vmem:[#allocation6 + $0x968] ss:$40 sps:$4 sm:$0xff]  }
 0x578   :  { %7410 = vmatpush1.bf16.msra.mxu1 %v11111_v11  ;;  %v11186_v11 = vld [vmem:[#allocation6 + $0x920] ss:$40 sps:$4 sm:$0xff]  }
 0x579   :  { %7411 = vmatprep.subr.bf16.mxu1 %v11119_v32  ;;  %v11194_v32 = vld [vmem:[#allocation6 + $0x974] ss:$40 sps:$4 sm:$0xff]  }
 0x57a   :  { %7654 = vmatpush1.bf16.msra.mxu0 %v11114_v41  ;;  %v11191_v41 = vld [vmem:[#allocation6 + $0x9bc] ss:$40 sps:$4 sm:$0xff]  }
 0x57b   :  { %7655 = vmatprep.subr.bf16.mxu0 %v11122_v10  ;;  %v11189_v10 = vld [vmem:[#allocation6 + $0x9b8] ss:$40 sps:$4 sm:$0xff]  }
 0x57c   :  { %7412 = vmatpush1.bf16.msra.mxu1 %v11117_v42  ;;  %v11192_v42 = vld [vmem:[#allocation6 + $0x970] ss:$40 sps:$4 sm:$0xff]  }
 0x57d   :  { %7413 = vmatprep.subr.bf16.mxu1 %v11125_v15  ;;  %v11200_v15 = vld [vmem:[#allocation6 + $0x9c4] ss:$40 sps:$4 sm:$0xff]  }
 0x57e   :  { %7656 = vmatpush1.bf16.msra.mxu0 %v11120_v19  ;;  %v11197_v19 = vld [vmem:[#allocation6 + $0xa0c] ss:$40 sps:$4 sm:$0xff]  }
 0x57f   :  { %7657 = vmatprep.subr.bf16.mxu0 %v11128_v17  ;;  %v11195_v17 = vld [vmem:[#allocation6 + $0xa08] ss:$40 sps:$4 sm:$0xff]  }
 0x580   :  { %7414 = vmatpush1.bf16.msra.mxu1 %v11123_v49  ;;  %v11198_v49 = vld [vmem:[#allocation6 + $0x9c0] ss:$40 sps:$4 sm:$0xff]  }
 0x581   :  { %7415 = vmatprep.subr.bf16.mxu1 %v11131_v43  ;;  %v11206_v43 = vld [vmem:[#allocation6 + $0xa14] ss:$40 sps:$4 sm:$0xff]  }
 0x582   :  { %7658 = vmatpush1.bf16.msra.mxu0 %v11126_v59  ;;  %v11203_v59 = vld [vmem:[#allocation6 + $0xa5c] ss:$40 sps:$4 sm:$0xff]  }
 0x583   :  { %7659 = vmatprep.subr.bf16.mxu0 %v11134_v31  ;;  %v11201_v31 = vld [vmem:[#allocation6 + $0xa58] ss:$40 sps:$4 sm:$0xff]  }
 0x584   :  { %7416 = vmatpush1.bf16.msra.mxu1 %v11129_v26  ;;  %v11204_v26 = vld [vmem:[#allocation6 + $0xa10] ss:$40 sps:$4 sm:$0xff]  }
 0x585   :  { %7417 = vmatprep.subr.bf16.mxu1 %v11137_v38  ;;  %v11212_v38 = vld [vmem:[#allocation6 + $0xa64] ss:$40 sps:$4 sm:$0xff]  }
 0x586   :  { %7660 = vmatpush1.bf16.msra.mxu0 %v11132_v48  ;;  %v11209_v48 = vld [vmem:[#allocation6 + $0xaac] ss:$40 sps:$4 sm:$0xff]  }
 0x587   :  { %7661 = vmatprep.subr.bf16.mxu0 %v11140_v4  ;;  %v11207_v4 = vld [vmem:[#allocation6 + $0xaa8] ss:$40 sps:$4 sm:$0xff]  }
 0x588   :  { %7418 = vmatpush1.bf16.msra.mxu1 %v11135_v29  ;;  %v11210_v29 = vld [vmem:[#allocation6 + $0xa60] ss:$40 sps:$4 sm:$0xff]  }
 0x589   :  { %7419 = vmatprep.subr.bf16.mxu1 %v11143_v12  ;;  %v11218_v12 = vld [vmem:[#allocation6 + $0xab4] ss:$40 sps:$4 sm:$0xff]  }
 0x58a   :  { %7662 = vmatpush1.bf16.msra.mxu0 %v11138_v21  ;;  %v11215_v21 = vld [vmem:[#allocation6 + $0xafc] ss:$40 sps:$4 sm:$0xff]  }
 0x58b   :  { %7663 = vmatprep.subr.bf16.mxu0 %v11146_v8  ;;  %v11213_v8 = vld [vmem:[#allocation6 + $0xaf8] ss:$40 sps:$4 sm:$0xff]  }
 0x58c   :  { %7420 = vmatpush1.bf16.msra.mxu1 %v11141_v61  ;;  %v11216_v61 = vld [vmem:[#allocation6 + $0xab0] ss:$40 sps:$4 sm:$0xff]  }
 0x58d   :  { %7421 = vmatprep.subr.bf16.mxu1 %v11149_v28  ;;  %v11224_v28 = vld [vmem:[#allocation6 + $0xb04] ss:$40 sps:$4 sm:$0xff]  }
 0x58e   :  { %7664 = vmatpush1.bf16.msra.mxu0 %v11144_v22  ;;  %v11221_v22 = vld [vmem:[#allocation6 + $0xb4c] ss:$40 sps:$4 sm:$0xff]  }
 0x58f   :  { %7665 = vmatprep.subr.bf16.mxu0 %v11152_v54  ;;  %v11219_v54 = vld [vmem:[#allocation6 + $0xb48] ss:$40 sps:$4 sm:$0xff]  }
 0x590   :  { %7422 = vmatpush1.bf16.msra.mxu1 %v11147_v36  ;;  %v11222_v36 = vld [vmem:[#allocation6 + $0xb00] ss:$40 sps:$4 sm:$0xff]  }
 0x591   :  { %7423 = vmatprep.subr.bf16.mxu1 %v11155_v18  ;;  %v11230_v18 = vld [vmem:[#allocation6 + $0xb54] ss:$40 sps:$4 sm:$0xff]  }
 0x592   :  { %7666 = vmatpush1.bf16.msra.mxu0 %v11150_v47  ;;  %v11227_v47 = vld [vmem:[#allocation6 + $0xb9c] ss:$40 sps:$4 sm:$0xff]  }
 0x593   :  { %7667 = vmatprep.subr.bf16.mxu0 %v11158_v3  ;;  %v11225_v3 = vld [vmem:[#allocation6 + $0xb98] ss:$40 sps:$4 sm:$0xff]  }
 0x594   :  { %7424 = vmatpush1.bf16.msra.mxu1 %v11153_v46  ;;  %v11228_v46 = vld [vmem:[#allocation6 + $0xb50] ss:$40 sps:$4 sm:$0xff]  }
 0x595   :  { %7425 = vmatprep.subr.bf16.mxu1 %v11161_v60  ;;  %v11236_v60 = vld [vmem:[#allocation6 + $0xba4] ss:$40 sps:$4 sm:$0xff]  }
 0x596   :  { %7668 = vmatpush1.bf16.msra.mxu0 %v11156_v9  ;;  %v11233_v9 = vld [vmem:[#allocation6 + $0xbec] ss:$40 sps:$4 sm:$0xff]  }
 0x597   :  { %7669 = vmatprep.subr.bf16.mxu0 %v11164_v58  ;;  %v11231_v58 = vld [vmem:[#allocation6 + $0xbe8] ss:$40 sps:$4 sm:$0xff]  }
 0x598   :  { %7426 = vmatpush1.bf16.msra.mxu1 %v11159_v6  ;;  %v11234_v6 = vld [vmem:[#allocation6 + $0xba0] ss:$40 sps:$4 sm:$0xff]  }
 0x599   :  { %7427 = vmatprep.subr.bf16.mxu1 %v11167_v50  ;;  %v11242_v50 = vld [vmem:[#allocation6 + $0xbf4] ss:$40 sps:$4 sm:$0xff]  }
 0x59a   :  { %7670 = vmatpush1.bf16.msra.mxu0 %v11162_v52  ;;  %v11239_v52 = vld [vmem:[#allocation6 + $0xc3c] ss:$40 sps:$4 sm:$0xff]  }
 0x59b   :  { %7671 = vmatprep.subr.bf16.mxu0 %v11170_v14  ;;  %v11237_v14 = vld [vmem:[#allocation6 + $0xc38] ss:$40 sps:$4 sm:$0xff]  }
 0x59c   :  { %7428 = vmatpush1.bf16.msra.mxu1 %v11165_v51  ;;  %v11240_v51 = vld [vmem:[#allocation6 + $0xbf0] ss:$40 sps:$4 sm:$0xff]  }
 0x59d   :  { %7429 = vmatprep.subr.bf16.mxu1 %v11173_v0  ;;  %v11248_v0 = vld [vmem:[#allocation6 + $0xc44] ss:$40 sps:$4 sm:$0xff]  }
 0x59e   :  { %7672 = vmatpush1.bf16.msra.mxu0 %v11168_v62  ;;  %v11245_v62 = vld [vmem:[#allocation6 + $0xc8c] ss:$40 sps:$4 sm:$0xff]  }
 0x59f   :  { %7673 = vmatprep.subr.bf16.mxu0 %v11176_v23  ;;  %v11243_v23 = vld [vmem:[#allocation6 + $0xc88] ss:$40 sps:$4 sm:$0xff]  }
 0x5a0   :  { %7430 = vmatpush1.bf16.msra.mxu1 %v11171_v44  ;;  %v11246_v44 = vld [vmem:[#allocation6 + $0xc40] ss:$40 sps:$4 sm:$0xff]  }
 0x5a1   :  { %7431 = vmatprep.subr.bf16.mxu1 %v11179_v30  ;;  %v11254_v30 = vld [vmem:[#allocation6 + $0xc94] ss:$40 sps:$4 sm:$0xff]  }
 0x5a2   :  { %7674 = vmatpush1.bf16.msra.mxu0 %v11174_v20  ;;  %v11251_v20 = vld [vmem:[#allocation6 + $0xcdc] ss:$40 sps:$4 sm:$0xff]  }
 0x5a3   :  { %7675 = vmatprep.subr.bf16.mxu0 %v11182_v24  ;;  %v11249_v24 = vld [vmem:[#allocation6 + $0xcd8] ss:$40 sps:$4 sm:$0xff]  }
 0x5a4   :  { %7432 = vmatpush1.bf16.msra.mxu1 %v11177_v53  ;;  %v11252_v53 = vld [vmem:[#allocation6 + $0xc90] ss:$40 sps:$4 sm:$0xff]  }
 0x5a5   :  { %7433 = vmatprep.subr.bf16.mxu1 %v11185_v55  ;;  %v11260_v55 = vld [vmem:[#allocation6 + $0xce4] ss:$40 sps:$4 sm:$0xff]  }
 0x5a6   :  { %7676 = vmatpush1.bf16.msra.mxu0 %v11180_v1  ;;  %v11257_v1 = vld [vmem:[#allocation6 + $0xd2c] ss:$40 sps:$4 sm:$0xff]  }
 0x5a7   :  { %7677 = vmatprep.subr.bf16.mxu0 %v11188_v45  ;;  %v11255_v45 = vld [vmem:[#allocation6 + $0xd28] ss:$40 sps:$4 sm:$0xff]  }
 0x5a8   :  { %7434 = vmatpush1.bf16.msra.mxu1 %v11183_v39  ;;  %v11258_v39 = vld [vmem:[#allocation6 + $0xce0] ss:$40 sps:$4 sm:$0xff]  }
 0x5a9   :  { %7435 = vmatprep.subr.bf16.mxu1 %v11191_v41  ;;  %v11266_v41 = vld [vmem:[#allocation6 + $0xd34] ss:$40 sps:$4 sm:$0xff]  }
 0x5aa   :  { %7678 = vmatpush1.bf16.msra.mxu0 %v11186_v11  ;;  %v11263_v11 = vld [vmem:[#allocation6 + $0xd7c] ss:$40 sps:$4 sm:$0xff]  }
 0x5ab   :  { %7679 = vmatprep.subr.bf16.mxu0 %v11194_v32  ;;  %v11261_v32 = vld [vmem:[#allocation6 + $0xd78] ss:$40 sps:$4 sm:$0xff]  }
 0x5ac   :  { %7436 = vmatpush1.bf16.msra.mxu1 %v11189_v10  ;;  %v11264_v10 = vld [vmem:[#allocation6 + $0xd30] ss:$40 sps:$4 sm:$0xff]  }
 0x5ad   :  { %7446 = vmatprep.subr.bf16.mxu1 %v11197_v19  ;;  %v11272_v19 = vld [vmem:[#allocation6 + $0xd84] ss:$40 sps:$4 sm:$0xff]  }
 0x5ae   :  { %7680 = vmatpush1.bf16.msra.mxu0 %v11192_v42  ;;  %v11269_v42 = vld [vmem:[#allocation6 + $0xdcc] ss:$40 sps:$4 sm:$0xff]  }
 0x5af   :  { %7681 = vmatprep.subr.bf16.mxu0 %v11200_v15  ;;  %7438 = vmatmul.mubr.bf16.vlgmr.msra.gmra.mrb[28].mxu1 %v13523_v34  ;;  %v11267_v15 = vld [vmem:[#allocation6 + $0xdc8] ss:$40 sps:$4 sm:$0xff]  }
 0x5b0   :  { %7447 = vmatpush1.bf16.msra.mxu1 %v11195_v17  ;;  %7478 = vmatprep.mubr.bf16.mxu1 %v13233_v33  ;;  %v11270_v17 = vld [vmem:[#allocation6 + $0xd80] ss:$40 sps:$4 sm:$0xff]  }
 0x5b1   :  { %7448 = vmatprep.subr.bf16.mxu1 %v11203_v59  ;;  %v11278_v59 = vld [vmem:[#allocation6 + $0xdd4] ss:$40 sps:$4 sm:$0xff]  }
 0x5b2   :  { %7682 = vmatpush1.bf16.msra.mxu0 %v11198_v49  ;;  %v11275_v49 = vld [vmem:[#allocation6 + $0xe1c] ss:$40 sps:$4 sm:$0xff]  }
 0x5b3   :  { %7692 = vmatprep.subr.bf16.mxu0 %v11206_v43  ;;  %v11273_v43 = vld [vmem:[#allocation6 + $0xe18] ss:$40 sps:$4 sm:$0xff]  }
 0x5b4   :  { %7449 = vmatpush1.bf16.msra.mxu1 %v11201_v31  ;;  %v11276_v31 = vld [vmem:[#allocation6 + $0xdd0] ss:$40 sps:$4 sm:$0xff]  }
 0x5b5   :  { %7684 = vmatmul.mubr.bf16.vlgmr.msra.gmra.mrb[28].mxu0 %v13523_v34  ;;  %7450 = vmatprep.subr.bf16.mxu1 %v11209_v48  ;;  %v11284_v48 = vld [vmem:[#allocation6 + $0xe24] ss:$40 sps:$4 sm:$0xff]  }
 0x5b6   :  { %7693 = vmatpush1.bf16.msra.mxu0 %v11204_v26  ;;  %7724 = vmatprep.mubr.bf16.mxu0 %v13233_v33  ;;  %v11281_v26 = vld [vmem:[#allocation6 + $0xe6c] ss:$40 sps:$4 sm:$0xff]  }
 0x5b7   :  { %7694 = vmatprep.subr.bf16.mxu0 %v11212_v38  ;;  %v11279_v38 = vld [vmem:[#allocation6 + $0xe68] ss:$40 sps:$4 sm:$0xff]  }
 0x5b8   :  { %7451 = vmatpush1.bf16.msra.mxu1 %v11207_v4  ;;  %v11282_v4 = vld [vmem:[#allocation6 + $0xe20] ss:$40 sps:$4 sm:$0xff]  }
 0x5b9   :  { %7452 = vmatprep.subr.bf16.mxu1 %v11215_v21  ;;  %v11290_v21 = vld [vmem:[#allocation6 + $0xe74] ss:$40 sps:$4 sm:$0xff]  }
 0x5ba   :  { %7695 = vmatpush1.bf16.msra.mxu0 %v11210_v29  ;;  %v11287_v29 = vld [vmem:[#allocation6 + $0xebc] ss:$40 sps:$4 sm:$0xff]  }
 0x5bb   :  { %7696 = vmatprep.subr.bf16.mxu0 %v11218_v12  ;;  %v11285_v12 = vld [vmem:[#allocation6 + $0xeb8] ss:$40 sps:$4 sm:$0xff]  }
 0x5bc   :  { %7453 = vmatpush1.bf16.msra.mxu1 %v11213_v8  ;;  %v11288_v8 = vld [vmem:[#allocation6 + $0xe70] ss:$40 sps:$4 sm:$0xff]  }
 0x5bd   :  { %7454 = vmatprep.subr.bf16.mxu1 %v11221_v22  ;;  %v11296_v22 = vld [vmem:[#allocation6 + $0xec4] ss:$40 sps:$4 sm:$0xff]  }
 0x5be   :  { %7697 = vmatpush1.bf16.msra.mxu0 %v11216_v61  ;;  %v11293_v61 = vld [vmem:[#allocation6 + $0xf0c] ss:$40 sps:$4 sm:$0xff]  }
 0x5bf   :  { %7698 = vmatprep.subr.bf16.mxu0 %v11224_v28  ;;  %v11291_v28 = vld [vmem:[#allocation6 + $0xf08] ss:$40 sps:$4 sm:$0xff]  }
 0x5c0   :  { %7455 = vmatpush1.bf16.msra.mxu1 %v11219_v54  ;;  %v11294_v54 = vld [vmem:[#allocation6 + $0xec0] ss:$40 sps:$4 sm:$0xff]  }
 0x5c1   :  { %7456 = vmatprep.subr.bf16.mxu1 %v11227_v47  ;;  %v11302_v47 = vld [vmem:[#allocation6 + $0xf14] ss:$40 sps:$4 sm:$0xff]  }
 0x5c2   :  { %7699 = vmatpush1.bf16.msra.mxu0 %v11222_v36  ;;  %v11299_v36 = vld [vmem:[#allocation6 + $0xf5c] ss:$40 sps:$4 sm:$0xff]  }
 0x5c3   :  { %7700 = vmatprep.subr.bf16.mxu0 %v11230_v18  ;;  %v11297_v18 = vld [vmem:[#allocation6 + $0xf58] ss:$40 sps:$4 sm:$0xff]  }
 0x5c4   :  { %7457 = vmatpush1.bf16.msra.mxu1 %v11225_v3  ;;  %v11300_v3 = vld [vmem:[#allocation6 + $0xf10] ss:$40 sps:$4 sm:$0xff]  }
 0x5c5   :  { %7458 = vmatprep.subr.bf16.mxu1 %v11233_v9  ;;  %v11308_v9 = vld [vmem:[#allocation6 + $0xf64] ss:$40 sps:$4 sm:$0xff]  }
 0x5c6   :  { %7701 = vmatpush1.bf16.msra.mxu0 %v11228_v46  ;;  %v11305_v46 = vld [vmem:[#allocation6 + $0xfac] ss:$40 sps:$4 sm:$0xff]  }
 0x5c7   :  { %7702 = vmatprep.subr.bf16.mxu0 %v11236_v60  ;;  %v11303_v60 = vld [vmem:[#allocation6 + $0xfa8] ss:$40 sps:$4 sm:$0xff]  }
 0x5c8   :  { %7459 = vmatpush1.bf16.msra.mxu1 %v11231_v58  ;;  %v11306_v58 = vld [vmem:[#allocation6 + $0xf60] ss:$40 sps:$4 sm:$0xff]  }
 0x5c9   :  { %7460 = vmatprep.subr.bf16.mxu1 %v11239_v52  ;;  %v11314_v52 = vld [vmem:[#allocation6 + $0xfb4] ss:$40 sps:$4 sm:$0xff]  }
 0x5ca   :  { %7703 = vmatpush1.bf16.msra.mxu0 %v11234_v6  ;;  %v11311_v6 = vld [vmem:[#allocation6 + $0xffc] ss:$40 sps:$4 sm:$0xff]  }
 0x5cb   :  { %7704 = vmatprep.subr.bf16.mxu0 %v11242_v50  ;;  %v11309_v50 = vld [vmem:[#allocation6 + $0xff8] ss:$40 sps:$4 sm:$0xff]  }
 0x5cc   :  { %7461 = vmatpush1.bf16.msra.mxu1 %v11237_v14  ;;  %v11312_v14 = vld [vmem:[#allocation6 + $0xfb0] ss:$40 sps:$4 sm:$0xff]  }
 0x5cd   :  { %7462 = vmatprep.subr.bf16.mxu1 %v11245_v62  ;;  %v11320_v62 = vld [vmem:[#allocation6 + $0x1004] ss:$40 sps:$4 sm:$0xff]  }
 0x5ce   :  { %7705 = vmatpush1.bf16.msra.mxu0 %v11240_v51  ;;  %v11317_v51 = vld [vmem:[#allocation6 + $0x104c] ss:$40 sps:$4 sm:$0xff]  }
 0x5cf   :  { %7706 = vmatprep.subr.bf16.mxu0 %v11248_v0  ;;  %v11315_v0 = vld [vmem:[#allocation6 + $0x1048] ss:$40 sps:$4 sm:$0xff]  }
 0x5d0   :  { %7463 = vmatpush1.bf16.msra.mxu1 %v11243_v23  ;;  %v11318_v23 = vld [vmem:[#allocation6 + $0x1000] ss:$40 sps:$4 sm:$0xff]  }
 0x5d1   :  { %7464 = vmatprep.subr.bf16.mxu1 %v11251_v20  ;;  %v11326_v20 = vld [vmem:[#allocation6 + $0x1054] ss:$40 sps:$4 sm:$0xff]  }
 0x5d2   :  { %7707 = vmatpush1.bf16.msra.mxu0 %v11246_v44  ;;  %v11323_v44 = vld [vmem:[#allocation6 + $0x109c] ss:$40 sps:$4 sm:$0xff]  }
 0x5d3   :  { %7708 = vmatprep.subr.bf16.mxu0 %v11254_v30  ;;  %v2560_v30 = vld [vmem:[#allocation7] sm:$0xff] }
 0x5d4   :  { %7465 = vmatpush1.bf16.msra.mxu1 %v11249_v24  ;;  %v11321_v24 = vld [vmem:[#allocation6 + $0x1098] ss:$40 sps:$4 sm:$0xff]  }
 0x5d5   :  { %7466 = vmatprep.subr.bf16.mxu1 %v11257_v1  ;;  %v11329_v1 = vld [vmem:[#allocation6 + $0x10ec] ss:$40 sps:$4 sm:$0xff]  }
 0x5d6   :  { %7709 = vmatpush1.bf16.msra.mxu0 %v11252_v53  ;;  %v11324_v53 = vld [vmem:[#allocation6 + $0x1050] ss:$40 sps:$4 sm:$0xff]  }
 0x5d7   :  { %7710 = vmatprep.subr.bf16.mxu0 %v11260_v55  ;;  %v2567_v55 = vrot.slane %v2560_v30, %v12767_v5 }
 0x5d8   :  { %7467 = vmatpush1.bf16.msra.mxu1 %v11255_v45 }
 0x5d9   :  { %7468 = vmatprep.subr.bf16.mxu1 %v11263_v11  ;;  %v2571_v11 = vrot.slane %v2560_v30, %v12770_v7  ;;  %v11377_v30 = vld [vmem:[#allocation6 + $0x136c] ss:$40 sps:$4 sm:$0xff]  }
 0x5da   :  { %7711 = vmatpush1.bf16.msra.mxu0 %v11258_v39  ;;  %v11332_v39 = vld [vmem:[#allocation6 + $0x10a4] ss:$40 sps:$4 sm:$0xff]  }
 0x5db   :  { %7712 = vmatprep.subr.bf16.mxu0 %v11266_v41 }
 0x5dc   :  { %7469 = vmatpush1.bf16.msra.mxu1 %v11261_v32 }
 0x5dd   :  { %7470 = vmatprep.subr.bf16.mxu1 %v11269_v42 }
 0x5de   :  { %7713 = vmatpush1.bf16.msra.mxu0 %v11264_v10  ;;  %v11327_v10 = vld [vmem:[#allocation6 + $0x10e8] ss:$40 sps:$4 sm:$0xff]  }
 0x5df   :  { %7714 = vmatprep.subr.bf16.mxu0 %v11272_v19  ;;  %v11330_v19 = vld [vmem:[#allocation6 + $0x10a0] ss:$40 sps:$4 sm:$0xff]  }
 0x5e0   :  { %7471 = vmatpush1.bf16.msra.mxu1 %v11267_v15  ;;  %v11335_v15 = vld [vmem:[#allocation6 + $0x113c] ss:$40 sps:$4 sm:$0xff]  }
 0x5e1   :  { %7472 = vmatprep.subr.bf16.mxu1 %v11275_v49  ;;  %v11338_v49 = vld [vmem:[#allocation6 + $0x10f4] ss:$40 sps:$4 sm:$0xff]  }
 0x5e2   :  { %7715 = vmatpush1.bf16.msra.mxu0 %v11270_v17 }
 0x5e3   :  { %7716 = vmatprep.subr.bf16.mxu0 %v11278_v59 }
 0x5e4   :  { %7473 = vmatpush1.bf16.msra.mxu1 %v11273_v43 }
 0x5e5   :  { %7474 = vmatprep.subr.bf16.mxu1 %v11281_v26 }
 0x5e6   :  { %7717 = vmatpush1.bf16.msra.mxu0 %v11276_v31 }
 0x5e7   :  { %7718 = vmatprep.subr.bf16.mxu0 %v11284_v48  ;;  %v11333_v48 = vld [vmem:[#allocation6 + $0x1138] ss:$40 sps:$4 sm:$0xff]  }
 0x5e8   :  { %7475 = vmatpush1.bf16.msra.mxu1 %v11279_v38 }
 0x5e9   :  { %7476 = vmatprep.subr.bf16.mxu1 %v11287_v29  ;;  %v11336_v29 = vld [vmem:[#allocation6 + $0x10f0] ss:$40 sps:$4 sm:$0xff]  }
 0x5ea   :  { %7719 = vmatpush1.bf16.msra.mxu0 %v11282_v4 }
 0x5eb   :  { %7720 = vmatprep.subr.bf16.mxu0 %v11290_v21  ;;  %v11341_v21 = vld [vmem:[#allocation6 + $0x118c] ss:$40 sps:$4 sm:$0xff]  }
 0x5ec   :  { %7477 = vmatpush1.bf16.msra.mxu1 %v11285_v12 }
 0x5ed   :  { %7487 = vmatprep.subr.bf16.mxu1 %v11293_v61  ;;  %v11339_v61 = vld [vmem:[#allocation6 + $0x1188] ss:$40 sps:$4 sm:$0xff]  }
 0x5ee   :  { %7721 = vmatpush1.bf16.msra.mxu0 %v11288_v8  ;;  %v11344_v8 = vld [vmem:[#allocation6 + $0x1144] ss:$40 sps:$4 sm:$0xff]  }
 0x5ef   :  { %7722 = vmatprep.subr.bf16.mxu0 %v11296_v22  ;;  %7479 = vmatmul.mubr.bf16.vlgmr.msra.gmra.mrb[28].mxu1 %v13236_v63  ;;  %v11342_v22 = vld [vmem:[#allocation6 + $0x1140] ss:$40 sps:$4 sm:$0xff]  }
 0x5f0   :  { %7488 = vmatpush1.bf16.msra.mxu1 %v11291_v28  ;;  %7519 = vmatprep.mubr.bf16.mxu1 %v13443_v37  ;;  %v11347_v28 = vld [vmem:[#allocation6 + $0x11dc] ss:$40 sps:$4 sm:$0xff]  }
 0x5f1   :  { %7489 = vmatprep.subr.bf16.mxu1 %v11299_v36  ;;  %v11345_v36 = vld [vmem:[#allocation6 + $0x11d8] ss:$40 sps:$4 sm:$0xff]  }
 0x5f2   :  { %7723 = vmatpush1.bf16.msra.mxu0 %v11294_v54  ;;  %v11350_v54 = vld [vmem:[#allocation6 + $0x1194] ss:$40 sps:$4 sm:$0xff]  }
 0x5f3   :  { %7733 = vmatprep.subr.bf16.mxu0 %v11302_v47  ;;  %v11348_v47 = vld [vmem:[#allocation6 + $0x1190] ss:$40 sps:$4 sm:$0xff]  }
 0x5f4   :  { %7490 = vmatpush1.bf16.msra.mxu1 %v11297_v18  ;;  %v11353_v18 = vld [vmem:[#allocation6 + $0x122c] ss:$40 sps:$4 sm:$0xff]  }
 0x5f5   :  { %7725 = vmatmul.mubr.bf16.vlgmr.msra.gmra.mrb[28].mxu0 %v13236_v63  ;;  %7491 = vmatprep.subr.bf16.mxu1 %v11305_v46  ;;  %v11351_v46 = vld [vmem:[#allocation6 + $0x1228] ss:$40 sps:$4 sm:$0xff]  }
 0x5f6   :  { %7734 = vmatpush1.bf16.msra.mxu0 %v11300_v3  ;;  %7765 = vmatprep.mubr.bf16.mxu0 %v13443_v37  ;;  %v11356_v3 = vld [vmem:[#allocation6 + $0x11e4] ss:$40 sps:$4 sm:$0xff]  }
 0x5f7   :  { %7735 = vmatprep.subr.bf16.mxu0 %v11308_v9  ;;  %v11354_v9 = vld [vmem:[#allocation6 + $0x11e0] ss:$40 sps:$4 sm:$0xff]  }
 0x5f8   :  { %7492 = vmatpush1.bf16.msra.mxu1 %v11303_v60  ;;  %v11359_v60 = vld [vmem:[#allocation6 + $0x127c] ss:$40 sps:$4 sm:$0xff]  }
 0x5f9   :  { %7493 = vmatprep.subr.bf16.mxu1 %v11311_v6  ;;  %v11357_v6 = vld [vmem:[#allocation6 + $0x1278] ss:$40 sps:$4 sm:$0xff]  }
 0x5fa   :  { %7736 = vmatpush1.bf16.msra.mxu0 %v11306_v58  ;;  %v11362_v58 = vld [vmem:[#allocation6 + $0x1234] ss:$40 sps:$4 sm:$0xff]  }
 0x5fb   :  { %7737 = vmatprep.subr.bf16.mxu0 %v11314_v52  ;;  %v11360_v52 = vld [vmem:[#allocation6 + $0x1230] ss:$40 sps:$4 sm:$0xff]  }
 0x5fc   :  { %7494 = vmatpush1.bf16.msra.mxu1 %v11309_v50  ;;  %v11365_v50 = vld [vmem:[#allocation6 + $0x12cc] ss:$40 sps:$4 sm:$0xff]  }
 0x5fd   :  { %7495 = vmatprep.subr.bf16.mxu1 %v11317_v51  ;;  %v11363_v51 = vld [vmem:[#allocation6 + $0x12c8] ss:$40 sps:$4 sm:$0xff]  }
 0x5fe   :  { %7738 = vmatpush1.bf16.msra.mxu0 %v11312_v14  ;;  %v11368_v14 = vld [vmem:[#allocation6 + $0x1284] ss:$40 sps:$4 sm:$0xff]  }
 0x5ff   :  { %7739 = vmatprep.subr.bf16.mxu0 %v11320_v62  ;;  %v11366_v62 = vld [vmem:[#allocation6 + $0x1280] ss:$40 sps:$4 sm:$0xff]  }
 0x600   :  { %7496 = vmatpush1.bf16.msra.mxu1 %v11315_v0  ;;  %v11371_v0 = vld [vmem:[#allocation6 + $0x131c] ss:$40 sps:$4 sm:$0xff]  }
 0x601   :  { %7497 = vmatprep.subr.bf16.mxu1 %v11323_v44  ;;  %v11369_v44 = vld [vmem:[#allocation6 + $0x1318] ss:$40 sps:$4 sm:$0xff]  }
 0x602   :  { %7740 = vmatpush1.bf16.msra.mxu0 %v11318_v23  ;;  %v7193_v45 = vpop.f32.mrb[24].mxu1  ;;  %v11374_v23 = vld [vmem:[#allocation6 + $0x12d4] ss:$40 sps:$4 sm:$0xff]  }
 0x603   :  { %7741 = vmatprep.subr.bf16.mxu0 %v11326_v20  ;;  %v7195_v41 = vpop.f32.mrb[25].mxu1  ;;  %v9994_v17 = vadd.f32 %v7193_v45, %v2567_v55  ;;  %v11372_v20 = vld [vmem:[#allocation6 + $0x12d0] ss:$40 sps:$4 sm:$0xff]   ;;  %v11383_v55 = vld [vmem:[#allocation6 + $0x13bc] ss:$40 sps:$4 sm:$0xff]  }
 0x604   :  { %7498 = vmatpush1.bf16.msra.mxu1 %v11321_v24  ;;  %v7197_v32 = vpop.f32.mrb[26].mxu1  ;;  %v9996_v59 = vadd.f32 %v7195_v41, %v2571_v11  ;;  %v11380_v24 = vld [vmem:[#allocation6 + $0x1324] ss:$40 sps:$4 sm:$0xff]   ;;  %v11386_v45 = vld [vmem:[#allocation6 + $0x1374] ss:$40 sps:$4 sm:$0xff]  }
 0x605   :  { %v7198_v42 = vpop.f32.mrb[27].mxu1  ;;  %7499 = vmatprep.subr.bf16.mxu1 %v11329_v1  ;;  %v11378_v1 = vld [vmem:[#allocation6 + $0x1320] ss:$40 sps:$4 sm:$0xff]   ;;  %v11384_v11 = vld [vmem:[#allocation6 + $0x1370] ss:$40 sps:$4 sm:$0xff]  }
 0x606   :  { %7742 = vmatpush1.bf16.msra.mxu0 %v11324_v53  ;;  %v11375_v53 = vld [vmem:[#allocation6 + $0x1368] ss:$40 sps:$4 sm:$0xff]   ;;  %v11389_v41 = vld [vmem:[#allocation6 + $0x140c] ss:$40 sps:$4 sm:$0xff]  }
 0x607   :  { %7743 = vmatprep.subr.bf16.mxu0 %v11332_v39  ;;  %v11381_v39 = vld [vmem:[#allocation6 + $0x13b8] ss:$40 sps:$4 sm:$0xff]   ;;  %v11392_v32 = vld [vmem:[#allocation6 + $0x13c4] ss:$40 sps:$4 sm:$0xff]  }
 0x608   :  { %v7357_v43 = vpop.f32.mrb[24].mxu0  ;;  %7500 = vmatpush1.bf16.msra.mxu1 %v11327_v10  ;;  %v11387_v10 = vld [vmem:[#allocation6 + $0x1408] ss:$40 sps:$4 sm:$0xff]  }
 0x609   :  { %v13553_v31 = vadd.f32 %v9994_v17, %v7357_v43  ;;  %v7359_v26 = vpop.f32.mrb[25].mxu0  ;;  %7501 = vmatprep.subr.bf16.mxu1 %v11335_v15  ;;  %v11390_v42 = vld [vmem:[#allocation6 + $0x13c0] ss:$40 sps:$4 sm:$0xff]   ;;  %v11398_v15 = vld [vmem:[#allocation6 + $0x1414] ss:$40 sps:$4 sm:$0xff]  }
 0x60a   :  { %v13555_v38 = vadd.f32 %v9996_v59, %v7359_v26  ;;  %v7361_v4 = vpop.f32.mrb[26].mxu0  ;;  %7744 = vmatpush1.bf16.msra.mxu0 %v11330_v19  ;;  %v11395_v19 = vld [vmem:[#allocation6 + $0x145c] ss:$40 sps:$4 sm:$0xff]   ;;  %v11393_v17 = vld [vmem:[#allocation6 + $0x1458] ss:$40 sps:$4 sm:$0xff]  }
 0x60b   :  { %v7362_v12 = vpop.f32.mrb[27].mxu0  ;;  %7745 = vmatprep.subr.bf16.mxu0 %v11338_v49  ;;  %v11396_v49 = vld [vmem:[#allocation6 + $0x1410] ss:$40 sps:$4 sm:$0xff]   ;;  %v11401_v59 = vld [vmem:[#allocation6 + $0x14ac] ss:$40 sps:$4 sm:$0xff]  }
 0x60c   :  { %7502 = vmatpush1.bf16.msra.mxu1 %v11333_v48  ;;  %v11404_v43 = vld [vmem:[#allocation6 + $0x1464] ss:$40 sps:$4 sm:$0xff]   ;;  %v11399_v26 = vld [vmem:[#allocation6 + $0x14a8] ss:$40 sps:$4 sm:$0xff]  }
 0x60d   :  { %7503 = vmatprep.subr.bf16.mxu1 %v11341_v21  ;;  %v11402_v48 = vld [vmem:[#allocation6 + $0x1460] ss:$40 sps:$4 sm:$0xff]   ;;  %v11407_v4 = vld [vmem:[#allocation6 + $0x14fc] ss:$40 sps:$4 sm:$0xff]   ;;  %v11408_v12 = vld [vmem:[#allocation6 + $0x14b0] ss:$40 sps:$4 sm:$0xff]  }
 0x60e   :  { %7746 = vmatpush1.bf16.msra.mxu0 %v11336_v29  ;;  %v11410_v29 = vld [vmem:[#allocation6 + $0x14b4] ss:$40 sps:$4 sm:$0xff]   ;;  %v11405_v21 = vld [vmem:[#allocation6 + $0x14f8] ss:$40 sps:$4 sm:$0xff]  }
 0x60f   :  { %7747 = vmatprep.subr.bf16.mxu0 %v11344_v8  ;;  %v11413_v8 = vld [vmem:[#allocation6 + $0x154c] ss:$40 sps:$4 sm:$0xff]  }
 0x610   :  { %7504 = vmatpush1.bf16.msra.mxu1 %v11339_v61  ;;  %v11416_v61 = vld [vmem:[#allocation6 + $0x1504] ss:$40 sps:$4 sm:$0xff]  }
 0x611   :  { %7505 = vmatprep.subr.bf16.mxu1 %v11347_v28  ;;  %v11414_v28 = vld [vmem:[#allocation6 + $0x1500] ss:$40 sps:$4 sm:$0xff]  }
 0x612   :  { %7748 = vmatpush1.bf16.msra.mxu0 %v11342_v22  ;;  %v11411_v22 = vld [vmem:[#allocation6 + $0x1548] ss:$40 sps:$4 sm:$0xff]  }
 0x613   :  { %7749 = vmatprep.subr.bf16.mxu0 %v11350_v54  ;;  %v11419_v54 = vld [vmem:[#allocation6 + $0x159c] ss:$40 sps:$4 sm:$0xff]  }
 0x614   :  { %7506 = vmatpush1.bf16.msra.mxu1 %v11345_v36  ;;  %v11422_v36 = vld [vmem:[#allocation6 + $0x1554] ss:$40 sps:$4 sm:$0xff]  }
 0x615   :  { %7507 = vmatprep.subr.bf16.mxu1 %v11353_v18  ;;  %v11420_v18 = vld [vmem:[#allocation6 + $0x1550] ss:$40 sps:$4 sm:$0xff]  }
 0x616   :  { %7750 = vmatpush1.bf16.msra.mxu0 %v11348_v47  ;;  %v11417_v47 = vld [vmem:[#allocation6 + $0x1598] ss:$40 sps:$4 sm:$0xff]  }
 0x617   :  { %7751 = vmatprep.subr.bf16.mxu0 %v11356_v3  ;;  %v11425_v3 = vld [vmem:[#allocation6 + $0x15ec] ss:$40 sps:$4 sm:$0xff]  }
 0x618   :  { %7508 = vmatpush1.bf16.msra.mxu1 %v11351_v46  ;;  %v11428_v46 = vld [vmem:[#allocation6 + $0x15a4] ss:$40 sps:$4 sm:$0xff]  }
 0x619   :  { %7509 = vmatprep.subr.bf16.mxu1 %v11359_v60  ;;  %v11426_v60 = vld [vmem:[#allocation6 + $0x15a0] ss:$40 sps:$4 sm:$0xff]  }
 0x61a   :  { %7752 = vmatpush1.bf16.msra.mxu0 %v11354_v9  ;;  %v11423_v9 = vld [vmem:[#allocation6 + $0x15e8] ss:$40 sps:$4 sm:$0xff]  }
 0x61b   :  { %7753 = vmatprep.subr.bf16.mxu0 %v11362_v58  ;;  %v11431_v58 = vld [vmem:[#allocation6 + $0x163c] ss:$40 sps:$4 sm:$0xff]  }
 0x61c   :  { %7510 = vmatpush1.bf16.msra.mxu1 %v11357_v6  ;;  %v11434_v6 = vld [vmem:[#allocation6 + $0x15f4] ss:$40 sps:$4 sm:$0xff]  }
 0x61d   :  { %7511 = vmatprep.subr.bf16.mxu1 %v11365_v50  ;;  %v11432_v50 = vld [vmem:[#allocation6 + $0x15f0] ss:$40 sps:$4 sm:$0xff]  }
 0x61e   :  { %7754 = vmatpush1.bf16.msra.mxu0 %v11360_v52  ;;  %v11429_v52 = vld [vmem:[#allocation6 + $0x1638] ss:$40 sps:$4 sm:$0xff]  }
 0x61f   :  { %7755 = vmatprep.subr.bf16.mxu0 %v11368_v14  ;;  %v11437_v14 = vld [vmem:[#allocation6 + $0x168c] ss:$40 sps:$4 sm:$0xff]  }
 0x620   :  { %7512 = vmatpush1.bf16.msra.mxu1 %v11363_v51  ;;  %v11440_v51 = vld [vmem:[#allocation6 + $0x1644] ss:$40 sps:$4 sm:$0xff]  }
 0x621   :  { %7513 = vmatprep.subr.bf16.mxu1 %v11371_v0  ;;  %v11438_v0 = vld [vmem:[#allocation6 + $0x1640] ss:$40 sps:$4 sm:$0xff]  }
 0x622   :  { %7756 = vmatpush1.bf16.msra.mxu0 %v11366_v62  ;;  %v11435_v62 = vld [vmem:[#allocation6 + $0x1688] ss:$40 sps:$4 sm:$0xff]  }
 0x623   :  { %7757 = vmatprep.subr.bf16.mxu0 %v11374_v23  ;;  %v11443_v23 = vld [vmem:[#allocation6 + $0x16dc] ss:$40 sps:$4 sm:$0xff]  }
 0x624   :  { %7514 = vmatpush1.bf16.msra.mxu1 %v11369_v44  ;;  %v11446_v44 = vld [vmem:[#allocation6 + $0x1694] ss:$40 sps:$4 sm:$0xff]  }
 0x625   :  { %7515 = vmatprep.subr.bf16.mxu1 %v11377_v30  ;;  %v11444_v30 = vld [vmem:[#allocation6 + $0x1690] ss:$40 sps:$4 sm:$0xff]  }
 0x626   :  { %7758 = vmatpush1.bf16.msra.mxu0 %v11372_v20  ;;  %v11441_v20 = vld [vmem:[#allocation6 + $0x16d8] ss:$40 sps:$4 sm:$0xff]  }
 0x627   :  { %7759 = vmatprep.subr.bf16.mxu0 %v11380_v24  ;;  %v11449_v24 = vld [vmem:[#allocation6 + $0x172c] ss:$40 sps:$4 sm:$0xff]  }
 0x628   :  { %7516 = vmatpush1.bf16.msra.mxu1 %v11375_v53  ;;  %v11452_v53 = vld [vmem:[#allocation6 + $0x16e4] ss:$40 sps:$4 sm:$0xff]  }
 0x629   :  { %7517 = vmatprep.subr.bf16.mxu1 %v11383_v55  ;;  %v11450_v55 = vld [vmem:[#allocation6 + $0x16e0] ss:$40 sps:$4 sm:$0xff]  }
 0x62a   :  { %7760 = vmatpush1.bf16.msra.mxu0 %v11378_v1  ;;  %v11447_v1 = vld [vmem:[#allocation6 + $0x1728] ss:$40 sps:$4 sm:$0xff]  }
 0x62b   :  { %7761 = vmatprep.subr.bf16.mxu0 %v11386_v45  ;;  %v11455_v45 = vld [vmem:[#allocation6 + $0x177c] ss:$40 sps:$4 sm:$0xff]  }
 0x62c   :  { %7518 = vmatpush1.bf16.msra.mxu1 %v11381_v39  ;;  %v11458_v39 = vld [vmem:[#allocation6 + $0x1734] ss:$40 sps:$4 sm:$0xff]  }
 0x62d   :  { %7528 = vmatprep.subr.bf16.mxu1 %v11389_v41  ;;  %v11456_v41 = vld [vmem:[#allocation6 + $0x1730] ss:$40 sps:$4 sm:$0xff]  }
 0x62e   :  { %7762 = vmatpush1.bf16.msra.mxu0 %v11384_v11  ;;  %v11453_v11 = vld [vmem:[#allocation6 + $0x1778] ss:$40 sps:$4 sm:$0xff]  }
 0x62f   :  { %7763 = vmatprep.subr.bf16.mxu0 %v11392_v32  ;;  %7520 = vmatmul.mubr.bf16.vlgmr.msra.gmra.mrb[28].mxu1 %v13441_v57  ;;  %v11461_v32 = vld [vmem:[#allocation6 + $0x17cc] ss:$40 sps:$4 sm:$0xff]  }
 0x630   :  { %7529 = vmatpush1.bf16.msra.mxu1 %v11387_v10  ;;  %7560 = vmatprep.mubr.bf16.mxu1 %v13516_v56  ;;  %v11464_v10 = vld [vmem:[#allocation6 + $0x1784] ss:$40 sps:$4 sm:$0xff]  }
 0x631   :  { %7530 = vmatprep.subr.bf16.mxu1 %v11395_v19  ;;  %v11462_v19 = vld [vmem:[#allocation6 + $0x1780] ss:$40 sps:$4 sm:$0xff]  }
 0x632   :  { %7764 = vmatpush1.bf16.msra.mxu0 %v11390_v42  ;;  %v11459_v42 = vld [vmem:[#allocation6 + $0x17c8] ss:$40 sps:$4 sm:$0xff]  }
 0x633   :  { %7774 = vmatprep.subr.bf16.mxu0 %v11398_v15  ;;  %v11467_v15 = vld [vmem:[#allocation6 + $0x181c] ss:$40 sps:$4 sm:$0xff]  }
 0x634   :  { %7531 = vmatpush1.bf16.msra.mxu1 %v11393_v17  ;;  %v11470_v17 = vld [vmem:[#allocation6 + $0x17d4] ss:$40 sps:$4 sm:$0xff]  }
 0x635   :  { %7766 = vmatmul.mubr.bf16.vlgmr.msra.gmra.mrb[28].mxu0 %v13441_v57  ;;  %7532 = vmatprep.subr.bf16.mxu1 %v11401_v59  ;;  %v11468_v59 = vld [vmem:[#allocation6 + $0x17d0] ss:$40 sps:$4 sm:$0xff]  }
 0x636   :  { %7775 = vmatpush1.bf16.msra.mxu0 %v11396_v49  ;;  %7806 = vmatprep.mubr.bf16.mxu0 %v13516_v56  ;;  %v11465_v49 = vld [vmem:[#allocation6 + $0x1818] ss:$40 sps:$4 sm:$0xff]  }
 0x637   :  { %7776 = vmatprep.subr.bf16.mxu0 %v11404_v43  ;;  %v11473_v43 = vld [vmem:[#allocation6 + $0x186c] ss:$40 sps:$4 sm:$0xff]  }
 0x638   :  { %7533 = vmatpush1.bf16.msra.mxu1 %v11399_v26  ;;  %v11476_v26 = vld [vmem:[#allocation6 + $0x1824] ss:$40 sps:$4 sm:$0xff]  }
 0x639   :  { %7534 = vmatprep.subr.bf16.mxu1 %v11407_v4  ;;  %v11474_v4 = vld [vmem:[#allocation6 + $0x1820] ss:$40 sps:$4 sm:$0xff]  }
 0x63a   :  { %7777 = vmatpush1.bf16.msra.mxu0 %v11402_v48  ;;  %v11471_v48 = vld [vmem:[#allocation6 + $0x1868] ss:$40 sps:$4 sm:$0xff]  }
 0x63b   :  { %7778 = vmatprep.subr.bf16.mxu0 %v11410_v29  ;;  %v11479_v29 = vld [vmem:[#allocation6 + $0x18bc] ss:$40 sps:$4 sm:$0xff]  }
 0x63c   :  { %7535 = vmatpush1.bf16.msra.mxu1 %v11405_v21  ;;  %v11482_v21 = vld [vmem:[#allocation6 + $0x1874] ss:$40 sps:$4 sm:$0xff]  }
 0x63d   :  { %7536 = vmatprep.subr.bf16.mxu1 %v11413_v8  ;;  %v11480_v8 = vld [vmem:[#allocation6 + $0x1870] ss:$40 sps:$4 sm:$0xff]  }
 0x63e   :  { %7779 = vmatpush1.bf16.msra.mxu0 %v11408_v12  ;;  %v11477_v12 = vld [vmem:[#allocation6 + $0x18b8] ss:$40 sps:$4 sm:$0xff]  }
 0x63f   :  { %7780 = vmatprep.subr.bf16.mxu0 %v11416_v61  ;;  %v11485_v61 = vld [vmem:[#allocation6 + $0x190c] ss:$40 sps:$4 sm:$0xff]  }
 0x640   :  { %7537 = vmatpush1.bf16.msra.mxu1 %v11411_v22  ;;  %v11488_v22 = vld [vmem:[#allocation6 + $0x18c4] ss:$40 sps:$4 sm:$0xff]  }
 0x641   :  { %7538 = vmatprep.subr.bf16.mxu1 %v11419_v54  ;;  %v11486_v54 = vld [vmem:[#allocation6 + $0x18c0] ss:$40 sps:$4 sm:$0xff]  }
 0x642   :  { %7781 = vmatpush1.bf16.msra.mxu0 %v11414_v28  ;;  %v11483_v28 = vld [vmem:[#allocation6 + $0x1908] ss:$40 sps:$4 sm:$0xff]  }
 0x643   :  { %7782 = vmatprep.subr.bf16.mxu0 %v11422_v36  ;;  %v11491_v36 = vld [vmem:[#allocation6 + $0x195c] ss:$40 sps:$4 sm:$0xff]  }
 0x644   :  { %7539 = vmatpush1.bf16.msra.mxu1 %v11417_v47  ;;  %v11494_v47 = vld [vmem:[#allocation6 + $0x1914] ss:$40 sps:$4 sm:$0xff]  }
 0x645   :  { %7540 = vmatprep.subr.bf16.mxu1 %v11425_v3  ;;  %v11492_v3 = vld [vmem:[#allocation6 + $0x1910] ss:$40 sps:$4 sm:$0xff]  }
 0x646   :  { %7783 = vmatpush1.bf16.msra.mxu0 %v11420_v18  ;;  %v11489_v18 = vld [vmem:[#allocation6 + $0x1958] ss:$40 sps:$4 sm:$0xff]  }
 0x647   :  { %7784 = vmatprep.subr.bf16.mxu0 %v11428_v46  ;;  %v11497_v46 = vld [vmem:[#allocation6 + $0x19ac] ss:$40 sps:$4 sm:$0xff]  }
 0x648   :  { %7541 = vmatpush1.bf16.msra.mxu1 %v11423_v9  ;;  %v11500_v9 = vld [vmem:[#allocation6 + $0x1964] ss:$40 sps:$4 sm:$0xff]  }
 0x649   :  { %7542 = vmatprep.subr.bf16.mxu1 %v11431_v58  ;;  %v11498_v58 = vld [vmem:[#allocation6 + $0x1960] ss:$40 sps:$4 sm:$0xff]  }
 0x64a   :  { %7785 = vmatpush1.bf16.msra.mxu0 %v11426_v60  ;;  %v11495_v60 = vld [vmem:[#allocation6 + $0x19a8] ss:$40 sps:$4 sm:$0xff]  }
 0x64b   :  { %7786 = vmatprep.subr.bf16.mxu0 %v11434_v6  ;;  %v11503_v6 = vld [vmem:[#allocation6 + $0x19fc] ss:$40 sps:$4 sm:$0xff]  }
 0x64c   :  { %7543 = vmatpush1.bf16.msra.mxu1 %v11429_v52  ;;  %v11506_v52 = vld [vmem:[#allocation6 + $0x19b4] ss:$40 sps:$4 sm:$0xff]  }
 0x64d   :  { %7544 = vmatprep.subr.bf16.mxu1 %v11437_v14  ;;  %v11504_v14 = vld [vmem:[#allocation6 + $0x19b0] ss:$40 sps:$4 sm:$0xff]  }
 0x64e   :  { %7787 = vmatpush1.bf16.msra.mxu0 %v11432_v50  ;;  %v11501_v50 = vld [vmem:[#allocation6 + $0x19f8] ss:$40 sps:$4 sm:$0xff]  }
 0x64f   :  { %7788 = vmatprep.subr.bf16.mxu0 %v11440_v51  ;;  %v11509_v51 = vld [vmem:[#allocation6 + $0x1a4c] ss:$40 sps:$4 sm:$0xff]  }
 0x650   :  { %7545 = vmatpush1.bf16.msra.mxu1 %v11435_v62  ;;  %v11512_v62 = vld [vmem:[#allocation6 + $0x1a04] ss:$40 sps:$4 sm:$0xff]  }
 0x651   :  { %7546 = vmatprep.subr.bf16.mxu1 %v11443_v23  ;;  %v11510_v23 = vld [vmem:[#allocation6 + $0x1a00] ss:$40 sps:$4 sm:$0xff]  }
 0x652   :  { %7789 = vmatpush1.bf16.msra.mxu0 %v11438_v0  ;;  %v11507_v0 = vld [vmem:[#allocation6 + $0x1a48] ss:$40 sps:$4 sm:$0xff]  }
 0x653   :  { %7790 = vmatprep.subr.bf16.mxu0 %v11446_v44  ;;  %v11515_v44 = vld [vmem:[#allocation6 + $0x1a9c] ss:$40 sps:$4 sm:$0xff]  }
 0x654   :  { %7547 = vmatpush1.bf16.msra.mxu1 %v11441_v20  ;;  %v11518_v20 = vld [vmem:[#allocation6 + $0x1a54] ss:$40 sps:$4 sm:$0xff]  }
 0x655   :  { %7548 = vmatprep.subr.bf16.mxu1 %v11449_v24  ;;  %v11516_v24 = vld [vmem:[#allocation6 + $0x1a50] ss:$40 sps:$4 sm:$0xff]  }
 0x656   :  { %7791 = vmatpush1.bf16.msra.mxu0 %v11444_v30  ;;  %v11513_v30 = vld [vmem:[#allocation6 + $0x1a98] ss:$40 sps:$4 sm:$0xff]  }
 0x657   :  { %7792 = vmatprep.subr.bf16.mxu0 %v11452_v53  ;;  %v11521_v53 = vld [vmem:[#allocation6 + $0x1aec] ss:$40 sps:$4 sm:$0xff]  }
 0x658   :  { %7549 = vmatpush1.bf16.msra.mxu1 %v11447_v1  ;;  %v11524_v1 = vld [vmem:[#allocation6 + $0x1aa4] ss:$40 sps:$4 sm:$0xff]  }
 0x659   :  { %7550 = vmatprep.subr.bf16.mxu1 %v11455_v45  ;;  %v11522_v45 = vld [vmem:[#allocation6 + $0x1aa0] ss:$40 sps:$4 sm:$0xff]  }
 0x65a   :  { %7793 = vmatpush1.bf16.msra.mxu0 %v11450_v55  ;;  %v11519_v55 = vld [vmem:[#allocation6 + $0x1ae8] ss:$40 sps:$4 sm:$0xff]  }
 0x65b   :  { %7794 = vmatprep.subr.bf16.mxu0 %v11458_v39  ;;  %v11527_v39 = vld [vmem:[#allocation6 + $0x1b3c] ss:$40 sps:$4 sm:$0xff]  }
 0x65c   :  { %7551 = vmatpush1.bf16.msra.mxu1 %v11453_v11  ;;  %v11530_v11 = vld [vmem:[#allocation6 + $0x1af4] ss:$40 sps:$4 sm:$0xff]  }
 0x65d   :  { %7552 = vmatprep.subr.bf16.mxu1 %v11461_v32  ;;  %v11528_v32 = vld [vmem:[#allocation6 + $0x1af0] ss:$40 sps:$4 sm:$0xff]  }
 0x65e   :  { %7795 = vmatpush1.bf16.msra.mxu0 %v11456_v41  ;;  %v11525_v41 = vld [vmem:[#allocation6 + $0x1b38] ss:$40 sps:$4 sm:$0xff]  }
 0x65f   :  { %7796 = vmatprep.subr.bf16.mxu0 %v11464_v10  ;;  %v11533_v10 = vld [vmem:[#allocation6 + $0x1b8c] ss:$40 sps:$4 sm:$0xff]  }
 0x660   :  { %7553 = vmatpush1.bf16.msra.mxu1 %v11459_v42  ;;  %v11536_v42 = vld [vmem:[#allocation6 + $0x1b44] ss:$40 sps:$4 sm:$0xff]  }
 0x661   :  { %7554 = vmatprep.subr.bf16.mxu1 %v11467_v15  ;;  %v11534_v15 = vld [vmem:[#allocation6 + $0x1b40] ss:$40 sps:$4 sm:$0xff]  }
 0x662   :  { %7797 = vmatpush1.bf16.msra.mxu0 %v11462_v19  ;;  %v11531_v19 = vld [vmem:[#allocation6 + $0x1b88] ss:$40 sps:$4 sm:$0xff]  }
 0x663   :  { %7798 = vmatprep.subr.bf16.mxu0 %v11470_v17  ;;  %v11539_v17 = vld [vmem:[#allocation6 + $0x1bdc] ss:$40 sps:$4 sm:$0xff]  }
 0x664   :  { %7555 = vmatpush1.bf16.msra.mxu1 %v11465_v49  ;;  %v11542_v49 = vld [vmem:[#allocation6 + $0x1b94] ss:$40 sps:$4 sm:$0xff]  }
 0x665   :  { %7556 = vmatprep.subr.bf16.mxu1 %v11473_v43  ;;  %v11540_v43 = vld [vmem:[#allocation6 + $0x1b90] ss:$40 sps:$4 sm:$0xff]  }
 0x666   :  { %7799 = vmatpush1.bf16.msra.mxu0 %v11468_v59  ;;  %v11537_v59 = vld [vmem:[#allocation6 + $0x1bd8] ss:$40 sps:$4 sm:$0xff]  }
 0x667   :  { %7800 = vmatprep.subr.bf16.mxu0 %v11476_v26  ;;  %v11545_v26 = vld [vmem:[#allocation6 + $0x1c] ss:$40 sps:$4 sm:$0xff]  }
 0x668   :  { %7557 = vmatpush1.bf16.msra.mxu1 %v11471_v48  ;;  %v11548_v48 = vld [vmem:[#allocation6 + $0x1be4] ss:$40 sps:$4 sm:$0xff]  }
 0x669   :  { %7558 = vmatprep.subr.bf16.mxu1 %v11479_v29  ;;  %v11546_v29 = vld [vmem:[#allocation6 + $0x1be0] ss:$40 sps:$4 sm:$0xff]  }
 0x66a   :  { %7801 = vmatpush1.bf16.msra.mxu0 %v11474_v4  ;;  %v11543_v4 = vld [vmem:[#allocation6 + $0x18] ss:$40 sps:$4 sm:$0xff]  }
 0x66b   :  { %7802 = vmatprep.subr.bf16.mxu0 %v11482_v21  ;;  %v11551_v21 = vld [vmem:[#allocation6 + $0x6c] ss:$40 sps:$4 sm:$0xff]  }
 0x66c   :  { %7559 = vmatpush1.bf16.msra.mxu1 %v11477_v12  ;;  %v11554_v12 = vld [vmem:[#allocation6 + $0x24] ss:$40 sps:$4 sm:$0xff]  }
 0x66d   :  { %7569 = vmatprep.subr.bf16.mxu1 %v11485_v61  ;;  %v11552_v61 = vld [vmem:[#allocation6 + $0x20] ss:$40 sps:$4 sm:$0xff]  }
 0x66e   :  { %7803 = vmatpush1.bf16.msra.mxu0 %v11480_v8  ;;  %v11549_v8 = vld [vmem:[#allocation6 + $0x68] ss:$40 sps:$4 sm:$0xff]  }
 0x66f   :  { %7804 = vmatprep.subr.bf16.mxu0 %v11488_v22  ;;  %7561 = vmatmul.mubr.bf16.vlgmr.msra.gmra.mrb[28].mxu1 %v13514_v27  ;;  %v11557_v22 = vld [vmem:[#allocation6 + $0xbc] ss:$40 sps:$4 sm:$0xff]  }
 0x670   :  { %7570 = vmatpush1.bf16.msra.mxu1 %v11483_v28  ;;  %9891 = vmatprep.mubr.msk.bf16.mxu1 %vm7114_vm11, %v13529_v40  ;;  %v11560_v28 = vld [vmem:[#allocation6 + $0x74] ss:$40 sps:$4 sm:$0xff]  }
 0x671   :  { %7571 = vmatprep.subr.bf16.mxu1 %v11491_v36  ;;  %v11558_v36 = vld [vmem:[#allocation6 + $0x70] ss:$40 sps:$4 sm:$0xff]  }
 0x672   :  { %7805 = vmatpush1.bf16.msra.mxu0 %v11486_v54  ;;  %v11555_v54 = vld [vmem:[#allocation6 + $0xb8] ss:$40 sps:$4 sm:$0xff]  }
 0x673   :  { %7815 = vmatprep.subr.bf16.mxu0 %v11494_v47  ;;  %v11563_v47 = vld [vmem:[#allocation6 + $0x10c] ss:$40 sps:$4 sm:$0xff]  }
 0x674   :  { %7572 = vmatpush1.bf16.msra.mxu1 %v11489_v18  ;;  %v11566_v18 = vld [vmem:[#allocation6 + $0xc4] ss:$40 sps:$4 sm:$0xff]  }
 0x675   :  { %7807 = vmatmul.mubr.bf16.vlgmr.msra.gmra.mrb[28].mxu0 %v13514_v27  ;;  %7573 = vmatprep.subr.bf16.mxu1 %v11497_v46  ;;  %v11564_v46 = vld [vmem:[#allocation6 + $0xc0] ss:$40 sps:$4 sm:$0xff]  }
 0x676   :  { %7816 = vmatpush1.bf16.msra.mxu0 %v11492_v3  ;;  %9892 = vmatprep.mubr.msk.bf16.mxu0 %vm7114_vm11, %v13529_v40  ;;  %v11561_v3 = vld [vmem:[#allocation6 + $0x108] ss:$40 sps:$4 sm:$0xff]  }
 0x677   :  { %7817 = vmatprep.subr.bf16.mxu0 %v11500_v9  ;;  %v11569_v9 = vld [vmem:[#allocation6 + $0x15c] ss:$40 sps:$4 sm:$0xff]  }
 0x678   :  { %7574 = vmatpush1.bf16.msra.mxu1 %v11495_v60  ;;  %v11572_v60 = vld [vmem:[#allocation6 + $0x114] ss:$40 sps:$4 sm:$0xff]  }
 0x679   :  { %7575 = vmatprep.subr.bf16.mxu1 %v11503_v6  ;;  %v11570_v6 = vld [vmem:[#allocation6 + $0x110] ss:$40 sps:$4 sm:$0xff]  }
 0x67a   :  { %7818 = vmatpush1.bf16.msra.mxu0 %v11498_v58  ;;  %v11567_v58 = vld [vmem:[#allocation6 + $0x158] ss:$40 sps:$4 sm:$0xff]  }
 0x67b   :  { %7819 = vmatprep.subr.bf16.mxu0 %v11506_v52  ;;  %v11575_v52 = vld [vmem:[#allocation6 + $0x1ac] ss:$40 sps:$4 sm:$0xff]  }
 0x67c   :  { %7576 = vmatpush1.bf16.msra.mxu1 %v11501_v50  ;;  %v11578_v50 = vld [vmem:[#allocation6 + $0x164] ss:$40 sps:$4 sm:$0xff]  }
 0x67d   :  { %7577 = vmatprep.subr.bf16.mxu1 %v11509_v51  ;;  %v11581_v51 = vld [vmem:[#allocation6 + $0x1fc] ss:$40 sps:$4 sm:$0xff]  }
 0x67e   :  { %7820 = vmatpush1.bf16.msra.mxu0 %v11504_v14  ;;  %v11576_v14 = vld [vmem:[#allocation6 + $0x160] ss:$40 sps:$4 sm:$0xff]  }
 0x67f   :  { %7821 = vmatprep.subr.bf16.mxu0 %v11512_v62  ;;  %v11584_v62 = vld [vmem:[#allocation6 + $0x1b4] ss:$40 sps:$4 sm:$0xff]  }
 0x680   :  { %7578 = vmatpush1.bf16.msra.mxu1 %v11507_v0  ;;  %v11579_v0 = vld [vmem:[#allocation6 + $0x1f8] ss:$40 sps:$4 sm:$0xff]  }
 0x681   :  { %7579 = vmatprep.subr.bf16.mxu1 %v11515_v44  ;;  %v11587_v44 = vld [vmem:[#allocation6 + $0x24c] ss:$40 sps:$4 sm:$0xff]  }
 0x682   :  { %7822 = vmatpush1.bf16.msra.mxu0 %v11510_v23  ;;  %v11582_v23 = vld [vmem:[#allocation6 + $0x1b0] ss:$40 sps:$4 sm:$0xff]  }
 0x683   :  { %7823 = vmatprep.subr.bf16.mxu0 %v11518_v20  ;;  %v11590_v20 = vld [vmem:[#allocation6 + $0x204] ss:$40 sps:$4 sm:$0xff]  }
 0x684   :  { %7580 = vmatpush1.bf16.msra.mxu1 %v11513_v30  ;;  %v11585_v30 = vld [vmem:[#allocation6 + $0x248] ss:$40 sps:$4 sm:$0xff]  }
 0x685   :  { %7581 = vmatprep.subr.bf16.mxu1 %v11521_v53  ;;  %v11593_v53 = vld [vmem:[#allocation6 + $0x29c] ss:$40 sps:$4 sm:$0xff]  }
 0x686   :  { %7824 = vmatpush1.bf16.msra.mxu0 %v11516_v24  ;;  %v11588_v24 = vld [vmem:[#allocation6 + $0x200] ss:$40 sps:$4 sm:$0xff]  }
 0x687   :  { %7825 = vmatprep.subr.bf16.mxu0 %v11524_v1  ;;  %v11596_v1 = vld [vmem:[#allocation6 + $0x254] ss:$40 sps:$4 sm:$0xff]  }
 0x688   :  { %7582 = vmatpush1.bf16.msra.mxu1 %v11519_v55  ;;  %v11591_v55 = vld [vmem:[#allocation6 + $0x298] ss:$40 sps:$4 sm:$0xff]  }
 0x689   :  { %7583 = vmatprep.subr.bf16.mxu1 %v11527_v39  ;;  %v11599_v39 = vld [vmem:[#allocation6 + $0x2ec] ss:$40 sps:$4 sm:$0xff]  }
 0x68a   :  { %7826 = vmatpush1.bf16.msra.mxu0 %v11522_v45  ;;  %v11594_v45 = vld [vmem:[#allocation6 + $0x250] ss:$40 sps:$4 sm:$0xff]  }
 0x68b   :  { %7827 = vmatprep.subr.bf16.mxu0 %v11530_v11  ;;  %v11602_v11 = vld [vmem:[#allocation6 + $0x2a4] ss:$40 sps:$4 sm:$0xff]  }
 0x68c   :  { %7584 = vmatpush1.bf16.msra.mxu1 %v11525_v41  ;;  %v11597_v41 = vld [vmem:[#allocation6 + $0x2e8] ss:$40 sps:$4 sm:$0xff]  }
 0x68d   :  { %7585 = vmatprep.subr.bf16.mxu1 %v11533_v10  ;;  %v11605_v10 = vld [vmem:[#allocation6 + $0x33c] ss:$40 sps:$4 sm:$0xff]  }
 0x68e   :  { %7828 = vmatpush1.bf16.msra.mxu0 %v11528_v32  ;;  %v11600_v32 = vld [vmem:[#allocation6 + $0x2a0] ss:$40 sps:$4 sm:$0xff]  }
 0x68f   :  { %7829 = vmatprep.subr.bf16.mxu0 %v11536_v42  ;;  %v11608_v42 = vld [vmem:[#allocation6 + $0x2f4] ss:$40 sps:$4 sm:$0xff]  }
 0x690   :  { %7586 = vmatpush1.bf16.msra.mxu1 %v11531_v19  ;;  %v11603_v19 = vld [vmem:[#allocation6 + $0x338] ss:$40 sps:$4 sm:$0xff]  }
 0x691   :  { %7587 = vmatprep.subr.bf16.mxu1 %v11539_v17  ;;  %v11611_v17 = vld [vmem:[#allocation6 + $0x38c] ss:$40 sps:$4 sm:$0xff]  }
 0x692   :  { %7830 = vmatpush1.bf16.msra.mxu0 %v11534_v15  ;;  %v11606_v15 = vld [vmem:[#allocation6 + $0x2f0] ss:$40 sps:$4 sm:$0xff]  }
 0x693   :  { %7831 = vmatprep.subr.bf16.mxu0 %v11542_v49  ;;  %v11614_v49 = vld [vmem:[#allocation6 + $0x344] ss:$40 sps:$4 sm:$0xff]  }
 0x694   :  { %7588 = vmatpush1.bf16.msra.mxu1 %v11537_v59  ;;  %v11609_v59 = vld [vmem:[#allocation6 + $0x388] ss:$40 sps:$4 sm:$0xff]  }
 0x695   :  { %7856 = vmatprep.subr.bf16.mxu1 %v11545_v26  ;;  %v11617_v26 = vld [vmem:[#allocation6 + $0x3dc] ss:$40 sps:$4 sm:$0xff]  }
 0x696   :  { %7832 = vmatpush1.bf16.msra.mxu0 %v11540_v43  ;;  %v11612_v43 = vld [vmem:[#allocation6 + $0x340] ss:$40 sps:$4 sm:$0xff]  }
 0x697   :  { %7833 = vmatprep.subr.bf16.mxu0 %v11548_v48  ;;  %7602 = vmatmul.mubr.bf16.vlgmr.msra.gmra.mrb[28].mxu1 %v13535_v25  ;;  %v11620_v48 = vld [vmem:[#allocation6 + $0x394] ss:$40 sps:$4 sm:$0xff]  }
 0x698   :  { %7857 = vmatpush1.bf16.msra.mxu1 %v11543_v4  ;;  %7888 = vmatprep.mubr.bf16.mxu1 %v13482_v13  ;;  %v11615_v4 = vld [vmem:[#allocation6 + $0x3d8] ss:$40 sps:$4 sm:$0xff]  }
 0x699   :  { %7858 = vmatprep.subr.bf16.mxu1 %v11551_v21  ;;  %v11623_v21 = vld [vmem:[#allocation6 + $0x42c] ss:$40 sps:$4 sm:$0xff]  }
 0x69a   :  { %7834 = vmatpush1.bf16.msra.mxu0 %v11546_v29  ;;  %v11618_v29 = vld [vmem:[#allocation6 + $0x390] ss:$40 sps:$4 sm:$0xff]  }
 0x69b   :  { %8102 = vmatprep.subr.bf16.mxu0 %v11554_v12  ;;  %v11626_v12 = vld [vmem:[#allocation6 + $0x3e4] ss:$40 sps:$4 sm:$0xff]  }
 0x69c   :  { %7859 = vmatpush1.bf16.msra.mxu1 %v11549_v8  ;;  %v11621_v8 = vld [vmem:[#allocation6 + $0x428] ss:$40 sps:$4 sm:$0xff]  }
 0x69d   :  { %7848 = vmatmul.mubr.bf16.vlgmr.msra.gmra.mrb[28].mxu0 %v13535_v25  ;;  %7860 = vmatprep.subr.bf16.mxu1 %v11557_v22  ;;  %v11629_v22 = vld [vmem:[#allocation6 + $0x47c] ss:$40 sps:$4 sm:$0xff]  }
 0x69e   :  { %8103 = vmatpush1.bf16.msra.mxu0 %v11552_v61  ;;  %8134 = vmatprep.mubr.bf16.mxu0 %v13482_v13  ;;  %v11573_v13 = vld [vmem:[#allocation6 + $0x1a8] ss:$40 sps:$4 sm:$0xff]  }
 0x69f   :  { %8104 = vmatprep.subr.bf16.mxu0 %v11560_v28  ;;  %v11624_v61 = vld [vmem:[#allocation6 + $0x3e0] ss:$40 sps:$4 sm:$0xff]   ;;  %v11632_v28 = vld [vmem:[#allocation6 + $0x434] ss:$40 sps:$4 sm:$0xff]  }
 0x6a0   :  { %7861 = vmatpush1.bf16.msra.mxu1 %v11555_v54  ;;  %v11627_v54 = vld [vmem:[#allocation6 + $0x478] ss:$40 sps:$4 sm:$0xff]  }
 0x6a1   :  { %7862 = vmatprep.subr.bf16.mxu1 %v11563_v47  ;;  %v11635_v47 = vld [vmem:[#allocation6 + $0x4cc] ss:$40 sps:$4 sm:$0xff]  }
 0x6a2   :  { %8105 = vmatpush1.bf16.msra.mxu0 %v11558_v36  ;;  %v11630_v36 = vld [vmem:[#allocation6 + $0x430] ss:$40 sps:$4 sm:$0xff]  }
 0x6a3   :  { %8106 = vmatprep.subr.bf16.mxu0 %v11566_v18  ;;  %v11638_v18 = vld [vmem:[#allocation6 + $0x484] ss:$40 sps:$4 sm:$0xff]  }
 0x6a4   :  { %7863 = vmatpush1.bf16.msra.mxu1 %v11561_v3  ;;  %v11633_v3 = vld [vmem:[#allocation6 + $0x4c8] ss:$40 sps:$4 sm:$0xff]  }
 0x6a5   :  { %7864 = vmatprep.subr.bf16.mxu1 %v11569_v9  ;;  %v11641_v9 = vld [vmem:[#allocation6 + $0x51c] ss:$40 sps:$4 sm:$0xff]  }
 0x6a6   :  { %8107 = vmatpush1.bf16.msra.mxu0 %v11564_v46  ;;  %v11636_v46 = vld [vmem:[#allocation6 + $0x480] ss:$40 sps:$4 sm:$0xff]  }
 0x6a7   :  { %8108 = vmatprep.subr.bf16.mxu0 %v11572_v60  ;;  %v11644_v60 = vld [vmem:[#allocation6 + $0x4d4] ss:$40 sps:$4 sm:$0xff]  }
 0x6a8   :  { %7865 = vmatpush1.bf16.msra.mxu1 %v11567_v58  ;;  %v11639_v58 = vld [vmem:[#allocation6 + $0x518] ss:$40 sps:$4 sm:$0xff]  }
 0x6a9   :  { %7866 = vmatprep.subr.bf16.mxu1 %v11575_v52  ;;  %v11647_v52 = vld [vmem:[#allocation6 + $0x56c] ss:$40 sps:$4 sm:$0xff]  }
 0x6aa   :  { %8109 = vmatpush1.bf16.msra.mxu0 %v11570_v6  ;;  %v11642_v6 = vld [vmem:[#allocation6 + $0x4d0] ss:$40 sps:$4 sm:$0xff]  }
 0x6ab   :  { %8110 = vmatprep.subr.bf16.mxu0 %v11578_v50  ;;  %v11650_v50 = vld [vmem:[#allocation6 + $0x524] ss:$40 sps:$4 sm:$0xff]  }
 0x6ac   :  { %7867 = vmatpush1.bf16.msra.mxu1 %v11573_v13  ;;  %v11645_v13 = vld [vmem:[#allocation6 + $0x568] ss:$40 sps:$4 sm:$0xff]  }
 0x6ad   :  { %7868 = vmatprep.subr.bf16.mxu1 %v11581_v51  ;;  %v11653_v51 = vld [vmem:[#allocation6 + $0x5bc] ss:$40 sps:$4 sm:$0xff]  }
 0x6ae   :  { %8111 = vmatpush1.bf16.msra.mxu0 %v11576_v14  ;;  %v11648_v14 = vld [vmem:[#allocation6 + $0x520] ss:$40 sps:$4 sm:$0xff]  }
 0x6af   :  { %8112 = vmatprep.subr.bf16.mxu0 %v11584_v62  ;;  %v11656_v62 = vld [vmem:[#allocation6 + $0x574] ss:$40 sps:$4 sm:$0xff]  }
 0x6b0   :  { %7869 = vmatpush1.bf16.msra.mxu1 %v11579_v0  ;;  %v11651_v0 = vld [vmem:[#allocation6 + $0x5b8] ss:$40 sps:$4 sm:$0xff]  }
 0x6b1   :  { %7870 = vmatprep.subr.bf16.mxu1 %v11587_v44  ;;  %v11659_v44 = vld [vmem:[#allocation6 + $0x60c] ss:$40 sps:$4 sm:$0xff]  }
 0x6b2   :  { %8113 = vmatpush1.bf16.msra.mxu0 %v11582_v23  ;;  %v11654_v23 = vld [vmem:[#allocation6 + $0x570] ss:$40 sps:$4 sm:$0xff]  }
 0x6b3   :  { %8114 = vmatprep.subr.bf16.mxu0 %v11590_v20  ;;  %v11662_v20 = vld [vmem:[#allocation6 + $0x5c4] ss:$40 sps:$4 sm:$0xff]  }
 0x6b4   :  { %7871 = vmatpush1.bf16.msra.mxu1 %v11585_v30  ;;  %v11657_v30 = vld [vmem:[#allocation6 + $0x608] ss:$40 sps:$4 sm:$0xff]  }
 0x6b5   :  { %7872 = vmatprep.subr.bf16.mxu1 %v11593_v53  ;;  %v11665_v53 = vld [vmem:[#allocation6 + $0x65c] ss:$40 sps:$4 sm:$0xff]  }
 0x6b6   :  { %8115 = vmatpush1.bf16.msra.mxu0 %v11588_v24  ;;  %v11660_v24 = vld [vmem:[#allocation6 + $0x5c0] ss:$40 sps:$4 sm:$0xff]  }
 0x6b7   :  { %8116 = vmatprep.subr.bf16.mxu0 %v11596_v1  ;;  %v11668_v1 = vld [vmem:[#allocation6 + $0x614] ss:$40 sps:$4 sm:$0xff]  }
 0x6b8   :  { %7873 = vmatpush1.bf16.msra.mxu1 %v11591_v55  ;;  %v11663_v55 = vld [vmem:[#allocation6 + $0x658] ss:$40 sps:$4 sm:$0xff]  }
 0x6b9   :  { %7874 = vmatprep.subr.bf16.mxu1 %v11599_v39  ;;  %v11674_v39 = vld [vmem:[#allocation6 + $0x664] ss:$40 sps:$4 sm:$0xff]  }
 0x6ba   :  { %8117 = vmatpush1.bf16.msra.mxu0 %v11594_v45  ;;  %v11671_v45 = vld [vmem:[#allocation6 + $0x6ac] ss:$40 sps:$4 sm:$0xff]  }
 0x6bb   :  { %8118 = vmatprep.subr.bf16.mxu0 %v11602_v11  ;;  %v11672_v11 = vld [vmem:[#allocation6 + $0x660] ss:$40 sps:$4 sm:$0xff]  }
 0x6bc   :  { %7875 = vmatpush1.bf16.msra.mxu1 %v11597_v41  ;;  %v11677_v41 = vld [vmem:[#allocation6 + $0x6fc] ss:$40 sps:$4 sm:$0xff]  }
 0x6bd   :  { %7876 = vmatprep.subr.bf16.mxu1 %v11605_v10  ;;  %v11675_v10 = vld [vmem:[#allocation6 + $0x6f8] ss:$40 sps:$4 sm:$0xff]  }
 0x6be   :  { %8119 = vmatpush1.bf16.msra.mxu0 %v11600_v32  ;;  %v11680_v32 = vld [vmem:[#allocation6 + $0x6b4] ss:$40 sps:$4 sm:$0xff]  }
 0x6bf   :  { %8120 = vmatprep.subr.bf16.mxu0 %v11608_v42  ;;  %v11678_v42 = vld [vmem:[#allocation6 + $0x6b0] ss:$40 sps:$4 sm:$0xff]  }
 0x6c0   :  { %7877 = vmatpush1.bf16.msra.mxu1 %v11603_v19  ;;  %v11683_v19 = vld [vmem:[#allocation6 + $0x74c] ss:$40 sps:$4 sm:$0xff]  }
 0x6c1   :  { %7878 = vmatprep.subr.bf16.mxu1 %v11611_v17  ;;  %v11681_v17 = vld [vmem:[#allocation6 + $0x748] ss:$40 sps:$4 sm:$0xff]  }
 0x6c2   :  { %8121 = vmatpush1.bf16.msra.mxu0 %v11606_v15  ;;  %v11686_v15 = vld [vmem:[#allocation6 + $0x704] ss:$40 sps:$4 sm:$0xff]  }
 0x6c3   :  { %8122 = vmatprep.subr.bf16.mxu0 %v11614_v49  ;;  %v11684_v49 = vld [vmem:[#allocation6 + $0x700] ss:$40 sps:$4 sm:$0xff]  }
 0x6c4   :  { %7879 = vmatpush1.bf16.msra.mxu1 %v11609_v59  ;;  %v11689_v59 = vld [vmem:[#allocation6 + $0x79c] ss:$40 sps:$4 sm:$0xff]  }
 0x6c5   :  { %7880 = vmatprep.subr.bf16.mxu1 %v11617_v26  ;;  %v11687_v26 = vld [vmem:[#allocation6 + $0x798] ss:$40 sps:$4 sm:$0xff]  }
 0x6c6   :  { %8123 = vmatpush1.bf16.msra.mxu0 %v11612_v43  ;;  %v11692_v43 = vld [vmem:[#allocation6 + $0x754] ss:$40 sps:$4 sm:$0xff]  }
 0x6c7   :  { %8124 = vmatprep.subr.bf16.mxu0 %v11620_v48  ;;  %v11690_v48 = vld [vmem:[#allocation6 + $0x750] ss:$40 sps:$4 sm:$0xff]  }
 0x6c8   :  { %7881 = vmatpush1.bf16.msra.mxu1 %v11615_v4  ;;  %v11695_v4 = vld [vmem:[#allocation6 + $0x7ec] ss:$40 sps:$4 sm:$0xff]  }
 0x6c9   :  { %7882 = vmatprep.subr.bf16.mxu1 %v11623_v21  ;;  %v11693_v21 = vld [vmem:[#allocation6 + $0x7e8] ss:$40 sps:$4 sm:$0xff]  }
 0x6ca   :  { %8125 = vmatpush1.bf16.msra.mxu0 %v11618_v29  ;;  %v11698_v29 = vld [vmem:[#allocation6 + $0x7a4] ss:$40 sps:$4 sm:$0xff]  }
 0x6cb   :  { %8126 = vmatprep.subr.bf16.mxu0 %v11626_v12  ;;  %v11696_v12 = vld [vmem:[#allocation6 + $0x7a0] ss:$40 sps:$4 sm:$0xff]  }
 0x6cc   :  { %7883 = vmatpush1.bf16.msra.mxu1 %v11621_v8  ;;  %v11701_v8 = vld [vmem:[#allocation6 + $0x83c] ss:$40 sps:$4 sm:$0xff]  }
 0x6cd   :  { %7884 = vmatprep.subr.bf16.mxu1 %v11629_v22  ;;  %v11699_v22 = vld [vmem:[#allocation6 + $0x838] ss:$40 sps:$4 sm:$0xff]  }
 0x6ce   :  { %8127 = vmatpush1.bf16.msra.mxu0 %v11624_v61  ;;  %v11704_v61 = vld [vmem:[#allocation6 + $0x7f4] ss:$40 sps:$4 sm:$0xff]  }
 0x6cf   :  { %8128 = vmatprep.subr.bf16.mxu0 %v11632_v28  ;;  %v11702_v28 = vld [vmem:[#allocation6 + $0x7f0] ss:$40 sps:$4 sm:$0xff]  }
 0x6d0   :  { %7885 = vmatpush1.bf16.msra.mxu1 %v11627_v54  ;;  %v11707_v54 = vld [vmem:[#allocation6 + $0x88c] ss:$40 sps:$4 sm:$0xff]  }
 0x6d1   :  { %7886 = vmatprep.subr.bf16.mxu1 %v11635_v47  ;;  %v11705_v47 = vld [vmem:[#allocation6 + $0x888] ss:$40 sps:$4 sm:$0xff]  }
 0x6d2   :  { %8129 = vmatpush1.bf16.msra.mxu0 %v11630_v36  ;;  %v11710_v36 = vld [vmem:[#allocation6 + $0x844] ss:$40 sps:$4 sm:$0xff]  }
 0x6d3   :  { %8130 = vmatprep.subr.bf16.mxu0 %v11638_v18  ;;  %v11708_v18 = vld [vmem:[#allocation6 + $0x840] ss:$40 sps:$4 sm:$0xff]  }
 0x6d4   :  { %7887 = vmatpush1.bf16.msra.mxu1 %v11633_v3  ;;  %v11713_v3 = vld [vmem:[#allocation6 + $0x8dc] ss:$40 sps:$4 sm:$0xff]  }
 0x6d5   :  { %7897 = vmatprep.subr.bf16.mxu1 %v11641_v9  ;;  %v11711_v9 = vld [vmem:[#allocation6 + $0x8d8] ss:$40 sps:$4 sm:$0xff]  }
 0x6d6   :  { %8131 = vmatpush1.bf16.msra.mxu0 %v11636_v46  ;;  %v11716_v46 = vld [vmem:[#allocation6 + $0x894] ss:$40 sps:$4 sm:$0xff]  }
 0x6d7   :  { %8132 = vmatprep.subr.bf16.mxu0 %v11644_v60  ;;  %7889 = vmatmul.mubr.bf16.vlgmr.msra.gmra.mrb[32].mxu1 %v13485_v16  ;;  %v11714_v60 = vld [vmem:[#allocation6 + $0x890] ss:$40 sps:$4 sm:$0xff]  }
 0x6d8   :  { %7898 = vmatpush1.bf16.msra.mxu1 %v11639_v58  ;;  %7929 = vmatprep.mubr.bf16.mxu1 %v13525_v35  ;;  %v11719_v58 = vld [vmem:[#allocation6 + $0x92c] ss:$40 sps:$4 sm:$0xff]  }
 0x6d9   :  { %7899 = vmatprep.subr.bf16.mxu1 %v11647_v52  ;;  %v11717_v52 = vld [vmem:[#allocation6 + $0x928] ss:$40 sps:$4 sm:$0xff]  }
 0x6da   :  { %8133 = vmatpush1.bf16.msra.mxu0 %v11642_v6  ;;  %v11722_v6 = vld [vmem:[#allocation6 + $0x8e4] ss:$40 sps:$4 sm:$0xff]  }
 0x6db   :  { %8143 = vmatprep.subr.bf16.mxu0 %v11650_v50  ;;  %v11720_v50 = vld [vmem:[#allocation6 + $0x8e0] ss:$40 sps:$4 sm:$0xff]  }
 0x6dc   :  { %7900 = vmatpush1.bf16.msra.mxu1 %v11645_v13  ;;  %v11725_v13 = vld [vmem:[#allocation6 + $0x97c] ss:$40 sps:$4 sm:$0xff]  }
 0x6dd   :  { %8135 = vmatmul.mubr.bf16.vlgmr.msra.gmra.mrb[32].mxu0 %v13485_v16  ;;  %7901 = vmatprep.subr.bf16.mxu1 %v11653_v51  ;;  %v11666_v16 = vld [vmem:[#allocation6 + $0x610] ss:$40 sps:$4 sm:$0xff]  }
 0x6de   :  { %8144 = vmatpush1.bf16.msra.mxu0 %v11648_v14  ;;  %8175 = vmatprep.mubr.bf16.mxu0 %v13525_v35  ;;  %v11669_v35 = vld [vmem:[#allocation6 + $0x6a8] ss:$40 sps:$4 sm:$0xff]   ;;  %v11728_v14 = vld [vmem:[#allocation6 + $0x934] ss:$40 sps:$4 sm:$0xff]   ;;  %v11723_v51 = vld [vmem:[#allocation6 + $0x978] ss:$40 sps:$4 sm:$0xff]  }
 0x6df   :  { %8145 = vmatprep.subr.bf16.mxu0 %v11656_v62  ;;  %v11726_v62 = vld [vmem:[#allocation6 + $0x930] ss:$40 sps:$4 sm:$0xff]  }
 0x6e0   :  { %7902 = vmatpush1.bf16.msra.mxu1 %v11651_v0  ;;  %v11731_v0 = vld [vmem:[#allocation6 + $0x9cc] ss:$40 sps:$4 sm:$0xff]  }
 0x6e1   :  { %7903 = vmatprep.subr.bf16.mxu1 %v11659_v44  ;;  %v11729_v44 = vld [vmem:[#allocation6 + $0x9c8] ss:$40 sps:$4 sm:$0xff]  }
 0x6e2   :  { %8146 = vmatpush1.bf16.msra.mxu0 %v11654_v23  ;;  %v11734_v23 = vld [vmem:[#allocation6 + $0x984] ss:$40 sps:$4 sm:$0xff]  }
 0x6e3   :  { %8147 = vmatprep.subr.bf16.mxu0 %v11662_v20  ;;  %v11732_v20 = vld [vmem:[#allocation6 + $0x980] ss:$40 sps:$4 sm:$0xff]  }
 0x6e4   :  { %7904 = vmatpush1.bf16.msra.mxu1 %v11657_v30  ;;  %v11737_v30 = vld [vmem:[#allocation6 + $0xa1c] ss:$40 sps:$4 sm:$0xff]  }
 0x6e5   :  { %7905 = vmatprep.subr.bf16.mxu1 %v11665_v53  ;;  %v11735_v53 = vld [vmem:[#allocation6 + $0xa18] ss:$40 sps:$4 sm:$0xff]  }
 0x6e6   :  { %8148 = vmatpush1.bf16.msra.mxu0 %v11660_v24  ;;  %v11740_v24 = vld [vmem:[#allocation6 + $0x9d4] ss:$40 sps:$4 sm:$0xff]  }
 0x6e7   :  { %8149 = vmatprep.subr.bf16.mxu0 %v11668_v1  ;;  %v11738_v1 = vld [vmem:[#allocation6 + $0x9d0] ss:$40 sps:$4 sm:$0xff]  }
 0x6e8   :  { %7906 = vmatpush1.bf16.msra.mxu1 %v11663_v55  ;;  %v11743_v55 = vld [vmem:[#allocation6 + $0xa6c] ss:$40 sps:$4 sm:$0xff]  }
 0x6e9   :  { %7907 = vmatprep.subr.bf16.mxu1 %v11671_v45  ;;  %v11741_v45 = vld [vmem:[#allocation6 + $0xa68] ss:$40 sps:$4 sm:$0xff]  }
 0x6ea   :  { %8150 = vmatpush1.bf16.msra.mxu0 %v11666_v16  ;;  %v11746_v16 = vld [vmem:[#allocation6 + $0xa24] ss:$40 sps:$4 sm:$0xff]  }
 0x6eb   :  { %8151 = vmatprep.subr.bf16.mxu0 %v11674_v39  ;;  %v11744_v39 = vld [vmem:[#allocation6 + $0xa20] ss:$40 sps:$4 sm:$0xff]  }
 0x6ec   :  { %7908 = vmatpush1.bf16.msra.mxu1 %v11669_v35  ;;  %v11749_v35 = vld [vmem:[#allocation6 + $0xabc] ss:$40 sps:$4 sm:$0xff]  }
 0x6ed   :  { %7909 = vmatprep.subr.bf16.mxu1 %v11677_v41  ;;  %v11747_v41 = vld [vmem:[#allocation6 + $0xab8] ss:$40 sps:$4 sm:$0xff]  }
 0x6ee   :  { %8152 = vmatpush1.bf16.msra.mxu0 %v11672_v11  ;;  %v11752_v11 = vld [vmem:[#allocation6 + $0xa74] ss:$40 sps:$4 sm:$0xff]  }
 0x6ef   :  { %8153 = vmatprep.subr.bf16.mxu0 %v11680_v32  ;;  %v11750_v32 = vld [vmem:[#allocation6 + $0xa70] ss:$40 sps:$4 sm:$0xff]  }
 0x6f0   :  { %7910 = vmatpush1.bf16.msra.mxu1 %v11675_v10  ;;  %v11755_v10 = vld [vmem:[#allocation6 + $0xb0c] ss:$40 sps:$4 sm:$0xff]  }
 0x6f1   :  { %7911 = vmatprep.subr.bf16.mxu1 %v11683_v19  ;;  %v11753_v19 = vld [vmem:[#allocation6 + $0xb08] ss:$40 sps:$4 sm:$0xff]  }
 0x6f2   :  { %8154 = vmatpush1.bf16.msra.mxu0 %v11678_v42  ;;  %v11758_v42 = vld [vmem:[#allocation6 + $0xac4] ss:$40 sps:$4 sm:$0xff]  }
 0x6f3   :  { %8155 = vmatprep.subr.bf16.mxu0 %v11686_v15  ;;  %v11756_v15 = vld [vmem:[#allocation6 + $0xac0] ss:$40 sps:$4 sm:$0xff]  }
 0x6f4   :  { %7912 = vmatpush1.bf16.msra.mxu1 %v11681_v17  ;;  %v11761_v17 = vld [vmem:[#allocation6 + $0xb5c] ss:$40 sps:$4 sm:$0xff]  }
 0x6f5   :  { %7913 = vmatprep.subr.bf16.mxu1 %v11689_v59  ;;  %v11759_v59 = vld [vmem:[#allocation6 + $0xb58] ss:$40 sps:$4 sm:$0xff]  }
 0x6f6   :  { %8156 = vmatpush1.bf16.msra.mxu0 %v11684_v49  ;;  %v11764_v49 = vld [vmem:[#allocation6 + $0xb14] ss:$40 sps:$4 sm:$0xff]  }
 0x6f7   :  { %8157 = vmatprep.subr.bf16.mxu0 %v11692_v43  ;;  %v11767_v43 = vld [vmem:[#allocation6 + $0xbac] ss:$40 sps:$4 sm:$0xff]  }
 0x6f8   :  { %7914 = vmatpush1.bf16.msra.mxu1 %v11687_v26  ;;  %v11770_v26 = vld [vmem:[#allocation6 + $0xb64] ss:$40 sps:$4 sm:$0xff]  }
 0x6f9   :  { %7915 = vmatprep.subr.bf16.mxu1 %v11695_v4  ;;  %v11773_v4 = vld [vmem:[#allocation6 + $0xbfc] ss:$40 sps:$4 sm:$0xff]  }
 0x6fa   :  { %8158 = vmatpush1.bf16.msra.mxu0 %v11690_v48  ;;  %v11768_v48 = vld [vmem:[#allocation6 + $0xb60] ss:$40 sps:$4 sm:$0xff]  }
 0x6fb   :  { %8159 = vmatprep.subr.bf16.mxu0 %v11698_v29  ;;  %v11776_v29 = vld [vmem:[#allocation6 + $0xbb4] ss:$40 sps:$4 sm:$0xff]  }
 0x6fc   :  { %7916 = vmatpush1.bf16.msra.mxu1 %v11693_v21  ;;  %v11771_v21 = vld [vmem:[#allocation6 + $0xbf8] ss:$40 sps:$4 sm:$0xff]  }
 0x6fd   :  { %7917 = vmatprep.subr.bf16.mxu1 %v11701_v8  ;;  %v11779_v8 = vld [vmem:[#allocation6 + $0xc4c] ss:$40 sps:$4 sm:$0xff]  }
 0x6fe   :  { %8160 = vmatpush1.bf16.msra.mxu0 %v11696_v12  ;;  %v11774_v12 = vld [vmem:[#allocation6 + $0xbb0] ss:$40 sps:$4 sm:$0xff]  }
 0x6ff   :  { %8161 = vmatprep.subr.bf16.mxu0 %v11704_v61  ;;  %v11782_v61 = vld [vmem:[#allocation6 + $0xc04] ss:$40 sps:$4 sm:$0xff]  }
 0x700   :  { %7918 = vmatpush1.bf16.msra.mxu1 %v11699_v22  ;;  %v11777_v22 = vld [vmem:[#allocation6 + $0xc48] ss:$40 sps:$4 sm:$0xff]  }
 0x701   :  { %7919 = vmatprep.subr.bf16.mxu1 %v11707_v54  ;;  %v11785_v54 = vld [vmem:[#allocation6 + $0xc9c] ss:$40 sps:$4 sm:$0xff]  }
 0x702   :  { %8162 = vmatpush1.bf16.msra.mxu0 %v11702_v28  ;;  %v11780_v28 = vld [vmem:[#allocation6 + $0xc00] ss:$40 sps:$4 sm:$0xff]  }
 0x703   :  { %8163 = vmatprep.subr.bf16.mxu0 %v11710_v36  ;;  %v11788_v36 = vld [vmem:[#allocation6 + $0xc54] ss:$40 sps:$4 sm:$0xff]  }
 0x704   :  { %7920 = vmatpush1.bf16.msra.mxu1 %v11705_v47  ;;  %v11783_v47 = vld [vmem:[#allocation6 + $0xc98] ss:$40 sps:$4 sm:$0xff]  }
 0x705   :  { %7921 = vmatprep.subr.bf16.mxu1 %v11713_v3  ;;  %v11791_v3 = vld [vmem:[#allocation6 + $0xcec] ss:$40 sps:$4 sm:$0xff]  }
 0x706   :  { %8164 = vmatpush1.bf16.msra.mxu0 %v11708_v18  ;;  %v11786_v18 = vld [vmem:[#allocation6 + $0xc50] ss:$40 sps:$4 sm:$0xff]  }
 0x707   :  { %8165 = vmatprep.subr.bf16.mxu0 %v11716_v46  ;;  %v11794_v46 = vld [vmem:[#allocation6 + $0xca4] ss:$40 sps:$4 sm:$0xff]  }
 0x708   :  { %7922 = vmatpush1.bf16.msra.mxu1 %v11711_v9  ;;  %v11789_v9 = vld [vmem:[#allocation6 + $0xce8] ss:$40 sps:$4 sm:$0xff]  }
 0x709   :  { %7923 = vmatprep.subr.bf16.mxu1 %v11719_v58  ;;  %v11797_v58 = vld [vmem:[#allocation6 + $0xd3c] ss:$40 sps:$4 sm:$0xff]  }
 0x70a   :  { %8166 = vmatpush1.bf16.msra.mxu0 %v11714_v60  ;;  %v11792_v60 = vld [vmem:[#allocation6 + $0xca0] ss:$40 sps:$4 sm:$0xff]  }
 0x70b   :  { %8167 = vmatprep.subr.bf16.mxu0 %v11722_v6  ;;  %v11800_v6 = vld [vmem:[#allocation6 + $0xcf4] ss:$40 sps:$4 sm:$0xff]  }
 0x70c   :  { %7924 = vmatpush1.bf16.msra.mxu1 %v11717_v52  ;;  %v11795_v52 = vld [vmem:[#allocation6 + $0xd38] ss:$40 sps:$4 sm:$0xff]  }
 0x70d   :  { %7925 = vmatprep.subr.bf16.mxu1 %v11725_v13  ;;  %v11803_v13 = vld [vmem:[#allocation6 + $0xd8c] ss:$40 sps:$4 sm:$0xff]  }
 0x70e   :  { %8168 = vmatpush1.bf16.msra.mxu0 %v11720_v50  ;;  %v11798_v50 = vld [vmem:[#allocation6 + $0xcf0] ss:$40 sps:$4 sm:$0xff]  }
 0x70f   :  { %8169 = vmatprep.subr.bf16.mxu0 %v11728_v14  ;;  %v11806_v14 = vld [vmem:[#allocation6 + $0xd44] ss:$40 sps:$4 sm:$0xff]  }
 0x710   :  { %7926 = vmatpush1.bf16.msra.mxu1 %v11723_v51  ;;  %v11801_v51 = vld [vmem:[#allocation6 + $0xd88] ss:$40 sps:$4 sm:$0xff]  }
 0x711   :  { %7927 = vmatprep.subr.bf16.mxu1 %v11731_v0  ;;  %v11809_v0 = vld [vmem:[#allocation6 + $0xddc] ss:$40 sps:$4 sm:$0xff]  }
 0x712   :  { %8170 = vmatpush1.bf16.msra.mxu0 %v11726_v62  ;;  %v11804_v62 = vld [vmem:[#allocation6 + $0xd40] ss:$40 sps:$4 sm:$0xff]  }
 0x713   :  { %8171 = vmatprep.subr.bf16.mxu0 %v11734_v23  ;;  %v11812_v23 = vld [vmem:[#allocation6 + $0xd94] ss:$40 sps:$4 sm:$0xff]  }
 0x714   :  { %7928 = vmatpush1.bf16.msra.mxu1 %v11729_v44  ;;  %v11807_v44 = vld [vmem:[#allocation6 + $0xdd8] ss:$40 sps:$4 sm:$0xff]  }
 0x715   :  { %7938 = vmatprep.subr.bf16.mxu1 %v11737_v30  ;;  %v11815_v30 = vld [vmem:[#allocation6 + $0xe2c] ss:$40 sps:$4 sm:$0xff]  }
 0x716   :  { %8172 = vmatpush1.bf16.msra.mxu0 %v11732_v20  ;;  %v11810_v20 = vld [vmem:[#allocation6 + $0xd90] ss:$40 sps:$4 sm:$0xff]  }
 0x717   :  { %8173 = vmatprep.subr.bf16.mxu0 %v11740_v24  ;;  %7930 = vmatmul.mubr.bf16.vlgmr.msra.gmra.mrb[32].mxu1 %v13523_v34  ;;  %v11818_v24 = vld [vmem:[#allocation6 + $0xde4] ss:$40 sps:$4 sm:$0xff]  }
 0x718   :  { %7939 = vmatpush1.bf16.msra.mxu1 %v11735_v53  ;;  %7970 = vmatprep.mubr.bf16.mxu1 %v13233_v33  ;;  %v11813_v53 = vld [vmem:[#allocation6 + $0xe28] ss:$40 sps:$4 sm:$0xff]  }
 0x719   :  { %7940 = vmatprep.subr.bf16.mxu1 %v11743_v55  ;;  %v11821_v55 = vld [vmem:[#allocation6 + $0xe7c] ss:$40 sps:$4 sm:$0xff]  }
 0x71a   :  { %8174 = vmatpush1.bf16.msra.mxu0 %v11738_v1  ;;  %v11816_v1 = vld [vmem:[#allocation6 + $0xde0] ss:$40 sps:$4 sm:$0xff]  }
 0x71b   :  { %8184 = vmatprep.subr.bf16.mxu0 %v11746_v16  ;;  %v11824_v16 = vld [vmem:[#allocation6 + $0xe34] ss:$40 sps:$4 sm:$0xff]  }
 0x71c   :  { %7941 = vmatpush1.bf16.msra.mxu1 %v11741_v45  ;;  %v11819_v45 = vld [vmem:[#allocation6 + $0xe78] ss:$40 sps:$4 sm:$0xff]  }
 0x71d   :  { %8176 = vmatmul.mubr.bf16.vlgmr.msra.gmra.mrb[32].mxu0 %v13523_v34  ;;  %7942 = vmatprep.subr.bf16.mxu1 %v11749_v35  ;;  %v11762_v34 = vld [vmem:[#allocation6 + $0xb10] ss:$40 sps:$4 sm:$0xff]   ;;  %v11827_v35 = vld [vmem:[#allocation6 + $0xecc] ss:$40 sps:$4 sm:$0xff]  }
 0x71e   :  { %8185 = vmatpush1.bf16.msra.mxu0 %v11744_v39  ;;  %8216 = vmatprep.mubr.bf16.mxu0 %v13233_v33  ;;  %v11765_v33 = vld [vmem:[#allocation6 + $0xba8] ss:$40 sps:$4 sm:$0xff]  }
 0x71f   :  { %8186 = vmatprep.subr.bf16.mxu0 %v11752_v11  ;;  %v11822_v39 = vld [vmem:[#allocation6 + $0xe30] ss:$40 sps:$4 sm:$0xff]   ;;  %v11830_v11 = vld [vmem:[#allocation6 + $0xe84] ss:$40 sps:$4 sm:$0xff]  }
 0x720   :  { %7943 = vmatpush1.bf16.msra.mxu1 %v11747_v41  ;;  %v11825_v41 = vld [vmem:[#allocation6 + $0xec8] ss:$40 sps:$4 sm:$0xff]  }
 0x721   :  { %7944 = vmatprep.subr.bf16.mxu1 %v11755_v10  ;;  %v11833_v10 = vld [vmem:[#allocation6 + $0xf1c] ss:$40 sps:$4 sm:$0xff]  }
 0x722   :  { %8187 = vmatpush1.bf16.msra.mxu0 %v11750_v32  ;;  %v11828_v32 = vld [vmem:[#allocation6 + $0xe80] ss:$40 sps:$4 sm:$0xff]  }
 0x723   :  { %8188 = vmatprep.subr.bf16.mxu0 %v11758_v42  ;;  %v11836_v42 = vld [vmem:[#allocation6 + $0xed4] ss:$40 sps:$4 sm:$0xff]  }
 0x724   :  { %7945 = vmatpush1.bf16.msra.mxu1 %v11753_v19  ;;  %v11831_v19 = vld [vmem:[#allocation6 + $0xf18] ss:$40 sps:$4 sm:$0xff]  }
 0x725   :  { %7946 = vmatprep.subr.bf16.mxu1 %v11761_v17  ;;  %v11839_v17 = vld [vmem:[#allocation6 + $0xf6c] ss:$40 sps:$4 sm:$0xff]  }
 0x726   :  { %8189 = vmatpush1.bf16.msra.mxu0 %v11756_v15  ;;  %v11834_v15 = vld [vmem:[#allocation6 + $0xed0] ss:$40 sps:$4 sm:$0xff]  }
 0x727   :  { %8190 = vmatprep.subr.bf16.mxu0 %v11764_v49  ;;  %v11842_v49 = vld [vmem:[#allocation6 + $0xf24] ss:$40 sps:$4 sm:$0xff]  }
 0x728   :  { %7947 = vmatpush1.bf16.msra.mxu1 %v11759_v59  ;;  %v11837_v59 = vld [vmem:[#allocation6 + $0xf68] ss:$40 sps:$4 sm:$0xff]  }
 0x729   :  { %7948 = vmatprep.subr.bf16.mxu1 %v11767_v43  ;;  %v11845_v43 = vld [vmem:[#allocation6 + $0xfbc] ss:$40 sps:$4 sm:$0xff]  }
 0x72a   :  { %8191 = vmatpush1.bf16.msra.mxu0 %v11762_v34  ;;  %v11840_v34 = vld [vmem:[#allocation6 + $0xf20] ss:$40 sps:$4 sm:$0xff]  }
 0x72b   :  { %8192 = vmatprep.subr.bf16.mxu0 %v11770_v26  ;;  %v11848_v26 = vld [vmem:[#allocation6 + $0xf74] ss:$40 sps:$4 sm:$0xff]  }
 0x72c   :  { %7949 = vmatpush1.bf16.msra.mxu1 %v11765_v33  ;;  %v11843_v33 = vld [vmem:[#allocation6 + $0xfb8] ss:$40 sps:$4 sm:$0xff]  }
 0x72d   :  { %7950 = vmatprep.subr.bf16.mxu1 %v11773_v4  ;;  %v11851_v4 = vld [vmem:[#allocation6 + $0x100c] ss:$40 sps:$4 sm:$0xff]  }
 0x72e   :  { %8193 = vmatpush1.bf16.msra.mxu0 %v11768_v48  ;;  %v11846_v48 = vld [vmem:[#allocation6 + $0xf70] ss:$40 sps:$4 sm:$0xff]  }
 0x72f   :  { %8194 = vmatprep.subr.bf16.mxu0 %v11776_v29  ;;  %v11854_v29 = vld [vmem:[#allocation6 + $0xfc4] ss:$40 sps:$4 sm:$0xff]  }
 0x730   :  { %7951 = vmatpush1.bf16.msra.mxu1 %v11771_v21  ;;  %v11849_v21 = vld [vmem:[#allocation6 + $0x1008] ss:$40 sps:$4 sm:$0xff]  }
 0x731   :  { %7952 = vmatprep.subr.bf16.mxu1 %v11779_v8  ;;  %v11857_v8 = vld [vmem:[#allocation6 + $0x105c] ss:$40 sps:$4 sm:$0xff]  }
 0x732   :  { %8195 = vmatpush1.bf16.msra.mxu0 %v11774_v12  ;;  %v11852_v12 = vld [vmem:[#allocation6 + $0xfc0] ss:$40 sps:$4 sm:$0xff]  }
 0x733   :  { %8196 = vmatprep.subr.bf16.mxu0 %v11782_v61  ;;  %v11860_v61 = vld [vmem:[#allocation6 + $0x1014] ss:$40 sps:$4 sm:$0xff]  }
 0x734   :  { %7953 = vmatpush1.bf16.msra.mxu1 %v11777_v22  ;;  %v11855_v22 = vld [vmem:[#allocation6 + $0x1058] ss:$40 sps:$4 sm:$0xff]  }
 0x735   :  { %7954 = vmatprep.subr.bf16.mxu1 %v11785_v54  ;;  %v11866_v54 = vld [vmem:[#allocation6 + $0x1064] ss:$40 sps:$4 sm:$0xff]  }
 0x736   :  { %8197 = vmatpush1.bf16.msra.mxu0 %v11780_v28  ;;  %v11863_v28 = vld [vmem:[#allocation6 + $0x10ac] ss:$40 sps:$4 sm:$0xff]  }
 0x737   :  { %8198 = vmatprep.subr.bf16.mxu0 %v11788_v36  ;;  %v2582_v36 = vsub.s32 4, %v12764_v2 }
 0x738   :  { %7955 = vmatpush1.bf16.msra.mxu1 %v11783_v47  ;;  %v11864_v47 = vld [vmem:[#allocation6 + $0x1060] ss:$40 sps:$4 sm:$0xff]  }
 0x739   :  { %7956 = vmatprep.subr.bf16.mxu1 %v11791_v3 }
 0x73a   :  { %8199 = vmatpush1.bf16.msra.mxu0 %v11786_v18  ;;  %v11869_v18 = vld [vmem:[#allocation6 + $0x10fc] ss:$40 sps:$4 sm:$0xff]  }
 0x73b   :  { %8200 = vmatprep.subr.bf16.mxu0 %v11794_v46  ;;  %v11872_v46 = vld [vmem:[#allocation6 + $0x10b4] ss:$40 sps:$4 sm:$0xff]  }
 0x73c   :  { %7957 = vmatpush1.bf16.msra.mxu1 %v11789_v9 }
 0x73d   :  { %7958 = vmatprep.subr.bf16.mxu1 %v11797_v58  ;;  %v11867_v58 = vld [vmem:[#allocation6 + $0x10f8] ss:$40 sps:$4 sm:$0xff]  }
 0x73e   :  { %8201 = vmatpush1.bf16.msra.mxu0 %v11792_v60 }
 0x73f   :  { %8202 = vmatprep.subr.bf16.mxu0 %v11800_v6  ;;  %v13588_v6 = vld [vmem:[#allocation7] sm:$0xff] }
 0x740   :  { %7959 = vmatpush1.bf16.msra.mxu1 %v11795_v52  ;;  %v2583_v52 = vrot.slane %v13588_v6, %v2582_v36  ;;  %v11929_v36 = vld [vmem:[#allocation6 + $0x141c] ss:$40 sps:$4 sm:$0xff]  }
 0x741   :  { %7960 = vmatprep.subr.bf16.mxu1 %v11803_v13  ;;  %v11870_v13 = vld [vmem:[#allocation6 + $0x10b0] ss:$40 sps:$4 sm:$0xff]  }
 0x742   :  { %8203 = vmatpush1.bf16.msra.mxu0 %v11798_v50 }
 0x743   :  { %8204 = vmatprep.subr.bf16.mxu0 %v11806_v14  ;;  %v11875_v14 = vld [vmem:[#allocation6 + $0x114c] ss:$40 sps:$4 sm:$0xff]  }
 0x744   :  { %7961 = vmatpush1.bf16.msra.mxu1 %v11801_v51  ;;  %v11878_v51 = vld [vmem:[#allocation6 + $0x1104] ss:$40 sps:$4 sm:$0xff]  }
 0x745   :  { %7962 = vmatprep.subr.bf16.mxu1 %v11809_v0 }
 0x746   :  { %8205 = vmatpush1.bf16.msra.mxu0 %v11804_v62 }
 0x747   :  { %8206 = vmatprep.subr.bf16.mxu0 %v11812_v23 }
 0x748   :  { %7963 = vmatpush1.bf16.msra.mxu1 %v11807_v44  ;;  %v11873_v44 = vld [vmem:[#allocation6 + $0x1148] ss:$40 sps:$4 sm:$0xff]  }
 0x749   :  { %7964 = vmatprep.subr.bf16.mxu1 %v11815_v30  ;;  %v11876_v30 = vld [vmem:[#allocation6 + $0x1100] ss:$40 sps:$4 sm:$0xff]  }
 0x74a   :  { %8207 = vmatpush1.bf16.msra.mxu0 %v11810_v20 }
 0x74b   :  { %8208 = vmatprep.subr.bf16.mxu0 %v11818_v24  ;;  %v11881_v24 = vld [vmem:[#allocation6 + $0x119c] ss:$40 sps:$4 sm:$0xff]  }
 0x74c   :  { %7965 = vmatpush1.bf16.msra.mxu1 %v11813_v53 }
 0x74d   :  { %7966 = vmatprep.subr.bf16.mxu1 %v11821_v55  ;;  %v11884_v55 = vld [vmem:[#allocation6 + $0x1154] ss:$40 sps:$4 sm:$0xff]  }
 0x74e   :  { %8209 = vmatpush1.bf16.msra.mxu0 %v11816_v1 }
 0x74f   :  { %8210 = vmatprep.subr.bf16.mxu0 %v11824_v16  ;;  %v11879_v16 = vld [vmem:[#allocation6 + $0x1198] ss:$40 sps:$4 sm:$0xff]  }
 0x750   :  { %7967 = vmatpush1.bf16.msra.mxu1 %v11819_v45  ;;  %v11882_v45 = vld [vmem:[#allocation6 + $0x1150] ss:$40 sps:$4 sm:$0xff]  }
 0x751   :  { %7968 = vmatprep.subr.bf16.mxu1 %v11827_v35  ;;  %v11890_v35 = vld [vmem:[#allocation6 + $0x11a4] ss:$40 sps:$4 sm:$0xff]  }
 0x752   :  { %8211 = vmatpush1.bf16.msra.mxu0 %v11822_v39  ;;  %v11887_v39 = vld [vmem:[#allocation6 + $0x11ec] ss:$40 sps:$4 sm:$0xff]  }
 0x753   :  { %8212 = vmatprep.subr.bf16.mxu0 %v11830_v11  ;;  %v11885_v11 = vld [vmem:[#allocation6 + $0x11e8] ss:$40 sps:$4 sm:$0xff]  }
 0x754   :  { %7969 = vmatpush1.bf16.msra.mxu1 %v11825_v41  ;;  %v11888_v41 = vld [vmem:[#allocation6 + $0x11a0] ss:$40 sps:$4 sm:$0xff]  }
 0x755   :  { %7979 = vmatprep.subr.bf16.mxu1 %v11833_v10  ;;  %v11896_v10 = vld [vmem:[#allocation6 + $0x11f4] ss:$40 sps:$4 sm:$0xff]  }
 0x756   :  { %8213 = vmatpush1.bf16.msra.mxu0 %v11828_v32  ;;  %v11893_v32 = vld [vmem:[#allocation6 + $0x123c] ss:$40 sps:$4 sm:$0xff]  }
 0x757   :  { %8214 = vmatprep.subr.bf16.mxu0 %v11836_v42  ;;  %7971 = vmatmul.mubr.bf16.vlgmr.msra.gmra.mrb[32].mxu1 %v13236_v63  ;;  %v11891_v42 = vld [vmem:[#allocation6 + $0x1238] ss:$40 sps:$4 sm:$0xff]  }
 0x758   :  { %7980 = vmatpush1.bf16.msra.mxu1 %v11831_v19  ;;  %8011 = vmatprep.mubr.bf16.mxu1 %v13443_v37  ;;  %v11894_v19 = vld [vmem:[#allocation6 + $0x11f0] ss:$40 sps:$4 sm:$0xff]  }
 0x759   :  { %7981 = vmatprep.subr.bf16.mxu1 %v11839_v17  ;;  %v11902_v17 = vld [vmem:[#allocation6 + $0x1244] ss:$40 sps:$4 sm:$0xff]  }
 0x75a   :  { %8215 = vmatpush1.bf16.msra.mxu0 %v11834_v15  ;;  %v11899_v15 = vld [vmem:[#allocation6 + $0x128c] ss:$40 sps:$4 sm:$0xff]  }
 0x75b   :  { %8225 = vmatprep.subr.bf16.mxu0 %v11842_v49  ;;  %v11897_v49 = vld [vmem:[#allocation6 + $0x1288] ss:$40 sps:$4 sm:$0xff]  }
 0x75c   :  { %7982 = vmatpush1.bf16.msra.mxu1 %v11837_v59  ;;  %v11900_v59 = vld [vmem:[#allocation6 + $0x1240] ss:$40 sps:$4 sm:$0xff]  }
 0x75d   :  { %8217 = vmatmul.mubr.bf16.vlgmr.msra.gmra.mrb[32].mxu0 %v13236_v63  ;;  %7983 = vmatprep.subr.bf16.mxu1 %v11845_v43  ;;  %v11858_v63 = vld [vmem:[#allocation6 + $0x1010] ss:$40 sps:$4 sm:$0xff]   ;;  %v11908_v43 = vld [vmem:[#allocation6 + $0x1294] ss:$40 sps:$4 sm:$0xff]  }
 0x75e   :  { %8226 = vmatpush1.bf16.msra.mxu0 %v11840_v34  ;;  %8257 = vmatprep.mubr.bf16.mxu0 %v13443_v37  ;;  %v11861_v37 = vld [vmem:[#allocation6 + $0x10a8] ss:$40 sps:$4 sm:$0xff]   ;;  %v11905_v34 = vld [vmem:[#allocation6 + $0x12dc] ss:$40 sps:$4 sm:$0xff]  }
 0x75f   :  { %8227 = vmatprep.subr.bf16.mxu0 %v11848_v26  ;;  %v11903_v26 = vld [vmem:[#allocation6 + $0x12d8] ss:$40 sps:$4 sm:$0xff]  }
 0x760   :  { %7984 = vmatpush1.bf16.msra.mxu1 %v11843_v33  ;;  %v11906_v33 = vld [vmem:[#allocation6 + $0x1290] ss:$40 sps:$4 sm:$0xff]  }
 0x761   :  { %7985 = vmatprep.subr.bf16.mxu1 %v11851_v4  ;;  %v11914_v4 = vld [vmem:[#allocation6 + $0x12e4] ss:$40 sps:$4 sm:$0xff]  }
 0x762   :  { %8228 = vmatpush1.bf16.msra.mxu0 %v11846_v48  ;;  %v11911_v48 = vld [vmem:[#allocation6 + $0x132c] ss:$40 sps:$4 sm:$0xff]  }
 0x763   :  { %8229 = vmatprep.subr.bf16.mxu0 %v11854_v29  ;;  %v11909_v29 = vld [vmem:[#allocation6 + $0x1328] ss:$40 sps:$4 sm:$0xff]  }
 0x764   :  { %7986 = vmatpush1.bf16.msra.mxu1 %v11849_v21  ;;  %v11912_v21 = vld [vmem:[#allocation6 + $0x12e0] ss:$40 sps:$4 sm:$0xff]  }
 0x765   :  { %7987 = vmatprep.subr.bf16.mxu1 %v11857_v8  ;;  %v11920_v8 = vld [vmem:[#allocation6 + $0x1334] ss:$40 sps:$4 sm:$0xff]  }
 0x766   :  { %8230 = vmatpush1.bf16.msra.mxu0 %v11852_v12  ;;  %v11917_v12 = vld [vmem:[#allocation6 + $0x137c] ss:$40 sps:$4 sm:$0xff]  }
 0x767   :  { %8231 = vmatprep.subr.bf16.mxu0 %v11860_v61  ;;  %v11915_v61 = vld [vmem:[#allocation6 + $0x1378] ss:$40 sps:$4 sm:$0xff]  }
 0x768   :  { %7988 = vmatpush1.bf16.msra.mxu1 %v11855_v22  ;;  %v11918_v22 = vld [vmem:[#allocation6 + $0x1330] ss:$40 sps:$4 sm:$0xff]  }
 0x769   :  { %7989 = vmatprep.subr.bf16.mxu1 %v11863_v28  ;;  %v11926_v28 = vld [vmem:[#allocation6 + $0x1384] ss:$40 sps:$4 sm:$0xff]  }
 0x76a   :  { %8232 = vmatpush1.bf16.msra.mxu0 %v11858_v63  ;;  %v13584_v3 = vpop.f32.mrb[28].mxu1  ;;  %v11923_v63 = vld [vmem:[#allocation6 + $0x13cc] ss:$40 sps:$4 sm:$0xff]  }
 0x76b   :  { %8233 = vmatprep.subr.bf16.mxu0 %v11866_v54  ;;  %v13586_v9 = vpop.f32.mrb[29].mxu1  ;;  %v11921_v54 = vld [vmem:[#allocation6 + $0x13c8] ss:$40 sps:$4 sm:$0xff]  }
 0x76c   :  { %v7607_v60 = vpop.f32.mrb[30].mxu1  ;;  %7990 = vmatpush1.bf16.msra.mxu1 %v11861_v37  ;;  %v11924_v37 = vld [vmem:[#allocation6 + $0x1380] ss:$40 sps:$4 sm:$0xff]  }
 0x76d   :  { %v7608_v50 = vpop.f32.mrb[31].mxu1  ;;  %7991 = vmatprep.subr.bf16.mxu1 %v11869_v18  ;;  %v11927_v18 = vld [vmem:[#allocation6 + $0x1418] ss:$40 sps:$4 sm:$0xff]   ;;  %v11935_v60 = vld [vmem:[#allocation6 + $0x146c] ss:$40 sps:$4 sm:$0xff]  }
 0x76e   :  { %8234 = vmatpush1.bf16.msra.mxu0 %v11864_v47  ;;  %v11932_v47 = vld [vmem:[#allocation6 + $0x13d4] ss:$40 sps:$4 sm:$0xff]   ;;  %v11936_v50 = vld [vmem:[#allocation6 + $0x1420] ss:$40 sps:$4 sm:$0xff]  }
 0x76f   :  { %8235 = vmatprep.subr.bf16.mxu0 %v11872_v46  ;;  %v11930_v46 = vld [vmem:[#allocation6 + $0x13d0] ss:$40 sps:$4 sm:$0xff]  }
 0x770   :  { %v7849_v62 = vpop.f32.mrb[28].mxu0  ;;  %7992 = vmatpush1.bf16.msra.mxu1 %v11867_v58  ;;  %v11938_v58 = vld [vmem:[#allocation6 + $0x1424] ss:$40 sps:$4 sm:$0xff]  }
 0x771   :  { %v13591_v0 = vadd.f32 %v7849_v62, %v2583_v52  ;;  %v13593_v23 = vpop.f32.mrb[29].mxu0  ;;  %7993 = vmatprep.subr.bf16.mxu1 %v11875_v14  ;;  %v11933_v52 = vld [vmem:[#allocation6 + $0x1468] ss:$40 sps:$4 sm:$0xff]   ;;  %v11944_v14 = vld [vmem:[#allocation6 + $0x1474] ss:$40 sps:$4 sm:$0xff]  }
 0x772   :  { %v7853_v20 = vpop.f32.mrb[30].mxu0  ;;  %8236 = vmatpush1.bf16.msra.mxu0 %v11870_v13  ;;  %v11941_v13 = vld [vmem:[#allocation6 + $0x14bc] ss:$40 sps:$4 sm:$0xff]   ;;  %v11942_v62 = vld [vmem:[#allocation6 + $0x1470] ss:$40 sps:$4 sm:$0xff]  }
 0x773   :  { %v10654_v53 = vpack.i.bf16 %v13555_v38, %v13591_v0  ;;  %v7854_v1 = vpop.f32.mrb[31].mxu0  ;;  %8237 = vmatprep.subr.bf16.mxu0 %v11878_v51  ;;  %v11939_v51 = vld [vmem:[#allocation6 + $0x14b8] ss:$40 sps:$4 sm:$0xff]   ;;  %v11950_v20 = vld [vmem:[#allocation6 + $0x14c4] ss:$40 sps:$4 sm:$0xff]  }
 0x774   :  { %7994 = vmatpush1.bf16.msra.mxu1 %v11873_v44  ;;  %v11947_v44 = vld [vmem:[#allocation6 + $0x150c] ss:$40 sps:$4 sm:$0xff]  }
 0x775   :  { %10655 = vrot.lane.b32.xlu1 %v10654_v53, %s12345_s20  ;;  %7995 = vmatprep.subr.bf16.mxu1 %v11881_v24  ;;  %v11948_v24 = vld [vmem:[#allocation6 + $0x14c0] ss:$40 sps:$4 sm:$0xff]   ;;  %v11953_v53 = vld [vmem:[#allocation6 + $0x155c] ss:$40 sps:$4 sm:$0xff]  }
 0x776   :  { %8238 = vmatpush1.bf16.msra.mxu0 %v11876_v30  ;;  %v11945_v30 = vld [vmem:[#allocation6 + $0x1508] ss:$40 sps:$4 sm:$0xff]   ;;  %v11956_v1 = vld [vmem:[#allocation6 + $0x1514] ss:$40 sps:$4 sm:$0xff]  }
 0x777   :  { %8239 = vmatprep.subr.bf16.mxu0 %v11884_v55  ;;  %v11951_v55 = vld [vmem:[#allocation6 + $0x1558] ss:$40 sps:$4 sm:$0xff]  }
 0x778   :  { %7996 = vmatpush1.bf16.msra.mxu1 %v11879_v16  ;;  %v11959_v16 = vld [vmem:[#allocation6 + $0x15ac] ss:$40 sps:$4 sm:$0xff]  }
 0x779   :  { %7997 = vmatprep.subr.bf16.mxu1 %v11887_v39  ;;  %v11960_v39 = vld [vmem:[#allocation6 + $0x1560] ss:$40 sps:$4 sm:$0xff]  }
 0x77a   :  { %8240 = vmatpush1.bf16.msra.mxu0 %v11882_v45  ;;  %v11962_v45 = vld [vmem:[#allocation6 + $0x1564] ss:$40 sps:$4 sm:$0xff]  }
 0x77b   :  { %8241 = vmatprep.subr.bf16.mxu0 %v11890_v35  ;;  %v11965_v35 = vld [vmem:[#allocation6 + $0x15fc] ss:$40 sps:$4 sm:$0xff]  }
 0x77c   :  { %7998 = vmatpush1.bf16.msra.mxu1 %v11885_v11  ;;  %v11968_v11 = vld [vmem:[#allocation6 + $0x15b4] ss:$40 sps:$4 sm:$0xff]  }
 0x77d   :  { %7999 = vmatprep.subr.bf16.mxu1 %v11893_v32  ;;  %v11966_v32 = vld [vmem:[#allocation6 + $0x15b0] ss:$40 sps:$4 sm:$0xff]  }
 0x77e   :  { %8242 = vmatpush1.bf16.msra.mxu0 %v11888_v41  ;;  %v11963_v41 = vld [vmem:[#allocation6 + $0x15f8] ss:$40 sps:$4 sm:$0xff]  }
 0x77f   :  { %8243 = vmatprep.subr.bf16.mxu0 %v11896_v10  ;;  %v11971_v10 = vld [vmem:[#allocation6 + $0x164c] ss:$40 sps:$4 sm:$0xff]  }
 0x780   :  { %8000 = vmatpush1.bf16.msra.mxu1 %v11891_v42  ;;  %v11974_v42 = vld [vmem:[#allocation6 + $0x1604] ss:$40 sps:$4 sm:$0xff]  }
 0x781   :  { %8001 = vmatprep.subr.bf16.mxu1 %v11899_v15  ;;  %v11972_v15 = vld [vmem:[#allocation6 + $0x1600] ss:$40 sps:$4 sm:$0xff]  }
 0x782   :  { %8244 = vmatpush1.bf16.msra.mxu0 %v11894_v19  ;;  %v11969_v19 = vld [vmem:[#allocation6 + $0x1648] ss:$40 sps:$4 sm:$0xff]  }
 0x783   :  { %8245 = vmatprep.subr.bf16.mxu0 %v11902_v17  ;;  %v11977_v17 = vld [vmem:[#allocation6 + $0x169c] ss:$40 sps:$4 sm:$0xff]  }
 0x784   :  { %8002 = vmatpush1.bf16.msra.mxu1 %v11897_v49  ;;  %v11980_v49 = vld [vmem:[#allocation6 + $0x1654] ss:$40 sps:$4 sm:$0xff]  }
 0x785   :  { %8003 = vmatprep.subr.bf16.mxu1 %v11905_v34  ;;  %v11978_v34 = vld [vmem:[#allocation6 + $0x1650] ss:$40 sps:$4 sm:$0xff]  }
 0x786   :  { %8246 = vmatpush1.bf16.msra.mxu0 %v11900_v59  ;;  %v11975_v59 = vld [vmem:[#allocation6 + $0x1698] ss:$40 sps:$4 sm:$0xff]  }
 0x787   :  { %8247 = vmatprep.subr.bf16.mxu0 %v11908_v43  ;;  %v11983_v43 = vld [vmem:[#allocation6 + $0x16ec] ss:$40 sps:$4 sm:$0xff]  }
 0x788   :  { %8004 = vmatpush1.bf16.msra.mxu1 %v11903_v26  ;;  %v11986_v26 = vld [vmem:[#allocation6 + $0x16a4] ss:$40 sps:$4 sm:$0xff]  }
 0x789   :  { %8005 = vmatprep.subr.bf16.mxu1 %v11911_v48  ;;  %v11984_v48 = vld [vmem:[#allocation6 + $0x16a0] ss:$40 sps:$4 sm:$0xff]  }
 0x78a   :  { %8248 = vmatpush1.bf16.msra.mxu0 %v11906_v33  ;;  %v11981_v33 = vld [vmem:[#allocation6 + $0x16e8] ss:$40 sps:$4 sm:$0xff]  }
 0x78b   :  { %8249 = vmatprep.subr.bf16.mxu0 %v11914_v4  ;;  %v11989_v4 = vld [vmem:[#allocation6 + $0x173c] ss:$40 sps:$4 sm:$0xff]  }
 0x78c   :  { %8006 = vmatpush1.bf16.msra.mxu1 %v11909_v29  ;;  %v11992_v29 = vld [vmem:[#allocation6 + $0x16f4] ss:$40 sps:$4 sm:$0xff]  }
 0x78d   :  { %8007 = vmatprep.subr.bf16.mxu1 %v11917_v12  ;;  %v11990_v12 = vld [vmem:[#allocation6 + $0x16f0] ss:$40 sps:$4 sm:$0xff]  }
 0x78e   :  { %8250 = vmatpush1.bf16.msra.mxu0 %v11912_v21  ;;  %v11987_v21 = vld [vmem:[#allocation6 + $0x1738] ss:$40 sps:$4 sm:$0xff]  }
 0x78f   :  { %8251 = vmatprep.subr.bf16.mxu0 %v11920_v8  ;;  %v11995_v8 = vld [vmem:[#allocation6 + $0x178c] ss:$40 sps:$4 sm:$0xff]  }
 0x790   :  { %8008 = vmatpush1.bf16.msra.mxu1 %v11915_v61  ;;  %v11998_v61 = vld [vmem:[#allocation6 + $0x1744] ss:$40 sps:$4 sm:$0xff]  }
 0x791   :  { %8009 = vmatprep.subr.bf16.mxu1 %v11923_v63  ;;  %v11996_v63 = vld [vmem:[#allocation6 + $0x1740] ss:$40 sps:$4 sm:$0xff]  }
 0x792   :  { %8252 = vmatpush1.bf16.msra.mxu0 %v11918_v22  ;;  %v11993_v22 = vld [vmem:[#allocation6 + $0x1788] ss:$40 sps:$4 sm:$0xff]  }
 0x793   :  { %8253 = vmatprep.subr.bf16.mxu0 %v11926_v28  ;;  %v12001_v28 = vld [vmem:[#allocation6 + $0x17dc] ss:$40 sps:$4 sm:$0xff]  }
 0x794   :  { %8010 = vmatpush1.bf16.msra.mxu1 %v11921_v54  ;;  %v12004_v54 = vld [vmem:[#allocation6 + $0x1794] ss:$40 sps:$4 sm:$0xff]  }
 0x795   :  { %8020 = vmatprep.subr.bf16.mxu1 %v11929_v36  ;;  %v12002_v36 = vld [vmem:[#allocation6 + $0x1790] ss:$40 sps:$4 sm:$0xff]  }
 0x796   :  { %8254 = vmatpush1.bf16.msra.mxu0 %v11924_v37  ;;  %v11999_v37 = vld [vmem:[#allocation6 + $0x17d8] ss:$40 sps:$4 sm:$0xff]  }
 0x797   :  { %8255 = vmatprep.subr.bf16.mxu0 %v11932_v47  ;;  %8012 = vmatmul.mubr.bf16.vlgmr.msra.gmra.mrb[32].mxu1 %v13441_v57  ;;  %v12007_v47 = vld [vmem:[#allocation6 + $0x182c] ss:$40 sps:$4 sm:$0xff]  }
 0x798   :  { %8021 = vmatpush1.bf16.msra.mxu1 %v11927_v18  ;;  %8052 = vmatprep.mubr.bf16.mxu1 %v13516_v56  ;;  %v12010_v18 = vld [vmem:[#allocation6 + $0x17e4] ss:$40 sps:$4 sm:$0xff]  }
 0x799   :  { %8022 = vmatprep.subr.bf16.mxu1 %v11935_v60  ;;  %v12008_v60 = vld [vmem:[#allocation6 + $0x17e0] ss:$40 sps:$4 sm:$0xff]  }
 0x79a   :  { %8256 = vmatpush1.bf16.msra.mxu0 %v11930_v46  ;;  %v12005_v46 = vld [vmem:[#allocation6 + $0x1828] ss:$40 sps:$4 sm:$0xff]  }
 0x79b   :  { %8266 = vmatprep.subr.bf16.mxu0 %v11938_v58  ;;  %v12013_v58 = vld [vmem:[#allocation6 + $0x187c] ss:$40 sps:$4 sm:$0xff]  }
 0x79c   :  { %8023 = vmatpush1.bf16.msra.mxu1 %v11933_v52  ;;  %v12016_v52 = vld [vmem:[#allocation6 + $0x1834] ss:$40 sps:$4 sm:$0xff]  }
 0x79d   :  { %8258 = vmatmul.mubr.bf16.vlgmr.msra.gmra.mrb[32].mxu0 %v13441_v57  ;;  %8024 = vmatprep.subr.bf16.mxu1 %v11941_v13  ;;  %v11954_v57 = vld [vmem:[#allocation6 + $0x1510] ss:$40 sps:$4 sm:$0xff]  }
 0x79e   :  { %8267 = vmatpush1.bf16.msra.mxu0 %v11936_v50  ;;  %8298 = vmatprep.mubr.bf16.mxu0 %v13516_v56  ;;  %v11957_v56 = vld [vmem:[#allocation6 + $0x15a8] ss:$40 sps:$4 sm:$0xff]   ;;  %v12011_v50 = vld [vmem:[#allocation6 + $0x1878] ss:$40 sps:$4 sm:$0xff]  }
 0x79f   :  { %8268 = vmatprep.subr.bf16.mxu0 %v11944_v14  ;;  %v12014_v13 = vld [vmem:[#allocation6 + $0x1830] ss:$40 sps:$4 sm:$0xff]   ;;  %v12019_v14 = vld [vmem:[#allocation6 + $0x18cc] ss:$40 sps:$4 sm:$0xff]  }
 0x7a0   :  { %8025 = vmatpush1.bf16.msra.mxu1 %v11939_v51  ;;  %v12022_v51 = vld [vmem:[#allocation6 + $0x1884] ss:$40 sps:$4 sm:$0xff]  }
 0x7a1   :  { %8026 = vmatprep.subr.bf16.mxu1 %v11947_v44  ;;  %v12020_v44 = vld [vmem:[#allocation6 + $0x1880] ss:$40 sps:$4 sm:$0xff]  }
 0x7a2   :  { %8269 = vmatpush1.bf16.msra.mxu0 %v11942_v62  ;;  %v12017_v62 = vld [vmem:[#allocation6 + $0x18c8] ss:$40 sps:$4 sm:$0xff]  }
 0x7a3   :  { %8270 = vmatprep.subr.bf16.mxu0 %v11950_v20  ;;  %v12025_v20 = vld [vmem:[#allocation6 + $0x191c] ss:$40 sps:$4 sm:$0xff]  }
 0x7a4   :  { %8027 = vmatpush1.bf16.msra.mxu1 %v11945_v30  ;;  %v12028_v30 = vld [vmem:[#allocation6 + $0x18d4] ss:$40 sps:$4 sm:$0xff]  }
 0x7a5   :  { %8028 = vmatprep.subr.bf16.mxu1 %v11953_v53  ;;  %v12026_v53 = vld [vmem:[#allocation6 + $0x18d0] ss:$40 sps:$4 sm:$0xff]  }
 0x7a6   :  { %8271 = vmatpush1.bf16.msra.mxu0 %v11948_v24  ;;  %v12023_v24 = vld [vmem:[#allocation6 + $0x1918] ss:$40 sps:$4 sm:$0xff]  }
 0x7a7   :  { %8272 = vmatprep.subr.bf16.mxu0 %v11956_v1  ;;  %v12031_v1 = vld [vmem:[#allocation6 + $0x196c] ss:$40 sps:$4 sm:$0xff]  }
 0x7a8   :  { %8029 = vmatpush1.bf16.msra.mxu1 %v11951_v55  ;;  %v12034_v55 = vld [vmem:[#allocation6 + $0x1924] ss:$40 sps:$4 sm:$0xff]  }
 0x7a9   :  { %8030 = vmatprep.subr.bf16.mxu1 %v11959_v16  ;;  %v12032_v16 = vld [vmem:[#allocation6 + $0x1920] ss:$40 sps:$4 sm:$0xff]  }
 0x7aa   :  { %8273 = vmatpush1.bf16.msra.mxu0 %v11954_v57  ;;  %v12029_v57 = vld [vmem:[#allocation6 + $0x1968] ss:$40 sps:$4 sm:$0xff]  }
 0x7ab   :  { %8274 = vmatprep.subr.bf16.mxu0 %v11962_v45  ;;  %v12037_v45 = vld [vmem:[#allocation6 + $0x19bc] ss:$40 sps:$4 sm:$0xff]  }
 0x7ac   :  { %8031 = vmatpush1.bf16.msra.mxu1 %v11957_v56  ;;  %v12040_v56 = vld [vmem:[#allocation6 + $0x1974] ss:$40 sps:$4 sm:$0xff]  }
 0x7ad   :  { %8032 = vmatprep.subr.bf16.mxu1 %v11965_v35  ;;  %v12038_v35 = vld [vmem:[#allocation6 + $0x1970] ss:$40 sps:$4 sm:$0xff]  }
 0x7ae   :  { %8275 = vmatpush1.bf16.msra.mxu0 %v11960_v39  ;;  %v12035_v39 = vld [vmem:[#allocation6 + $0x19b8] ss:$40 sps:$4 sm:$0xff]  }
 0x7af   :  { %8276 = vmatprep.subr.bf16.mxu0 %v11968_v11  ;;  %v12043_v11 = vld [vmem:[#allocation6 + $0x1a0c] ss:$40 sps:$4 sm:$0xff]  }
 0x7b0   :  { %8033 = vmatpush1.bf16.msra.mxu1 %v11963_v41  ;;  %v12046_v41 = vld [vmem:[#allocation6 + $0x19c4] ss:$40 sps:$4 sm:$0xff]  }
 0x7b1   :  { %8034 = vmatprep.subr.bf16.mxu1 %v11971_v10  ;;  %v12044_v10 = vld [vmem:[#allocation6 + $0x19c0] ss:$40 sps:$4 sm:$0xff]  }
 0x7b2   :  { %8277 = vmatpush1.bf16.msra.mxu0 %v11966_v32  ;;  %v12041_v32 = vld [vmem:[#allocation6 + $0x1a08] ss:$40 sps:$4 sm:$0xff]  }
 0x7b3   :  { %8278 = vmatprep.subr.bf16.mxu0 %v11974_v42  ;;  %v12049_v42 = vld [vmem:[#allocation6 + $0x1a5c] ss:$40 sps:$4 sm:$0xff]  }
 0x7b4   :  { %8035 = vmatpush1.bf16.msra.mxu1 %v11969_v19  ;;  %v12052_v19 = vld [vmem:[#allocation6 + $0x1a14] ss:$40 sps:$4 sm:$0xff]  }
 0x7b5   :  { %8036 = vmatprep.subr.bf16.mxu1 %v11977_v17  ;;  %v12055_v17 = vld [vmem:[#allocation6 + $0x1aac] ss:$40 sps:$4 sm:$0xff]  }
 0x7b6   :  { %8279 = vmatpush1.bf16.msra.mxu0 %v11972_v15  ;;  %v12050_v15 = vld [vmem:[#allocation6 + $0x1a10] ss:$40 sps:$4 sm:$0xff]  }
 0x7b7   :  { %8280 = vmatprep.subr.bf16.mxu0 %v11980_v49  ;;  %v12058_v49 = vld [vmem:[#allocation6 + $0x1a64] ss:$40 sps:$4 sm:$0xff]  }
 0x7b8   :  { %8037 = vmatpush1.bf16.msra.mxu1 %v11975_v59  ;;  %v12056_v59 = vld [vmem:[#allocation6 + $0x1a60] ss:$40 sps:$4 sm:$0xff]  }
 0x7b9   :  { %8038 = vmatprep.subr.bf16.mxu1 %v11983_v43  ;;  %v12064_v43 = vld [vmem:[#allocation6 + $0x1ab4] ss:$40 sps:$4 sm:$0xff]  }
 0x7ba   :  { %8281 = vmatpush1.bf16.msra.mxu0 %v11978_v34  ;;  %v12061_v34 = vld [vmem:[#allocation6 + $0x1afc] ss:$40 sps:$4 sm:$0xff]  }
 0x7bb   :  { %8282 = vmatprep.subr.bf16.mxu0 %v11986_v26  ;;  %v12059_v26 = vld [vmem:[#allocation6 + $0x1af8] ss:$40 sps:$4 sm:$0xff]  }
 0x7bc   :  { %8039 = vmatpush1.bf16.msra.mxu1 %v11981_v33  ;;  %v12062_v33 = vld [vmem:[#allocation6 + $0x1ab0] ss:$40 sps:$4 sm:$0xff]  }
 0x7bd   :  { %8040 = vmatprep.subr.bf16.mxu1 %v11989_v4  ;;  %v12070_v4 = vld [vmem:[#allocation6 + $0x1b04] ss:$40 sps:$4 sm:$0xff]  }
 0x7be   :  { %8283 = vmatpush1.bf16.msra.mxu0 %v11984_v48  ;;  %v12067_v48 = vld [vmem:[#allocation6 + $0x1b4c] ss:$40 sps:$4 sm:$0xff]  }
 0x7bf   :  { %8284 = vmatprep.subr.bf16.mxu0 %v11992_v29  ;;  %v12065_v29 = vld [vmem:[#allocation6 + $0x1b48] ss:$40 sps:$4 sm:$0xff]  }
 0x7c0   :  { %8041 = vmatpush1.bf16.msra.mxu1 %v11987_v21  ;;  %v12068_v21 = vld [vmem:[#allocation6 + $0x1b00] ss:$40 sps:$4 sm:$0xff]  }
 0x7c1   :  { %8042 = vmatprep.subr.bf16.mxu1 %v11995_v8  ;;  %v12076_v8 = vld [vmem:[#allocation6 + $0x1b54] ss:$40 sps:$4 sm:$0xff]  }
 0x7c2   :  { %8285 = vmatpush1.bf16.msra.mxu0 %v11990_v12  ;;  %v12073_v12 = vld [vmem:[#allocation6 + $0x1b9c] ss:$40 sps:$4 sm:$0xff]  }
 0x7c3   :  { %8286 = vmatprep.subr.bf16.mxu0 %v11998_v61  ;;  %v12071_v61 = vld [vmem:[#allocation6 + $0x1b98] ss:$40 sps:$4 sm:$0xff]  }
 0x7c4   :  { %8043 = vmatpush1.bf16.msra.mxu1 %v11993_v22  ;;  %v12074_v22 = vld [vmem:[#allocation6 + $0x1b50] ss:$40 sps:$4 sm:$0xff]  }
 0x7c5   :  { %8044 = vmatprep.subr.bf16.mxu1 %v12001_v28  ;;  %v12082_v28 = vld [vmem:[#allocation6 + $0x1ba4] ss:$40 sps:$4 sm:$0xff]  }
 0x7c6   :  { %8287 = vmatpush1.bf16.msra.mxu0 %v11996_v63  ;;  %v12079_v63 = vld [vmem:[#allocation6 + $0x1bec] ss:$40 sps:$4 sm:$0xff]  }
 0x7c7   :  { %8288 = vmatprep.subr.bf16.mxu0 %v12004_v54  ;;  %v12077_v54 = vld [vmem:[#allocation6 + $0x1be8] ss:$40 sps:$4 sm:$0xff]  }
 0x7c8   :  { %8045 = vmatpush1.bf16.msra.mxu1 %v11999_v37  ;;  %v12080_v37 = vld [vmem:[#allocation6 + $0x1ba0] ss:$40 sps:$4 sm:$0xff]  }
 0x7c9   :  { %8046 = vmatprep.subr.bf16.mxu1 %v12007_v47  ;;  %v12083_v47 = vld [vmem:[#allocation6 + $0x1bf0] ss:$40 sps:$4 sm:$0xff]  }
 0x7ca   :  { %8289 = vmatpush1.bf16.msra.mxu0 %v12002_v36  ;;  %v12085_v36 = vld [vmem:[#allocation6 + $0x1bf4] ss:$40 sps:$4 sm:$0xff]  }
 0x7cb   :  { %8290 = vmatprep.subr.bf16.mxu0 %v12010_v18  ;;  %v2574_v18 = vsub.s32 2, %v12764_v2 }
 0x7cc   :  { %8047 = vmatpush1.bf16.msra.mxu1 %v12005_v46  ;;  %v2590_v46 = vsub.s32 6, %v12764_v2 }
 0x7cd   :  { %8048 = vmatprep.subr.bf16.mxu1 %v12013_v58  ;;  %v2594_v58 = vsub.s32 7, %v12764_v2 }
 0x7ce   :  { %8291 = vmatpush1.bf16.msra.mxu0 %v12008_v60  ;;  %v2578_v60 = vsub.s32 3, %v12764_v2 }
 0x7cf   :  { %8292 = vmatprep.subr.bf16.mxu0 %v12016_v52  ;;  %v2586_v52 = vsub.s32 5, %v12764_v2 }
 0x7d0   :  { %8049 = vmatpush1.bf16.msra.mxu1 %v12011_v50  ;;  %v2575_v50 = vrot.slane %v13588_v6, %v2574_v18 }
 0x7d1   :  { %8050 = vmatprep.subr.bf16.mxu1 %v12019_v14  ;;  %v2579_v14 = vrot.slane %v13588_v6, %v2578_v60 }
 0x7d2   :  { %8293 = vmatpush1.bf16.msra.mxu0 %v12014_v13  ;;  %v2591_v13 = vrot.slane %v13588_v6, %v2590_v46 }
 0x7d3   :  { %8294 = vmatprep.subr.bf16.mxu0 %v12022_v51  ;;  %v2595_v51 = vrot.slane %v13588_v6, %v2594_v58 }
 0x7d4   :  { %8051 = vmatpush1.bf16.msra.mxu1 %v12017_v62  ;;  %v2561_v62 = vld [vmem:[#allocation7 + $0x8] sm:$0x3] }
 0x7d5   :  { %8061 = vmatprep.subr.bf16.mxu1 %v12025_v20  ;;  %v13621_v20 = vadd.f32 %v13584_v3, %v2575_v50 }
 0x7d6   :  { %8295 = vmatpush1.bf16.msra.mxu0 %v12020_v44 }
 0x7d7   :  { %8296 = vmatprep.subr.bf16.mxu0 %v12028_v30  ;;  %8053 = vmatmul.mubr.bf16.vlgmr.msra.gmra.mrb[32].mxu1 %v13514_v27 }
 0x7d8   :  { %8062 = vmatpush1.bf16.msra.mxu1 %v12023_v24  ;;  %9893 = vmatprep.mubr.msk.bf16.mxu1 %vm7114_vm11, %v13529_v40 }
 0x7d9   :  { %8063 = vmatprep.subr.bf16.mxu1 %v12031_v1 }
 0x7da   :  { %8297 = vmatpush1.bf16.msra.mxu0 %v12026_v53  ;;  %v13624_v53 = vadd.f32 %v13586_v9, %v2579_v14 }
 0x7db   :  { %8307 = vmatprep.subr.bf16.mxu0 %v12034_v55 }
 0x7dc   :  { %8064 = vmatpush1.bf16.msra.mxu1 %v12029_v57  ;;  %v2599_v57 = vrot.slane %v2561_v62, %v12767_v5 }
 0x7dd   :  { %8299 = vmatmul.mubr.bf16.vlgmr.msra.gmra.mrb[32].mxu0 %v13514_v27  ;;  %8065 = vmatprep.subr.bf16.mxu1 %v12037_v45  ;;  %v12047_v27 = vld [vmem:[#allocation6 + $0x1a58] ss:$40 sps:$4 sm:$0xff]  }
 0x7de   :  { %8308 = vmatpush1.bf16.msra.mxu0 %v12032_v16  ;;  %9894 = vmatprep.mubr.msk.bf16.mxu0 %vm7114_vm11, %v13529_v40  ;;  %v12053_v40 = vld [vmem:[#allocation6 + $0x1aa8] ss:$40 sps:$4 sm:$0xff]  }
 0x7df   :  { %8309 = vmatprep.subr.bf16.mxu0 %v12040_v56 }
 0x7e0   :  { %8066 = vmatpush1.bf16.msra.mxu1 %v12035_v39 }
 0x7e1   :  { %8067 = vmatprep.subr.bf16.mxu1 %v12043_v11 }
 0x7e2   :  { %8310 = vmatpush1.bf16.msra.mxu0 %v12038_v35 }
 0x7e3   :  { %8311 = vmatprep.subr.bf16.mxu0 %v12046_v41 }
 0x7e4   :  { %8068 = vmatpush1.bf16.msra.mxu1 %v12041_v32 }
 0x7e5   :  { %8069 = vmatprep.subr.bf16.mxu1 %v12049_v42 }
 0x7e6   :  { %8312 = vmatpush1.bf16.msra.mxu0 %v12044_v10 }
 0x7e7   :  { %8313 = vmatprep.subr.bf16.mxu0 %v12052_v19  ;;  %v13626_v2 = vpop.permute.xlu1 %10655 }
 0x7e8   :  { %8070 = vmatpush1.bf16.msra.mxu1 %v12047_v27  ;;  %v10658_v9 = vunpack.i.h.bf16 %v13626_v2  ;;  %v10657_v39 = vunpack.i.l.bf16 %v13626_v2 }
 0x7e9   :  { %8071 = vmatprep.subr.bf16.mxu1 %v12055_v17 }
 0x7ea   :  { %8314 = vmatpush1.bf16.msra.mxu0 %v12050_v15  ;;  %v13649_v10 = vmax.f32 %v13555_v38, %v10658_v9  ;;  %v8406_v42 = vmax.f32 %v13591_v0, %v10657_v39 }
 0x7eb   :  { %8315 = vmatprep.subr.bf16.mxu0 %v12058_v49 }
 0x7ec   :  { %8072 = vmatpush1.bf16.msra.mxu1 %v12053_v40  ;;  %v10679_v27 = vpack.i.bf16 %v13649_v10, %v8406_v42 }
 0x7ed   :  { %8073 = vmatprep.subr.bf16.mxu1 %v12061_v34 }
 0x7ee   :  { %8316 = vmatpush1.bf16.msra.mxu0 %v12056_v59 }
 0x7ef   :  { %8317 = vmatprep.subr.bf16.mxu0 %v12064_v43 }
 0x7f0   :  { %8074 = vmatpush1.bf16.msra.mxu1 %v12059_v26 }
 0x7f1   :  { %8075 = vmatprep.subr.bf16.mxu1 %v12067_v48 }
 0x7f2   :  { %8318 = vmatpush1.bf16.msra.mxu0 %v12062_v33 }
 0x7f3   :  { %8319 = vmatprep.subr.bf16.mxu0 %v12070_v4 }
 0x7f4   :  { %8076 = vmatpush1.bf16.msra.mxu1 %v12065_v29 }
 0x7f5   :  { %8077 = vmatprep.subr.bf16.mxu1 %v12073_v12 }
 0x7f6   :  { %8320 = vmatpush1.bf16.msra.mxu0 %v12068_v21 }
 0x7f7   :  { %8321 = vmatprep.subr.bf16.mxu0 %v12076_v8 }
 0x7f8   :  { %8078 = vmatpush1.bf16.msra.mxu1 %v12071_v61 }
 0x7f9   :  { %8079 = vmatprep.subr.bf16.mxu1 %v12079_v63 }
 0x7fa   :  { %8322 = vmatpush1.bf16.msra.mxu0 %v12074_v22 }
 0x7fb   :  { %8323 = vmatprep.subr.bf16.mxu0 %v12082_v28 }
 0x7fc   :  { %8080 = vmatpush1.bf16.msra.mxu1 %v12077_v54 }
 0x7fe   :  { %8324 = vmatpush1.bf16.msra.mxu0 %v12080_v37 }
 0x7ff   :  { %8325 = vmatprep.subr.bf16.mxu0 %v12085_v36  ;;  %8094 = vmatmul.mubr.bf16.vlgmr.msra.gmra.mrb[32].mxu1 %v13535_v25 }
 0x802   :  { %8326 = vmatpush1.bf16.msra.mxu0 %v12083_v47 }
 0x805   :  { %8340 = vmatmul.mubr.bf16.vlgmr.msra.gmra.mrb[32].mxu0 %v13535_v25  ;;  %v2587_v25 = vrot.slane %v13588_v6, %v2586_v52  ;;  %v2603_v6 = vrot.slane %v2561_v62, %v12770_v7 }
 0x807   :  { %v13634_v3 = vadd.f32 %v13593_v23, %v2587_v25 }
 0x809   :  { %v10674_v23 = vpack.i.bf16 %v13634_v3, %v13553_v31 }
 0x8d2   :  { %v8095_v44 = vpop.f32.mrb[32].mxu1 }
 0x8d3   :  { %v10002_v30 = vadd.f32 %v8095_v44, %v2591_v13  ;;  %v8097_v24 = vpop.f32.mrb[33].mxu1 }
 0x8d4   :  { %v13628_v1 = vadd.f32 %v8097_v24, %v2595_v51  ;;  %v8099_v55 = vpop.f32.mrb[34].mxu1  ;;  %v12088_v24 = vld [vmem:[#allocation9 + $0x48] sm:$0xff]  }
 0x8d5   :  { %v10659_v16 = vpack.i.bf16 %v10002_v30, %v13621_v20  ;;  %v8100_v45 = vpop.f32.mrb[35].mxu1  ;;  %v12090_v55 = vld [vmem:[#allocation9 + $0x50] sm:$0xff]  }
 0x8d6   :  { %v10664_v56 = vpack.i.bf16 %v13624_v53, %v13628_v1  ;;  %v12093_v45 = vld [vmem:[#allocation9 + $0x18] sm:$0xff]  }
 0x8d7   :  { %10660 = vrot.lane.b32.xlu0 %v10659_v16, %s12345_s20  ;;  %v12092_v16 = vld [vmem:[#allocation9 + $0x58] sm:$0xff]  }
 0x8d8   :  { %v8341_v35 = vpop.f32.mrb[32].mxu0  ;;  %10665 = vrot.lane.b32.xlu1 %v10664_v56, %s12345_s20 }
 0x8d9   :  { %v13642_v5 = vadd.f32 %v8341_v35, %v2599_v57  ;;  %v8343_v11 = vpop.f32.mrb[33].mxu0  ;;  %v12091_v57 = vld [vmem:[#allocation9 + $0x10] sm:$0xff]   ;;  %v8380_v35 = vmax.f32 %v13553_v31, %v10658_v9 }
 0x8da   :  { %v10005_v41 = vadd.f32 %v8343_v11, %v2603_v6  ;;  %v8345_v7 = vpop.f32.mrb[34].mxu0  ;;  %v12094_v6 = vld [vmem:[#allocation9 + $0x60] sm:$0xff]  }
 0x8db   :  { %v8346_v32 = vpop.f32.mrb[35].mxu0 }
 0x8dc   :  { %v10669_v19 = vpack.i.bf16 %v10005_v41, %v13642_v5  ;;  %10675 = vrot.lane.b32.xlu1 %v10674_v23, %s12345_s20  ;;  %v12095_v23 = vld [vmem:[#allocation9 + $0x20] sm:$0xff]  }
 0x8de   :  { %10670 = vrot.lane.b32.xlu0 %v10669_v19, %s12345_s20 }
 0x8e2   :  { %10680 = vrot.lane.b32.xlu0 %v10679_v27, %s12353_s26 }
 0x949   :  { %v13657_v15 = vpop.permute.xlu0 %10660 }
 0x94a   :  { %v10663_v17 = vunpack.i.h.bf16 %v13657_v15  ;;  %v10662_v49 = vunpack.i.l.bf16 %v13657_v15  ;;  %v10666_v40 = vpop.permute.xlu1 %10665 }
 0x94b   :  { %v10668_v59 = vunpack.i.h.bf16 %v10666_v40  ;;  %v10667_v0 = vunpack.i.l.bf16 %v10666_v40 }
 0x94c   :  { %v13663_v34 = vmax.f32 %v10002_v30, %v10663_v17  ;;  %v8368_v43 = vmax.f32 %v13555_v38, %v10662_v49  ;;  %v13667_v26 = vmax.f32 %v13621_v20, %v10662_v49  ;;  %v8449_v40 = vmax.f32 %v13634_v3, %v10663_v17 }
 0x94d   :  { %v8393_v33 = vsel %vm8392_vm13, %v10668_v59, %v10657_v39  ;;  %v8402_v48 = vsel %vm8392_vm13, %v10662_v49, %v10668_v59  ;;  %v8437_v4 = vmax.f32 %v10002_v30, %v10667_v0  ;;  %v13673_v21 = vmax.f32 %v13628_v1, %v10667_v0  ;;  %v12087_v30 = vld [vmem:[#allocation9] sm:$0xff]   ;;  %v12096_v49 = vld [vmem:[#allocation9 + $0x68] sm:$0xff]  }
 0x94e   :  { %v8395_v29 = vmax.f32 %v13624_v53, %v8393_v33  ;;  %v10684_v12 = vpack.i.bf16 %v13667_v26, %v8368_v43  ;;  %v13676_v8 = vpop.permute.xlu1 %10675  ;;  %v8414_v46 = vmax.f32 %v13624_v53, %v10668_v59  ;;  %v8404_v52 = vmax.f32 %v13621_v20, %v8402_v48  ;;  %v12086_v20 = vld [vmem:[#allocation9 + $0x40] sm:$0xff]   ;;  %v12089_v53 = vld [vmem:[#allocation9 + $0x8] sm:$0xff]  }
 0x94f   :  { %v10689_v38 = vpack.i.bf16 %v8437_v4, %v13663_v34  ;;  %v10677_v28 = vunpack.i.l.bf16 %v13676_v8  ;;  %9926 = vmatprep.subr.bf16.mxu1 %v12086_v20  ;;  %v10678_v56 = vunpack.i.h.bf16 %v13676_v8  ;;  %v12097_v48 = vld [vmem:[#allocation9 + $0x28] sm:$0xff]   ;;  %v12099_v8 = vld [vmem:[#allocation9 + $0x30] sm:$0xff]  }
 0x950   :  { %v10671_v61 = vpop.permute.xlu0 %10670  ;;  %10685 = vrot.lane.b32.xlu1 %v10684_v12, %s12353_s26  ;;  %v10694_v37 = vpack.i.bf16 %v8395_v29, %v13673_v21  ;;  %9927 = vmatpush3.bf16.msra.mxu1 %v12087_v30 }
 0x951   :  { %v10673_v22 = vunpack.i.h.bf16 %v10671_v61  ;;  %v13680_v63 = vunpack.i.l.bf16 %v10671_v61  ;;  %10690 = vrot.lane.b32.xlu0 %v10689_v38, %s12353_s26  ;;  %v8352_v50 = vmax.f32 %v13553_v31, %v10677_v28  ;;  %9928 = vmatprep.subr.bf16.mxu1 %v12088_v24  ;;  %v8421_v2 = vmax.f32 %v13634_v3, %v10678_v56  ;;  %v12098_v3 = vld [vmem:[#allocation9 + $0x70] sm:$0xff]   ;;  %v12100_v28 = vld [vmem:[#allocation9 + $0x78] sm:$0xff]  }
 0x953   :  { %v8461_v54 = vsel %vm8392_vm13, %v13680_v63, %v10673_v22  ;;  %v13689_v36 = vsel %vm8392_vm13, %v10667_v0, %v13680_v63  ;;  %v8474_v13 = vmax.f32 %v10005_v41, %v10673_v22 }
 0x954   :  { %v8463_v47 = vmax.f32 %v13642_v5, %v8461_v54  ;;  %v10681_v18 = vpop.permute.xlu0 %10680  ;;  %10695 = vrot.lane.b32.xlu1 %v10694_v37, %s12353_s26  ;;  %9929 = vmatpush3.bf16.msra.mxu1 %v12089_v53 }
 0x955   :  { %v10683_v60 = vunpack.i.h.bf16 %v10681_v18  ;;  %v10682_v58 = vunpack.i.l.bf16 %v10681_v18  ;;  %9930 = vmatprep.subr.bf16.mxu1 %v12090_v55 }
 0x956   :  { %8465 = vrot.lane.b32.xlu0 %v8463_v47, %s12353_s26  ;;  %v12101_v47 = vld [vmem:[#allocation9 + $0x38] sm:$0xff]  }
 0x957   :  { %v13697_v14 = vmax.f32 %v8404_v52, %v10682_v58  ;;  %v8415_v51 = vmax.f32 %v8414_v46, %v10682_v58  ;;  %v13699_v62 = vmax.f32 %v8352_v50, %v10683_v60  ;;  %v8472_v60 = vmax.f32 %v13628_v1, %v13689_v36 }
 0x958   :  { %8476 = vrot.lane.b32.xlu1 %v8474_v13, %s12353_s26  ;;  %9931 = vmatpush3.bf16.msra.mxu1 %v12091_v57  ;;  %v12358_v52 = vmov 0.0  }
 0x959   :  { %v8416_v25 = vmax.f32 %v8415_v51, 0.0  ;;  %v8363_v44 = vmax.f32 %v13699_v62, 0.0  ;;  %9932 = vmatprep.subr.bf16.mxu1 %v12092_v16 }
 0x95b   :  { %8510 = vrot.lane.b32.xlu0 %v8416_v25, %s12355_s24 }
 0x95c   :  { %8513 = vrot.lane.b32.xlu1 %v8416_v25, %s12337_s5  ;;  %9933 = vmatpush3.bf16.msra.mxu1 %v12093_v45  ;;  %s12357_s5 = smov 16   ;;  %v8482_v25 = vmax.f32 %v13642_v5, %v13680_v63 }
 0x95d   :  { %9934 = vmatprep.subr.bf16.mxu1 %v12094_v6 }
 0x95f   :  { %8486 = vrot.lane.b32.xlu0 %v8363_v44, %s12345_s20 }
 0x960   :  { %9935 = vmatpush3.bf16.msra.mxu1 %v12095_v23 }
 0x961   :  { %9936 = vmatprep.subr.bf16.mxu1 %v12096_v49 }
 0x964   :  { %9937 = vmatpush3.bf16.msra.mxu1 %v12097_v48 }
 0x965   :  { %9938 = vmatprep.subr.bf16.mxu1 %v12098_v3  ;;  %v12105_v3 = vld [vmem:[#allocation9 + $0x98] sm:$0xff]  }
 0x968   :  { %9939 = vmatpush3.bf16.msra.mxu1 %v12099_v8 }
 0x969   :  { %9940 = vmatprep.subr.bf16.mxu1 %v12100_v28  ;;  %v12107_v28 = vld [vmem:[#allocation12 + $0x8] sm:$0xff]  }
 0x96c   :  { %9941 = vmatpush3.bf16.msra.mxu1 %v12101_v47  ;;  %v12112_v47 = vld [vmem:[#allocation12 + $0x30] sm:$0xff]  }
 0x96d   :  { %9962 = vmatprep.subr.bf16.mxu1 %v12358_v52 }
 0x9c2   :  { %v10686_v39 = vpop.permute.xlu1 %10685 }
 0x9c3   :  { %v10688_v11 = vunpack.i.h.bf16 %v10686_v39  ;;  %v10687_v41 = vunpack.i.l.bf16 %v10686_v39  ;;  %v10691_v7 = vpop.permute.xlu0 %10690 }
 0x9c4   :  { %v10692_v32 = vunpack.i.l.bf16 %v10691_v7  ;;  %v10693_v54 = vunpack.i.h.bf16 %v10691_v7 }
 0x9c5   :  { %v8382_v42 = vmax.f32 %v8380_v35, %v10688_v11  ;;  %v8383_v19 = vmax.f32 %v13649_v10, %v10688_v11  ;;  %v8376_v27 = vsel %vm1635_vm9, %v10687_v41, %v10688_v11 }
 0x9c6   :  { %v8378_v59 = vmax.f32 %v8352_v50, %v8376_v27  ;;  %v10696_v31 = vpop.permute.xlu1 %10695  ;;  %v8431_v4 = vmax.f32 %v8421_v2, %v10692_v32  ;;  %v8412_v50 = vmax.f32 %v13697_v14, 0.0 }
 0x9c7   :  { %v8384_v9 = vmax.f32 %v8382_v42, 0.0  ;;  %v8385_v0 = vmax.f32 %v8383_v19, 0.0  ;;  %v10698_v43 = vunpack.i.h.bf16 %v10696_v31  ;;  %v10697_v33 = vunpack.i.l.bf16 %v10696_v31 }
 0x9c8   :  { %v8379_v10 = vmax.f32 %v8378_v59, 0.0  ;;  %v8432_v61 = vmax.f32 %v8431_v4, 0.0  ;;  %v8466_v58 = vpop.permute.xlu0 %8465  ;;  %v12103_v4 = vld [vmem:[#allocation9 + $0x88] sm:$0xff]  }
 0x9c9   :  { %v8451_v29 = vmax.f32 %v8449_v40, %v10697_v33  ;;  %v8452_v12 = vmax.f32 %v13663_v34, %v10697_v33  ;;  %v8400_v15 = vmax.f32 %v13667_v26, %v10698_v43  ;;  %v10699_v17 = vpack.i.bf16 %v8385_v0, %v8384_v9 }
 0x9ca   :  { %8490 = vrot.lane.b32.xlu0 %v8379_v10, %s12346_s21  ;;  %v8445_v34 = vsel %vm1635_vm9, %v10693_v54, %v10697_v33  ;;  %v8477_v18 = vpop.permute.xlu1 %8476  ;;  %v8468_v51 = vmax.f32 %v13673_v21, %v8466_v58  ;;  %v12102_v33 = vld [vmem:[#allocation9 + $0x80] sm:$0xff]   ;;  %v12108_v54 = vld [vmem:[#allocation12 + $0x10] sm:$0xff]  }
 0x9cb   :  { %v8453_v38 = vmax.f32 %v8451_v29, 0.0  ;;  %v8454_v22 = vmax.f32 %v8452_v12, 0.0  ;;  %10700 = vrot.lane.b32.xlu1 %v10699_v17, %s12343_s16  ;;  %v8401_v37 = vmax.f32 %v8400_v15, 0.0  ;;  %v8447_v46 = vmax.f32 %v8421_v2, %v8445_v34  ;;  %v12104_v12 = vld [vmem:[#allocation9 + $0x90] sm:$0xff]   ;;  %v12110_v34 = vld [vmem:[#allocation12 + $0x20] sm:$0xff]  }
 0x9cc   :  { %v8479_v13 = vmax.f32 %v8472_v60, %v8477_v18  ;;  %v8483_v20 = vmax.f32 %v8482_v25, %v8477_v18  ;;  %v8469_v30 = vmax.f32 %v8468_v51, 0.0  ;;  %v12113_v18 = vld [vmem:[#allocation12 + $0x38] sm:$0xff]  }
 0x9cd   :  { %v10704_v26 = vpack.i.bf16 %v8454_v22, %v8453_v38  ;;  %v8448_v1 = vmax.f32 %v8447_v46, 0.0  ;;  %v8511_v21 = vpop.permute.xlu0 %8510  ;;  %v12106_v38 = vld [vmem:[#allocation12] sm:$0xff]   ;;  %v9895_v51 = vld [vmem:[#allocation10] ss:$0 sm:$0xff] }
 0x9ce   :  { %8520 = vrot.lane.b32.xlu0 %v8432_v61, %s12356_s15  ;;  %v8480_v36 = vmax.f32 %v8479_v13, 0.0  ;;  %v8484_v24 = vmax.f32 %v8483_v20, 0.0  ;;  %v8514_v5 = vpop.permute.xlu1 %8513 }
 0x9cf   :  { %8502 = vrot.lane.b32.xlu1 %v8401_v37, %s12357_s5  ;;  %v8556_v35 = vsel %vm13780_vm0, %v8511_v21, %v8514_v5  ;;  %v12109_v37 = vld [vmem:[#allocation12 + $0x18] sm:$0xff]   ;;  %v9917_v5 = vld [vmem:[#allocation13] ss:$0 sm:$0xff] }
 0x9d1   :  { %v8487_v14 = vpop.permute.xlu0 %8486 }
 0x9d2   :  { %10705 = vrot.lane.b32.xlu0 %v10704_v26, %s12335_s1  ;;  %s12361_s1 = smov 116   ;;  %v8550_v39 = vsel %vm850_vm7, %v8363_v44, %v8487_v14  ;;  %vm8561_vm7 = vcmask 752640   ;;  %v12111_v26 = vld [vmem:[#allocation12 + $0x28] sm:$0xff]  }
 0x9d3   :  { %8517 = vrot.lane.b32.xlu1 %v8432_v61, %s12359_s27 }
 0x9d6   :  { %8506 = vrot.lane.b32.xlu0 %v8412_v50, %s12360_s28 }
 0x9d7   :  { %8524 = vrot.lane.b32.xlu1 %v8448_v1, %s12354_s3 }
 0x9da   :  { %8540 = vrot.lane.b32.xlu0 %v8480_v36, %s12339_s10 }
 0x9db   :  { %8536 = vrot.lane.b32.xlu1 %v8469_v30, %s12349_s22 }
 0x9de   :  { %8547 = vrot.lane.b32.xlu0 %v8484_v24, %s12361_s1 }
 0x9df   :  { %8544 = vrot.lane.b32.xlu1 %v8484_v24, %s12326_s11 }
 0xa3c   :  { %v8491_v63 = vpop.permute.xlu0 %8490 }
 0xa3d   :  { %v10701_v53 = vpop.permute.xlu1 %10700  ;;  %v8551_v11 = vsel %vm864_vm10, %v8550_v39, %v8491_v63  ;;  %vm8564_vm10 = vcmask 31744  }
 0xa3e   :  { %v10703_v55 = vunpack.i.h.bf16 %v10701_v53  ;;  %v10702_v57 = vunpack.i.l.bf16 %v10701_v53 }
 0xa40   :  { %v8521_v16 = vpop.permute.xlu0 %8520  ;;  %v8499_v6 = vsel %vm740_vm8, %v10702_v57, %v10703_v55  ;;  %vm12362_vm8 = vmmov 0  }
 0xa41   :  { %v8503_v45 = vpop.permute.xlu1 %8502  ;;  %v8552_v7 = vsel %vm878_vm12, %v8551_v11, %v8499_v6  ;;  %vm13781_vm12 = vcmask 523264  }
 0xa42   :  { %v8553_v27 = vsel %vm892_vm14, %v8552_v7, %v8503_v45 }
 0xa44   :  { %v10706_v56 = vpop.permute.xlu0 %10705 }
 0xa45   :  { %v8518_v41 = vpop.permute.xlu1 %8517  ;;  %v10708_v42 = vunpack.i.h.bf16 %v10706_v56  ;;  %v10707_v19 = vunpack.i.l.bf16 %v10706_v56 }
 0xa46   :  { %v8557_v23 = vsel %vm7114_vm11, %v8556_v35, %v8518_v41 }
 0xa47   :  { %v8559_v40 = vsel %vm8558_vm3, %v8557_v23, %v8521_v16  ;;  %v8533_v2 = vsel %vm906_vm15, %v10707_v19, %v10708_v42 }
 0xa48   :  { %v8507_v32 = vpop.permute.xlu0 %8506 }
 0xa49   :  { %v8525_v49 = vpop.permute.xlu1 %8524  ;;  %v8554_v62 = vsel %vm906_vm15, %v8553_v27, %v8507_v32 }
 0xa4a   :  { %v8560_v44 = vsel %vm1640_vm4, %v8559_v40, %v8525_v49  ;;  %v8555_v59 = vsel %vm1630_vm2, %v8554_v62, %v8511_v21  ;;  %vm8566_vm2 = vcmask 195584  }
 0xa4b   :  { %v8562_v9 = vsel %vm8561_vm7, %v8560_v44, %v8533_v2  ;;  %v8570_v48 = vpack.c.bf16 %v8555_v59, %v8555_v59 }
 0xa4c   :  { %v8541_v10 = vpop.permute.xlu0 %8540 }
 0xa4d   :  { %v8537_v31 = vpop.permute.xlu1 %8536 }
 0xa4e   :  { %v8563_v0 = vsel %vm184_vm1, %v8562_v9, %v8537_v31  ;;  %v8565_v15 = vsel %vm8564_vm10, %v8537_v31, %v8541_v10  ;;  %vm8568_vm1 = vcmask 359424  }
 0xa4f   :  { %v8571_v43 = vpack.c.bf16 %v8563_v0, %v8563_v0 }
 0xa50   :  { %v8548_v8 = vpop.permute.xlu0 %8547 }
 0xa51   :  { %8775 = vmatprep.mubr.bf16.mxu1 %v8571_v43  ;;  %v8545_v29 = vpop.permute.xlu1 %8544 }
 0xa52   :  { %8776 = vmatmul.mubr.bf16.vlgmr.msra.gmra.mrb[36].mxu1 %v8570_v48  ;;  %v8567_v17 = vsel %vm8566_vm2, %v8565_v15, %v8545_v29 }
 0xa53   :  { %9963 = vmatpush3.bf16.msra.mxu1 %v12102_v33  ;;  %9970 = vmatprep.mubr.msk.bf16.mxu1 %vm12362_vm8, %v12358_v52  ;;  %v8569_v61 = vsel %vm8568_vm1, %v8567_v17, %v8548_v8 }
 0xa54   :  { %9964 = vmatprep.subr.bf16.mxu1 %v12358_v52  ;;  %v8572_v22 = vpack.c.bf16 %v8569_v61, %v8569_v61 }
 0xa57   :  { %9965 = vmatpush3.bf16.msra.mxu1 %v12103_v4 }
 0xa58   :  { %9966 = vmatprep.subr.bf16.mxu1 %v12358_v52 }
 0xa5b   :  { %9967 = vmatpush3.bf16.msra.mxu1 %v12104_v12 }
 0xa5c   :  { %9968 = vmatprep.subr.bf16.mxu1 %v12358_v52 }
 0xa5f   :  { %9969 = vmatpush3.bf16.msra.mxu1 %v12105_v3 }
 0xa60   :  { %9974 = vmatprep.subr.bf16.mxu1 %v12358_v52 }
 0xa62   :  { %9971 = vmatmul.mubr.msk.bf16.vlgmr.msra.gmra.mrb[40].mxu1 %vm13781_vm12, %v8572_v22 }
 0xa63   :  { %9975 = vmatpush3.bf16.msra.mxu1 %v12106_v38  ;;  %9990 = vmatprep.mubr.msk.bf16.mxu1 %vm12362_vm8, %v12358_v52 }
 0xa64   :  { %9976 = vmatprep.subr.bf16.mxu1 %v12358_v52 }
 0xa67   :  { %9977 = vmatpush3.bf16.msra.mxu1 %v12107_v28 }
 0xa68   :  { %9978 = vmatprep.subr.bf16.mxu1 %v12358_v52 }
 0xa6b   :  { %9979 = vmatpush3.bf16.msra.mxu1 %v12108_v54 }
 0xa6c   :  { %9980 = vmatprep.subr.bf16.mxu1 %v12358_v52 }
 0xa6f   :  { %9981 = vmatpush3.bf16.msra.mxu1 %v12109_v37 }
 0xa70   :  { %9982 = vmatprep.subr.bf16.mxu1 %v12358_v52 }
 0xa73   :  { %9983 = vmatpush3.bf16.msra.mxu1 %v12110_v34 }
 0xa74   :  { %9984 = vmatprep.subr.bf16.mxu1 %v12358_v52 }
 0xa77   :  { %9985 = vmatpush3.bf16.msra.mxu1 %v12111_v26 }
 0xa78   :  { %9986 = vmatprep.subr.bf16.mxu1 %v12358_v52 }
 0xa7b   :  { %9987 = vmatpush3.bf16.msra.mxu1 %v12112_v47 }
 0xa7c   :  { %9988 = vmatprep.subr.bf16.mxu1 %v12358_v52 }
 0xa7f   :  { %9989 = vmatpush3.bf16.msra.mxu1 %v12113_v18 }
 0xb25   :  { %v9942_v46 = vpop.f32.mrb[36].mxu1 }
 0xb26   :  { %v9943_v60 = vpop.f32.mrb[37].mxu1 }
 0xb27   :  { %v9944_v58 = vadd.f32 %v9943_v60, %v9942_v46  ;;  %v9945_v50 = vpop.f32.mrb[38].mxu1 }
 0xb28   :  { %v9946_v13 = vpop.f32.mrb[39].mxu1 }
 0xb29   :  { %v8778_v25 = vadd.f32 %v9944_v58, %v9895_v51 }
 0xb35   :  { %v8817_v1 = vpop.f32.mrb[40].mxu1 }
 0xb36   :  { %v8818_v36 = vadd.f32 %v8817_v1, %v8778_v25  ;;  %v9972_v20 = vpop.f32.mrb[41].mxu1 }
 0xb37   :  { %v8820_v30 = vpop.f32.mrb[42].mxu1 }
 0xb38   :  { %v8823_v24 = vmax.f32 %v8818_v36, 0.0  ;;  %v9973_v21 = vpop.f32.mrb[43].mxu1 }
 0xb3a   :  { %v8824_v14 = vpack.c.bf16 %v8823_v24, %v8823_v24 }
 0xb3c   :  { %9991 = vmatmul.mubr.bf16.vlgmr.msra.gmra.mrb[44].mxu1 %v8824_v14 }
 0xc0f   :  { %v8930_v63 = vpop.f32.mrb[44].mxu1 }
 0xc10   :  { %v8931_v53 = vadd.f32 %v9917_v5, %v8930_v63  ;;  %v9992_v52 = vpop.f32.mrb[45].mxu1 }
 0xc11   :  { %v8933_v55 = vpop.f32.mrb[46].mxu1 }
 0xc12   :  { %8936 = vmax.xlane.f32.xlu1 %v8931_v53  ;;  %v9993_v57 = vpop.f32.mrb[47].mxu1 }
 0xc9f   :  { %v8937_v16 = vpop.xlane.xlu1 %8936 }
 0xca0   :  { %v8938_v45 = vsub.f32 %v8931_v53, %v8937_v16 }
 0xca2   :  { %v8939_v6 = vmul.f32 1.442695, %v8938_v45 }
 0xca4   :  { %12114 = vpow2.f32 %v8939_v6 }
 0xcae   :  { %v12115_v56 = vpop.eup %12114 }
 0xcaf   :  { %8941 = vadd.xlane.f32.xlu0 %v12115_v56 }
 0xd3c   :  { %v8942_v39 = vpop.xlane.xlu0 %8941 }
 0xd3d   :  { %12116 = vlog2.f32 %v8942_v39 }
 0xd47   :  { %v12117_v35 = vpop.eup %12116 }
 0xd48   :  { %v8944_v11 = vmul.f32 0.6931472, %v12117_v35 }
 0xd4a   :  { %v8945_v41 = vsub.f32 %v8938_v45, %v8944_v11 }
 0xd4c   :  { %8946 = vst [vmem:[%s13777_s9] sm:$0xff] %v8945_v41 }
 0xd4d   :  { %8951 = vsyncpa [#allocation3], 1 }
 0xd4e   :  { %8952 = vsyncpa [#allocation5], 1 }
 0xd4f   :  { %8953 = vsyncpa [#allocation8], 1 }
 0xd50   :  { %8954 = vsyncpa [#allocation11], 1 }
 0xd51   :  { %8955 = vsyncpa [#allocation14], 1 }

</bundles_post_ra>
